<compile_context>
chip_gen: v7x
topology: tpu7x:2x2x1
jax: 0.10.0
libtpu: 0.0.40
codegen_flags: <defaults>
</compile_context>

<pallas_src>
import functools

import jax
import jax.numpy as jnp
from jax.experimental import pallas as pl
from jax.experimental.pallas import tpu as pltpu


# ------------------------------------------------------------------ tiling helpers

def _ceil_to(x, m):
    return ((x + m - 1) // m) * m


def _tile(dim, max_tile, align):
    """Return (padded_dim, tile) with tile | padded_dim and tile % align == 0
    (or tile == padded_dim when the whole dim fits in one block)."""
    d = _ceil_to(dim, align)
    if d <= max_tile:
        return d, d
    nt = -(-d // max_tile)                      # cdiv
    t = _ceil_to(-(-d // nt), align)
    return t * nt, t


# ------------------------------------------------------------------ Pallas kernels

def _mm_bias_act_kernel(x_ref, w_ref, b_ref, o_ref, acc_ref, *, relu):
    """Tiled (tm,tk)@(tk,tn) matmul, f32 accumulation over the K grid axis,
    fused bias (+ optional ReLU) epilogue on the last K step."""
    @pl.when(pl.program_id(2) == 0)
    def _init():
        acc_ref[...] = jnp.zeros_like(acc_ref)

    acc_ref[...] += jnp.dot(x_ref[...], w_ref[...],
                            preferred_element_type=jnp.float32)

    @pl.when(pl.program_id(2) == pl.num_programs(2) - 1)
    def _finalize():
        y = acc_ref[...] + b_ref[...]
        if relu:
            y = jnp.maximum(y, 0.0)
        o_ref[...] = y.astype(o_ref.dtype)


def _mm_bias_res_relu_kernel(x_ref, w_ref, b_ref, r_ref, o_ref, acc_ref):
    """Tiled matmul + bias + residual add + ReLU (BasicBlock second conv,
    identity-shortcut case)."""
    @pl.when(pl.program_id(2) == 0)
    def _init():
        acc_ref[...] = jnp.zeros_like(acc_ref)

    acc_ref[...] += jnp.dot(x_ref[...], w_ref[...],
                            preferred_element_type=jnp.float32)

    @pl.when(pl.program_id(2) == pl.num_programs(2) - 1)
    def _finalize():
        y = acc_ref[...] + b_ref[...] + r_ref[...].astype(jnp.float32)
        o_ref[...] = jnp.maximum(y, 0.0).astype(o_ref.dtype)


def _maxpool_kernel(x00_ref, x01_ref, x10_ref, x11_ref, o_ref, *, ho, wo):
    """3x3/stride-2/pad-1 max pool.  The 9 taps are built from static slices of
    the 4 stride-2 phase planes resident in VMEM (no 9x HBM tap stack)."""
    phases = {(0, 0): x00_ref, (0, 1): x01_ref, (1, 0): x10_ref, (1, 1): x11_ref}
    m = None
    for di in range(3):
        for dj in range(3):
            r = phases[(di % 2, dj % 2)][di // 2:di // 2 + ho,
                                         dj // 2:dj // 2 + wo, :]
            m = r if m is None else jnp.maximum(m, r)
    o_ref[...] = m.astype(o_ref.dtype)


def _head_kernel(x_ref, w_ref, b_ref, o_ref):
    """AdaptiveAvgPool2d((1,1)) + flatten + Linear, fused in one launch."""
    pooled = jnp.mean(x_ref[...].astype(jnp.float32), axis=1)          # (N, C)
    y = jnp.dot(pooled.astype(jnp.bfloat16), w_ref[...],
                preferred_element_type=jnp.float32)
    o_ref[...] = y + b_ref[...]


# ------------------------------------------------------------------ fused matmul wrapper

def fused_matmul(x, w, b, *, relu, residual=None, out_dtype=jnp.bfloat16,
                 max_tm=256, max_tn=256, max_tk=768):
    """(M,K)@(K,N) on the MXU with bf16 operands / f32 accumulation.

    BN scale must already be folded into `w`; the epilogue is +bias
    [+ residual] [+ ReLU].  Reduction axis is last in the grid; the output
    block stays resident across it with an f32 VMEM accumulator, so the
    pipeline double-buffers the bf16 operand tiles while the MXU runs.
    M is padded to a multiple of 8 and N to a multiple of 128 so all stores
    are lane-dense, full-tile stores; padding is sliced off afterwards.
    """
    M, K = x.shape
    _, N = w.shape

    M_pad, tm = _tile(M, max_tm, 8)
    N_pad, tn = _tile(N, max_tn, 128)           # lane-dense (>=128 wide) output
    if K <= max_tk:
        K_pad, tk = K, K                        # single K step, full-dim block
    else:
        K_pad, tk = _tile(K, max_tk, 128)

    xp = x.astype(jnp.bfloat16)
    wp = w.astype(jnp.bfloat16)
    if (M_pad, K_pad) != (M, K):
        xp = jnp.pad(xp, ((0, M_pad - M), (0, K_pad - K)))
    if (K_pad, N_pad) != (K, N):
        wp = jnp.pad(wp, ((0, K_pad - K), (0, N_pad - N)))
    bp = jnp.pad(b.astype(jnp.float32), (0, N_pad - N)).reshape(1, N_pad)

    grid = (M_pad // tm, N_pad // tn, K_pad // tk)

    in_specs = [
        pl.BlockSpec((tm, tk), lambda i, j, k: (i, k)),
        pl.BlockSpec((tk, tn), lambda i, j, k: (k, j)),
        pl.BlockSpec((1, tn), lambda i, j, k: (0, j)),
    ]
    operands = [xp, wp, bp]
    if residual is not None:
        rp = residual.astype(jnp.bfloat16)
        if rp.shape != (M_pad, N_pad):
            rp = jnp.pad(rp, ((0, M_pad - residual.shape[0]),
                              (0, N_pad - residual.shape[1])))
        in_specs.append(pl.BlockSpec((tm, tn), lambda i, j, k: (i, j)))
        operands.append(rp)
        kernel = _mm_bias_res_relu_kernel
    else:
        kernel = functools.partial(_mm_bias_act_kernel, relu=relu)

    # VMEM budget from the double-buffered bf16 tile footprint + f32 accumulator,
    # with headroom; kept well under v7x's 64 MiB physical VMEM.
    fp = 2 * 2 * (tm * tk + tk * tn + tm * tn + tn) + 4 * tm * tn
    if residual is not None:
        fp += 2 * 2 * tm * tn
    vmem_limit = int(min(max(4 * fp, 16 * 1024 * 1024), 64 * 1024 * 1024))

    out = pl.pallas_call(
        kernel,
        grid=grid,
        in_specs=in_specs,
        out_specs=pl.BlockSpec((tm, tn), lambda i, j, k: (i, j)),
        out_shape=jax.ShapeDtypeStruct((M_pad, N_pad), out_dtype),
        scratch_shapes=[pltpu.VMEM((tm, tn), jnp.float32)],
        compiler_params=pltpu.CompilerParams(
            dimension_semantics=("parallel", "parallel", "arbitrary"),
            vmem_limit_bytes=vmem_limit),
    )(*operands)

    if (M_pad, N_pad) != (M, N):
        out = out[:M, :N]
    return out


# ------------------------------------------------------------------ conv / pool / head

def _im2col(x, kh, kw, stride, pad):
    """NHWC -> (N*Ho*Wo, kh*kw*C) bf16 patches (tap-major, channel-minor)."""
    # TODO(synk): the tap-expanded patch tensor is still materialized in HBM; fusing the
    #             tap extraction into the matmul kernel (kh*kw accumulated dots over
    #             shifted VMEM rows) would remove the ~9x read/write amplification.
    n, h, w, c = x.shape
    if pad > 0:
        x = jnp.pad(x, ((0, 0), (pad, pad), (pad, pad), (0, 0)))
    hp, wp = h + 2 * pad, w + 2 * pad
    ho = (hp - kh) // stride + 1
    wo = (wp - kw) // stride + 1
    cols = []
    for i in range(kh):
        for j in range(kw):
            cols.append(x[:, i:i + stride * (ho - 1) + 1:stride,
                             j:j + stride * (wo - 1) + 1:stride, :])
    p = jnp.stack(cols, axis=3)                        # (N, Ho, Wo, kh*kw, C)
    return p.reshape(n * ho * wo, kh * kw * c).astype(jnp.bfloat16), ho, wo


def _fold_bn(w, scale):
    """(Cout,Cin,kh,kw) conv weight -> (kh*kw*Cin, Cout) matmul weight with the
    eval-mode BN scale folded in (removes one VALU multiply/element from the
    kernel epilogue)."""
    cout, cin, kh, kw = w.shape
    wm = jnp.transpose(w, (2, 3, 1, 0)).reshape(kh * kw * cin, cout)
    return (wm * scale.reshape(1, cout)).astype(jnp.bfloat16)


def conv_bn(x, w, scale, bias, *, stride, pad, relu,
            residual=None, downsample=None):
    """Conv2d(bias=False) + folded eval-mode BN; NHWC bf16 in/out.

    residual:   NHWC tensor added before the final ReLU (identity shortcut).
    downsample: (x_in, blk_stride, w_ds, scale_ds, bias_ds) -- the BasicBlock's
                1x1 stride-s downsample conv+BN, fused into this matmul by
                concatenating its (strided) input along K, so the shortcut
                branch costs zero extra kernel launches.
    """
    cout = w.shape[0]
    kh, kw = w.shape[2], w.shape[3]
    patches, ho, wo = _im2col(x, kh, kw, stride, pad)
    wm = _fold_bn(w, scale)
    bvec = bias.astype(jnp.float32)
    n = x.shape[0]

    if downsample is not None:
        x_in, s_blk, w_ds, s_ds, b_ds = downsample
        xs = x_in[:, ::s_blk, ::s_blk, :]
        xs = xs.reshape(xs.shape[0] * xs.shape[1] * xs.shape[2], xs.shape[3])
        patches = jnp.concatenate([patches, xs.astype(jnp.bfloat16)], axis=1)
        wm = jnp.concatenate([wm, _fold_bn(w_ds, s_ds)], axis=0)
        bvec = bvec + b_ds.astype(jnp.float32)
        # out = relu(conv2*bn2 + downsample*bn_ds)  -- ReLU always applied here.
        out = fused_matmul(patches, wm, bvec, relu=True)
    elif residual is not None:
        # BasicBlock identity shortcut: ReLU is always applied after the add.
        res = residual.reshape(-1, cout)
        out = fused_matmul(patches, wm, bvec, relu=True, residual=res)
    else:
        out = fused_matmul(patches, wm, bvec, relu=relu)

    return out.reshape(n, ho, wo, cout)


def maxpool_3x3_s2_p1(x):
    """MaxPool2d(kernel_size=3, stride=2, padding=1); NHWC bf16."""
    n, h, w, c = x.shape
    assert h % 2 == 0 and w % 2 == 0
    ho, wo = (h + 2 - 3) // 2 + 1, (w + 2 - 3) // 2 + 1
    pad_val = jnp.finfo(x.dtype).min
    xp = jnp.pad(x, ((0, 0), (1, 1), (1, 1), (0, 0)), constant_values=pad_val)
    # Split padded H/W into stride-2 phases (a single 1x rearrangement) so the
    # kernel can form all 9 taps with contiguous static slices in VMEM.
    phases = [xp[:, a::2, b::2, :] for a in (0, 1) for b in (0, 1)]
    hp2, wp2 = phases[0].shape[1], phases[0].shape[2]

    spec_in = pl.BlockSpec((None, hp2, wp2, c), lambda i: (i, 0, 0, 0))
    return pl.pallas_call(
        functools.partial(_maxpool_kernel, ho=ho, wo=wo),
        grid=(n,),
        in_specs=[spec_in] * 4,
        out_specs=pl.BlockSpec((None, ho, wo, c), lambda i: (i, 0, 0, 0)),
        out_shape=jax.ShapeDtypeStruct((n, ho, wo, c), x.dtype),
        compiler_params=pltpu.CompilerParams(
            dimension_semantics=("parallel",)),
    )(*phases)


def avgpool_fc(x, w, b):
    """AdaptiveAvgPool2d((1,1)) + flatten + nn.Linear; NHWC -> (N, classes) f32."""
    n, h, w_sp, c = x.shape
    nc = w.shape[0]
    n_pad = _ceil_to(n, 8)
    nc_pad = _ceil_to(nc, 128)                 # lane-dense output block
    xr = x.reshape(n, h * w_sp, c)
    if n_pad != n:
        xr = jnp.pad(xr, ((0, n_pad - n), (0, 0), (0, 0)))
    wm = jnp.pad(jnp.transpose(w), ((0, 0), (0, nc_pad - nc))).astype(jnp.bfloat16)
    bp = jnp.pad(b, (0, nc_pad - nc)).reshape(1, nc_pad).astype(jnp.float32)

    # The head is tiny (O(N*C)); one fused launch with everything VMEM resident
    # minimizes launch + HBM round-trip overhead.
    out = pl.pallas_call(
        _head_kernel,
        grid=(1,),
        in_specs=[pl.BlockSpec((n_pad, h * w_sp, c), lambda i: (0, 0, 0)),
                  pl.BlockSpec((c, nc_pad), lambda i: (0, 0)),
                  pl.BlockSpec((1, nc_pad), lambda i: (0, 0))],
        out_specs=pl.BlockSpec((n_pad, nc_pad), lambda i: (0, 0)),
        out_shape=jax.ShapeDtypeStruct((n_pad, nc_pad), jnp.float32),
        compiler_params=pltpu.CompilerParams(
            dimension_semantics=("arbitrary",)),
    )(xr, wm, bp)
    return out[:n, :nc]


# ------------------------------------------------------------------ parameters

def init_params(key, layers=(2, 2, 2, 2), num_classes=10, in_ch=1):
    keys = iter(jax.random.split(key, 64))
    eps = 1e-5

    def kaiming(shape):  # (Cout, Cin, kh, kw), mode='fan_out', relu gain
        fan_out = shape[0] * shape[2] * shape[3]
        std = (2.0 / fan_out) ** 0.5
        return std * jax.random.normal(next(keys), shape, jnp.float32)

    def bn(c, zero=False):
        gamma = jnp.zeros((c,), jnp.float32) if zero else jnp.ones((c,), jnp.float32)
        beta = jnp.zeros((c,), jnp.float32)
        scale = gamma / jnp.sqrt(1.0 + eps)     # eval-mode fold: mean=0, var=1
        return scale, beta

    p = {'conv1_w': kaiming((32, in_ch, 3, 3))}
    p['bn1_s'], p['bn1_b'] = bn(32)

    inplanes = 32
    for li, (planes, nblk, stride) in enumerate(
            zip((32, 64, 128, 256), layers, (1, 2, 2, 2)), start=1):
        blocks = []
        for b in range(nblk):
            s = stride if b == 0 else 1
            blk = {}
            blk['conv1_w'] = kaiming((planes, inplanes, 3, 3))
            blk['bn1_s'], blk['bn1_b'] = bn(planes)
            blk['conv2_w'] = kaiming((planes, planes, 3, 3))
            blk['bn2_s'], blk['bn2_b'] = bn(planes, zero=True)  # zero_init_residual
            if s != 1 or inplanes != planes:
                blk['ds_w'] = kaiming((planes, inplanes, 1, 1))  # conv1x1 downsample
                blk['ds_s'], blk['ds_b'] = bn(planes)
            blocks.append(blk)
            inplanes = planes
        p[f'layer{li}'] = blocks

    fan_in = 256  # 256 * BasicBlock.expansion
    bound = 1.0 / (fan_in ** 0.5)
    p['fc_w'] = jax.random.uniform(next(keys), (num_classes, fan_in),
                                   jnp.float32, -bound, bound)
    p['fc_b'] = jax.random.uniform(next(keys), (num_classes,),
                                   jnp.float32, -bound, bound)
    return p


# ------------------------------------------------------------------ forward

_STAGE_STRIDE = {'layer1': 1, 'layer2': 2, 'layer3': 2, 'layer4': 2}


def resnet_forward(params, x_nchw):
    # NCHW (PyTorch) -> NHWC; activations kept in bf16 between layers to halve
    # HBM traffic (all matmuls accumulate in f32 on the MXU).
    x = jnp.transpose(x_nchw, (0, 2, 3, 1)).astype(jnp.bfloat16)

    # stem
    x = conv_bn(x, params['conv1_w'], params['bn1_s'], params['bn1_b'],
                stride=1, pad=1, relu=True)
    x = maxpool_3x3_s2_p1(x)

    # residual stages (BasicBlock)
    # TODO(synk): a further win would be fusing a whole BasicBlock into a single
    #             pallas_call with the intermediate activation in VMEM scratch;
    #             kept at two fused-matmul launches per block here (the downsample
    #             branch is already folded into the second matmul via K-concat).
    for lname in ('layer1', 'layer2', 'layer3', 'layer4'):
        for bi, blk in enumerate(params[lname]):
            s = _STAGE_STRIDE[lname] if bi == 0 else 1
            out = conv_bn(x, blk['conv1_w'], blk['bn1_s'], blk['bn1_b'],
                          stride=s, pad=1, relu=True)
            if 'ds_w' in blk:
                x = conv_bn(out, blk['conv2_w'], blk['bn2_s'], blk['bn2_b'],
                            stride=1, pad=1, relu=True,
                            downsample=(x, s, blk['ds_w'],
                                        blk['ds_s'], blk['ds_b']))
            else:
                x = conv_bn(out, blk['conv2_w'], blk['bn2_s'], blk['bn2_b'],
                            stride=1, pad=1, relu=True, residual=x)

    # head: fused global avg-pool + fc
    return avgpool_fc(x, params['fc_w'], params['fc_b'])


# ------------------------------------------------------------------ main

if __name__ == "__main__":
    key = jax.random.PRNGKey(0)
    pkey, xkey = jax.random.split(key)

    params = init_params(pkey, layers=(2, 2, 2, 2), num_classes=10, in_ch=1)
    # small mnist-like input: batch=2, channels=1, spatial=16x16, NCHW
    x = jax.random.normal(xkey, (2, 1, 16, 16), jnp.float32)

    fwd = jax.jit(resnet_forward)
    out = jax.block_until_ready(fwd(params, x))
    assert out.shape == (2, 10), out.shape
    assert bool(jnp.all(jnp.isfinite(out)))
    print("KERNEL_OK")
</pallas_src>

<mosaic_0001>
module attributes {stable_mosaic.version = 11 : i64} {
  func.func @_mm_bias_act_kernel(%arg0: i32, %arg1: i32, %arg2: i32, %arg3: memref<256x9xbf16, #tpu.memory_space<vmem>>, %arg4: memref<9x128xbf16, #tpu.memory_space<vmem>>, %arg5: memref<1x128xf32, #tpu.memory_space<vmem>>, %arg6: memref<256x128xbf16, #tpu.memory_space<vmem>>, %arg7: memref<256x128xf32, #tpu.memory_space<vmem>>) attributes {dimension_semantics = [#tpu.dimension_semantics<parallel>, #tpu.dimension_semantics<parallel>, #tpu.dimension_semantics<arbitrary>], iteration_bounds = array<i64: 2, 1, 1>, scalar_prefetch = 0 : i64, scratch_operands = 1 : i64, tpu.core_type = #tpu.core_type<tc>, window_params = [{transform_indices = @transform_0, window_bounds = array<i64: 256, 9>}, {transform_indices = @transform_1, window_bounds = array<i64: 9, 128>}, {transform_indices = @transform_2, window_bounds = array<i64: 1, 128>}, {transform_indices = @transform_3, window_bounds = array<i64: 256, 128>}]} {
    %c0_i32 = arith.constant 0 : i32
    %0 = arith.cmpi eq, %arg2, %c0_i32 : i32
    %1 = arith.extui %0 : i1 to i32
    %c0_i32_0 = arith.constant 0 : i32
    %2 = arith.cmpi ne, %1, %c0_i32_0 : i32
    scf.if %2 {
      %cst_10 = arith.constant 0.000000e+00 : f32
      %12 = vector.broadcast %cst_10 : f32 to vector<256x128xf32>
      %c0_11 = arith.constant 0 : index
      %c0_12 = arith.constant 0 : index
      %13 = vector.load %arg7[%c0_11, %c0_12] : memref<256x128xf32, #tpu.memory_space<vmem>>, vector<256x128xf32>
      tpu.vector_store %arg7[%c0_11, %c0_12], %12 {strides = array<i32>} : memref<256x128xf32, #tpu.memory_space<vmem>>, vector<256x128xf32>,
    } else {
    }
    %c0 = arith.constant 0 : index
    %c0_1 = arith.constant 0 : index
    %3 = vector.load %arg7[%c0, %c0_1] : memref<256x128xf32, #tpu.memory_space<vmem>>, vector<256x128xf32>
    %c0_2 = arith.constant 0 : index
    %c0_3 = arith.constant 0 : index
    %4 = vector.load %arg3[%c0_2, %c0_3] : memref<256x9xbf16, #tpu.memory_space<vmem>>, vector<256x9xbf16>
    %c0_4 = arith.constant 0 : index
    %c0_5 = arith.constant 0 : index
    %5 = vector.load %arg4[%c0_4, %c0_5] : memref<9x128xbf16, #tpu.memory_space<vmem>>, vector<9x128xbf16>
    %cst = arith.constant dense<0.000000e+00> : vector<256x128xf32>
    %6 = tpu.matmul %4, %5, %cst {dimension_numbers = #tpu.dot_dimension_numbers<[1], [0], [0], [1], [0, 0, 1, 1], [], []>} : vector<256x9xbf16>, vector<9x128xbf16>, vector<256x128xf32> -> vector<256x128xf32>
    %7 = arith.addf %3, %6 : vector<256x128xf32>
    %c0_6 = arith.constant 0 : index
    %c0_7 = arith.constant 0 : index
    %8 = vector.load %arg7[%c0_6, %c0_7] : memref<256x128xf32, #tpu.memory_space<vmem>>, vector<256x128xf32>
    tpu.vector_store %arg7[%c0_6, %c0_7], %7 {strides = array<i32>} : memref<256x128xf32, #tpu.memory_space<vmem>>, vector<256x128xf32>,
    %c0_i32_8 = arith.constant 0 : i32
    %9 = arith.cmpi eq, %arg2, %c0_i32_8 : i32
    %10 = arith.extui %9 : i1 to i32
    %c0_i32_9 = arith.constant 0 : i32
    %11 = arith.cmpi ne, %10, %c0_i32_9 : i32
    scf.if %11 {
      %c0_10 = arith.constant 0 : index
      %c0_11 = arith.constant 0 : index
      %12 = vector.load %arg7[%c0_10, %c0_11] : memref<256x128xf32, #tpu.memory_space<vmem>>, vector<256x128xf32>
      %c0_12 = arith.constant 0 : index
      %c0_13 = arith.constant 0 : index
      %13 = vector.load %arg5[%c0_12, %c0_13] : memref<1x128xf32, #tpu.memory_space<vmem>>, vector<1x128xf32>
      %14 = vector.broadcast %13 : vector<1x128xf32> to vector<256x128xf32>
      %15 = arith.addf %12, %14 : vector<256x128xf32>
      %cst_14 = arith.constant 0.000000e+00 : f32
      %16 = vector.broadcast %cst_14 : f32 to vector<256x128xf32>
      %17 = arith.maximumf %15, %16 : vector<256x128xf32>
      %18 = arith.truncf %17 : vector<256x128xf32> to vector<256x128xbf16>
      %c0_15 = arith.constant 0 : index
      %c0_16 = arith.constant 0 : index
      %19 = vector.load %arg6[%c0_15, %c0_16] : memref<256x128xbf16, #tpu.memory_space<vmem>>, vector<256x128xbf16>
      tpu.vector_store %arg6[%c0_15, %c0_16], %18 {strides = array<i32>} : memref<256x128xbf16, #tpu.memory_space<vmem>>, vector<256x128xbf16>,
    } else {
    }
    return
  }
  func.func @transform_0(%arg0: i32, %arg1: i32, %arg2: i32) -> (i32, i32) {
    %c0_i32 = arith.constant 0 : i32
    return %arg0, %arg2 : i32, i32
  }
  func.func @transform_1(%arg0: i32, %arg1: i32, %arg2: i32) -> (i32, i32) {
    %c0_i32 = arith.constant 0 : i32
    return %arg2, %arg1 : i32, i32
  }
  func.func @transform_2(%arg0: i32, %arg1: i32, %arg2: i32) -> (i32, i32) {
    %c0_i32 = arith.constant 0 : i32
    %c0_i32_0 = arith.constant 0 : i32
    return %c0_i32, %arg1 : i32, i32
  }
  func.func @transform_3(%arg0: i32, %arg1: i32, %arg2: i32) -> (i32, i32) {
    %c0_i32 = arith.constant 0 : i32
    return %arg0, %arg1 : i32, i32
  }
}

module attributes {stable_mosaic.version = 11 : i64} {
  func.func @_maxpool_kernel(%arg0: i32, %arg1: memref<1x9x9x32xbf16, #tpu.memory_space<vmem>>, %arg2: memref<1x9x9x32xbf16, #tpu.memory_space<vmem>>, %arg3: memref<1x9x9x32xbf16, #tpu.memory_space<vmem>>, %arg4: memref<1x9x9x32xbf16, #tpu.memory_space<vmem>>, %arg5: memref<1x8x8x32xbf16, #tpu.memory_space<vmem>>) attributes {dimension_semantics = [#tpu.dimension_semantics<parallel>], iteration_bounds = array<i64: 2>, scalar_prefetch = 0 : i64, scratch_operands = 0 : i64, tpu.core_type = #tpu.core_type<tc>, window_params = [{transform_indices = @transform_0, window_bounds = array<i64: 1, 9, 9, 32>}, {transform_indices = @transform_1, window_bounds = array<i64: 1, 9, 9, 32>}, {transform_indices = @transform_2, window_bounds = array<i64: 1, 9, 9, 32>}, {transform_indices = @transform_3, window_bounds = array<i64: 1, 9, 9, 32>}, {transform_indices = @transform_4, window_bounds = array<i64: 1, 8, 8, 32>}]} {
    %c0 = arith.constant 0 : index
    %c0_0 = arith.constant 0 : index
    %c0_1 = arith.constant 0 : index
    %c0_2 = arith.constant 0 : index
    %0 = vector.load %arg1[%c0, %c0_0, %c0_1, %c0_2] : memref<1x9x9x32xbf16, #tpu.memory_space<vmem>>, vector<1x8x8x32xbf16>
    %1 = vector.shape_cast %0 : vector<1x8x8x32xbf16> to vector<8x8x32xbf16>
    %c0_3 = arith.constant 0 : index
    %c0_4 = arith.constant 0 : index
    %c0_5 = arith.constant 0 : index
    %c0_6 = arith.constant 0 : index
    %2 = vector.load %arg2[%c0_3, %c0_4, %c0_5, %c0_6] : memref<1x9x9x32xbf16, #tpu.memory_space<vmem>>, vector<1x8x8x32xbf16>
    %3 = vector.shape_cast %2 : vector<1x8x8x32xbf16> to vector<8x8x32xbf16>
    %4 = arith.maximumf %1, %3 : vector<8x8x32xbf16>
    %c0_7 = arith.constant 0 : index
    %c0_8 = arith.constant 0 : index
    %c1 = arith.constant 1 : index
    %c0_9 = arith.constant 0 : index
    %5 = vector.load %arg1[%c0_7, %c0_8, %c1, %c0_9] : memref<1x9x9x32xbf16, #tpu.memory_space<vmem>>, vector<1x8x8x32xbf16>
    %6 = vector.shape_cast %5 : vector<1x8x8x32xbf16> to vector<8x8x32xbf16>
    %7 = arith.maximumf %4, %6 : vector<8x8x32xbf16>
    %c0_10 = arith.constant 0 : index
    %c0_11 = arith.constant 0 : index
    %c0_12 = arith.constant 0 : index
    %c0_13 = arith.constant 0 : index
    %8 = vector.load %arg3[%c0_10, %c0_11, %c0_12, %c0_13] : memref<1x9x9x32xbf16, #tpu.memory_space<vmem>>, vector<1x8x8x32xbf16>
    %9 = vector.shape_cast %8 : vector<1x8x8x32xbf16> to vector<8x8x32xbf16>
    %10 = arith.maximumf %7, %9 : vector<8x8x32xbf16>
    %c0_14 = arith.constant 0 : index
    %c0_15 = arith.constant 0 : index
    %c0_16 = arith.constant 0 : index
    %c0_17 = arith.constant 0 : index
    %11 = vector.load %arg4[%c0_14, %c0_15, %c0_16, %c0_17] : memref<1x9x9x32xbf16, #tpu.memory_space<vmem>>, vector<1x8x8x32xbf16>
    %12 = vector.shape_cast %11 : vector<1x8x8x32xbf16> to vector<8x8x32xbf16>
    %13 = arith.maximumf %10, %12 : vector<8x8x32xbf16>
    %c0_18 = arith.constant 0 : index
    %c0_19 = arith.constant 0 : index
    %c1_20 = arith.constant 1 : index
    %c0_21 = arith.constant 0 : index
    %14 = vector.load %arg3[%c0_18, %c0_19, %c1_20, %c0_21] : memref<1x9x9x32xbf16, #tpu.memory_space<vmem>>, vector<1x8x8x32xbf16>
    %15 = vector.shape_cast %14 : vector<1x8x8x32xbf16> to vector<8x8x32xbf16>
    %16 = arith.maximumf %13, %15 : vector<8x8x32xbf16>
    %c0_22 = arith.constant 0 : index
    %c1_23 = arith.constant 1 : index
    %c0_24 = arith.constant 0 : index
    %c0_25 = arith.constant 0 : index
    %17 = vector.load %arg1[%c0_22, %c1_23, %c0_24, %c0_25] : memref<1x9x9x32xbf16, #tpu.memory_space<vmem>>, vector<1x8x8x32xbf16>
    %18 = vector.shape_cast %17 : vector<1x8x8x32xbf16> to vector<8x8x32xbf16>
    %19 = arith.maximumf %16, %18 : vector<8x8x32xbf16>
    %c0_26 = arith.constant 0 : index
    %c1_27 = arith.constant 1 : index
    %c0_28 = arith.constant 0 : index
    %c0_29 = arith.constant 0 : index
    %20 = vector.load %arg2[%c0_26, %c1_27, %c0_28, %c0_29] : memref<1x9x9x32xbf16, #tpu.memory_space<vmem>>, vector<1x8x8x32xbf16>
    %21 = vector.shape_cast %20 : vector<1x8x8x32xbf16> to vector<8x8x32xbf16>
    %22 = arith.maximumf %19, %21 : vector<8x8x32xbf16>
    %c0_30 = arith.constant 0 : index
    %c1_31 = arith.constant 1 : index
    %c1_32 = arith.constant 1 : index
    %c0_33 = arith.constant 0 : index
    %23 = vector.load %arg1[%c0_30, %c1_31, %c1_32, %c0_33] : memref<1x9x9x32xbf16, #tpu.memory_space<vmem>>, vector<1x8x8x32xbf16>
    %24 = vector.shape_cast %23 : vector<1x8x8x32xbf16> to vector<8x8x32xbf16>
    %25 = arith.maximumf %22, %24 : vector<8x8x32xbf16>
    %c0_34 = arith.constant 0 : index
    %c0_35 = arith.constant 0 : index
    %c0_36 = arith.constant 0 : index
    %c0_37 = arith.constant 0 : index
    %26 = vector.load %arg5[%c0_34, %c0_35, %c0_36, %c0_37] : memref<1x8x8x32xbf16, #tpu.memory_space<vmem>>, vector<1x8x8x32xbf16>
    %27 = vector.shape_cast %26 : vector<1x8x8x32xbf16> to vector<8x8x32xbf16>
    %28 = vector.shape_cast %25 : vector<8x8x32xbf16> to vector<1x8x8x32xbf16>
    tpu.vector_store %arg5[%c0_34, %c0_35, %c0_36, %c0_37], %28 {strides = array<i32>} : memref<1x8x8x32xbf16, #tpu.memory_space<vmem>>, vector<1x8x8x32xbf16>,
    return
  }
  func.func @transform_0(%arg0: i32) -> (i32, i32, i32, i32) {
    %c0_i32 = arith.constant 0 : i32
    %c0_i32_0 = arith.constant 0 : i32
    %c0_i32_1 = arith.constant 0 : i32
    %c0_i32_2 = arith.constant 0 : i32
    return %arg0, %c0_i32, %c0_i32_0, %c0_i32_1 : i32, i32, i32, i32
  }
  func.func @transform_1(%arg0: i32) -> (i32, i32, i32, i32) {
    %c0_i32 = arith.constant 0 : i32
    %c0_i32_0 = arith.constant 0 : i32
    %c0_i32_1 = arith.constant 0 : i32
    %c0_i32_2 = arith.constant 0 : i32
    return %arg0, %c0_i32, %c0_i32_0, %c0_i32_1 : i32, i32, i32, i32
  }
  func.func @transform_2(%arg0: i32) -> (i32, i32, i32, i32) {
    %c0_i32 = arith.constant 0 : i32
    %c0_i32_0 = arith.constant 0 : i32
    %c0_i32_1 = arith.constant 0 : i32
    %c0_i32_2 = arith.constant 0 : i32
    return %arg0, %c0_i32, %c0_i32_0, %c0_i32_1 : i32, i32, i32, i32
  }
  func.func @transform_3(%arg0: i32) -> (i32, i32, i32, i32) {
    %c0_i32 = arith.constant 0 : i32
    %c0_i32_0 = arith.constant 0 : i32
    %c0_i32_1 = arith.constant 0 : i32
    %c0_i32_2 = arith.constant 0 : i32
    return %arg0, %c0_i32, %c0_i32_0, %c0_i32_1 : i32, i32, i32, i32
  }
  func.func @transform_4(%arg0: i32) -> (i32, i32, i32, i32) {
    %c0_i32 = arith.constant 0 : i32
    %c0_i32_0 = arith.constant 0 : i32
    %c0_i32_1 = arith.constant 0 : i32
    %c0_i32_2 = arith.constant 0 : i32
    return %arg0, %c0_i32, %c0_i32_0, %c0_i32_1 : i32, i32, i32, i32
  }
}

module attributes {stable_mosaic.version = 11 : i64} {
  func.func @_mm_bias_act_kernel(%arg0: i32, %arg1: i32, %arg2: i32, %arg3: memref<128x288xbf16, #tpu.memory_space<vmem>>, %arg4: memref<288x128xbf16, #tpu.memory_space<vmem>>, %arg5: memref<1x128xf32, #tpu.memory_space<vmem>>, %arg6: memref<128x128xbf16, #tpu.memory_space<vmem>>, %arg7: memref<128x128xf32, #tpu.memory_space<vmem>>) attributes {dimension_semantics = [#tpu.dimension_semantics<parallel>, #tpu.dimension_semantics<parallel>, #tpu.dimension_semantics<arbitrary>], iteration_bounds = array<i64: 1, 1, 1>, scalar_prefetch = 0 : i64, scratch_operands = 1 : i64, tpu.core_type = #tpu.core_type<tc>, window_params = [{transform_indices = @transform_0, window_bounds = array<i64: 128, 288>}, {transform_indices = @transform_1, window_bounds = array<i64: 288, 128>}, {transform_indices = @transform_2, window_bounds = array<i64: 1, 128>}, {transform_indices = @transform_3, window_bounds = array<i64: 128, 128>}]} {
    %c0_i32 = arith.constant 0 : i32
    %0 = arith.cmpi eq, %arg2, %c0_i32 : i32
    %1 = arith.extui %0 : i1 to i32
    %c0_i32_0 = arith.constant 0 : i32
    %2 = arith.cmpi ne, %1, %c0_i32_0 : i32
    scf.if %2 {
      %cst_10 = arith.constant 0.000000e+00 : f32
      %12 = vector.broadcast %cst_10 : f32 to vector<128x128xf32>
      %c0_11 = arith.constant 0 : index
      %c0_12 = arith.constant 0 : index
      %13 = vector.load %arg7[%c0_11, %c0_12] : memref<128x128xf32, #tpu.memory_space<vmem>>, vector<128x128xf32>
      tpu.vector_store %arg7[%c0_11, %c0_12], %12 {strides = array<i32>} : memref<128x128xf32, #tpu.memory_space<vmem>>, vector<128x128xf32>,
    } else {
    }
    %c0 = arith.constant 0 : index
    %c0_1 = arith.constant 0 : index
    %3 = vector.load %arg7[%c0, %c0_1] : memref<128x128xf32, #tpu.memory_space<vmem>>, vector<128x128xf32>
    %c0_2 = arith.constant 0 : index
    %c0_3 = arith.constant 0 : index
    %4 = vector.load %arg3[%c0_2, %c0_3] : memref<128x288xbf16, #tpu.memory_space<vmem>>, vector<128x288xbf16>
    %c0_4 = arith.constant 0 : index
    %c0_5 = arith.constant 0 : index
    %5 = vector.load %arg4[%c0_4, %c0_5] : memref<288x128xbf16, #tpu.memory_space<vmem>>, vector<288x128xbf16>
    %cst = arith.constant dense<0.000000e+00> : vector<128x128xf32>
    %6 = tpu.matmul %4, %5, %cst {dimension_numbers = #tpu.dot_dimension_numbers<[1], [0], [0], [1], [0, 0, 1, 1], [], []>} : vector<128x288xbf16>, vector<288x128xbf16>, vector<128x128xf32> -> vector<128x128xf32>
    %7 = arith.addf %3, %6 : vector<128x128xf32>
    %c0_6 = arith.constant 0 : index
    %c0_7 = arith.constant 0 : index
    %8 = vector.load %arg7[%c0_6, %c0_7] : memref<128x128xf32, #tpu.memory_space<vmem>>, vector<128x128xf32>
    tpu.vector_store %arg7[%c0_6, %c0_7], %7 {strides = array<i32>} : memref<128x128xf32, #tpu.memory_space<vmem>>, vector<128x128xf32>,
    %c0_i32_8 = arith.constant 0 : i32
    %9 = arith.cmpi eq, %arg2, %c0_i32_8 : i32
    %10 = arith.extui %9 : i1 to i32
    %c0_i32_9 = arith.constant 0 : i32
    %11 = arith.cmpi ne, %10, %c0_i32_9 : i32
    scf.if %11 {
      %c0_10 = arith.constant 0 : index
      %c0_11 = arith.constant 0 : index
      %12 = vector.load %arg7[%c0_10, %c0_11] : memref<128x128xf32, #tpu.memory_space<vmem>>, vector<128x128xf32>
      %c0_12 = arith.constant 0 : index
      %c0_13 = arith.constant 0 : index
      %13 = vector.load %arg5[%c0_12, %c0_13] : memref<1x128xf32, #tpu.memory_space<vmem>>, vector<1x128xf32>
      %14 = vector.broadcast %13 : vector<1x128xf32> to vector<128x128xf32>
      %15 = arith.addf %12, %14 : vector<128x128xf32>
      %cst_14 = arith.constant 0.000000e+00 : f32
      %16 = vector.broadcast %cst_14 : f32 to vector<128x128xf32>
      %17 = arith.maximumf %15, %16 : vector<128x128xf32>
      %18 = arith.truncf %17 : vector<128x128xf32> to vector<128x128xbf16>
      %c0_15 = arith.constant 0 : index
      %c0_16 = arith.constant 0 : index
      %19 = vector.load %arg6[%c0_15, %c0_16] : memref<128x128xbf16, #tpu.memory_space<vmem>>, vector<128x128xbf16>
      tpu.vector_store %arg6[%c0_15, %c0_16], %18 {strides = array<i32>} : memref<128x128xbf16, #tpu.memory_space<vmem>>, vector<128x128xbf16>,
    } else {
    }
    return
  }
  func.func @transform_0(%arg0: i32, %arg1: i32, %arg2: i32) -> (i32, i32) {
    %c0_i32 = arith.constant 0 : i32
    return %arg0, %arg2 : i32, i32
  }
  func.func @transform_1(%arg0: i32, %arg1: i32, %arg2: i32) -> (i32, i32) {
    %c0_i32 = arith.constant 0 : i32
    return %arg2, %arg1 : i32, i32
  }
  func.func @transform_2(%arg0: i32, %arg1: i32, %arg2: i32) -> (i32, i32) {
    %c0_i32 = arith.constant 0 : i32
    %c0_i32_0 = arith.constant 0 : i32
    return %c0_i32, %arg1 : i32, i32
  }
  func.func @transform_3(%arg0: i32, %arg1: i32, %arg2: i32) -> (i32, i32) {
    %c0_i32 = arith.constant 0 : i32
    return %arg0, %arg1 : i32, i32
  }
}

module attributes {stable_mosaic.version = 11 : i64} {
  func.func @_mm_bias_res_relu_kernel(%arg0: i32, %arg1: i32, %arg2: i32, %arg3: memref<128x288xbf16, #tpu.memory_space<vmem>>, %arg4: memref<288x128xbf16, #tpu.memory_space<vmem>>, %arg5: memref<1x128xf32, #tpu.memory_space<vmem>>, %arg6: memref<128x128xbf16, #tpu.memory_space<vmem>>, %arg7: memref<128x128xbf16, #tpu.memory_space<vmem>>, %arg8: memref<128x128xf32, #tpu.memory_space<vmem>>) attributes {dimension_semantics = [#tpu.dimension_semantics<parallel>, #tpu.dimension_semantics<parallel>, #tpu.dimension_semantics<arbitrary>], iteration_bounds = array<i64: 1, 1, 1>, scalar_prefetch = 0 : i64, scratch_operands = 1 : i64, tpu.core_type = #tpu.core_type<tc>, window_params = [{transform_indices = @transform_0, window_bounds = array<i64: 128, 288>}, {transform_indices = @transform_1, window_bounds = array<i64: 288, 128>}, {transform_indices = @transform_2, window_bounds = array<i64: 1, 128>}, {transform_indices = @transform_3, window_bounds = array<i64: 128, 128>}, {transform_indices = @transform_4, window_bounds = array<i64: 128, 128>}]} {
    %c0_i32 = arith.constant 0 : i32
    %0 = arith.cmpi eq, %arg2, %c0_i32 : i32
    %1 = arith.extui %0 : i1 to i32
    %c0_i32_0 = arith.constant 0 : i32
    %2 = arith.cmpi ne, %1, %c0_i32_0 : i32
    scf.if %2 {
      %cst_10 = arith.constant 0.000000e+00 : f32
      %12 = vector.broadcast %cst_10 : f32 to vector<128x128xf32>
      %c0_11 = arith.constant 0 : index
      %c0_12 = arith.constant 0 : index
      %13 = vector.load %arg8[%c0_11, %c0_12] : memref<128x128xf32, #tpu.memory_space<vmem>>, vector<128x128xf32>
      tpu.vector_store %arg8[%c0_11, %c0_12], %12 {strides = array<i32>} : memref<128x128xf32, #tpu.memory_space<vmem>>, vector<128x128xf32>,
    } else {
    }
    %c0 = arith.constant 0 : index
    %c0_1 = arith.constant 0 : index
    %3 = vector.load %arg8[%c0, %c0_1] : memref<128x128xf32, #tpu.memory_space<vmem>>, vector<128x128xf32>
    %c0_2 = arith.constant 0 : index
    %c0_3 = arith.constant 0 : index
    %4 = vector.load %arg3[%c0_2, %c0_3] : memref<128x288xbf16, #tpu.memory_space<vmem>>, vector<128x288xbf16>
    %c0_4 = arith.constant 0 : index
    %c0_5 = arith.constant 0 : index
    %5 = vector.load %arg4[%c0_4, %c0_5] : memref<288x128xbf16, #tpu.memory_space<vmem>>, vector<288x128xbf16>
    %cst = arith.constant dense<0.000000e+00> : vector<128x128xf32>
    %6 = tpu.matmul %4, %5, %cst {dimension_numbers = #tpu.dot_dimension_numbers<[1], [0], [0], [1], [0, 0, 1, 1], [], []>} : vector<128x288xbf16>, vector<288x128xbf16>, vector<128x128xf32> -> vector<128x128xf32>
    %7 = arith.addf %3, %6 : vector<128x128xf32>
    %c0_6 = arith.constant 0 : index
    %c0_7 = arith.constant 0 : index
    %8 = vector.load %arg8[%c0_6, %c0_7] : memref<128x128xf32, #tpu.memory_space<vmem>>, vector<128x128xf32>
    tpu.vector_store %arg8[%c0_6, %c0_7], %7 {strides = array<i32>} : memref<128x128xf32, #tpu.memory_space<vmem>>, vector<128x128xf32>,
    %c0_i32_8 = arith.constant 0 : i32
    %9 = arith.cmpi eq, %arg2, %c0_i32_8 : i32
    %10 = arith.extui %9 : i1 to i32
    %c0_i32_9 = arith.constant 0 : i32
    %11 = arith.cmpi ne, %10, %c0_i32_9 : i32
    scf.if %11 {
      %c0_10 = arith.constant 0 : index
      %c0_11 = arith.constant 0 : index
      %12 = vector.load %arg8[%c0_10, %c0_11] : memref<128x128xf32, #tpu.memory_space<vmem>>, vector<128x128xf32>
      %c0_12 = arith.constant 0 : index
      %c0_13 = arith.constant 0 : index
      %13 = vector.load %arg5[%c0_12, %c0_13] : memref<1x128xf32, #tpu.memory_space<vmem>>, vector<1x128xf32>
      %14 = vector.broadcast %13 : vector<1x128xf32> to vector<128x128xf32>
      %15 = arith.addf %12, %14 : vector<128x128xf32>
      %c0_14 = arith.constant 0 : index
      %c0_15 = arith.constant 0 : index
      %16 = vector.load %arg6[%c0_14, %c0_15] : memref<128x128xbf16, #tpu.memory_space<vmem>>, vector<128x128xbf16>
      %17 = arith.extf %16 : vector<128x128xbf16> to vector<128x128xf32>
      %18 = arith.addf %15, %17 : vector<128x128xf32>
      %cst_16 = arith.constant 0.000000e+00 : f32
      %19 = vector.broadcast %cst_16 : f32 to vector<128x128xf32>
      %20 = arith.maximumf %18, %19 : vector<128x128xf32>
      %21 = arith.truncf %20 : vector<128x128xf32> to vector<128x128xbf16>
      %c0_17 = arith.constant 0 : index
      %c0_18 = arith.constant 0 : index
      %22 = vector.load %arg7[%c0_17, %c0_18] : memref<128x128xbf16, #tpu.memory_space<vmem>>, vector<128x128xbf16>
      tpu.vector_store %arg7[%c0_17, %c0_18], %21 {strides = array<i32>} : memref<128x128xbf16, #tpu.memory_space<vmem>>, vector<128x128xbf16>,
    } else {
    }
    return
  }
  func.func @transform_0(%arg0: i32, %arg1: i32, %arg2: i32) -> (i32, i32) {
    %c0_i32 = arith.constant 0 : i32
    return %arg0, %arg2 : i32, i32
  }
  func.func @transform_1(%arg0: i32, %arg1: i32, %arg2: i32) -> (i32, i32) {
    %c0_i32 = arith.constant 0 : i32
    return %arg2, %arg1 : i32, i32
  }
  func.func @transform_2(%arg0: i32, %arg1: i32, %arg2: i32) -> (i32, i32) {
    %c0_i32 = arith.constant 0 : i32
    %c0_i32_0 = arith.constant 0 : i32
    return %c0_i32, %arg1 : i32, i32
  }
  func.func @transform_3(%arg0: i32, %arg1: i32, %arg2: i32) -> (i32, i32) {
    %c0_i32 = arith.constant 0 : i32
    return %arg0, %arg1 : i32, i32
  }
  func.func @transform_4(%arg0: i32, %arg1: i32, %arg2: i32) -> (i32, i32) {
    %c0_i32 = arith.constant 0 : i32
    return %arg0, %arg1 : i32, i32
  }
}

module attributes {stable_mosaic.version = 11 : i64} {
  func.func @_mm_bias_act_kernel(%arg0: i32, %arg1: i32, %arg2: i32, %arg3: memref<32x288xbf16, #tpu.memory_space<vmem>>, %arg4: memref<288x128xbf16, #tpu.memory_space<vmem>>, %arg5: memref<1x128xf32, #tpu.memory_space<vmem>>, %arg6: memref<32x128xbf16, #tpu.memory_space<vmem>>, %arg7: memref<32x128xf32, #tpu.memory_space<vmem>>) attributes {dimension_semantics = [#tpu.dimension_semantics<parallel>, #tpu.dimension_semantics<parallel>, #tpu.dimension_semantics<arbitrary>], iteration_bounds = array<i64: 1, 1, 1>, scalar_prefetch = 0 : i64, scratch_operands = 1 : i64, tpu.core_type = #tpu.core_type<tc>, window_params = [{transform_indices = @transform_0, window_bounds = array<i64: 32, 288>}, {transform_indices = @transform_1, window_bounds = array<i64: 288, 128>}, {transform_indices = @transform_2, window_bounds = array<i64: 1, 128>}, {transform_indices = @transform_3, window_bounds = array<i64: 32, 128>}]} {
    %c0_i32 = arith.constant 0 : i32
    %0 = arith.cmpi eq, %arg2, %c0_i32 : i32
    %1 = arith.extui %0 : i1 to i32
    %c0_i32_0 = arith.constant 0 : i32
    %2 = arith.cmpi ne, %1, %c0_i32_0 : i32
    scf.if %2 {
      %cst_10 = arith.constant 0.000000e+00 : f32
      %12 = vector.broadcast %cst_10 : f32 to vector<32x128xf32>
      %c0_11 = arith.constant 0 : index
      %c0_12 = arith.constant 0 : index
      %13 = vector.load %arg7[%c0_11, %c0_12] : memref<32x128xf32, #tpu.memory_space<vmem>>, vector<32x128xf32>
      tpu.vector_store %arg7[%c0_11, %c0_12], %12 {strides = array<i32>} : memref<32x128xf32, #tpu.memory_space<vmem>>, vector<32x128xf32>,
    } else {
    }
    %c0 = arith.constant 0 : index
    %c0_1 = arith.constant 0 : index
    %3 = vector.load %arg7[%c0, %c0_1] : memref<32x128xf32, #tpu.memory_space<vmem>>, vector<32x128xf32>
    %c0_2 = arith.constant 0 : index
    %c0_3 = arith.constant 0 : index
    %4 = vector.load %arg3[%c0_2, %c0_3] : memref<32x288xbf16, #tpu.memory_space<vmem>>, vector<32x288xbf16>
    %c0_4 = arith.constant 0 : index
    %c0_5 = arith.constant 0 : index
    %5 = vector.load %arg4[%c0_4, %c0_5] : memref<288x128xbf16, #tpu.memory_space<vmem>>, vector<288x128xbf16>
    %cst = arith.constant dense<0.000000e+00> : vector<32x128xf32>
    %6 = tpu.matmul %4, %5, %cst {dimension_numbers = #tpu.dot_dimension_numbers<[1], [0], [0], [1], [0, 0, 1, 1], [], []>} : vector<32x288xbf16>, vector<288x128xbf16>, vector<32x128xf32> -> vector<32x128xf32>
    %7 = arith.addf %3, %6 : vector<32x128xf32>
    %c0_6 = arith.constant 0 : index
    %c0_7 = arith.constant 0 : index
    %8 = vector.load %arg7[%c0_6, %c0_7] : memref<32x128xf32, #tpu.memory_space<vmem>>, vector<32x128xf32>
    tpu.vector_store %arg7[%c0_6, %c0_7], %7 {strides = array<i32>} : memref<32x128xf32, #tpu.memory_space<vmem>>, vector<32x128xf32>,
    %c0_i32_8 = arith.constant 0 : i32
    %9 = arith.cmpi eq, %arg2, %c0_i32_8 : i32
    %10 = arith.extui %9 : i1 to i32
    %c0_i32_9 = arith.constant 0 : i32
    %11 = arith.cmpi ne, %10, %c0_i32_9 : i32
    scf.if %11 {
      %c0_10 = arith.constant 0 : index
      %c0_11 = arith.constant 0 : index
      %12 = vector.load %arg7[%c0_10, %c0_11] : memref<32x128xf32, #tpu.memory_space<vmem>>, vector<32x128xf32>
      %c0_12 = arith.constant 0 : index
      %c0_13 = arith.constant 0 : index
      %13 = vector.load %arg5[%c0_12, %c0_13] : memref<1x128xf32, #tpu.memory_space<vmem>>, vector<1x128xf32>
      %14 = vector.broadcast %13 : vector<1x128xf32> to vector<32x128xf32>
      %15 = arith.addf %12, %14 : vector<32x128xf32>
      %cst_14 = arith.constant 0.000000e+00 : f32
      %16 = vector.broadcast %cst_14 : f32 to vector<32x128xf32>
      %17 = arith.maximumf %15, %16 : vector<32x128xf32>
      %18 = arith.truncf %17 : vector<32x128xf32> to vector<32x128xbf16>
      %c0_15 = arith.constant 0 : index
      %c0_16 = arith.constant 0 : index
      %19 = vector.load %arg6[%c0_15, %c0_16] : memref<32x128xbf16, #tpu.memory_space<vmem>>, vector<32x128xbf16>
      tpu.vector_store %arg6[%c0_15, %c0_16], %18 {strides = array<i32>} : memref<32x128xbf16, #tpu.memory_space<vmem>>, vector<32x128xbf16>,
    } else {
    }
    return
  }
  func.func @transform_0(%arg0: i32, %arg1: i32, %arg2: i32) -> (i32, i32) {
    %c0_i32 = arith.constant 0 : i32
    return %arg0, %arg2 : i32, i32
  }
  func.func @transform_1(%arg0: i32, %arg1: i32, %arg2: i32) -> (i32, i32) {
    %c0_i32 = arith.constant 0 : i32
    return %arg2, %arg1 : i32, i32
  }
  func.func @transform_2(%arg0: i32, %arg1: i32, %arg2: i32) -> (i32, i32) {
    %c0_i32 = arith.constant 0 : i32
    %c0_i32_0 = arith.constant 0 : i32
    return %c0_i32, %arg1 : i32, i32
  }
  func.func @transform_3(%arg0: i32, %arg1: i32, %arg2: i32) -> (i32, i32) {
    %c0_i32 = arith.constant 0 : i32
    return %arg0, %arg1 : i32, i32
  }
}

module attributes {stable_mosaic.version = 11 : i64} {
  func.func @_mm_bias_act_kernel(%arg0: i32, %arg1: i32, %arg2: i32, %arg3: memref<32x608xbf16, #tpu.memory_space<vmem>>, %arg4: memref<608x128xbf16, #tpu.memory_space<vmem>>, %arg5: memref<1x128xf32, #tpu.memory_space<vmem>>, %arg6: memref<32x128xbf16, #tpu.memory_space<vmem>>, %arg7: memref<32x128xf32, #tpu.memory_space<vmem>>) attributes {dimension_semantics = [#tpu.dimension_semantics<parallel>, #tpu.dimension_semantics<parallel>, #tpu.dimension_semantics<arbitrary>], iteration_bounds = array<i64: 1, 1, 1>, scalar_prefetch = 0 : i64, scratch_operands = 1 : i64, tpu.core_type = #tpu.core_type<tc>, window_params = [{transform_indices = @transform_0, window_bounds = array<i64: 32, 608>}, {transform_indices = @transform_1, window_bounds = array<i64: 608, 128>}, {transform_indices = @transform_2, window_bounds = array<i64: 1, 128>}, {transform_indices = @transform_3, window_bounds = array<i64: 32, 128>}]} {
    %c0_i32 = arith.constant 0 : i32
    %0 = arith.cmpi eq, %arg2, %c0_i32 : i32
    %1 = arith.extui %0 : i1 to i32
    %c0_i32_0 = arith.constant 0 : i32
    %2 = arith.cmpi ne, %1, %c0_i32_0 : i32
    scf.if %2 {
      %cst_10 = arith.constant 0.000000e+00 : f32
      %12 = vector.broadcast %cst_10 : f32 to vector<32x128xf32>
      %c0_11 = arith.constant 0 : index
      %c0_12 = arith.constant 0 : index
      %13 = vector.load %arg7[%c0_11, %c0_12] : memref<32x128xf32, #tpu.memory_space<vmem>>, vector<32x128xf32>
      tpu.vector_store %arg7[%c0_11, %c0_12], %12 {strides = array<i32>} : memref<32x128xf32, #tpu.memory_space<vmem>>, vector<32x128xf32>,
    } else {
    }
    %c0 = arith.constant 0 : index
    %c0_1 = arith.constant 0 : index
    %3 = vector.load %arg7[%c0, %c0_1] : memref<32x128xf32, #tpu.memory_space<vmem>>, vector<32x128xf32>
    %c0_2 = arith.constant 0 : index
    %c0_3 = arith.constant 0 : index
    %4 = vector.load %arg3[%c0_2, %c0_3] : memref<32x608xbf16, #tpu.memory_space<vmem>>, vector<32x608xbf16>
    %c0_4 = arith.constant 0 : index
    %c0_5 = arith.constant 0 : index
    %5 = vector.load %arg4[%c0_4, %c0_5] : memref<608x128xbf16, #tpu.memory_space<vmem>>, vector<608x128xbf16>
    %cst = arith.constant dense<0.000000e+00> : vector<32x128xf32>
    %6 = tpu.matmul %4, %5, %cst {dimension_numbers = #tpu.dot_dimension_numbers<[1], [0], [0], [1], [0, 0, 1, 1], [], []>} : vector<32x608xbf16>, vector<608x128xbf16>, vector<32x128xf32> -> vector<32x128xf32>
    %7 = arith.addf %3, %6 : vector<32x128xf32>
    %c0_6 = arith.constant 0 : index
    %c0_7 = arith.constant 0 : index
    %8 = vector.load %arg7[%c0_6, %c0_7] : memref<32x128xf32, #tpu.memory_space<vmem>>, vector<32x128xf32>
    tpu.vector_store %arg7[%c0_6, %c0_7], %7 {strides = array<i32>} : memref<32x128xf32, #tpu.memory_space<vmem>>, vector<32x128xf32>,
    %c0_i32_8 = arith.constant 0 : i32
    %9 = arith.cmpi eq, %arg2, %c0_i32_8 : i32
    %10 = arith.extui %9 : i1 to i32
    %c0_i32_9 = arith.constant 0 : i32
    %11 = arith.cmpi ne, %10, %c0_i32_9 : i32
    scf.if %11 {
      %c0_10 = arith.constant 0 : index
      %c0_11 = arith.constant 0 : index
      %12 = vector.load %arg7[%c0_10, %c0_11] : memref<32x128xf32, #tpu.memory_space<vmem>>, vector<32x128xf32>
      %c0_12 = arith.constant 0 : index
      %c0_13 = arith.constant 0 : index
      %13 = vector.load %arg5[%c0_12, %c0_13] : memref<1x128xf32, #tpu.memory_space<vmem>>, vector<1x128xf32>
      %14 = vector.broadcast %13 : vector<1x128xf32> to vector<32x128xf32>
      %15 = arith.addf %12, %14 : vector<32x128xf32>
      %cst_14 = arith.constant 0.000000e+00 : f32
      %16 = vector.broadcast %cst_14 : f32 to vector<32x128xf32>
      %17 = arith.maximumf %15, %16 : vector<32x128xf32>
      %18 = arith.truncf %17 : vector<32x128xf32> to vector<32x128xbf16>
      %c0_15 = arith.constant 0 : index
      %c0_16 = arith.constant 0 : index
      %19 = vector.load %arg6[%c0_15, %c0_16] : memref<32x128xbf16, #tpu.memory_space<vmem>>, vector<32x128xbf16>
      tpu.vector_store %arg6[%c0_15, %c0_16], %18 {strides = array<i32>} : memref<32x128xbf16, #tpu.memory_space<vmem>>, vector<32x128xbf16>,
    } else {
    }
    return
  }
  func.func @transform_0(%arg0: i32, %arg1: i32, %arg2: i32) -> (i32, i32) {
    %c0_i32 = arith.constant 0 : i32
    return %arg0, %arg2 : i32, i32
  }
  func.func @transform_1(%arg0: i32, %arg1: i32, %arg2: i32) -> (i32, i32) {
    %c0_i32 = arith.constant 0 : i32
    return %arg2, %arg1 : i32, i32
  }
  func.func @transform_2(%arg0: i32, %arg1: i32, %arg2: i32) -> (i32, i32) {
    %c0_i32 = arith.constant 0 : i32
    %c0_i32_0 = arith.constant 0 : i32
    return %c0_i32, %arg1 : i32, i32
  }
  func.func @transform_3(%arg0: i32, %arg1: i32, %arg2: i32) -> (i32, i32) {
    %c0_i32 = arith.constant 0 : i32
    return %arg0, %arg1 : i32, i32
  }
}

module attributes {stable_mosaic.version = 11 : i64} {
  func.func @_mm_bias_act_kernel(%arg0: i32, %arg1: i32, %arg2: i32, %arg3: memref<32x576xbf16, #tpu.memory_space<vmem>>, %arg4: memref<576x128xbf16, #tpu.memory_space<vmem>>, %arg5: memref<1x128xf32, #tpu.memory_space<vmem>>, %arg6: memref<32x128xbf16, #tpu.memory_space<vmem>>, %arg7: memref<32x128xf32, #tpu.memory_space<vmem>>) attributes {dimension_semantics = [#tpu.dimension_semantics<parallel>, #tpu.dimension_semantics<parallel>, #tpu.dimension_semantics<arbitrary>], iteration_bounds = array<i64: 1, 1, 1>, scalar_prefetch = 0 : i64, scratch_operands = 1 : i64, tpu.core_type = #tpu.core_type<tc>, window_params = [{transform_indices = @transform_0, window_bounds = array<i64: 32, 576>}, {transform_indices = @transform_1, window_bounds = array<i64: 576, 128>}, {transform_indices = @transform_2, window_bounds = array<i64: 1, 128>}, {transform_indices = @transform_3, window_bounds = array<i64: 32, 128>}]} {
    %c0_i32 = arith.constant 0 : i32
    %0 = arith.cmpi eq, %arg2, %c0_i32 : i32
    %1 = arith.extui %0 : i1 to i32
    %c0_i32_0 = arith.constant 0 : i32
    %2 = arith.cmpi ne, %1, %c0_i32_0 : i32
    scf.if %2 {
      %cst_10 = arith.constant 0.000000e+00 : f32
      %12 = vector.broadcast %cst_10 : f32 to vector<32x128xf32>
      %c0_11 = arith.constant 0 : index
      %c0_12 = arith.constant 0 : index
      %13 = vector.load %arg7[%c0_11, %c0_12] : memref<32x128xf32, #tpu.memory_space<vmem>>, vector<32x128xf32>
      tpu.vector_store %arg7[%c0_11, %c0_12], %12 {strides = array<i32>} : memref<32x128xf32, #tpu.memory_space<vmem>>, vector<32x128xf32>,
    } else {
    }
    %c0 = arith.constant 0 : index
    %c0_1 = arith.constant 0 : index
    %3 = vector.load %arg7[%c0, %c0_1] : memref<32x128xf32, #tpu.memory_space<vmem>>, vector<32x128xf32>
    %c0_2 = arith.constant 0 : index
    %c0_3 = arith.constant 0 : index
    %4 = vector.load %arg3[%c0_2, %c0_3] : memref<32x576xbf16, #tpu.memory_space<vmem>>, vector<32x576xbf16>
    %c0_4 = arith.constant 0 : index
    %c0_5 = arith.constant 0 : index
    %5 = vector.load %arg4[%c0_4, %c0_5] : memref<576x128xbf16, #tpu.memory_space<vmem>>, vector<576x128xbf16>
    %cst = arith.constant dense<0.000000e+00> : vector<32x128xf32>
    %6 = tpu.matmul %4, %5, %cst {dimension_numbers = #tpu.dot_dimension_numbers<[1], [0], [0], [1], [0, 0, 1, 1], [], []>} : vector<32x576xbf16>, vector<576x128xbf16>, vector<32x128xf32> -> vector<32x128xf32>
    %7 = arith.addf %3, %6 : vector<32x128xf32>
    %c0_6 = arith.constant 0 : index
    %c0_7 = arith.constant 0 : index
    %8 = vector.load %arg7[%c0_6, %c0_7] : memref<32x128xf32, #tpu.memory_space<vmem>>, vector<32x128xf32>
    tpu.vector_store %arg7[%c0_6, %c0_7], %7 {strides = array<i32>} : memref<32x128xf32, #tpu.memory_space<vmem>>, vector<32x128xf32>,
    %c0_i32_8 = arith.constant 0 : i32
    %9 = arith.cmpi eq, %arg2, %c0_i32_8 : i32
    %10 = arith.extui %9 : i1 to i32
    %c0_i32_9 = arith.constant 0 : i32
    %11 = arith.cmpi ne, %10, %c0_i32_9 : i32
    scf.if %11 {
      %c0_10 = arith.constant 0 : index
      %c0_11 = arith.constant 0 : index
      %12 = vector.load %arg7[%c0_10, %c0_11] : memref<32x128xf32, #tpu.memory_space<vmem>>, vector<32x128xf32>
      %c0_12 = arith.constant 0 : index
      %c0_13 = arith.constant 0 : index
      %13 = vector.load %arg5[%c0_12, %c0_13] : memref<1x128xf32, #tpu.memory_space<vmem>>, vector<1x128xf32>
      %14 = vector.broadcast %13 : vector<1x128xf32> to vector<32x128xf32>
      %15 = arith.addf %12, %14 : vector<32x128xf32>
      %cst_14 = arith.constant 0.000000e+00 : f32
      %16 = vector.broadcast %cst_14 : f32 to vector<32x128xf32>
      %17 = arith.maximumf %15, %16 : vector<32x128xf32>
      %18 = arith.truncf %17 : vector<32x128xf32> to vector<32x128xbf16>
      %c0_15 = arith.constant 0 : index
      %c0_16 = arith.constant 0 : index
      %19 = vector.load %arg6[%c0_15, %c0_16] : memref<32x128xbf16, #tpu.memory_space<vmem>>, vector<32x128xbf16>
      tpu.vector_store %arg6[%c0_15, %c0_16], %18 {strides = array<i32>} : memref<32x128xbf16, #tpu.memory_space<vmem>>, vector<32x128xbf16>,
    } else {
    }
    return
  }
  func.func @transform_0(%arg0: i32, %arg1: i32, %arg2: i32) -> (i32, i32) {
    %c0_i32 = arith.constant 0 : i32
    return %arg0, %arg2 : i32, i32
  }
  func.func @transform_1(%arg0: i32, %arg1: i32, %arg2: i32) -> (i32, i32) {
    %c0_i32 = arith.constant 0 : i32
    return %arg2, %arg1 : i32, i32
  }
  func.func @transform_2(%arg0: i32, %arg1: i32, %arg2: i32) -> (i32, i32) {
    %c0_i32 = arith.constant 0 : i32
    %c0_i32_0 = arith.constant 0 : i32
    return %c0_i32, %arg1 : i32, i32
  }
  func.func @transform_3(%arg0: i32, %arg1: i32, %arg2: i32) -> (i32, i32) {
    %c0_i32 = arith.constant 0 : i32
    return %arg0, %arg1 : i32, i32
  }
}

module attributes {stable_mosaic.version = 11 : i64} {
  func.func @_mm_bias_res_relu_kernel(%arg0: i32, %arg1: i32, %arg2: i32, %arg3: memref<32x576xbf16, #tpu.memory_space<vmem>>, %arg4: memref<576x128xbf16, #tpu.memory_space<vmem>>, %arg5: memref<1x128xf32, #tpu.memory_space<vmem>>, %arg6: memref<32x128xbf16, #tpu.memory_space<vmem>>, %arg7: memref<32x128xbf16, #tpu.memory_space<vmem>>, %arg8: memref<32x128xf32, #tpu.memory_space<vmem>>) attributes {dimension_semantics = [#tpu.dimension_semantics<parallel>, #tpu.dimension_semantics<parallel>, #tpu.dimension_semantics<arbitrary>], iteration_bounds = array<i64: 1, 1, 1>, scalar_prefetch = 0 : i64, scratch_operands = 1 : i64, tpu.core_type = #tpu.core_type<tc>, window_params = [{transform_indices = @transform_0, window_bounds = array<i64: 32, 576>}, {transform_indices = @transform_1, window_bounds = array<i64: 576, 128>}, {transform_indices = @transform_2, window_bounds = array<i64: 1, 128>}, {transform_indices = @transform_3, window_bounds = array<i64: 32, 128>}, {transform_indices = @transform_4, window_bounds = array<i64: 32, 128>}]} {
    %c0_i32 = arith.constant 0 : i32
    %0 = arith.cmpi eq, %arg2, %c0_i32 : i32
    %1 = arith.extui %0 : i1 to i32
    %c0_i32_0 = arith.constant 0 : i32
    %2 = arith.cmpi ne, %1, %c0_i32_0 : i32
    scf.if %2 {
      %cst_10 = arith.constant 0.000000e+00 : f32
      %12 = vector.broadcast %cst_10 : f32 to vector<32x128xf32>
      %c0_11 = arith.constant 0 : index
      %c0_12 = arith.constant 0 : index
      %13 = vector.load %arg8[%c0_11, %c0_12] : memref<32x128xf32, #tpu.memory_space<vmem>>, vector<32x128xf32>
      tpu.vector_store %arg8[%c0_11, %c0_12], %12 {strides = array<i32>} : memref<32x128xf32, #tpu.memory_space<vmem>>, vector<32x128xf32>,
    } else {
    }
    %c0 = arith.constant 0 : index
    %c0_1 = arith.constant 0 : index
    %3 = vector.load %arg8[%c0, %c0_1] : memref<32x128xf32, #tpu.memory_space<vmem>>, vector<32x128xf32>
    %c0_2 = arith.constant 0 : index
    %c0_3 = arith.constant 0 : index
    %4 = vector.load %arg3[%c0_2, %c0_3] : memref<32x576xbf16, #tpu.memory_space<vmem>>, vector<32x576xbf16>
    %c0_4 = arith.constant 0 : index
    %c0_5 = arith.constant 0 : index
    %5 = vector.load %arg4[%c0_4, %c0_5] : memref<576x128xbf16, #tpu.memory_space<vmem>>, vector<576x128xbf16>
    %cst = arith.constant dense<0.000000e+00> : vector<32x128xf32>
    %6 = tpu.matmul %4, %5, %cst {dimension_numbers = #tpu.dot_dimension_numbers<[1], [0], [0], [1], [0, 0, 1, 1], [], []>} : vector<32x576xbf16>, vector<576x128xbf16>, vector<32x128xf32> -> vector<32x128xf32>
    %7 = arith.addf %3, %6 : vector<32x128xf32>
    %c0_6 = arith.constant 0 : index
    %c0_7 = arith.constant 0 : index
    %8 = vector.load %arg8[%c0_6, %c0_7] : memref<32x128xf32, #tpu.memory_space<vmem>>, vector<32x128xf32>
    tpu.vector_store %arg8[%c0_6, %c0_7], %7 {strides = array<i32>} : memref<32x128xf32, #tpu.memory_space<vmem>>, vector<32x128xf32>,
    %c0_i32_8 = arith.constant 0 : i32
    %9 = arith.cmpi eq, %arg2, %c0_i32_8 : i32
    %10 = arith.extui %9 : i1 to i32
    %c0_i32_9 = arith.constant 0 : i32
    %11 = arith.cmpi ne, %10, %c0_i32_9 : i32
    scf.if %11 {
      %c0_10 = arith.constant 0 : index
      %c0_11 = arith.constant 0 : index
      %12 = vector.load %arg8[%c0_10, %c0_11] : memref<32x128xf32, #tpu.memory_space<vmem>>, vector<32x128xf32>
      %c0_12 = arith.constant 0 : index
      %c0_13 = arith.constant 0 : index
      %13 = vector.load %arg5[%c0_12, %c0_13] : memref<1x128xf32, #tpu.memory_space<vmem>>, vector<1x128xf32>
      %14 = vector.broadcast %13 : vector<1x128xf32> to vector<32x128xf32>
      %15 = arith.addf %12, %14 : vector<32x128xf32>
      %c0_14 = arith.constant 0 : index
      %c0_15 = arith.constant 0 : index
      %16 = vector.load %arg6[%c0_14, %c0_15] : memref<32x128xbf16, #tpu.memory_space<vmem>>, vector<32x128xbf16>
      %17 = arith.extf %16 : vector<32x128xbf16> to vector<32x128xf32>
      %18 = arith.addf %15, %17 : vector<32x128xf32>
      %cst_16 = arith.constant 0.000000e+00 : f32
      %19 = vector.broadcast %cst_16 : f32 to vector<32x128xf32>
      %20 = arith.maximumf %18, %19 : vector<32x128xf32>
      %21 = arith.truncf %20 : vector<32x128xf32> to vector<32x128xbf16>
      %c0_17 = arith.constant 0 : index
      %c0_18 = arith.constant 0 : index
      %22 = vector.load %arg7[%c0_17, %c0_18] : memref<32x128xbf16, #tpu.memory_space<vmem>>, vector<32x128xbf16>
      tpu.vector_store %arg7[%c0_17, %c0_18], %21 {strides = array<i32>} : memref<32x128xbf16, #tpu.memory_space<vmem>>, vector<32x128xbf16>,
    } else {
    }
    return
  }
  func.func @transform_0(%arg0: i32, %arg1: i32, %arg2: i32) -> (i32, i32) {
    %c0_i32 = arith.constant 0 : i32
    return %arg0, %arg2 : i32, i32
  }
  func.func @transform_1(%arg0: i32, %arg1: i32, %arg2: i32) -> (i32, i32) {
    %c0_i32 = arith.constant 0 : i32
    return %arg2, %arg1 : i32, i32
  }
  func.func @transform_2(%arg0: i32, %arg1: i32, %arg2: i32) -> (i32, i32) {
    %c0_i32 = arith.constant 0 : i32
    %c0_i32_0 = arith.constant 0 : i32
    return %c0_i32, %arg1 : i32, i32
  }
  func.func @transform_3(%arg0: i32, %arg1: i32, %arg2: i32) -> (i32, i32) {
    %c0_i32 = arith.constant 0 : i32
    return %arg0, %arg1 : i32, i32
  }
  func.func @transform_4(%arg0: i32, %arg1: i32, %arg2: i32) -> (i32, i32) {
    %c0_i32 = arith.constant 0 : i32
    return %arg0, %arg1 : i32, i32
  }
}

module attributes {stable_mosaic.version = 11 : i64} {
  func.func @_mm_bias_act_kernel(%arg0: i32, %arg1: i32, %arg2: i32, %arg3: memref<8x576xbf16, #tpu.memory_space<vmem>>, %arg4: memref<576x128xbf16, #tpu.memory_space<vmem>>, %arg5: memref<1x128xf32, #tpu.memory_space<vmem>>, %arg6: memref<8x128xbf16, #tpu.memory_space<vmem>>, %arg7: memref<8x128xf32, #tpu.memory_space<vmem>>) attributes {dimension_semantics = [#tpu.dimension_semantics<parallel>, #tpu.dimension_semantics<parallel>, #tpu.dimension_semantics<arbitrary>], iteration_bounds = array<i64: 1, 1, 1>, scalar_prefetch = 0 : i64, scratch_operands = 1 : i64, tpu.core_type = #tpu.core_type<tc>, window_params = [{transform_indices = @transform_0, window_bounds = array<i64: 8, 576>}, {transform_indices = @transform_1, window_bounds = array<i64: 576, 128>}, {transform_indices = @transform_2, window_bounds = array<i64: 1, 128>}, {transform_indices = @transform_3, window_bounds = array<i64: 8, 128>}]} {
    %c0_i32 = arith.constant 0 : i32
    %0 = arith.cmpi eq, %arg2, %c0_i32 : i32
    %1 = arith.extui %0 : i1 to i32
    %c0_i32_0 = arith.constant 0 : i32
    %2 = arith.cmpi ne, %1, %c0_i32_0 : i32
    scf.if %2 {
      %cst_10 = arith.constant 0.000000e+00 : f32
      %12 = vector.broadcast %cst_10 : f32 to vector<8x128xf32>
      %c0_11 = arith.constant 0 : index
      %c0_12 = arith.constant 0 : index
      %13 = vector.load %arg7[%c0_11, %c0_12] : memref<8x128xf32, #tpu.memory_space<vmem>>, vector<8x128xf32>
      tpu.vector_store %arg7[%c0_11, %c0_12], %12 {strides = array<i32>} : memref<8x128xf32, #tpu.memory_space<vmem>>, vector<8x128xf32>,
    } else {
    }
    %c0 = arith.constant 0 : index
    %c0_1 = arith.constant 0 : index
    %3 = vector.load %arg7[%c0, %c0_1] : memref<8x128xf32, #tpu.memory_space<vmem>>, vector<8x128xf32>
    %c0_2 = arith.constant 0 : index
    %c0_3 = arith.constant 0 : index
    %4 = vector.load %arg3[%c0_2, %c0_3] : memref<8x576xbf16, #tpu.memory_space<vmem>>, vector<8x576xbf16>
    %c0_4 = arith.constant 0 : index
    %c0_5 = arith.constant 0 : index
    %5 = vector.load %arg4[%c0_4, %c0_5] : memref<576x128xbf16, #tpu.memory_space<vmem>>, vector<576x128xbf16>
    %cst = arith.constant dense<0.000000e+00> : vector<8x128xf32>
    %6 = tpu.matmul %4, %5, %cst {dimension_numbers = #tpu.dot_dimension_numbers<[1], [0], [0], [1], [0, 0, 1, 1], [], []>} : vector<8x576xbf16>, vector<576x128xbf16>, vector<8x128xf32> -> vector<8x128xf32>
    %7 = arith.addf %3, %6 : vector<8x128xf32>
    %c0_6 = arith.constant 0 : index
    %c0_7 = arith.constant 0 : index
    %8 = vector.load %arg7[%c0_6, %c0_7] : memref<8x128xf32, #tpu.memory_space<vmem>>, vector<8x128xf32>
    tpu.vector_store %arg7[%c0_6, %c0_7], %7 {strides = array<i32>} : memref<8x128xf32, #tpu.memory_space<vmem>>, vector<8x128xf32>,
    %c0_i32_8 = arith.constant 0 : i32
    %9 = arith.cmpi eq, %arg2, %c0_i32_8 : i32
    %10 = arith.extui %9 : i1 to i32
    %c0_i32_9 = arith.constant 0 : i32
    %11 = arith.cmpi ne, %10, %c0_i32_9 : i32
    scf.if %11 {
      %c0_10 = arith.constant 0 : index
      %c0_11 = arith.constant 0 : index
      %12 = vector.load %arg7[%c0_10, %c0_11] : memref<8x128xf32, #tpu.memory_space<vmem>>, vector<8x128xf32>
      %c0_12 = arith.constant 0 : index
      %c0_13 = arith.constant 0 : index
      %13 = vector.load %arg5[%c0_12, %c0_13] : memref<1x128xf32, #tpu.memory_space<vmem>>, vector<1x128xf32>
      %14 = vector.broadcast %13 : vector<1x128xf32> to vector<8x128xf32>
      %15 = arith.addf %12, %14 : vector<8x128xf32>
      %cst_14 = arith.constant 0.000000e+00 : f32
      %16 = vector.broadcast %cst_14 : f32 to vector<8x128xf32>
      %17 = arith.maximumf %15, %16 : vector<8x128xf32>
      %18 = arith.truncf %17 : vector<8x128xf32> to vector<8x128xbf16>
      %c0_15 = arith.constant 0 : index
      %c0_16 = arith.constant 0 : index
      %19 = vector.load %arg6[%c0_15, %c0_16] : memref<8x128xbf16, #tpu.memory_space<vmem>>, vector<8x128xbf16>
      tpu.vector_store %arg6[%c0_15, %c0_16], %18 {strides = array<i32>} : memref<8x128xbf16, #tpu.memory_space<vmem>>, vector<8x128xbf16>,
    } else {
    }
    return
  }
  func.func @transform_0(%arg0: i32, %arg1: i32, %arg2: i32) -> (i32, i32) {
    %c0_i32 = arith.constant 0 : i32
    return %arg0, %arg2 : i32, i32
  }
  func.func @transform_1(%arg0: i32, %arg1: i32, %arg2: i32) -> (i32, i32) {
    %c0_i32 = arith.constant 0 : i32
    return %arg2, %arg1 : i32, i32
  }
  func.func @transform_2(%arg0: i32, %arg1: i32, %arg2: i32) -> (i32, i32) {
    %c0_i32 = arith.constant 0 : i32
    %c0_i32_0 = arith.constant 0 : i32
    return %c0_i32, %arg1 : i32, i32
  }
  func.func @transform_3(%arg0: i32, %arg1: i32, %arg2: i32) -> (i32, i32) {
    %c0_i32 = arith.constant 0 : i32
    return %arg0, %arg1 : i32, i32
  }
}

module attributes {stable_mosaic.version = 11 : i64} {
  func.func @_mm_bias_act_kernel(%arg0: i32, %arg1: i32, %arg2: i32, %arg3: memref<8x640xbf16, #tpu.memory_space<vmem>>, %arg4: memref<640x128xbf16, #tpu.memory_space<vmem>>, %arg5: memref<1x128xf32, #tpu.memory_space<vmem>>, %arg6: memref<8x128xbf16, #tpu.memory_space<vmem>>, %arg7: memref<8x128xf32, #tpu.memory_space<vmem>>) attributes {dimension_semantics = [#tpu.dimension_semantics<parallel>, #tpu.dimension_semantics<parallel>, #tpu.dimension_semantics<arbitrary>], iteration_bounds = array<i64: 1, 1, 2>, scalar_prefetch = 0 : i64, scratch_operands = 1 : i64, tpu.core_type = #tpu.core_type<tc>, window_params = [{transform_indices = @transform_0, window_bounds = array<i64: 8, 640>}, {transform_indices = @transform_1, window_bounds = array<i64: 640, 128>}, {transform_indices = @transform_2, window_bounds = array<i64: 1, 128>}, {transform_indices = @transform_3, window_bounds = array<i64: 8, 128>}]} {
    %c0_i32 = arith.constant 0 : i32
    %0 = arith.cmpi eq, %arg2, %c0_i32 : i32
    %1 = arith.extui %0 : i1 to i32
    %c0_i32_0 = arith.constant 0 : i32
    %2 = arith.cmpi ne, %1, %c0_i32_0 : i32
    scf.if %2 {
      %cst_9 = arith.constant 0.000000e+00 : f32
      %12 = vector.broadcast %cst_9 : f32 to vector<8x128xf32>
      %c0_10 = arith.constant 0 : index
      %c0_11 = arith.constant 0 : index
      %13 = vector.load %arg7[%c0_10, %c0_11] : memref<8x128xf32, #tpu.memory_space<vmem>>, vector<8x128xf32>
      tpu.vector_store %arg7[%c0_10, %c0_11], %12 {strides = array<i32>} : memref<8x128xf32, #tpu.memory_space<vmem>>, vector<8x128xf32>,
    } else {
    }
    %c0 = arith.constant 0 : index
    %c0_1 = arith.constant 0 : index
    %3 = vector.load %arg7[%c0, %c0_1] : memref<8x128xf32, #tpu.memory_space<vmem>>, vector<8x128xf32>
    %c0_2 = arith.constant 0 : index
    %c0_3 = arith.constant 0 : index
    %4 = vector.load %arg3[%c0_2, %c0_3] : memref<8x640xbf16, #tpu.memory_space<vmem>>, vector<8x640xbf16>
    %c0_4 = arith.constant 0 : index
    %c0_5 = arith.constant 0 : index
    %5 = vector.load %arg4[%c0_4, %c0_5] : memref<640x128xbf16, #tpu.memory_space<vmem>>, vector<640x128xbf16>
    %cst = arith.constant dense<0.000000e+00> : vector<8x128xf32>
    %6 = tpu.matmul %4, %5, %cst {dimension_numbers = #tpu.dot_dimension_numbers<[1], [0], [0], [1], [0, 0, 1, 1], [], []>} : vector<8x640xbf16>, vector<640x128xbf16>, vector<8x128xf32> -> vector<8x128xf32>
    %7 = arith.addf %3, %6 : vector<8x128xf32>
    %c0_6 = arith.constant 0 : index
    %c0_7 = arith.constant 0 : index
    %8 = vector.load %arg7[%c0_6, %c0_7] : memref<8x128xf32, #tpu.memory_space<vmem>>, vector<8x128xf32>
    tpu.vector_store %arg7[%c0_6, %c0_7], %7 {strides = array<i32>} : memref<8x128xf32, #tpu.memory_space<vmem>>, vector<8x128xf32>,
    %c1_i32 = arith.constant 1 : i32
    %9 = arith.cmpi eq, %arg2, %c1_i32 : i32
    %10 = arith.extui %9 : i1 to i32
    %c0_i32_8 = arith.constant 0 : i32
    %11 = arith.cmpi ne, %10, %c0_i32_8 : i32
    scf.if %11 {
      %c0_9 = arith.constant 0 : index
      %c0_10 = arith.constant 0 : index
      %12 = vector.load %arg7[%c0_9, %c0_10] : memref<8x128xf32, #tpu.memory_space<vmem>>, vector<8x128xf32>
      %c0_11 = arith.constant 0 : index
      %c0_12 = arith.constant 0 : index
      %13 = vector.load %arg5[%c0_11, %c0_12] : memref<1x128xf32, #tpu.memory_space<vmem>>, vector<1x128xf32>
      %14 = vector.broadcast %13 : vector<1x128xf32> to vector<8x128xf32>
      %15 = arith.addf %12, %14 : vector<8x128xf32>
      %cst_13 = arith.constant 0.000000e+00 : f32
      %16 = vector.broadcast %cst_13 : f32 to vector<8x128xf32>
      %17 = arith.maximumf %15, %16 : vector<8x128xf32>
      %18 = arith.truncf %17 : vector<8x128xf32> to vector<8x128xbf16>
      %c0_14 = arith.constant 0 : index
      %c0_15 = arith.constant 0 : index
      %19 = vector.load %arg6[%c0_14, %c0_15] : memref<8x128xbf16, #tpu.memory_space<vmem>>, vector<8x128xbf16>
      tpu.vector_store %arg6[%c0_14, %c0_15], %18 {strides = array<i32>} : memref<8x128xbf16, #tpu.memory_space<vmem>>, vector<8x128xbf16>,
    } else {
    }
    return
  }
  func.func @transform_0(%arg0: i32, %arg1: i32, %arg2: i32) -> (i32, i32) {
    %c0_i32 = arith.constant 0 : i32
    return %arg0, %arg2 : i32, i32
  }
  func.func @transform_1(%arg0: i32, %arg1: i32, %arg2: i32) -> (i32, i32) {
    %c0_i32 = arith.constant 0 : i32
    return %arg2, %arg1 : i32, i32
  }
  func.func @transform_2(%arg0: i32, %arg1: i32, %arg2: i32) -> (i32, i32) {
    %c0_i32 = arith.constant 0 : i32
    %c0_i32_0 = arith.constant 0 : i32
    return %c0_i32, %arg1 : i32, i32
  }
  func.func @transform_3(%arg0: i32, %arg1: i32, %arg2: i32) -> (i32, i32) {
    %c0_i32 = arith.constant 0 : i32
    return %arg0, %arg1 : i32, i32
  }
}

module attributes {stable_mosaic.version = 11 : i64} {
  func.func @_mm_bias_res_relu_kernel(%arg0: i32, %arg1: i32, %arg2: i32, %arg3: memref<8x640xbf16, #tpu.memory_space<vmem>>, %arg4: memref<640x128xbf16, #tpu.memory_space<vmem>>, %arg5: memref<1x128xf32, #tpu.memory_space<vmem>>, %arg6: memref<8x128xbf16, #tpu.memory_space<vmem>>, %arg7: memref<8x128xbf16, #tpu.memory_space<vmem>>, %arg8: memref<8x128xf32, #tpu.memory_space<vmem>>) attributes {dimension_semantics = [#tpu.dimension_semantics<parallel>, #tpu.dimension_semantics<parallel>, #tpu.dimension_semantics<arbitrary>], iteration_bounds = array<i64: 1, 1, 2>, scalar_prefetch = 0 : i64, scratch_operands = 1 : i64, tpu.core_type = #tpu.core_type<tc>, window_params = [{transform_indices = @transform_0, window_bounds = array<i64: 8, 640>}, {transform_indices = @transform_1, window_bounds = array<i64: 640, 128>}, {transform_indices = @transform_2, window_bounds = array<i64: 1, 128>}, {transform_indices = @transform_3, window_bounds = array<i64: 8, 128>}, {transform_indices = @transform_4, window_bounds = array<i64: 8, 128>}]} {
    %c0_i32 = arith.constant 0 : i32
    %0 = arith.cmpi eq, %arg2, %c0_i32 : i32
    %1 = arith.extui %0 : i1 to i32
    %c0_i32_0 = arith.constant 0 : i32
    %2 = arith.cmpi ne, %1, %c0_i32_0 : i32
    scf.if %2 {
      %cst_9 = arith.constant 0.000000e+00 : f32
      %12 = vector.broadcast %cst_9 : f32 to vector<8x128xf32>
      %c0_10 = arith.constant 0 : index
      %c0_11 = arith.constant 0 : index
      %13 = vector.load %arg8[%c0_10, %c0_11] : memref<8x128xf32, #tpu.memory_space<vmem>>, vector<8x128xf32>
      tpu.vector_store %arg8[%c0_10, %c0_11], %12 {strides = array<i32>} : memref<8x128xf32, #tpu.memory_space<vmem>>, vector<8x128xf32>,
    } else {
    }
    %c0 = arith.constant 0 : index
    %c0_1 = arith.constant 0 : index
    %3 = vector.load %arg8[%c0, %c0_1] : memref<8x128xf32, #tpu.memory_space<vmem>>, vector<8x128xf32>
    %c0_2 = arith.constant 0 : index
    %c0_3 = arith.constant 0 : index
    %4 = vector.load %arg3[%c0_2, %c0_3] : memref<8x640xbf16, #tpu.memory_space<vmem>>, vector<8x640xbf16>
    %c0_4 = arith.constant 0 : index
    %c0_5 = arith.constant 0 : index
    %5 = vector.load %arg4[%c0_4, %c0_5] : memref<640x128xbf16, #tpu.memory_space<vmem>>, vector<640x128xbf16>
    %cst = arith.constant dense<0.000000e+00> : vector<8x128xf32>
    %6 = tpu.matmul %4, %5, %cst {dimension_numbers = #tpu.dot_dimension_numbers<[1], [0], [0], [1], [0, 0, 1, 1], [], []>} : vector<8x640xbf16>, vector<640x128xbf16>, vector<8x128xf32> -> vector<8x128xf32>
    %7 = arith.addf %3, %6 : vector<8x128xf32>
    %c0_6 = arith.constant 0 : index
    %c0_7 = arith.constant 0 : index
    %8 = vector.load %arg8[%c0_6, %c0_7] : memref<8x128xf32, #tpu.memory_space<vmem>>, vector<8x128xf32>
    tpu.vector_store %arg8[%c0_6, %c0_7], %7 {strides = array<i32>} : memref<8x128xf32, #tpu.memory_space<vmem>>, vector<8x128xf32>,
    %c1_i32 = arith.constant 1 : i32
    %9 = arith.cmpi eq, %arg2, %c1_i32 : i32
    %10 = arith.extui %9 : i1 to i32
    %c0_i32_8 = arith.constant 0 : i32
    %11 = arith.cmpi ne, %10, %c0_i32_8 : i32
    scf.if %11 {
      %c0_9 = arith.constant 0 : index
      %c0_10 = arith.constant 0 : index
      %12 = vector.load %arg8[%c0_9, %c0_10] : memref<8x128xf32, #tpu.memory_space<vmem>>, vector<8x128xf32>
      %c0_11 = arith.constant 0 : index
      %c0_12 = arith.constant 0 : index
      %13 = vector.load %arg5[%c0_11, %c0_12] : memref<1x128xf32, #tpu.memory_space<vmem>>, vector<1x128xf32>
      %14 = vector.broadcast %13 : vector<1x128xf32> to vector<8x128xf32>
      %15 = arith.addf %12, %14 : vector<8x128xf32>
      %c0_13 = arith.constant 0 : index
      %c0_14 = arith.constant 0 : index
      %16 = vector.load %arg6[%c0_13, %c0_14] : memref<8x128xbf16, #tpu.memory_space<vmem>>, vector<8x128xbf16>
      %17 = arith.extf %16 : vector<8x128xbf16> to vector<8x128xf32>
      %18 = arith.addf %15, %17 : vector<8x128xf32>
      %cst_15 = arith.constant 0.000000e+00 : f32
      %19 = vector.broadcast %cst_15 : f32 to vector<8x128xf32>
      %20 = arith.maximumf %18, %19 : vector<8x128xf32>
      %21 = arith.truncf %20 : vector<8x128xf32> to vector<8x128xbf16>
      %c0_16 = arith.constant 0 : index
      %c0_17 = arith.constant 0 : index
      %22 = vector.load %arg7[%c0_16, %c0_17] : memref<8x128xbf16, #tpu.memory_space<vmem>>, vector<8x128xbf16>
      tpu.vector_store %arg7[%c0_16, %c0_17], %21 {strides = array<i32>} : memref<8x128xbf16, #tpu.memory_space<vmem>>, vector<8x128xbf16>,
    } else {
    }
    return
  }
  func.func @transform_0(%arg0: i32, %arg1: i32, %arg2: i32) -> (i32, i32) {
    %c0_i32 = arith.constant 0 : i32
    return %arg0, %arg2 : i32, i32
  }
  func.func @transform_1(%arg0: i32, %arg1: i32, %arg2: i32) -> (i32, i32) {
    %c0_i32 = arith.constant 0 : i32
    return %arg2, %arg1 : i32, i32
  }
  func.func @transform_2(%arg0: i32, %arg1: i32, %arg2: i32) -> (i32, i32) {
    %c0_i32 = arith.constant 0 : i32
    %c0_i32_0 = arith.constant 0 : i32
    return %c0_i32, %arg1 : i32, i32
  }
  func.func @transform_3(%arg0: i32, %arg1: i32, %arg2: i32) -> (i32, i32) {
    %c0_i32 = arith.constant 0 : i32
    return %arg0, %arg1 : i32, i32
  }
  func.func @transform_4(%arg0: i32, %arg1: i32, %arg2: i32) -> (i32, i32) {
    %c0_i32 = arith.constant 0 : i32
    return %arg0, %arg1 : i32, i32
  }
}

module attributes {stable_mosaic.version = 11 : i64} {
  func.func @_mm_bias_act_kernel(%arg0: i32, %arg1: i32, %arg2: i32, %arg3: memref<8x640xbf16, #tpu.memory_space<vmem>>, %arg4: memref<640x256xbf16, #tpu.memory_space<vmem>>, %arg5: memref<1x256xf32, #tpu.memory_space<vmem>>, %arg6: memref<8x256xbf16, #tpu.memory_space<vmem>>, %arg7: memref<8x256xf32, #tpu.memory_space<vmem>>) attributes {dimension_semantics = [#tpu.dimension_semantics<parallel>, #tpu.dimension_semantics<parallel>, #tpu.dimension_semantics<arbitrary>], iteration_bounds = array<i64: 1, 1, 2>, scalar_prefetch = 0 : i64, scratch_operands = 1 : i64, tpu.core_type = #tpu.core_type<tc>, window_params = [{transform_indices = @transform_0, window_bounds = array<i64: 8, 640>}, {transform_indices = @transform_1, window_bounds = array<i64: 640, 256>}, {transform_indices = @transform_2, window_bounds = array<i64: 1, 256>}, {transform_indices = @transform_3, window_bounds = array<i64: 8, 256>}]} {
    %c0_i32 = arith.constant 0 : i32
    %0 = arith.cmpi eq, %arg2, %c0_i32 : i32
    %1 = arith.extui %0 : i1 to i32
    %c0_i32_0 = arith.constant 0 : i32
    %2 = arith.cmpi ne, %1, %c0_i32_0 : i32
    scf.if %2 {
      %cst_9 = arith.constant 0.000000e+00 : f32
      %12 = vector.broadcast %cst_9 : f32 to vector<8x256xf32>
      %c0_10 = arith.constant 0 : index
      %c0_11 = arith.constant 0 : index
      %13 = vector.load %arg7[%c0_10, %c0_11] : memref<8x256xf32, #tpu.memory_space<vmem>>, vector<8x256xf32>
      tpu.vector_store %arg7[%c0_10, %c0_11], %12 {strides = array<i32>} : memref<8x256xf32, #tpu.memory_space<vmem>>, vector<8x256xf32>,
    } else {
    }
    %c0 = arith.constant 0 : index
    %c0_1 = arith.constant 0 : index
    %3 = vector.load %arg7[%c0, %c0_1] : memref<8x256xf32, #tpu.memory_space<vmem>>, vector<8x256xf32>
    %c0_2 = arith.constant 0 : index
    %c0_3 = arith.constant 0 : index
    %4 = vector.load %arg3[%c0_2, %c0_3] : memref<8x640xbf16, #tpu.memory_space<vmem>>, vector<8x640xbf16>
    %c0_4 = arith.constant 0 : index
    %c0_5 = arith.constant 0 : index
    %5 = vector.load %arg4[%c0_4, %c0_5] : memref<640x256xbf16, #tpu.memory_space<vmem>>, vector<640x256xbf16>
    %cst = arith.constant dense<0.000000e+00> : vector<8x256xf32>
    %6 = tpu.matmul %4, %5, %cst {dimension_numbers = #tpu.dot_dimension_numbers<[1], [0], [0], [1], [0, 0, 1, 1], [], []>} : vector<8x640xbf16>, vector<640x256xbf16>, vector<8x256xf32> -> vector<8x256xf32>
    %7 = arith.addf %3, %6 : vector<8x256xf32>
    %c0_6 = arith.constant 0 : index
    %c0_7 = arith.constant 0 : index
    %8 = vector.load %arg7[%c0_6, %c0_7] : memref<8x256xf32, #tpu.memory_space<vmem>>, vector<8x256xf32>
    tpu.vector_store %arg7[%c0_6, %c0_7], %7 {strides = array<i32>} : memref<8x256xf32, #tpu.memory_space<vmem>>, vector<8x256xf32>,
    %c1_i32 = arith.constant 1 : i32
    %9 = arith.cmpi eq, %arg2, %c1_i32 : i32
    %10 = arith.extui %9 : i1 to i32
    %c0_i32_8 = arith.constant 0 : i32
    %11 = arith.cmpi ne, %10, %c0_i32_8 : i32
    scf.if %11 {
      %c0_9 = arith.constant 0 : index
      %c0_10 = arith.constant 0 : index
      %12 = vector.load %arg7[%c0_9, %c0_10] : memref<8x256xf32, #tpu.memory_space<vmem>>, vector<8x256xf32>
      %c0_11 = arith.constant 0 : index
      %c0_12 = arith.constant 0 : index
      %13 = vector.load %arg5[%c0_11, %c0_12] : memref<1x256xf32, #tpu.memory_space<vmem>>, vector<1x256xf32>
      %14 = vector.broadcast %13 : vector<1x256xf32> to vector<8x256xf32>
      %15 = arith.addf %12, %14 : vector<8x256xf32>
      %cst_13 = arith.constant 0.000000e+00 : f32
      %16 = vector.broadcast %cst_13 : f32 to vector<8x256xf32>
      %17 = arith.maximumf %15, %16 : vector<8x256xf32>
      %18 = arith.truncf %17 : vector<8x256xf32> to vector<8x256xbf16>
      %c0_14 = arith.constant 0 : index
      %c0_15 = arith.constant 0 : index
      %19 = vector.load %arg6[%c0_14, %c0_15] : memref<8x256xbf16, #tpu.memory_space<vmem>>, vector<8x256xbf16>
      tpu.vector_store %arg6[%c0_14, %c0_15], %18 {strides = array<i32>} : memref<8x256xbf16, #tpu.memory_space<vmem>>, vector<8x256xbf16>,
    } else {
    }
    return
  }
  func.func @transform_0(%arg0: i32, %arg1: i32, %arg2: i32) -> (i32, i32) {
    %c0_i32 = arith.constant 0 : i32
    return %arg0, %arg2 : i32, i32
  }
  func.func @transform_1(%arg0: i32, %arg1: i32, %arg2: i32) -> (i32, i32) {
    %c0_i32 = arith.constant 0 : i32
    return %arg2, %arg1 : i32, i32
  }
  func.func @transform_2(%arg0: i32, %arg1: i32, %arg2: i32) -> (i32, i32) {
    %c0_i32 = arith.constant 0 : i32
    %c0_i32_0 = arith.constant 0 : i32
    return %c0_i32, %arg1 : i32, i32
  }
  func.func @transform_3(%arg0: i32, %arg1: i32, %arg2: i32) -> (i32, i32) {
    %c0_i32 = arith.constant 0 : i32
    return %arg0, %arg1 : i32, i32
  }
}

module attributes {stable_mosaic.version = 11 : i64} {
  func.func @_mm_bias_act_kernel(%arg0: i32, %arg1: i32, %arg2: i32, %arg3: memref<8x640xbf16, #tpu.memory_space<vmem>>, %arg4: memref<640x256xbf16, #tpu.memory_space<vmem>>, %arg5: memref<1x256xf32, #tpu.memory_space<vmem>>, %arg6: memref<8x256xbf16, #tpu.memory_space<vmem>>, %arg7: memref<8x256xf32, #tpu.memory_space<vmem>>) attributes {dimension_semantics = [#tpu.dimension_semantics<parallel>, #tpu.dimension_semantics<parallel>, #tpu.dimension_semantics<arbitrary>], iteration_bounds = array<i64: 1, 1, 4>, scalar_prefetch = 0 : i64, scratch_operands = 1 : i64, tpu.core_type = #tpu.core_type<tc>, window_params = [{transform_indices = @transform_0, window_bounds = array<i64: 8, 640>}, {transform_indices = @transform_1, window_bounds = array<i64: 640, 256>}, {transform_indices = @transform_2, window_bounds = array<i64: 1, 256>}, {transform_indices = @transform_3, window_bounds = array<i64: 8, 256>}]} {
    %c0_i32 = arith.constant 0 : i32
    %0 = arith.cmpi eq, %arg2, %c0_i32 : i32
    %1 = arith.extui %0 : i1 to i32
    %c0_i32_0 = arith.constant 0 : i32
    %2 = arith.cmpi ne, %1, %c0_i32_0 : i32
    scf.if %2 {
      %cst_9 = arith.constant 0.000000e+00 : f32
      %12 = vector.broadcast %cst_9 : f32 to vector<8x256xf32>
      %c0_10 = arith.constant 0 : index
      %c0_11 = arith.constant 0 : index
      %13 = vector.load %arg7[%c0_10, %c0_11] : memref<8x256xf32, #tpu.memory_space<vmem>>, vector<8x256xf32>
      tpu.vector_store %arg7[%c0_10, %c0_11], %12 {strides = array<i32>} : memref<8x256xf32, #tpu.memory_space<vmem>>, vector<8x256xf32>,
    } else {
    }
    %c0 = arith.constant 0 : index
    %c0_1 = arith.constant 0 : index
    %3 = vector.load %arg7[%c0, %c0_1] : memref<8x256xf32, #tpu.memory_space<vmem>>, vector<8x256xf32>
    %c0_2 = arith.constant 0 : index
    %c0_3 = arith.constant 0 : index
    %4 = vector.load %arg3[%c0_2, %c0_3] : memref<8x640xbf16, #tpu.memory_space<vmem>>, vector<8x640xbf16>
    %c0_4 = arith.constant 0 : index
    %c0_5 = arith.constant 0 : index
    %5 = vector.load %arg4[%c0_4, %c0_5] : memref<640x256xbf16, #tpu.memory_space<vmem>>, vector<640x256xbf16>
    %cst = arith.constant dense<0.000000e+00> : vector<8x256xf32>
    %6 = tpu.matmul %4, %5, %cst {dimension_numbers = #tpu.dot_dimension_numbers<[1], [0], [0], [1], [0, 0, 1, 1], [], []>} : vector<8x640xbf16>, vector<640x256xbf16>, vector<8x256xf32> -> vector<8x256xf32>
    %7 = arith.addf %3, %6 : vector<8x256xf32>
    %c0_6 = arith.constant 0 : index
    %c0_7 = arith.constant 0 : index
    %8 = vector.load %arg7[%c0_6, %c0_7] : memref<8x256xf32, #tpu.memory_space<vmem>>, vector<8x256xf32>
    tpu.vector_store %arg7[%c0_6, %c0_7], %7 {strides = array<i32>} : memref<8x256xf32, #tpu.memory_space<vmem>>, vector<8x256xf32>,
    %c3_i32 = arith.constant 3 : i32
    %9 = arith.cmpi eq, %arg2, %c3_i32 : i32
    %10 = arith.extui %9 : i1 to i32
    %c0_i32_8 = arith.constant 0 : i32
    %11 = arith.cmpi ne, %10, %c0_i32_8 : i32
    scf.if %11 {
      %c0_9 = arith.constant 0 : index
      %c0_10 = arith.constant 0 : index
      %12 = vector.load %arg7[%c0_9, %c0_10] : memref<8x256xf32, #tpu.memory_space<vmem>>, vector<8x256xf32>
      %c0_11 = arith.constant 0 : index
      %c0_12 = arith.constant 0 : index
      %13 = vector.load %arg5[%c0_11, %c0_12] : memref<1x256xf32, #tpu.memory_space<vmem>>, vector<1x256xf32>
      %14 = vector.broadcast %13 : vector<1x256xf32> to vector<8x256xf32>
      %15 = arith.addf %12, %14 : vector<8x256xf32>
      %cst_13 = arith.constant 0.000000e+00 : f32
      %16 = vector.broadcast %cst_13 : f32 to vector<8x256xf32>
      %17 = arith.maximumf %15, %16 : vector<8x256xf32>
      %18 = arith.truncf %17 : vector<8x256xf32> to vector<8x256xbf16>
      %c0_14 = arith.constant 0 : index
      %c0_15 = arith.constant 0 : index
      %19 = vector.load %arg6[%c0_14, %c0_15] : memref<8x256xbf16, #tpu.memory_space<vmem>>, vector<8x256xbf16>
      tpu.vector_store %arg6[%c0_14, %c0_15], %18 {strides = array<i32>} : memref<8x256xbf16, #tpu.memory_space<vmem>>, vector<8x256xbf16>,
    } else {
    }
    return
  }
  func.func @transform_0(%arg0: i32, %arg1: i32, %arg2: i32) -> (i32, i32) {
    %c0_i32 = arith.constant 0 : i32
    return %arg0, %arg2 : i32, i32
  }
  func.func @transform_1(%arg0: i32, %arg1: i32, %arg2: i32) -> (i32, i32) {
    %c0_i32 = arith.constant 0 : i32
    return %arg2, %arg1 : i32, i32
  }
  func.func @transform_2(%arg0: i32, %arg1: i32, %arg2: i32) -> (i32, i32) {
    %c0_i32 = arith.constant 0 : i32
    %c0_i32_0 = arith.constant 0 : i32
    return %c0_i32, %arg1 : i32, i32
  }
  func.func @transform_3(%arg0: i32, %arg1: i32, %arg2: i32) -> (i32, i32) {
    %c0_i32 = arith.constant 0 : i32
    return %arg0, %arg1 : i32, i32
  }
}

module attributes {stable_mosaic.version = 11 : i64} {
  func.func @_mm_bias_act_kernel(%arg0: i32, %arg1: i32, %arg2: i32, %arg3: memref<8x768xbf16, #tpu.memory_space<vmem>>, %arg4: memref<768x256xbf16, #tpu.memory_space<vmem>>, %arg5: memref<1x256xf32, #tpu.memory_space<vmem>>, %arg6: memref<8x256xbf16, #tpu.memory_space<vmem>>, %arg7: memref<8x256xf32, #tpu.memory_space<vmem>>) attributes {dimension_semantics = [#tpu.dimension_semantics<parallel>, #tpu.dimension_semantics<parallel>, #tpu.dimension_semantics<arbitrary>], iteration_bounds = array<i64: 1, 1, 3>, scalar_prefetch = 0 : i64, scratch_operands = 1 : i64, tpu.core_type = #tpu.core_type<tc>, window_params = [{transform_indices = @transform_0, window_bounds = array<i64: 8, 768>}, {transform_indices = @transform_1, window_bounds = array<i64: 768, 256>}, {transform_indices = @transform_2, window_bounds = array<i64: 1, 256>}, {transform_indices = @transform_3, window_bounds = array<i64: 8, 256>}]} {
    %c0_i32 = arith.constant 0 : i32
    %0 = arith.cmpi eq, %arg2, %c0_i32 : i32
    %1 = arith.extui %0 : i1 to i32
    %c0_i32_0 = arith.constant 0 : i32
    %2 = arith.cmpi ne, %1, %c0_i32_0 : i32
    scf.if %2 {
      %cst_9 = arith.constant 0.000000e+00 : f32
      %12 = vector.broadcast %cst_9 : f32 to vector<8x256xf32>
      %c0_10 = arith.constant 0 : index
      %c0_11 = arith.constant 0 : index
      %13 = vector.load %arg7[%c0_10, %c0_11] : memref<8x256xf32, #tpu.memory_space<vmem>>, vector<8x256xf32>
      tpu.vector_store %arg7[%c0_10, %c0_11], %12 {strides = array<i32>} : memref<8x256xf32, #tpu.memory_space<vmem>>, vector<8x256xf32>,
    } else {
    }
    %c0 = arith.constant 0 : index
    %c0_1 = arith.constant 0 : index
    %3 = vector.load %arg7[%c0, %c0_1] : memref<8x256xf32, #tpu.memory_space<vmem>>, vector<8x256xf32>
    %c0_2 = arith.constant 0 : index
    %c0_3 = arith.constant 0 : index
    %4 = vector.load %arg3[%c0_2, %c0_3] : memref<8x768xbf16, #tpu.memory_space<vmem>>, vector<8x768xbf16>
    %c0_4 = arith.constant 0 : index
    %c0_5 = arith.constant 0 : index
    %5 = vector.load %arg4[%c0_4, %c0_5] : memref<768x256xbf16, #tpu.memory_space<vmem>>, vector<768x256xbf16>
    %cst = arith.constant dense<0.000000e+00> : vector<8x256xf32>
    %6 = tpu.matmul %4, %5, %cst {dimension_numbers = #tpu.dot_dimension_numbers<[1], [0], [0], [1], [0, 0, 1, 1], [], []>} : vector<8x768xbf16>, vector<768x256xbf16>, vector<8x256xf32> -> vector<8x256xf32>
    %7 = arith.addf %3, %6 : vector<8x256xf32>
    %c0_6 = arith.constant 0 : index
    %c0_7 = arith.constant 0 : index
    %8 = vector.load %arg7[%c0_6, %c0_7] : memref<8x256xf32, #tpu.memory_space<vmem>>, vector<8x256xf32>
    tpu.vector_store %arg7[%c0_6, %c0_7], %7 {strides = array<i32>} : memref<8x256xf32, #tpu.memory_space<vmem>>, vector<8x256xf32>,
    %c2_i32 = arith.constant 2 : i32
    %9 = arith.cmpi eq, %arg2, %c2_i32 : i32
    %10 = arith.extui %9 : i1 to i32
    %c0_i32_8 = arith.constant 0 : i32
    %11 = arith.cmpi ne, %10, %c0_i32_8 : i32
    scf.if %11 {
      %c0_9 = arith.constant 0 : index
      %c0_10 = arith.constant 0 : index
      %12 = vector.load %arg7[%c0_9, %c0_10] : memref<8x256xf32, #tpu.memory_space<vmem>>, vector<8x256xf32>
      %c0_11 = arith.constant 0 : index
      %c0_12 = arith.constant 0 : index
      %13 = vector.load %arg5[%c0_11, %c0_12] : memref<1x256xf32, #tpu.memory_space<vmem>>, vector<1x256xf32>
      %14 = vector.broadcast %13 : vector<1x256xf32> to vector<8x256xf32>
      %15 = arith.addf %12, %14 : vector<8x256xf32>
      %cst_13 = arith.constant 0.000000e+00 : f32
      %16 = vector.broadcast %cst_13 : f32 to vector<8x256xf32>
      %17 = arith.maximumf %15, %16 : vector<8x256xf32>
      %18 = arith.truncf %17 : vector<8x256xf32> to vector<8x256xbf16>
      %c0_14 = arith.constant 0 : index
      %c0_15 = arith.constant 0 : index
      %19 = vector.load %arg6[%c0_14, %c0_15] : memref<8x256xbf16, #tpu.memory_space<vmem>>, vector<8x256xbf16>
      tpu.vector_store %arg6[%c0_14, %c0_15], %18 {strides = array<i32>} : memref<8x256xbf16, #tpu.memory_space<vmem>>, vector<8x256xbf16>,
    } else {
    }
    return
  }
  func.func @transform_0(%arg0: i32, %arg1: i32, %arg2: i32) -> (i32, i32) {
    %c0_i32 = arith.constant 0 : i32
    return %arg0, %arg2 : i32, i32
  }
  func.func @transform_1(%arg0: i32, %arg1: i32, %arg2: i32) -> (i32, i32) {
    %c0_i32 = arith.constant 0 : i32
    return %arg2, %arg1 : i32, i32
  }
  func.func @transform_2(%arg0: i32, %arg1: i32, %arg2: i32) -> (i32, i32) {
    %c0_i32 = arith.constant 0 : i32
    %c0_i32_0 = arith.constant 0 : i32
    return %c0_i32, %arg1 : i32, i32
  }
  func.func @transform_3(%arg0: i32, %arg1: i32, %arg2: i32) -> (i32, i32) {
    %c0_i32 = arith.constant 0 : i32
    return %arg0, %arg1 : i32, i32
  }
}

module attributes {stable_mosaic.version = 11 : i64} {
  func.func @_mm_bias_res_relu_kernel(%arg0: i32, %arg1: i32, %arg2: i32, %arg3: memref<8x768xbf16, #tpu.memory_space<vmem>>, %arg4: memref<768x256xbf16, #tpu.memory_space<vmem>>, %arg5: memref<1x256xf32, #tpu.memory_space<vmem>>, %arg6: memref<8x256xbf16, #tpu.memory_space<vmem>>, %arg7: memref<8x256xbf16, #tpu.memory_space<vmem>>, %arg8: memref<8x256xf32, #tpu.memory_space<vmem>>) attributes {dimension_semantics = [#tpu.dimension_semantics<parallel>, #tpu.dimension_semantics<parallel>, #tpu.dimension_semantics<arbitrary>], iteration_bounds = array<i64: 1, 1, 3>, scalar_prefetch = 0 : i64, scratch_operands = 1 : i64, tpu.core_type = #tpu.core_type<tc>, window_params = [{transform_indices = @transform_0, window_bounds = array<i64: 8, 768>}, {transform_indices = @transform_1, window_bounds = array<i64: 768, 256>}, {transform_indices = @transform_2, window_bounds = array<i64: 1, 256>}, {transform_indices = @transform_3, window_bounds = array<i64: 8, 256>}, {transform_indices = @transform_4, window_bounds = array<i64: 8, 256>}]} {
    %c0_i32 = arith.constant 0 : i32
    %0 = arith.cmpi eq, %arg2, %c0_i32 : i32
    %1 = arith.extui %0 : i1 to i32
    %c0_i32_0 = arith.constant 0 : i32
    %2 = arith.cmpi ne, %1, %c0_i32_0 : i32
    scf.if %2 {
      %cst_9 = arith.constant 0.000000e+00 : f32
      %12 = vector.broadcast %cst_9 : f32 to vector<8x256xf32>
      %c0_10 = arith.constant 0 : index
      %c0_11 = arith.constant 0 : index
      %13 = vector.load %arg8[%c0_10, %c0_11] : memref<8x256xf32, #tpu.memory_space<vmem>>, vector<8x256xf32>
      tpu.vector_store %arg8[%c0_10, %c0_11], %12 {strides = array<i32>} : memref<8x256xf32, #tpu.memory_space<vmem>>, vector<8x256xf32>,
    } else {
    }
    %c0 = arith.constant 0 : index
    %c0_1 = arith.constant 0 : index
    %3 = vector.load %arg8[%c0, %c0_1] : memref<8x256xf32, #tpu.memory_space<vmem>>, vector<8x256xf32>
    %c0_2 = arith.constant 0 : index
    %c0_3 = arith.constant 0 : index
    %4 = vector.load %arg3[%c0_2, %c0_3] : memref<8x768xbf16, #tpu.memory_space<vmem>>, vector<8x768xbf16>
    %c0_4 = arith.constant 0 : index
    %c0_5 = arith.constant 0 : index
    %5 = vector.load %arg4[%c0_4, %c0_5] : memref<768x256xbf16, #tpu.memory_space<vmem>>, vector<768x256xbf16>
    %cst = arith.constant dense<0.000000e+00> : vector<8x256xf32>
    %6 = tpu.matmul %4, %5, %cst {dimension_numbers = #tpu.dot_dimension_numbers<[1], [0], [0], [1], [0, 0, 1, 1], [], []>} : vector<8x768xbf16>, vector<768x256xbf16>, vector<8x256xf32> -> vector<8x256xf32>
    %7 = arith.addf %3, %6 : vector<8x256xf32>
    %c0_6 = arith.constant 0 : index
    %c0_7 = arith.constant 0 : index
    %8 = vector.load %arg8[%c0_6, %c0_7] : memref<8x256xf32, #tpu.memory_space<vmem>>, vector<8x256xf32>
    tpu.vector_store %arg8[%c0_6, %c0_7], %7 {strides = array<i32>} : memref<8x256xf32, #tpu.memory_space<vmem>>, vector<8x256xf32>,
    %c2_i32 = arith.constant 2 : i32
    %9 = arith.cmpi eq, %arg2, %c2_i32 : i32
    %10 = arith.extui %9 : i1 to i32
    %c0_i32_8 = arith.constant 0 : i32
    %11 = arith.cmpi ne, %10, %c0_i32_8 : i32
    scf.if %11 {
      %c0_9 = arith.constant 0 : index
      %c0_10 = arith.constant 0 : index
      %12 = vector.load %arg8[%c0_9, %c0_10] : memref<8x256xf32, #tpu.memory_space<vmem>>, vector<8x256xf32>
      %c0_11 = arith.constant 0 : index
      %c0_12 = arith.constant 0 : index
      %13 = vector.load %arg5[%c0_11, %c0_12] : memref<1x256xf32, #tpu.memory_space<vmem>>, vector<1x256xf32>
      %14 = vector.broadcast %13 : vector<1x256xf32> to vector<8x256xf32>
      %15 = arith.addf %12, %14 : vector<8x256xf32>
      %c0_13 = arith.constant 0 : index
      %c0_14 = arith.constant 0 : index
      %16 = vector.load %arg6[%c0_13, %c0_14] : memref<8x256xbf16, #tpu.memory_space<vmem>>, vector<8x256xbf16>
      %17 = arith.extf %16 : vector<8x256xbf16> to vector<8x256xf32>
      %18 = arith.addf %15, %17 : vector<8x256xf32>
      %cst_15 = arith.constant 0.000000e+00 : f32
      %19 = vector.broadcast %cst_15 : f32 to vector<8x256xf32>
      %20 = arith.maximumf %18, %19 : vector<8x256xf32>
      %21 = arith.truncf %20 : vector<8x256xf32> to vector<8x256xbf16>
      %c0_16 = arith.constant 0 : index
      %c0_17 = arith.constant 0 : index
      %22 = vector.load %arg7[%c0_16, %c0_17] : memref<8x256xbf16, #tpu.memory_space<vmem>>, vector<8x256xbf16>
      tpu.vector_store %arg7[%c0_16, %c0_17], %21 {strides = array<i32>} : memref<8x256xbf16, #tpu.memory_space<vmem>>, vector<8x256xbf16>,
    } else {
    }
    return
  }
  func.func @transform_0(%arg0: i32, %arg1: i32, %arg2: i32) -> (i32, i32) {
    %c0_i32 = arith.constant 0 : i32
    return %arg0, %arg2 : i32, i32
  }
  func.func @transform_1(%arg0: i32, %arg1: i32, %arg2: i32) -> (i32, i32) {
    %c0_i32 = arith.constant 0 : i32
    return %arg2, %arg1 : i32, i32
  }
  func.func @transform_2(%arg0: i32, %arg1: i32, %arg2: i32) -> (i32, i32) {
    %c0_i32 = arith.constant 0 : i32
    %c0_i32_0 = arith.constant 0 : i32
    return %c0_i32, %arg1 : i32, i32
  }
  func.func @transform_3(%arg0: i32, %arg1: i32, %arg2: i32) -> (i32, i32) {
    %c0_i32 = arith.constant 0 : i32
    return %arg0, %arg1 : i32, i32
  }
  func.func @transform_4(%arg0: i32, %arg1: i32, %arg2: i32) -> (i32, i32) {
    %c0_i32 = arith.constant 0 : i32
    return %arg0, %arg1 : i32, i32
  }
}

module attributes {stable_mosaic.version = 11 : i64} {
  func.func @_head_kernel(%arg0: i32, %arg1: memref<8x1x256xbf16, #tpu.memory_space<vmem>>, %arg2: memref<256x128xbf16, #tpu.memory_space<vmem>>, %arg3: memref<1x128xf32, #tpu.memory_space<vmem>>, %arg4: memref<8x128xf32, #tpu.memory_space<vmem>>) attributes {dimension_semantics = [#tpu.dimension_semantics<arbitrary>], iteration_bounds = array<i64: 1>, scalar_prefetch = 0 : i64, scratch_operands = 0 : i64, tpu.core_type = #tpu.core_type<tc>, window_params = [{pipeline_mode = #tpu.pipeline_mode<synchronous>, transform_indices = @transform_0, window_bounds = array<i64: 8, 1, 256>}, {pipeline_mode = #tpu.pipeline_mode<synchronous>, transform_indices = @transform_1, window_bounds = array<i64: 256, 128>}, {pipeline_mode = #tpu.pipeline_mode<synchronous>, transform_indices = @transform_2, window_bounds = array<i64: 1, 128>}, {pipeline_mode = #tpu.pipeline_mode<synchronous>, transform_indices = @transform_3, window_bounds = array<i64: 8, 128>}]} {
    %c0 = arith.constant 0 : index
    %c0_0 = arith.constant 0 : index
    %c0_1 = arith.constant 0 : index
    %0 = vector.load %arg1[%c0, %c0_0, %c0_1] : memref<8x1x256xbf16, #tpu.memory_space<vmem>>, vector<8x1x256xbf16>
    %1 = arith.extf %0 : vector<8x1x256xbf16> to vector<8x1x256xf32>
    %cst = arith.constant dense<0.000000e+00> : vector<8x256xf32>
    %2 = vector.multi_reduction <add>, %1, %cst [1] : vector<8x1x256xf32> to vector<8x256xf32>
    %cst_2 = arith.constant 1.000000e+00 : f32
    %3 = vector.broadcast %cst_2 : f32 to vector<8x256xf32>
    %4 = arith.divf %2, %3 : vector<8x256xf32>
    %5 = arith.truncf %4 : vector<8x256xf32> to vector<8x256xbf16>
    %c0_3 = arith.constant 0 : index
    %c0_4 = arith.constant 0 : index
    %6 = vector.load %arg2[%c0_3, %c0_4] : memref<256x128xbf16, #tpu.memory_space<vmem>>, vector<256x128xbf16>
    %cst_5 = arith.constant dense<0.000000e+00> : vector<8x128xf32>
    %7 = tpu.matmul %5, %6, %cst_5 {dimension_numbers = #tpu.dot_dimension_numbers<[1], [0], [0], [1], [0, 0, 1, 1], [], []>} : vector<8x256xbf16>, vector<256x128xbf16>, vector<8x128xf32> -> vector<8x128xf32>
    %c0_6 = arith.constant 0 : index
    %c0_7 = arith.constant 0 : index
    %8 = vector.load %arg3[%c0_6, %c0_7] : memref<1x128xf32, #tpu.memory_space<vmem>>, vector<1x128xf32>
    %9 = vector.broadcast %8 : vector<1x128xf32> to vector<8x128xf32>
    %10 = arith.addf %7, %9 : vector<8x128xf32>
    %c0_8 = arith.constant 0 : index
    %c0_9 = arith.constant 0 : index
    %11 = vector.load %arg4[%c0_8, %c0_9] : memref<8x128xf32, #tpu.memory_space<vmem>>, vector<8x128xf32>
    tpu.vector_store %arg4[%c0_8, %c0_9], %10 {strides = array<i32>} : memref<8x128xf32, #tpu.memory_space<vmem>>, vector<8x128xf32>,
    return
  }
  func.func @transform_0(%arg0: i32) -> (i32, i32, i32) {
    %c0_i32 = arith.constant 0 : i32
    %c0_i32_0 = arith.constant 0 : i32
    %c0_i32_1 = arith.constant 0 : i32
    %c0_i32_2 = arith.constant 0 : i32
    return %c0_i32, %c0_i32_0, %c0_i32_1 : i32, i32, i32
  }
  func.func @transform_1(%arg0: i32) -> (i32, i32) {
    %c0_i32 = arith.constant 0 : i32
    %c0_i32_0 = arith.constant 0 : i32
    %c0_i32_1 = arith.constant 0 : i32
    return %c0_i32, %c0_i32_0 : i32, i32
  }
  func.func @transform_2(%arg0: i32) -> (i32, i32) {
    %c0_i32 = arith.constant 0 : i32
    %c0_i32_0 = arith.constant 0 : i32
    %c0_i32_1 = arith.constant 0 : i32
    return %c0_i32, %c0_i32_0 : i32, i32
  }
  func.func @transform_3(%arg0: i32) -> (i32, i32) {
    %c0_i32 = arith.constant 0 : i32
    %c0_i32_0 = arith.constant 0 : i32
    %c0_i32_1 = arith.constant 0 : i32
    return %c0_i32, %c0_i32_0 : i32, i32
  }
}

</mosaic_0001>

<bundles_post_ra>
// kernel: resnet_forward.19
= control target key start
LH: loop header
LB: loop body
LE: loop exit
PB: predicated region body
PF: predicated region fallthrough
CT: control target
= control target key end

     0   :  { %s1451_s12 = smov 0   ;;  %s1453_s13 = smov 0   ;;  %s1583_s0 = inlined_call_operand.vmem [shape: bf16[512,9], index: 0, kind: input, shape index: {}]   ;;  %s1584_s1 = inlined_call_operand.vmem [shape: bf16[9,128], index: 1, kind: input, shape index: {}]   ;;  %s1585_s2 = inlined_call_operand.vmem [shape: f32[1,128], index: 2, kind: input, shape index: {}]   ;;  %s1586_s3 = inlined_call_operand.vmem [shape: bf16[512,128], index: 3, kind: output, shape index: {}]  }
   0x1   :  { %s1455_s14 = smov 0  }
   0x2 LB: > { %s32_s15 = sadd.s32 1, %s1424_s13  ;;  %p1111_p0 = scmp.ge.s32.totalorder %s1428_s14, 1  ;;  %s1428_s14 = sphi %s1455_s14, %s13_s14   ;;  %s1424_s13 = sphi %s1453_s13, %s1588_s13   ;;  %s1420_s12 = sphi %s1451_s12, %s1587_s12  }
   0x3   : > { %p34_p1 = scmp.ge.s32.totalorder %s32_s15, 2  ;;  %p188_p2 = scmp.lt.s32.totalorder %s1428_s14, 3 }
   0x5   : > { %s1590_s15 = smov (%p34_p1, %s32_s15), 0  ;;  %p189_p3 = pnand %p1111_p0, %p188_p2 }
   0x6   : > { %v1389_v0 = vld [vmem:[%s1584_s1] sm:$0x1f] (!%p189_p3)   ;;  %vm496_vm0 = vcmask (!%p189_p3), 1043456   ;;  %vm497_vm1 = vcmask (!%p189_p3), 1044480   ;;  %s1112_s18 = sshll.u32 (!%p189_p3), %s1420_s12, 5  ;;  %v1430_v1 = vmov (!%p189_p3), 65535  }
   0x7   : > { %192 = sbr.rel (%p189_p3) target bundleno = 266 (0x10a), region = 32  ;;  %v498_v2 = vsel (!%p189_p3), %vm496_vm0, 4294967295, %v1430_v1  ;;  %p230_p4 = scmp.lt.s32.totalorder (!%p189_p3), %s1112_s18, 63  ;;  %vm447_vm2 = vcmask (!%p189_p3), 72704   ;;  %v1517_v21 = vld [vmem:[%s1585_s2] ss:$0 sm:$0xff] (!%p189_p3) }
   0x8   : > { %v499_v3 = vsel (!%p189_p3), %vm497_vm1, %v498_v2, 0 }
   0x9   : > { %v501_v4 = vand.u32 (!%p189_p3), %v1389_v0, %v499_v3 }
   0xb   : > { %1328 = vmatprep.subr.bf16.mxu0 (!%p189_p3), %v501_v4  ;;  %1362 = vmatprep.subr.bf16.mxu1 (!%p189_p3), %v501_v4 }
   0xc   : > { %1329 = vmatpush3.bf16.msra.mxu0 (!%p189_p3), %v501_v4  ;;  %1363 = vmatpush3.bf16.msra.mxu1 (!%p189_p3), %v501_v4 }
   0xe   : > { %s1592_s18 = smov (!%p230_p4, %s1112_s18), 63 }
   0xf   : > { %s1113_s19 = sshll.u32 %s1592_s18, 2 }
  0x10   : > { %s1480_s22 = scalar_lea.vmem %s1583_s0, %s1113_s19  ;;  %s1532_s27 = scalar_lea.vmem %s1586_s3, %s1113_s19 }
  0x11   : > { %v1390_v5 = vld [vmem:[%s1480_s22] sm:$0xff]   ;;  %v1392_v7 = vld [vmem:[%s1480_s22 + $0x8] sm:$0xff]   ;;  %v1394_v9 = vld [vmem:[%s1480_s22 + $0x10] sm:$0xff]  }
  0x12   : > { %v1391_v6 = vld [vmem:[%s1480_s22 + $0x40] sm:$0xff]   ;;  %1330 = vmatprep.mubr.msk.bf16.mxu0 %vm447_vm2, %v1390_v5  ;;  %v1393_v8 = vld [vmem:[%s1480_s22 + $0x48] sm:$0xff]   ;;  %v1395_v10 = vld [vmem:[%s1480_s22 + $0x50] sm:$0xff]  }
  0x13   : > { %1346 = vmatprep.mubr.msk.bf16.mxu1 %vm447_vm2, %v1391_v6  ;;  %1331 = vmatmul.mubr.msk.bf16.vlgmr.msra.gmra.mrb[0].mxu0 %vm447_vm2, %v1392_v7  ;;  %v1396_v11 = vld [vmem:[%s1480_s22 + $0x18] sm:$0xff]   ;;  %v1398_v13 = vld [vmem:[%s1480_s22 + $0x20] sm:$0xff]   ;;  %v1400_v15 = vld [vmem:[%s1480_s22 + $0x28] sm:$0xff]  }
  0x14   : > { %1347 = vmatmul.mubr.msk.bf16.vlgmr.msra.gmra.mrb[0].mxu1 %vm447_vm2, %v1393_v8  ;;  %1334 = vmatprep.mubr.msk.bf16.mxu0 %vm447_vm2, %v1394_v9  ;;  %v1397_v12 = vld [vmem:[%s1480_s22 + $0x58] sm:$0xff]   ;;  %v1399_v14 = vld [vmem:[%s1480_s22 + $0x60] sm:$0xff]   ;;  %v1401_v16 = vld [vmem:[%s1480_s22 + $0x68] sm:$0xff]  }
  0x15   : > { %1350 = vmatprep.mubr.msk.bf16.mxu1 %vm447_vm2, %v1395_v10  ;;  %v1402_v17 = vld [vmem:[%s1480_s22 + $0x30] sm:$0xff]   ;;  %v1404_v19 = vld [vmem:[%s1480_s22 + $0x38] sm:$0xff]  }
  0x16   : > { %v1403_v18 = vld [vmem:[%s1480_s22 + $0x70] sm:$0xff]   ;;  %v1405_v20 = vld [vmem:[%s1480_s22 + $0x78] sm:$0xff]  }
  0x1b   : > { %1335 = vmatmul.mubr.msk.bf16.gmra.mrb[4].mxu0 %vm447_vm2, %v1396_v11 }
  0x1c   : > { %1351 = vmatmul.mubr.msk.bf16.gmra.mrb[4].mxu1 %vm447_vm2, %v1397_v12  ;;  %1338 = vmatprep.mubr.msk.bf16.mxu0 %vm447_vm2, %v1398_v13 }
  0x1d   : > { %1354 = vmatprep.mubr.msk.bf16.mxu1 %vm447_vm2, %v1399_v14 }
  0x23   : > { %1339 = vmatmul.mubr.msk.bf16.gmra.mrb[8].mxu0 %vm447_vm2, %v1400_v15 }
  0x24   : > { %1355 = vmatmul.mubr.msk.bf16.gmra.mrb[8].mxu1 %vm447_vm2, %v1401_v16  ;;  %1342 = vmatprep.mubr.msk.bf16.mxu0 %vm447_vm2, %v1402_v17 }
  0x25   : > { %1358 = vmatprep.mubr.msk.bf16.mxu1 %vm447_vm2, %v1403_v18 }
  0x2b   : > { %1343 = vmatmul.mubr.msk.bf16.gmra.mrb[12].mxu0 %vm447_vm2, %v1404_v19 }
  0x2c   : > { %1359 = vmatmul.mubr.msk.bf16.gmra.mrb[12].mxu1 %vm447_vm2, %v1405_v20 }
  0xe6   : > { %v1332_v22 = vpop.f32.mrb[0].mxu0 }
  0xe7   : > { %v772_v23 = vadd.f32 %v1332_v22, %v1517_v21  ;;  %v1348_v24 = vpop.f32.mrb[0].mxu1  ;;  %v537_v25 = vpop.f32.mrb[1].mxu0 }
  0xe8   : > { %v788_v26 = vadd.f32 %v1348_v24, %v1517_v21  ;;  %v770_v27 = vadd.f32 %v1517_v21, %v537_v25  ;;  %v601_v28 = vpop.f32.mrb[1].mxu1  ;;  %v1333_v29 = vpop.f32.mrb[2].mxu0 }
  0xe9   : > { %v786_v30 = vadd.f32 %v1517_v21, %v601_v28  ;;  %v773_v31 = vadd.f32 %v1333_v29, %v1517_v21  ;;  %v1349_v32 = vpop.f32.mrb[2].mxu1  ;;  %v540_v33 = vpop.f32.mrb[3].mxu0  ;;  %v804_v37 = vmax.f32 %v772_v23, 0.0 }
  0xea   : > { %v789_v34 = vadd.f32 %v1349_v32, %v1517_v21  ;;  %v771_v35 = vadd.f32 %v1517_v21, %v540_v33  ;;  %v604_v36 = vpop.f32.mrb[3].mxu1  ;;  %v820_v40 = vmax.f32 %v788_v26, 0.0  ;;  %v802_v41 = vmax.f32 %v770_v27, 0.0 }
  0xeb   : > { %v805_v38 = vmax.f32 %v773_v31, 0.0  ;;  %v787_v39 = vadd.f32 %v1517_v21, %v604_v36  ;;  %v818_v44 = vmax.f32 %v786_v30, 0.0 }
  0xec   : > { %v821_v42 = vmax.f32 %v789_v34, 0.0  ;;  %v803_v43 = vmax.f32 %v771_v35, 0.0 }
  0xed   : > { %v1224_v45 = vpack.c.bf16 %v805_v38, %v804_v37  ;;  %v819_v46 = vmax.f32 %v787_v39, 0.0 }
  0xee   : > { %v1264_v47 = vpack.c.bf16 %v821_v42, %v820_v40  ;;  %v1219_v48 = vpack.c.bf16 %v803_v43, %v802_v41  ;;  %v1336_v49 = vpop.f32.mrb[4].mxu0 }
  0xef   : > { %1296 = vst [vmem:[%s1532_s27 + $0x8] sm:$0xff] %v1224_v45   ;;  %v1259_v50 = vpack.c.bf16 %v819_v46, %v818_v44  ;;  %v776_v51 = vadd.f32 %v1336_v49, %v1517_v21  ;;  %v1352_v52 = vpop.f32.mrb[4].mxu1  ;;  %v553_v53 = vpop.f32.mrb[5].mxu0 }
  0xf0   : > { %1304 = vst [vmem:[%s1532_s27 + $0x48] sm:$0xff] %v1264_v47   ;;  %1220 = vst [vmem:[%s1532_s27] sm:$0xff] %v1219_v48   ;;  %v792_v54 = vadd.f32 %v1352_v52, %v1517_v21  ;;  %v774_v55 = vadd.f32 %v1517_v21, %v553_v53  ;;  %v617_v56 = vpop.f32.mrb[5].mxu1  ;;  %v1337_v57 = vpop.f32.mrb[6].mxu0 }
  0xf1   : > { %1303 = vst [vmem:[%s1532_s27 + $0x40] sm:$0xff] %v1259_v50   ;;  %v790_v58 = vadd.f32 %v1517_v21, %v617_v56  ;;  %v777_v59 = vadd.f32 %v1337_v57, %v1517_v21  ;;  %v1353_v60 = vpop.f32.mrb[6].mxu1  ;;  %v556_v61 = vpop.f32.mrb[7].mxu0  ;;  %v808_v1 = vmax.f32 %v776_v51, 0.0 }
  0xf2   : > { %v793_v62 = vadd.f32 %v1353_v60, %v1517_v21  ;;  %v775_v63 = vadd.f32 %v1517_v21, %v556_v61  ;;  %v620_v0 = vpop.f32.mrb[7].mxu1  ;;  %v824_v4 = vmax.f32 %v792_v54, 0.0  ;;  %v806_v5 = vmax.f32 %v774_v55, 0.0 }
  0xf3   : > { %v809_v2 = vmax.f32 %v777_v59, 0.0  ;;  %v791_v3 = vadd.f32 %v1517_v21, %v620_v0  ;;  %v822_v8 = vmax.f32 %v790_v58, 0.0 }
  0xf4   : > { %v825_v6 = vmax.f32 %v793_v62, 0.0  ;;  %v807_v7 = vmax.f32 %v775_v63, 0.0 }
  0xf5   : > { %v1234_v9 = vpack.c.bf16 %v809_v2, %v808_v1  ;;  %v823_v10 = vmax.f32 %v791_v3, 0.0 }
  0xf6   : > { %v1274_v11 = vpack.c.bf16 %v825_v6, %v824_v4  ;;  %v1229_v12 = vpack.c.bf16 %v807_v7, %v806_v5  ;;  %v1340_v13 = vpop.f32.mrb[8].mxu0 }
  0xf7   : > { %1298 = vst [vmem:[%s1532_s27 + $0x18] sm:$0xff] %v1234_v9   ;;  %v1269_v14 = vpack.c.bf16 %v823_v10, %v822_v8  ;;  %v780_v15 = vadd.f32 %v1340_v13, %v1517_v21  ;;  %v1356_v16 = vpop.f32.mrb[8].mxu1  ;;  %v569_v17 = vpop.f32.mrb[9].mxu0 }
  0xf8   : > { %1306 = vst [vmem:[%s1532_s27 + $0x58] sm:$0xff] %v1274_v11   ;;  %1297 = vst [vmem:[%s1532_s27 + $0x10] sm:$0xff] %v1229_v12   ;;  %v796_v18 = vadd.f32 %v1356_v16, %v1517_v21  ;;  %v778_v19 = vadd.f32 %v1517_v21, %v569_v17  ;;  %v633_v20 = vpop.f32.mrb[9].mxu1  ;;  %v1341_v22 = vpop.f32.mrb[10].mxu0 }
  0xf9   : > { %1305 = vst [vmem:[%s1532_s27 + $0x50] sm:$0xff] %v1269_v14   ;;  %v794_v23 = vadd.f32 %v1517_v21, %v633_v20  ;;  %v781_v24 = vadd.f32 %v1341_v22, %v1517_v21  ;;  %v1357_v25 = vpop.f32.mrb[10].mxu1  ;;  %v572_v26 = vpop.f32.mrb[11].mxu0  ;;  %v812_v30 = vmax.f32 %v780_v15, 0.0 }
  0xfa   : > { %v797_v27 = vadd.f32 %v1357_v25, %v1517_v21  ;;  %v779_v28 = vadd.f32 %v1517_v21, %v572_v26  ;;  %v636_v29 = vpop.f32.mrb[11].mxu1  ;;  %v828_v33 = vmax.f32 %v796_v18, 0.0  ;;  %v810_v34 = vmax.f32 %v778_v19, 0.0 }
  0xfb   : > { %v813_v31 = vmax.f32 %v781_v24, 0.0  ;;  %v795_v32 = vadd.f32 %v1517_v21, %v636_v29  ;;  %v826_v37 = vmax.f32 %v794_v23, 0.0 }
  0xfc   : > { %v829_v35 = vmax.f32 %v797_v27, 0.0  ;;  %v811_v36 = vmax.f32 %v779_v28, 0.0 }
  0xfd   : > { %v1244_v38 = vpack.c.bf16 %v813_v31, %v812_v30  ;;  %v827_v39 = vmax.f32 %v795_v32, 0.0 }
  0xfe   : > { %v1284_v40 = vpack.c.bf16 %v829_v35, %v828_v33  ;;  %v1239_v41 = vpack.c.bf16 %v811_v36, %v810_v34  ;;  %v1344_v42 = vpop.f32.mrb[12].mxu0 }
  0xff   : > { %1300 = vst [vmem:[%s1532_s27 + $0x28] sm:$0xff] %v1244_v38   ;;  %v1279_v43 = vpack.c.bf16 %v827_v39, %v826_v37  ;;  %v784_v44 = vadd.f32 %v1344_v42, %v1517_v21  ;;  %v1360_v45 = vpop.f32.mrb[12].mxu1  ;;  %v585_v46 = vpop.f32.mrb[13].mxu0 }
 0x100   : > { %1308 = vst [vmem:[%s1532_s27 + $0x68] sm:$0xff] %v1284_v40   ;;  %1299 = vst [vmem:[%s1532_s27 + $0x20] sm:$0xff] %v1239_v41   ;;  %v800_v47 = vadd.f32 %v1360_v45, %v1517_v21  ;;  %v782_v48 = vadd.f32 %v1517_v21, %v585_v46  ;;  %v649_v49 = vpop.f32.mrb[13].mxu1  ;;  %v1345_v50 = vpop.f32.mrb[14].mxu0 }
 0x101   : > { %1307 = vst [vmem:[%s1532_s27 + $0x60] sm:$0xff] %v1279_v43   ;;  %v798_v51 = vadd.f32 %v1517_v21, %v649_v49  ;;  %v785_v52 = vadd.f32 %v1345_v50, %v1517_v21  ;;  %v1361_v53 = vpop.f32.mrb[14].mxu1  ;;  %v588_v54 = vpop.f32.mrb[15].mxu0  ;;  %v816_v58 = vmax.f32 %v784_v44, 0.0 }
 0x102   : > { %v801_v55 = vadd.f32 %v1361_v53, %v1517_v21  ;;  %v783_v56 = vadd.f32 %v1517_v21, %v588_v54  ;;  %v652_v57 = vpop.f32.mrb[15].mxu1  ;;  %v832_v61 = vmax.f32 %v800_v47, 0.0  ;;  %v814_v62 = vmax.f32 %v782_v48, 0.0 }
 0x103   : > { %v817_v59 = vmax.f32 %v785_v52, 0.0  ;;  %v799_v60 = vadd.f32 %v1517_v21, %v652_v57  ;;  %v830_v1 = vmax.f32 %v798_v51, 0.0 }
 0x104   : > { %v833_v63 = vmax.f32 %v801_v55, 0.0  ;;  %v815_v0 = vmax.f32 %v783_v56, 0.0 }
 0x105   : > { %v1254_v2 = vpack.c.bf16 %v817_v59, %v816_v58  ;;  %v831_v3 = vmax.f32 %v799_v60, 0.0 }
 0x106   : > { %v1294_v4 = vpack.c.bf16 %v833_v63, %v832_v61  ;;  %v1249_v5 = vpack.c.bf16 %v815_v0, %v814_v62 }
 0x107   : > { %1302 = vst [vmem:[%s1532_s27 + $0x38] sm:$0xff] %v1254_v2   ;;  %v1289_v6 = vpack.c.bf16 %v831_v3, %v830_v1 }
 0x108   : > { %1310 = vst [vmem:[%s1532_s27 + $0x78] sm:$0xff] %v1294_v4   ;;  %1301 = vst [vmem:[%s1532_s27 + $0x30] sm:$0xff] %v1249_v5  }
 0x109   : > { %1309 = vst [vmem:[%s1532_s27 + $0x70] sm:$0xff] %v1289_v6  }
 0x10a PF: > { %s13_s14 = sadd.s32 1, %s1428_s14   ;;  %s1587_s12 = smov %s1424_s13 }
 0x10b   : > { %p10_p5 = scmp.ge.s32.totalorder %s13_s14, 4   ;;  %s1588_s13 = smov %s1590_s15 }
 0x10d   :  { %12 = sbr.rel (!%p10_p5) target bundleno = 2 (0x2), region = 76 }

// kernel: resnet_forward.20
= control target key start
LH: loop header
LB: loop body
LE: loop exit
PB: predicated region body
PF: predicated region fallthrough
CT: control target
= control target key end

     0   :  { %s939_s15 = smov 0   ;;  %s1224_s0 = inlined_call_operand.vmem [shape: bf16[2,9,9,32], index: 0, kind: input, shape index: {}]   ;;  %s1225_s1 = inlined_call_operand.vmem [shape: bf16[2,9,9,32], index: 1, kind: input, shape index: {}]   ;;  %s1226_s2 = inlined_call_operand.vmem [shape: bf16[2,9,9,32], index: 2, kind: input, shape index: {}]   ;;  %s1227_s3 = inlined_call_operand.vmem [shape: bf16[2,9,9,32], index: 3, kind: input, shape index: {}]   ;;  %s1228_s4 = inlined_call_operand.vmem [shape: bf16[2,8,8,32], index: 4, kind: output, shape index: {}]  }
   0x1 LB: > { %s859_s16 = sadd.s32 4294967295, %s912_s15   ;;  %p863_p0 = scmp.ge.s32.totalorder %s912_s15, 1  ;;  %s912_s15 = sphi %s939_s15, %s14_s15  }
   0x2   : > { %p192_p1 = scmp.lt.s32.totalorder %s912_s15, 3 }
   0x4   : > { %p193_p2 = pnand %p863_p0, %p192_p1 }
   0x5   : > { %p233_p3 = scmp.lt.s32.totalorder (!%p193_p2), %s859_s16, 1  ;;  %vm290_vm0 = vsmask.f32 (!%p193_p2), 3328  ;;  %vm291_vm1 = vsmask.f32 (!%p193_p2), 7440  ;;  %vm759_vm3 = vcmask (!%p193_p2), 257024  }
   0x6   : > { %196 = sbr.rel (%p193_p2) target bundleno = 100 (0x64), region = 36  ;;  %vm984_vm2 = vmor (!%p193_p2), %vm290_vm0, %vm291_vm1 }
   0xd   : > { %s1232_s16 = smov (!%p233_p3, %s859_s16), 1 }
   0xe   : > { %s950_s17 = smul.u32 72, %s1232_s16  ;;  %s896_s30 = sshll.u32 %s1232_s16, 5 }
   0xf   : > { %s1049_s7 = scalar_lea.vmem %s1228_s4, %s896_s30 }
  0x10   : > { %s956_s20 = scalar_lea.vmem %s1224_s0, %s950_s17  ;;  %s962_s23 = scalar_lea.vmem %s1225_s1, %s950_s17 }
  0x11   : > { %s968_s26 = scalar_lea.vmem %s1226_s2, %s950_s17  ;;  %v258_v0 = vld [vmem:[%s956_s20] sm:$0xf]  ;;  %v282_v1 = vld [vmem:[%s956_s20 + $0x4] sm:$0x1]  ;;  %v976_v13 = vld [vmem:[%s956_s20 + $0x8] sm:$0xf]  ;;  %s997_s29 = scalar_lea.vmem %s1227_s3, %s950_s17 }
  0x12   : > { %v294_v2 = vshrl.u32 %v258_v0, 16  ;;  %v297_v3 = vshll.u32 %v258_v0, 16  ;;  %v303_v4 = vshll.u32 %v282_v1, 16  ;;  %v421_v5 = vld [vmem:[%s968_s26] sm:$0xf]  ;;  %v632_v19 = vshrl.u32 %v976_v13, 16 }
  0x13   : > { %v266_v6 = vld [vmem:[%s962_s23] sm:$0xf]  ;;  %v453_v7 = vld [vmem:[%s968_s26 + $0x4] sm:$0x1]  ;;  %v462_v8 = vshrl.u32 %v421_v5, 16  ;;  %v465_v9 = vshll.u32 %v421_v5, 16 }
  0x14   : > { %v296_v10 = vrot.slane %v294_v2, 4  ;;  %v299_v11 = vrot.slane %v297_v3, 5  ;;  %v471_v12 = vshll.u32 %v453_v7, 16  ;;  %v886_v16 = vld [vmem:[%s956_s20 + $0xc] sm:$0x1]  ;;  %v305_v18 = vrot.slane %v303_v4, 5 }
  0x15   : > { %v464_v14 = vrot.slane %v462_v8, 4  ;;  %v467_v15 = vrot.slane %v465_v9, 5  ;;  %v635_v20 = vshll.u32 %v976_v13, 16  ;;  %v259_v21 = vld [vmem:[%s956_s20 + $0x8] sm:$0xf]  ;;  %v274_v22 = vmax.bf16 %v266_v6, %v258_v0 }
  0x16   : > { %v300_v17 = vor.u32 %v299_v11, %v296_v10  ;;  %v641_v25 = vshll.u32 %v886_v16, 16  ;;  %v267_v26 = vld [vmem:[%s962_s23 + $0x8] sm:$0xf]  ;;  %v283_v27 = vld [vmem:[%s956_s20 + $0xc] sm:$0x1]  ;;  %v308_v28 = vshrl.u32 %v259_v21, 16 }
  0x17   : > { %v468_v24 = vor.u32 %v467_v15, %v464_v14  ;;  %v473_v30 = vrot.slane %v471_v12, 5  ;;  %v634_v31 = vrot.slane %v632_v19, 4  ;;  %v637_v32 = vrot.slane %v635_v20, 5  ;;  %v991_v33 = vld [vmem:[%s968_s26 + $0x8] sm:$0xf] }
  0x18   : > { %v301_v29 = vrot.slane %v300_v17, 4  ;;  %v275_v35 = vmax.bf16 %v267_v26, %v259_v21  ;;  %v310_v36 = vrot.slane %v308_v28, 4  ;;  %v311_v37 = vshll.u32 %v259_v21, 16  ;;  %v454_v41 = vld [vmem:[%s968_s26 + $0xc] sm:$0x1] }
  0x19   : > { %v469_v34 = vrot.slane %v468_v24, 4  ;;  %v638_v39 = vor.u32 %v637_v32, %v634_v31  ;;  %v317_v40 = vshll.u32 %v283_v27, 16  ;;  %v476_v42 = vshrl.u32 %v991_v33, 16  ;;  %v1004_v43 = vld [vmem:[%s956_s20 + $0x10] sm:$0xf] }
  0x1a   : > { %v306_v38 = vsel %vm984_vm2, %v301_v29, %v305_v18  ;;  %v1006_v45 = vrot.slane %v641_v25, 5  ;;  %v313_v46 = vrot.slane %v311_v37, 5  ;;  %v479_v47 = vshll.u32 %v991_v33, 16  ;;  %v887_v48 = vld [vmem:[%s956_s20 + $0x14] sm:$0x1] }
  0x1b   : > { %v413_v44 = vmax.bf16 %v306_v38, %v274_v22  ;;  %v437_v49 = vld [vmem:[%s997_s29] sm:$0xf]  ;;  %v639_v50 = vrot.slane %v638_v39, 4  ;;  %v319_v51 = vrot.slane %v317_v40, 5  ;;  %v478_v52 = vrot.slane %v476_v42, 4 }
  0x1c   : > { %v485_v53 = vshll.u32 %v454_v41, 16  ;;  %v314_v55 = vor.u32 %v313_v46, %v310_v36  ;;  %v481_v56 = vrot.slane %v479_v47, 5  ;;  %v646_v57 = vshrl.u32 %v1004_v43, 16  ;;  %v1013_v58 = vld [vmem:[%s956_s20 + $0x10] sm:$0xf] }
  0x1d   : > { %v429_v54 = vmax.bf16 %v421_v5, %v413_v44  ;;  %v474_v59 = vsel %vm984_vm2, %v469_v34, %v473_v30  ;;  %v649_v61 = vshll.u32 %v1004_v43, 16  ;;  %v655_v62 = vshll.u32 %v887_v48, 16  ;;  %v284_v3 = vld [vmem:[%s956_s20 + $0x14] sm:$0x1]  ;;  %v1026_v8 = vld [vmem:[%s968_s26 + $0x10] sm:$0xf] }
  0x1e   : > { %v487_v60 = vrot.slane %v485_v53, 5  ;;  %v315_v0 = vrot.slane %v314_v55, 4  ;;  %v482_v1 = vor.u32 %v481_v56, %v478_v52  ;;  %v648_v2 = vrot.slane %v646_v57, 4  ;;  %v878_v10 = vld [vmem:[%s962_s23 + $0x8] sm:$0xf] }
  0x1f   : > { %v445_v63 = vmax.bf16 %v437_v49, %v429_v54  ;;  %v644_v4 = vsel %vm984_vm2, %v639_v50, %v1006_v45  ;;  %v651_v5 = vrot.slane %v649_v61, 5  ;;  %v1022_v6 = vrot.slane %v655_v62, 5  ;;  %v438_v16 = vld [vmem:[%s997_s29 + $0x8] sm:$0xf]  ;;  %v455_v20 = vld [vmem:[%s968_s26 + $0x14] sm:$0x1] }
  0x20   : > { %v322_v7 = vshrl.u32 %v1013_v58, 16  ;;  %v320_v11 = vsel %vm984_vm2, %v315_v0, %v319_v51  ;;  %v483_v12 = vrot.slane %v482_v1, 4  ;;  %v325_v14 = vshll.u32 %v1013_v58, 16  ;;  %v268_v24 = vld [vmem:[%s962_s23 + $0x10] sm:$0xf] }
  0x21   : > { %v581_v9 = vmax.bf16 %v474_v59, %v445_v63  ;;  %v414_v15 = vmax.bf16 %v320_v11, %v275_v35  ;;  %v652_v17 = vor.u32 %v651_v5, %v648_v2  ;;  %v331_v19 = vshll.u32 %v284_v3, 16  ;;  %v1041_v27 = vld [vmem:[%s956_s20 + $0x18] sm:$0xf]  ;;  %v888_v36 = vld [vmem:[%s956_s20 + $0x1c] sm:$0x1] }
  0x22   : > { %v324_v18 = vrot.slane %v322_v7, 4  ;;  %v488_v22 = vsel %vm984_vm2, %v483_v12, %v487_v60  ;;  %v327_v25 = vrot.slane %v325_v14, 5  ;;  %v490_v26 = vshrl.u32 %v1026_v8, 16  ;;  %v1054_v40 = vld [vmem:[%s956_s20 + $0x18] sm:$0xf] }
  0x23   : > { %v598_v21 = vmax.bf16 %v976_v13, %v581_v9  ;;  %v430_v28 = vmax.bf16 %v991_v33, %v414_v15  ;;  %v653_v29 = vrot.slane %v652_v17, 4  ;;  %v333_v30 = vrot.slane %v331_v19, 5  ;;  %v1061_v46 = vld [vmem:[%s962_s23 + $0x18] sm:$0xf]  ;;  %v879_v48 = vld [vmem:[%s962_s23 + $0x10] sm:$0xf] }
  0x24   : > { %v493_v31 = vshll.u32 %v1026_v8, 16  ;;  %v328_v34 = vor.u32 %v327_v25, %v324_v18  ;;  %v492_v13 = vrot.slane %v490_v26, 4  ;;  %v499_v35 = vshll.u32 %v455_v20, 16  ;;  %v285_v52 = vld [vmem:[%s956_s20 + $0x1c] sm:$0x1] }
  0x25   : > { %v615_v32 = vmax.bf16 %v878_v10, %v598_v21  ;;  %v446_v37 = vmax.bf16 %v438_v16, %v430_v28  ;;  %v276_v33 = vmax.bf16 %v268_v24, %v1013_v58  ;;  %v660_v39 = vshrl.u32 %v1041_v27, 16  ;;  %v1071_v57 = vld [vmem:[%s968_s26 + $0x18] sm:$0xf]  ;;  %v439_v60 = vld [vmem:[%s997_s29 + $0x10] sm:$0xf] }
  0x26   : > { %v495_v38 = vrot.slane %v493_v31, 5  ;;  %v658_v42 = vsel %vm984_vm2, %v653_v29, %v1022_v6  ;;  %v329_v44 = vrot.slane %v328_v34, 4  ;;  %v663_v45 = vshll.u32 %v1041_v27, 16  ;;  %v456_v3 = vld [vmem:[%s968_s26 + $0x1c] sm:$0x1] }
  0x27   : > { %v751_v41 = vmax.bf16 %v644_v4, %v615_v32  ;;  %v582_v47 = vmax.bf16 %v488_v22, %v446_v37  ;;  %v662_v50 = vrot.slane %v660_v39, 4  ;;  %v669_v51 = vshll.u32 %v888_v36, 16  ;;  %v1082_v7 = vld [vmem:[%s956_s20 + $0x20] sm:$0xf]  ;;  %v889_v14 = vld [vmem:[%s956_s20 + $0x24] sm:$0x1] }
  0x28   : > { %v496_v49 = vor.u32 %v495_v38, %v492_v13  ;;  %v334_v53 = vsel %vm984_vm2, %v329_v44, %v333_v30  ;;  %v501_v54 = vrot.slane %v499_v35, 5  ;;  %v665_v55 = vrot.slane %v663_v45, 5  ;;  %v1090_v22 = vld [vmem:[%s956_s20 + $0x20] sm:$0xf]  ;;  %v286_v29 = vld [vmem:[%s956_s20 + $0x24] sm:$0x1] }
  0x29   : > { %760 = vst.msk [vmem:[%s1049_s7] sm:$0xf] %vm759_vm3, %v751_v41  ;;  %v336_v56 = vshrl.u32 %v1054_v40, 16  ;;  %v599_v58 = vmax.bf16 %v1004_v43, %v582_v47  ;;  %v415_v59 = vmax.bf16 %v334_v53, %v276_v33  ;;  %v277_v62 = vmax.bf16 %v1061_v46, %v1054_v40  ;;  %v880_v30 = vld [vmem:[%s962_s23 + $0x18] sm:$0xf] }
  0x2a   : > { %v497_v61 = vrot.slane %v496_v49, 4  ;;  %v666_v63 = vor.u32 %v665_v55, %v662_v50  ;;  %v339_v1 = vshll.u32 %v1054_v40, 16  ;;  %v345_v2 = vshll.u32 %v285_v52, 16  ;;  %v1104_v38 = vld [vmem:[%s968_s26 + $0x20] sm:$0xf] }
  0x2b   : > { %v338_v0 = vrot.slane %v336_v56, 4  ;;  %v616_v4 = vmax.bf16 %v879_v48, %v599_v58  ;;  %v431_v5 = vmax.bf16 %v1026_v8, %v415_v59  ;;  %v671_v6 = vrot.slane %v669_v51, 5  ;;  %v440_v40 = vld [vmem:[%s997_s29 + $0x18] sm:$0xf]  ;;  %v457_v48 = vld [vmem:[%s968_s26 + $0x24] sm:$0x1] }
  0x2c   : > { %v504_v43 = vshrl.u32 %v1071_v57, 16  ;;  %v502_v9 = vsel %vm984_vm2, %v497_v61, %v501_v54  ;;  %v667_v10 = vrot.slane %v666_v63, 4  ;;  %v341_v11 = vrot.slane %v339_v1, 5  ;;  %v1112_v49 = vld [vmem:[%s956_s20 + $0x28] sm:$0xf] }
  0x2d   : > { %v507_v12 = vshll.u32 %v1071_v57, 16  ;;  %v752_v15 = vmax.bf16 %v658_v42, %v616_v4  ;;  %v447_v16 = vmax.bf16 %v439_v60, %v431_v5  ;;  %v513_v17 = vshll.u32 %v456_v3, 16  ;;  %v270_v51 = vld [vmem:[%s962_s23 + $0x20] sm:$0xf]  ;;  %v890_v63 = vld [vmem:[%s956_s20 + $0x2c] sm:$0x1] }
  0x2e   : > { %v506_v8 = vrot.slane %v504_v43, 4  ;;  %v342_v18 = vor.u32 %v341_v11, %v338_v0  ;;  %v347_v19 = vrot.slane %v345_v2, 5  ;;  %v674_v21 = vshrl.u32 %v1082_v7, 16  ;;  %v263_v4 = vld [vmem:[%s956_s20 + $0x28] sm:$0xf] }
  0x2f   : > { %v509_v20 = vrot.slane %v507_v12, 5  ;;  %761 = vst.msk [vmem:[%s1049_s7 + $0x4] sm:$0xf] %vm759_vm3, %v752_v15  ;;  %v583_v24 = vmax.bf16 %v502_v9, %v447_v16  ;;  %v672_v25 = vsel %vm984_vm2, %v667_v10, %v671_v6  ;;  %v677_v26 = vshll.u32 %v1082_v7, 16  ;;  %v271_v5 = vld [vmem:[%s962_s23 + $0x28] sm:$0xf] }
  0x30   : > { %v683_v28 = vshll.u32 %v889_v14, 16  ;;  %v343_v31 = vrot.slane %v342_v18, 4  ;;  %v515_v34 = vrot.slane %v513_v17, 5  ;;  %v676_v13 = vrot.slane %v674_v21, 4  ;;  %v287_v16 = vld [vmem:[%s956_s20 + $0x2c] sm:$0x1] }
  0x31   : > { %v510_v32 = vor.u32 %v509_v20, %v506_v8  ;;  %v600_v35 = vmax.bf16 %v1041_v27, %v583_v24  ;;  %v679_v36 = vrot.slane %v677_v26, 5  ;;  %v350_v33 = vshrl.u32 %v1090_v22, 16  ;;  %v1133_v8 = vld [vmem:[%s968_s26 + $0x28] sm:$0xf]  ;;  %v881_v17 = vld [vmem:[%s962_s23 + $0x20] sm:$0xf] }
  0x32   : > { %v1100_v37 = vrot.slane %v683_v28, 5  ;;  %v348_v39 = vsel %vm984_vm2, %v343_v31, %v347_v19  ;;  %v353_v42 = vshll.u32 %v1090_v22, 16  ;;  %v359_v44 = vshll.u32 %v286_v29, 16 }
  0x33   : > { %v511_v41 = vrot.slane %v510_v32, 4  ;;  %v617_v45 = vmax.bf16 %v880_v30, %v600_v35  ;;  %v416_v46 = vmax.bf16 %v348_v39, %v277_v62  ;;  %v680_v47 = vor.u32 %v679_v36, %v676_v13  ;;  %v458_v32 = vld [vmem:[%s968_s26 + $0x2c] sm:$0x1] }
  0x34   : > { %v352_v27 = vrot.slane %v350_v33, 4  ;;  %v355_v52 = vrot.slane %v353_v42, 5  ;;  %v361_v53 = vrot.slane %v359_v44, 5  ;;  %v518_v54 = vshrl.u32 %v1104_v38, 16  ;;  %v891_v42 = vld [vmem:[%s956_s20 + $0x34] sm:$0x1] }
  0x35   : > { %v516_v50 = vsel %vm984_vm2, %v511_v41, %v515_v34  ;;  %v753_v55 = vmax.bf16 %v672_v25, %v617_v45  ;;  %v432_v56 = vmax.bf16 %v1071_v57, %v416_v46  ;;  %v681_v58 = vrot.slane %v680_v47, 4  ;;  %v441_v25 = vld [vmem:[%s997_s29 + $0x20] sm:$0xf] }
  0x36   : > { %v521_v59 = vshll.u32 %v1104_v38, 16  ;;  %v356_v60 = vor.u32 %v355_v52, %v352_v27  ;;  %v520_v61 = vrot.slane %v518_v54, 4  ;;  %v527_v62 = vshll.u32 %v457_v48, 16 }
  0x37   : > { %v688_v0 = vshrl.u32 %v1112_v49, 16  ;;  %762 = vst.msk [vmem:[%s1049_s7 + $0x8] sm:$0xf] %vm759_vm3, %v753_v55  ;;  %v448_v1 = vmax.bf16 %v440_v40, %v432_v56  ;;  %v278_v2 = vmax.bf16 %v270_v51, %v1090_v22  ;;  %v691_v57 = vshll.u32 %v1112_v49, 16  ;;  %v1153_v51 = vld [vmem:[%s956_s20 + $0x30] sm:$0xf] }
  0x38   : > { %v523_v3 = vrot.slane %v521_v59, 5  ;;  %v686_v6 = vsel %vm984_vm2, %v681_v58, %v1100_v37  ;;  %v357_v43 = vrot.slane %v356_v60, 4  ;;  %v529_v9 = vrot.slane %v527_v62, 5  ;;  %v288_v55 = vld [vmem:[%s956_s20 + $0x34] sm:$0x1] }
  0x39   : > { %v690_v10 = vrot.slane %v688_v0, 4  ;;  %v584_v11 = vmax.bf16 %v516_v50, %v448_v1  ;;  %v693_v14 = vrot.slane %v691_v57, 5  ;;  %v697_v15 = vshll.u32 %v890_v63, 16  ;;  %v882_v56 = vld [vmem:[%s962_s23 + $0x28] sm:$0xf] }
  0x3a   : > { %v524_v12 = vor.u32 %v523_v3, %v520_v61  ;;  %v362_v18 = vsel %vm984_vm2, %v357_v43, %v361_v53  ;;  %v279_v19 = vmax.bf16 %v271_v5, %v263_v4  ;;  %v364_v20 = vshrl.u32 %v263_v4, 16  ;;  %v1162_v62 = vld [vmem:[%s968_s26 + $0x30] sm:$0xf]  ;;  %v442_v3 = vld [vmem:[%s997_s29 + $0x28] sm:$0xf] }
  0x3b   : > { %v367_v21 = vshll.u32 %v263_v4, 16  ;;  %v601_v22 = vmax.bf16 %v1082_v7, %v584_v11  ;;  %v417_v24 = vmax.bf16 %v362_v18, %v278_v2  ;;  %v694_v28 = vor.u32 %v693_v14, %v690_v10  ;;  %v1146_v7 = vld [vmem:[%s956_s20 + $0x30] sm:$0xf] }
  0x3c   : > { %v525_v26 = vrot.slane %v524_v12, 4  ;;  %v366_v29 = vrot.slane %v364_v20, 4  ;;  %v373_v31 = vshll.u32 %v287_v16, 16  ;;  %v532_v34 = vshrl.u32 %v1133_v8, 16  ;;  %v1174_v12 = vld [vmem:[%s956_s20 + $0x38] sm:$0xf] }
  0x3d   : > { %v369_v30 = vrot.slane %v367_v21, 5  ;;  %v618_v13 = vmax.bf16 %v881_v17, %v601_v22  ;;  %v433_v35 = vmax.bf16 %v1104_v38, %v417_v24  ;;  %v699_v37 = vrot.slane %v697_v15, 5  ;;  %v272_v17 = vld [vmem:[%s962_s23 + $0x30] sm:$0xf]  ;;  %v892_v22 = vld [vmem:[%s956_s20 + $0x3c] sm:$0x1] }
  0x3e   : > { %v530_v36 = vsel %vm984_vm2, %v525_v26, %v529_v9  ;;  %v375_v39 = vrot.slane %v373_v31, 5  ;;  %v534_v40 = vrot.slane %v532_v34, 4  ;;  %v535_v41 = vshll.u32 %v1133_v8, 16  ;;  %v883_v24 = vld [vmem:[%s962_s23 + $0x30] sm:$0xf] }
  0x3f   : > { %v370_v33 = vor.u32 %v369_v30, %v366_v29  ;;  %v754_v44 = vmax.bf16 %v686_v6, %v618_v13  ;;  %v449_v45 = vmax.bf16 %v441_v25, %v433_v35  ;;  %v695_v46 = vrot.slane %v694_v28, 4  ;;  %v265_v13 = vld [vmem:[%s956_s20 + $0x38] sm:$0xf]  ;;  %v289_v35 = vld [vmem:[%s956_s20 + $0x3c] sm:$0x1] }
  0x40   : > { %v541_v38 = vshll.u32 %v458_v32, 16  ;;  %v537_v27 = vrot.slane %v535_v41, 5  ;;  %v702_v48 = vshrl.u32 %v1146_v7, 16  ;;  %v705_v50 = vshll.u32 %v1146_v7, 16 }
  0x41   : > { %v371_v47 = vrot.slane %v370_v33, 4  ;;  %763 = vst.msk [vmem:[%s1049_s7 + $0xc] sm:$0xf] %vm759_vm3, %v754_v44  ;;  %v585_v52 = vmax.bf16 %v530_v36, %v449_v45  ;;  %v711_v54 = vshll.u32 %v891_v42, 16  ;;  %v700_v0 = vsel %vm984_vm2, %v695_v46, %v699_v37  ;;  %v428_v46 = vld [vmem:[%s968_s26 + $0x38] sm:$0xf] }
  0x42   : > { %v543_v53 = vrot.slane %v541_v38, 5  ;;  %v538_v59 = vor.u32 %v537_v27, %v534_v40  ;;  %v704_v60 = vrot.slane %v702_v48, 4  ;;  %v707_v61 = vrot.slane %v705_v50, 5  ;;  %v273_v40 = vld [vmem:[%s962_s23 + $0x38] sm:$0xf] }
  0x43   : > { %v376_v58 = vsel %vm984_vm2, %v371_v47, %v375_v39  ;;  %v602_v63 = vmax.bf16 %v1112_v49, %v585_v52  ;;  %v378_v2 = vshrl.u32 %v1153_v51, 16  ;;  %v381_v5 = vshll.u32 %v1153_v51, 16  ;;  %v459_v49 = vld [vmem:[%s968_s26 + $0x34] sm:$0x1]  ;;  %v443_v52 = vld [vmem:[%s997_s29 + $0x30] sm:$0xf] }
  0x44   : > { %v418_v1 = vmax.bf16 %v376_v58, %v279_v19  ;;  %v539_v57 = vrot.slane %v538_v59, 4  ;;  %v708_v4 = vor.u32 %v707_v61, %v704_v60  ;;  %v387_v6 = vshll.u32 %v288_v55, 16  ;;  %v460_v55 = vld [vmem:[%s968_s26 + $0x3c] sm:$0x1]  ;;  %v877_v60 = vld [vmem:[%s956_s20 + $0x40] sm:$0xf] }
  0x45   : > { %v619_v43 = vmax.bf16 %v882_v56, %v602_v63  ;;  %v380_v10 = vrot.slane %v378_v2, 4  ;;  %v546_v11 = vshrl.u32 %v1162_v62, 16  ;;  %v713_v16 = vrot.slane %v711_v54, 5  ;;  %v893_v2 = vld [vmem:[%s956_s20 + $0x44] sm:$0x1] }
  0x46   : > { %v434_v9 = vmax.bf16 %v1133_v8, %v418_v1  ;;  %v544_v14 = vsel %vm984_vm2, %v539_v57, %v543_v53  ;;  %v709_v15 = vrot.slane %v708_v4, 4  ;;  %v383_v18 = vrot.slane %v381_v5, 5 }
  0x47   : > { %v755_v19 = vmax.bf16 %v700_v0, %v619_v43  ;;  %v548_v21 = vrot.slane %v546_v11, 4  ;;  %v549_v8 = vshll.u32 %v1162_v62, 16  ;;  %v389_v26 = vrot.slane %v387_v6, 5 }
  0x48   : > { %v450_v20 = vmax.bf16 %v442_v3, %v434_v9  ;;  %v384_v25 = vor.u32 %v383_v18, %v380_v10  ;;  %v555_v28 = vshll.u32 %v459_v49, 16  ;;  %v716_v29 = vshrl.u32 %v1174_v12, 16  ;;  %v884_v18 = vld [vmem:[%s962_s23 + $0x38] sm:$0xf] }
  0x49   : > { %764 = vst.msk [vmem:[%s1049_s7 + $0x10] sm:$0xf] %vm759_vm3, %v755_v19  ;;  %v280_v31 = vmax.bf16 %v272_v17, %v1153_v51  ;;  %v551_v32 = vrot.slane %v549_v8, 5  ;;  %v719_v34 = vshll.u32 %v1174_v12, 16  ;;  %v714_v36 = vsel %vm984_vm2, %v709_v15, %v713_v16 }
  0x4a   : > { %v586_v30 = vmax.bf16 %v544_v14, %v450_v20  ;;  %v385_v37 = vrot.slane %v384_v25, 4  ;;  %v718_v33 = vrot.slane %v716_v29, 4  ;;  %v725_v39 = vshll.u32 %v892_v22, 16 }
  0x4b   : > { %v552_v42 = vor.u32 %v551_v32, %v548_v21  ;;  %v557_v44 = vrot.slane %v555_v28, 5  ;;  %v721_v45 = vrot.slane %v719_v34, 5  ;;  %v392_v47 = vshrl.u32 %v265_v13, 16  ;;  %v444_v28 = vld [vmem:[%s997_s29 + $0x38] sm:$0xf] }
  0x4c   : > { %v603_v41 = vmax.bf16 %v1146_v7, %v586_v30  ;;  %v390_v38 = vsel %vm984_vm2, %v385_v37, %v389_v26  ;;  %v395_v27 = vshll.u32 %v265_v13, 16  ;;  %v401_v48 = vshll.u32 %v289_v35, 16  ;;  %v885_v37 = vld [vmem:[%s962_s23 + $0x40] sm:$0xf] }
  0x4d   : > { %v419_v51 = vmax.bf16 %v390_v38, %v280_v31  ;;  %v553_v53 = vrot.slane %v552_v42, 4  ;;  %v281_v54 = vmax.bf16 %v273_v40, %v265_v13  ;;  %v722_v7 = vor.u32 %v721_v45, %v718_v33 }
  0x4e   : > { %v620_v50 = vmax.bf16 %v883_v24, %v603_v41  ;;  %v394_v56 = vrot.slane %v392_v47, 4  ;;  %v397_v58 = vrot.slane %v395_v27, 5  ;;  %v560_v59 = vshrl.u32 %v428_v46, 16 }
  0x4f   : > { %v435_v63 = vmax.bf16 %v1162_v62, %v419_v51  ;;  %v558_v0 = vsel %vm984_vm2, %v553_v53, %v557_v44  ;;  %v403_v1 = vrot.slane %v401_v48, 5  ;;  %v563_v4 = vshll.u32 %v428_v46, 16 }
  0x50   : > { %v756_v61 = vmax.bf16 %v714_v36, %v620_v50  ;;  %v398_v3 = vor.u32 %v397_v58, %v394_v56  ;;  %v562_v57 = vrot.slane %v560_v59, 4  ;;  %v569_v5 = vshll.u32 %v460_v55, 16 }
  0x51   : > { %v451_v6 = vmax.bf16 %v443_v52, %v435_v63  ;;  %v727_v43 = vrot.slane %v725_v39, 5  ;;  %v730_v9 = vshrl.u32 %v877_v60, 16  ;;  %v733_v10 = vshll.u32 %v877_v60, 16 }
  0x52   : > { %765 = vst.msk [vmem:[%s1049_s7 + $0x14] sm:$0xf] %vm759_vm3, %v756_v61  ;;  %v723_v49 = vrot.slane %v722_v7, 4  ;;  %v399_v11 = vrot.slane %v398_v3, 4  ;;  %v565_v62 = vrot.slane %v563_v4, 5  ;;  %v739_v14 = vshll.u32 %v893_v2, 16 }
  0x53   : > { %v587_v15 = vmax.bf16 %v558_v0, %v451_v6  ;;  %v732_v16 = vrot.slane %v730_v9, 4  ;;  %v735_v17 = vrot.slane %v733_v10, 5  ;;  %v571_v21 = vrot.slane %v569_v5, 5 }
  0x54   : > { %v404_v19 = vsel %vm984_vm2, %v399_v11, %v403_v1  ;;  %v566_v20 = vor.u32 %v565_v62, %v562_v57  ;;  %v741_v25 = vrot.slane %v739_v14, 5  ;;  %v728_v26 = vsel %vm984_vm2, %v723_v49, %v727_v43 }
  0x55   : > { %v604_v8 = vmax.bf16 %v1174_v12, %v587_v15  ;;  %v420_v22 = vmax.bf16 %v404_v19, %v281_v54  ;;  %v736_v24 = vor.u32 %v735_v17, %v732_v16 }
  0x56   : > { %v567_v29 = vrot.slane %v566_v20, 4 }
  0x57   : > { %v621_v30 = vmax.bf16 %v884_v18, %v604_v8  ;;  %v436_v31 = vmax.bf16 %v428_v46, %v420_v22  ;;  %v737_v32 = vrot.slane %v736_v24, 4 }
  0x58   : > { %v572_v34 = vsel %vm984_vm2, %v567_v29, %v571_v21 }
  0x59   : > { %v757_v13 = vmax.bf16 %v728_v26, %v621_v30  ;;  %v452_v35 = vmax.bf16 %v444_v28, %v436_v31  ;;  %v742_v12 = vsel %vm984_vm2, %v737_v32, %v741_v25 }
  0x5b   : > { %766 = vst.msk [vmem:[%s1049_s7 + $0x18] sm:$0xf] %vm759_vm3, %v757_v13  ;;  %v588_v36 = vmax.bf16 %v572_v34, %v452_v35 }
  0x5d   : > { %v605_v33 = vmax.bf16 %v877_v60, %v588_v36 }
  0x5f   : > { %v622_v39 = vmax.bf16 %v885_v37, %v605_v33 }
  0x61   : > { %v758_v40 = vmax.bf16 %v742_v12, %v622_v39 }
  0x63   : > { %767 = vst.msk [vmem:[%s1049_s7 + $0x1c] sm:$0xf] %vm759_vm3, %v758_v40 }
  0x64 PF: > { %s14_s15 = sadd.s32 1, %s912_s15  }
  0x65   : > { %p11_p4 = scmp.ge.s32.totalorder %s14_s15, 4  }
  0x67   :  { %13 = sbr.rel (!%p11_p4) target bundleno = 1 (0x1), region = 77 }

// kernel: resnet_forward.21
= control target key start
LH: loop header
LB: loop body
LE: loop exit
PB: predicated region body
PF: predicated region fallthrough
CT: control target
= control target key end

     0   :  { %vm347_vm0 = vcmask 261120   ;;  %s1241_s1 = inlined_call_operand.vmem [shape: bf16[288,128], index: 1, kind: input, shape index: {}]   ;;  %s1242_s0 = inlined_call_operand.vmem [shape: bf16[128,288], index: 0, kind: input, shape index: {}]   ;;  %s1243_s2 = inlined_call_operand.vmem [shape: f32[1,128], index: 2, kind: input, shape index: {}]   ;;  %s1244_s3 = inlined_call_operand.vmem [shape: bf16[128,128], index: 3, kind: output, shape index: {}]  }
   0x1   :  { %v980_v0 = vld [vmem:[%s1241_s1 + $0x40] sm:$0xff]   ;;  %v982_v2 = vld [vmem:[%s1241_s1 + $0x48] sm:$0xff]   ;;  %v984_v4 = vld [vmem:[%s1241_s1 + $0x50] sm:$0xff]  }
   0x2   :  { %v981_v1 = vld [vmem:[%s1241_s1] sm:$0xff]   ;;  %870 = vmatprep.subr.bf16.mxu0 %v980_v0  ;;  %964 = vmatprep.subr.bf16.mxu1 %v980_v0  ;;  %v983_v3 = vld [vmem:[%s1241_s1 + $0x8] sm:$0xff]   ;;  %v985_v5 = vld [vmem:[%s1241_s1 + $0x10] sm:$0xff]  }
   0x3   :  { %871 = vmatpush3.bf16.msra.mxu0 %v981_v1  ;;  %972 = vmatpush3.bf16.msra.mxu1 %v981_v1  ;;  %v986_v6 = vld [vmem:[%s1241_s1 + $0x58] sm:$0xff]   ;;  %v988_v8 = vld [vmem:[%s1241_s1 + $0x60] sm:$0xff]   ;;  %v990_v10 = vld [vmem:[%s1241_s1 + $0x68] sm:$0xff]  }
   0x4   :  { %872 = vmatprep.subr.bf16.mxu0 %v982_v2  ;;  %965 = vmatprep.subr.bf16.mxu1 %v982_v2  ;;  %v987_v7 = vld [vmem:[%s1241_s1 + $0x18] sm:$0xff]   ;;  %v989_v9 = vld [vmem:[%s1241_s1 + $0x20] sm:$0xff]   ;;  %v991_v13 = vld [vmem:[%s1241_s1 + $0x28] sm:$0xff]  }
   0x5   :  { %v998_v11 = vld [vmem:[%s1242_s0 + $0x4] ss:$12 sps:$4 sm:$0xff]   ;;  %v1001_v12 = vld [vmem:[%s1242_s0 + $0x94] ss:$12 sps:$4 sm:$0xff]   ;;  %v994_v16 = vld [vmem:[%s1241_s1 + $0x78] sm:$0xff]  }
   0x6   :  { %v992_v14 = vld [vmem:[%s1241_s1 + $0x70] sm:$0xff]   ;;  %404 = vmatprep.mubr.bf16.mxu0 %v998_v11  ;;  %452 = vmatprep.mubr.bf16.mxu1 %v1001_v12  ;;  %v995_v17 = vld [vmem:[%s1241_s1 + $0x38] sm:$0xff]   ;;  %v996_v18 = vld [vmem:[%s1242_s0] ss:$12 sps:$4 sm:$0xff]  }
   0x7   :  { %873 = vmatpush3.bf16.msra.mxu0 %v983_v3  ;;  %973 = vmatpush3.bf16.msra.mxu1 %v983_v3  ;;  %v993_v15 = vld [vmem:[%s1241_s1 + $0x30] sm:$0xff]   ;;  %v1002_v19 = vld [vmem:[%s1241_s1 + $0x80] sm:$0xff]   ;;  %v1003_v21 = vld [vmem:[%s1242_s0 + $0x1c] ss:$12 sps:$4 sm:$0xff]  }
   0x8   :  { %874 = vmatprep.subr.bf16.mxu0 %v984_v4  ;;  %966 = vmatprep.subr.bf16.mxu1 %v984_v4  ;;  %v999_v20 = vld [vmem:[%s1242_s0 + $0x90] ss:$12 sps:$4 sm:$0xff]   ;;  %v1005_v22 = vld [vmem:[%s1242_s0 + $0xac] ss:$12 sps:$4 sm:$0xff]   ;;  %v1008_v25 = vld [vmem:[%s1242_s0 + $0xa8] ss:$12 sps:$4 sm:$0xff]  }
   0x9   :  { %v1009_v23 = vld [vmem:[%s1241_s1 + $0x88] sm:$0xff]   ;;  %v1007_v24 = vld [vmem:[%s1242_s0 + $0x18] ss:$12 sps:$4 sm:$0xff]   ;;  %v1010_v26 = vld [vmem:[%s1242_s0 + $0x34] ss:$12 sps:$4 sm:$0xff]  }
   0xa   :  { %v1012_v27 = vld [vmem:[%s1242_s0 + $0x8] ss:$12 sps:$4 sm:$0xff]   ;;  %v1013_v28 = vld [vmem:[%s1242_s0 + $0x30] ss:$12 sps:$4 sm:$0xff]   ;;  %v1014_v29 = vld [vmem:[%s1242_s0 + $0x20] ss:$12 sps:$4 sm:$0xff]  }
   0xb   :  { %875 = vmatpush3.bf16.msra.mxu0 %v985_v5  ;;  %974 = vmatpush3.bf16.msra.mxu1 %v985_v5  ;;  %v1015_v30 = vld [vmem:[%s1242_s0 + $0x4c] ss:$12 sps:$4 sm:$0xff]   ;;  %v1018_v32 = vld [vmem:[%s1242_s0 + $0x48] ss:$12 sps:$4 sm:$0xff]   ;;  %v1019_v33 = vld [vmem:[%s1242_s0 + $0x50] ss:$12 sps:$4 sm:$0xff]  }
   0xc   :  { %876 = vmatprep.subr.bf16.mxu0 %v986_v6  ;;  %967 = vmatprep.subr.bf16.mxu1 %v986_v6  ;;  %v1017_v31 = vld [vmem:[%s1242_s0 + $0x38] ss:$12 sps:$4 sm:$0xff]   ;;  %v1022_v35 = vld [vmem:[%s1242_s0 + $0x68] ss:$12 sps:$4 sm:$0xff]   ;;  %v1023_v36 = vld [vmem:[%s1242_s0 + $0x60] ss:$12 sps:$4 sm:$0xff]  }
   0xd   :  { %v1020_v34 = vld [vmem:[%s1242_s0 + $0x64] ss:$12 sps:$4 sm:$0xff]   ;;  %v1024_v37 = vld [vmem:[%s1242_s0 + $0x80] ss:$12 sps:$4 sm:$0xff]   ;;  %v1025_v38 = vld [vmem:[%s1242_s0 + $0x7c] ss:$12 sps:$4 sm:$0xff]  }
   0xe   :  { %v1027_v39 = vld [vmem:[%s1242_s0 + $0x98] ss:$12 sps:$4 sm:$0xff]   ;;  %v1029_v41 = vld [vmem:[%s1242_s0 + $0xb0] ss:$12 sps:$4 sm:$0xff]   ;;  %v1195_v4 = vld [vmem:[%s1243_s2] ss:$0 sm:$0xff] }
   0xf   :  { %877 = vmatpush3.bf16.msra.mxu0 %v987_v7  ;;  %975 = vmatpush3.bf16.msra.mxu1 %v987_v7  ;;  %v1028_v40 = vld [vmem:[%s1242_s0 + $0x78] ss:$12 sps:$4 sm:$0xff]  }
  0x10   :  { %878 = vmatprep.subr.bf16.mxu0 %v988_v8  ;;  %968 = vmatprep.subr.bf16.mxu1 %v988_v8 }
  0x13   :  { %879 = vmatpush3.bf16.msra.mxu0 %v989_v9  ;;  %976 = vmatpush3.bf16.msra.mxu1 %v989_v9 }
  0x14   :  { %880 = vmatprep.subr.bf16.mxu0 %v990_v10  ;;  %969 = vmatprep.subr.bf16.mxu1 %v990_v10 }
  0x17   :  { %881 = vmatpush3.bf16.msra.mxu0 %v991_v13  ;;  %977 = vmatpush3.bf16.msra.mxu1 %v991_v13 }
  0x18   :  { %882 = vmatprep.subr.bf16.mxu0 %v992_v14  ;;  %970 = vmatprep.subr.bf16.mxu1 %v992_v14 }
  0x1b   :  { %883 = vmatpush3.bf16.msra.mxu0 %v993_v15  ;;  %978 = vmatpush3.bf16.msra.mxu1 %v993_v15 }
  0x1c   :  { %884 = vmatprep.subr.bf16.mxu0 %v994_v16  ;;  %971 = vmatprep.subr.bf16.mxu1 %v994_v16 }
  0x1f   :  { %885 = vmatpush3.bf16.msra.mxu0 %v995_v17  ;;  %979 = vmatpush3.bf16.msra.mxu1 %v995_v17 }
  0x20   :  { %944 = vmatprep.subr.bf16.mxu1 %v1002_v19 }
  0x22   :  { %405 = vmatmul.mubr.bf16.vlgmr.msra.gmra.mrb[0].mxu0 %v996_v18  ;;  %453 = vmatmul.mubr.bf16.vlgmr.msra.gmra.mrb[0].mxu1 %v999_v20 }
  0x23   :  { %945 = vmatpush3.bf16.msra.mxu1 %v1002_v19  ;;  %412 = vmatprep.mubr.bf16.mxu0 %v1003_v21 }
  0x24   :  { %460 = vmatprep.mubr.bf16.mxu1 %v1005_v22  ;;  %946 = vmatprep.subr.bf16.mxu1 %v1009_v23 }
  0x27   :  { %947 = vmatpush3.bf16.msra.mxu1 %v1009_v23 }
  0x2a   :  { %413 = vmatmul.mubr.bf16.gmra.mrb[4].mxu0 %v1007_v24  ;;  %461 = vmatmul.mubr.bf16.gmra.mrb[4].mxu1 %v1008_v25 }
  0x2b   :  { %420 = vmatprep.mubr.bf16.mxu0 %v1010_v26  ;;  %948 = vmatprep.mubr.msk.bf16.mxu1 %vm347_vm0, %v1012_v27 }
  0x32   :  { %421 = vmatmul.mubr.bf16.gmra.mrb[8].mxu0 %v1013_v28  ;;  %949 = vmatmul.mubr.msk.bf16.vlgmr.msra.gmra.mrb[8].mxu1 %vm347_vm0, %v1014_v29 }
  0x33   :  { %428 = vmatprep.mubr.bf16.mxu0 %v1015_v30  ;;  %952 = vmatprep.mubr.msk.bf16.mxu1 %vm347_vm0, %v1017_v31 }
  0x3a   :  { %429 = vmatmul.mubr.bf16.gmra.mrb[12].mxu0 %v1018_v32  ;;  %953 = vmatmul.mubr.msk.bf16.gmra.mrb[12].mxu1 %vm347_vm0, %v1019_v33 }
  0x3b   :  { %436 = vmatprep.mubr.bf16.mxu0 %v1020_v34  ;;  %956 = vmatprep.mubr.msk.bf16.mxu1 %vm347_vm0, %v1022_v35 }
  0x42   :  { %437 = vmatmul.mubr.bf16.gmra.mrb[16].mxu0 %v1023_v36  ;;  %957 = vmatmul.mubr.msk.bf16.gmra.mrb[16].mxu1 %vm347_vm0, %v1024_v37 }
  0x43   :  { %444 = vmatprep.mubr.bf16.mxu0 %v1025_v38  ;;  %960 = vmatprep.mubr.msk.bf16.mxu1 %vm347_vm0, %v1027_v39 }
  0x4a   :  { %445 = vmatmul.mubr.bf16.gmra.mrb[20].mxu0 %v1028_v40  ;;  %961 = vmatmul.mubr.msk.bf16.gmra.mrb[20].mxu1 %vm347_vm0, %v1029_v41 }
  0xf5   :  { %v886_v42 = vpop.f32.mrb[0].mxu0  ;;  %v922_v43 = vpop.f32.mrb[0].mxu1 }
  0xf6   :  { %v887_v44 = vpop.f32.mrb[1].mxu0  ;;  %v923_v45 = vpop.f32.mrb[1].mxu1 }
  0xf7   :  { %v888_v46 = vadd.f32 %v887_v44, %v886_v42  ;;  %v1184_v47 = vadd.f32 %v923_v45, %v922_v43  ;;  %v889_v48 = vpop.f32.mrb[2].mxu0  ;;  %v925_v49 = vpop.f32.mrb[2].mxu1 }
  0xf8   :  { %v890_v50 = vpop.f32.mrb[3].mxu0  ;;  %v926_v51 = vpop.f32.mrb[3].mxu1 }
  0xf9   :  { %v891_v52 = vadd.f32 %v890_v50, %v889_v48  ;;  %v1186_v53 = vadd.f32 %v926_v51, %v925_v49 }
  0xfd   :  { %v892_v54 = vpop.f32.mrb[4].mxu0  ;;  %v928_v55 = vpop.f32.mrb[4].mxu1 }
  0xfe   :  { %v893_v56 = vpop.f32.mrb[5].mxu0  ;;  %v929_v57 = vpop.f32.mrb[5].mxu1 }
  0xff   :  { %v894_v58 = vadd.f32 %v893_v56, %v892_v54  ;;  %v1188_v59 = vadd.f32 %v929_v57, %v928_v55  ;;  %v895_v60 = vpop.f32.mrb[6].mxu0  ;;  %v931_v61 = vpop.f32.mrb[6].mxu1 }
 0x100   :  { %v896_v62 = vpop.f32.mrb[7].mxu0  ;;  %v932_v63 = vpop.f32.mrb[7].mxu1 }
 0x101   :  { %v897_v0 = vadd.f32 %v896_v62, %v895_v60  ;;  %v1190_v1 = vadd.f32 %v932_v63, %v931_v61 }
 0x105   :  { %v898_v2 = vpop.f32.mrb[8].mxu0  ;;  %v950_v3 = vpop.f32.mrb[8].mxu1 }
 0x106   :  { %v512_v5 = vadd.f32 %v950_v3, %v894_v58  ;;  %v899_v6 = vpop.f32.mrb[9].mxu0  ;;  %v503_v7 = vpop.f32.mrb[9].mxu1 }
 0x107   :  { %v900_v8 = vadd.f32 %v899_v6, %v898_v2  ;;  %v504_v9 = vadd.f32 %v888_v46, %v503_v7  ;;  %v901_v10 = vpop.f32.mrb[10].mxu0  ;;  %v951_v11 = vpop.f32.mrb[10].mxu1 }
 0x108   :  { %v626_v12 = vadd.f32 %v1195_v4, %v512_v5  ;;  %v515_v13 = vadd.f32 %v951_v11, %v897_v0  ;;  %v902_v14 = vpop.f32.mrb[11].mxu0  ;;  %v506_v15 = vpop.f32.mrb[11].mxu1 }
 0x109   :  { %v624_v16 = vadd.f32 %v1195_v4, %v504_v9  ;;  %v903_v17 = vadd.f32 %v902_v14, %v901_v10  ;;  %v507_v18 = vadd.f32 %v891_v52, %v506_v15 }
 0x10a   :  { %v627_v19 = vadd.f32 %v1195_v4, %v515_v13  ;;  %v642_v21 = vmax.f32 %v626_v12, 0.0 }
 0x10b   :  { %v625_v20 = vadd.f32 %v1195_v4, %v507_v18  ;;  %v640_v23 = vmax.f32 %v624_v16, 0.0 }
 0x10c   :  { %v643_v22 = vmax.f32 %v627_v19, 0.0 }
 0x10d   :  { %v641_v24 = vmax.f32 %v625_v20, 0.0  ;;  %v904_v25 = vpop.f32.mrb[12].mxu0  ;;  %v954_v26 = vpop.f32.mrb[12].mxu1 }
 0x10e   :  { %v831_v27 = vpack.c.bf16 %v643_v22, %v642_v21  ;;  %v905_v28 = vpop.f32.mrb[13].mxu0  ;;  %v519_v29 = vpop.f32.mrb[13].mxu1 }
 0x10f   :  { %v826_v30 = vpack.c.bf16 %v641_v24, %v640_v23  ;;  %v906_v31 = vadd.f32 %v905_v28, %v904_v25  ;;  %v520_v32 = vadd.f32 %v900_v8, %v519_v29  ;;  %v907_v33 = vpop.f32.mrb[14].mxu0  ;;  %v955_v34 = vpop.f32.mrb[14].mxu1 }
 0x110   :  { %863 = vst [vmem:[%s1244_s3 + $0x8] sm:$0xff] %v831_v27   ;;  %v908_v35 = vpop.f32.mrb[15].mxu0  ;;  %v522_v36 = vpop.f32.mrb[15].mxu1 }
 0x111   :  { %827 = vst [vmem:[%s1244_s3] sm:$0xff] %v826_v30   ;;  %v528_v37 = vadd.f32 %v954_v26, %v906_v31  ;;  %v628_v38 = vadd.f32 %v1195_v4, %v520_v32  ;;  %v909_v39 = vadd.f32 %v908_v35, %v907_v33  ;;  %v523_v40 = vadd.f32 %v903_v17, %v522_v36 }
 0x113   :  { %v630_v41 = vadd.f32 %v1195_v4, %v528_v37  ;;  %v531_v42 = vadd.f32 %v955_v34, %v909_v39  ;;  %v629_v43 = vadd.f32 %v1195_v4, %v523_v40  ;;  %v644_v44 = vmax.f32 %v628_v38, 0.0 }
 0x115   :  { %v631_v45 = vadd.f32 %v1195_v4, %v531_v42  ;;  %v645_v46 = vmax.f32 %v629_v43, 0.0  ;;  %v910_v48 = vpop.f32.mrb[16].mxu0  ;;  %v958_v49 = vpop.f32.mrb[16].mxu1  ;;  %v646_v52 = vmax.f32 %v630_v41, 0.0 }
 0x116   :  { %v911_v50 = vpop.f32.mrb[17].mxu0  ;;  %v535_v51 = vpop.f32.mrb[17].mxu1 }
 0x117   :  { %v647_v54 = vmax.f32 %v631_v45, 0.0  ;;  %v836_v55 = vpack.c.bf16 %v645_v46, %v644_v44  ;;  %v912_v56 = vadd.f32 %v911_v50, %v910_v48  ;;  %v913_v57 = vpop.f32.mrb[18].mxu0  ;;  %v959_v58 = vpop.f32.mrb[18].mxu1 }
 0x118   :  { %v914_v60 = vpop.f32.mrb[19].mxu0  ;;  %v538_v61 = vpop.f32.mrb[19].mxu1 }
 0x119   :  { %v841_v62 = vpack.c.bf16 %v647_v54, %v646_v52  ;;  %864 = vst [vmem:[%s1244_s3 + $0x10] sm:$0xff] %v836_v55   ;;  %v536_v63 = vadd.f32 %v912_v56, %v535_v51  ;;  %v915_v0 = vadd.f32 %v914_v60, %v913_v57 }
 0x11b   :  { %865 = vst [vmem:[%s1244_s3 + $0x18] sm:$0xff] %v841_v62   ;;  %v632_v2 = vadd.f32 %v1195_v4, %v536_v63  ;;  %v539_v3 = vadd.f32 %v915_v0, %v538_v61 }
 0x11d   :  { %v633_v5 = vadd.f32 %v1195_v4, %v539_v3  ;;  %v916_v6 = vpop.f32.mrb[20].mxu0  ;;  %v962_v7 = vpop.f32.mrb[20].mxu1  ;;  %v648_v11 = vmax.f32 %v632_v2, 0.0 }
 0x11e   :  { %v560_v8 = vadd.f32 %v962_v7, %v1188_v59  ;;  %v917_v9 = vpop.f32.mrb[21].mxu0  ;;  %v551_v10 = vpop.f32.mrb[21].mxu1 }
 0x11f   :  { %v649_v12 = vmax.f32 %v633_v5, 0.0  ;;  %v918_v13 = vadd.f32 %v917_v9, %v916_v6  ;;  %v552_v14 = vadd.f32 %v1184_v47, %v551_v10  ;;  %v919_v15 = vpop.f32.mrb[22].mxu0  ;;  %v963_v16 = vpop.f32.mrb[22].mxu1 }
 0x120   :  { %v638_v17 = vadd.f32 %v1195_v4, %v560_v8  ;;  %v563_v18 = vadd.f32 %v963_v16, %v1190_v1  ;;  %v920_v19 = vpop.f32.mrb[23].mxu0  ;;  %v554_v20 = vpop.f32.mrb[23].mxu1 }
 0x121   :  { %v846_v21 = vpack.c.bf16 %v649_v12, %v648_v11  ;;  %v544_v22 = vadd.f32 %v958_v49, %v918_v13  ;;  %v921_v23 = vadd.f32 %v920_v19, %v919_v15  ;;  %v636_v59 = vadd.f32 %v1195_v4, %v552_v14 }
 0x122   :  { %v639_v24 = vadd.f32 %v1195_v4, %v563_v18  ;;  %v555_v25 = vadd.f32 %v1186_v53, %v554_v20  ;;  %v654_v27 = vmax.f32 %v638_v17, 0.0 }
 0x123   :  { %866 = vst [vmem:[%s1244_s3 + $0x20] sm:$0xff] %v846_v21   ;;  %v634_v47 = vadd.f32 %v1195_v4, %v544_v22  ;;  %v547_v26 = vadd.f32 %v959_v58, %v921_v23  ;;  %v652_v30 = vmax.f32 %v636_v59, 0.0 }
 0x124   :  { %v655_v1 = vmax.f32 %v639_v24, 0.0  ;;  %v637_v28 = vadd.f32 %v1195_v4, %v555_v25 }
 0x125   :  { %v635_v29 = vadd.f32 %v1195_v4, %v547_v26  ;;  %v650_v33 = vmax.f32 %v634_v47, 0.0 }
 0x126   :  { %v861_v31 = vpack.c.bf16 %v655_v1, %v654_v27  ;;  %v653_v32 = vmax.f32 %v637_v28, 0.0 }
 0x127   :  { %v651_v34 = vmax.f32 %v635_v29, 0.0 }
 0x128   :  { %869 = vst [vmem:[%s1244_s3 + $0x38] sm:$0xff] %v861_v31   ;;  %v856_v53 = vpack.c.bf16 %v653_v32, %v652_v30 }
 0x129   :  { %v851_v35 = vpack.c.bf16 %v651_v34, %v650_v33 }
 0x12a   :  { %868 = vst [vmem:[%s1244_s3 + $0x30] sm:$0xff] %v856_v53  }
 0x12b   :  { %867 = vst [vmem:[%s1244_s3 + $0x28] sm:$0xff] %v851_v35  }

// kernel: resnet_forward.22
= control target key start
LH: loop header
LB: loop body
LE: loop exit
PB: predicated region body
PF: predicated region fallthrough
CT: control target
= control target key end

     0   :  { %vm350_vm0 = vcmask 261120   ;;  %s1360_s1 = inlined_call_operand.vmem [shape: bf16[288,128], index: 1, kind: input, shape index: {}]   ;;  %s1361_s0 = inlined_call_operand.vmem [shape: bf16[128,288], index: 0, kind: input, shape index: {}]   ;;  %s1362_s3 = inlined_call_operand.vmem [shape: bf16[128,128], index: 3, kind: input, shape index: {}]   ;;  %s1363_s2 = inlined_call_operand.vmem [shape: f32[1,128], index: 2, kind: input, shape index: {}]   ;;  %s1364_s4 = inlined_call_operand.vmem [shape: bf16[128,128], index: 4, kind: output, shape index: {}]  }
   0x1   :  { %v1070_v0 = vld [vmem:[%s1360_s1 + $0x40] sm:$0xff]   ;;  %v1072_v2 = vld [vmem:[%s1360_s1 + $0x48] sm:$0xff]   ;;  %v1074_v4 = vld [vmem:[%s1360_s1 + $0x50] sm:$0xff]  }
   0x2   :  { %v1071_v1 = vld [vmem:[%s1360_s1] sm:$0xff]   ;;  %960 = vmatprep.subr.bf16.mxu0 %v1070_v0  ;;  %1054 = vmatprep.subr.bf16.mxu1 %v1070_v0  ;;  %v1073_v3 = vld [vmem:[%s1360_s1 + $0x8] sm:$0xff]   ;;  %v1075_v5 = vld [vmem:[%s1360_s1 + $0x10] sm:$0xff]  }
   0x3   :  { %961 = vmatpush3.bf16.msra.mxu0 %v1071_v1  ;;  %1062 = vmatpush3.bf16.msra.mxu1 %v1071_v1  ;;  %v1076_v6 = vld [vmem:[%s1360_s1 + $0x58] sm:$0xff]   ;;  %v1078_v8 = vld [vmem:[%s1360_s1 + $0x60] sm:$0xff]   ;;  %v1080_v10 = vld [vmem:[%s1360_s1 + $0x68] sm:$0xff]  }
   0x4   :  { %962 = vmatprep.subr.bf16.mxu0 %v1072_v2  ;;  %1055 = vmatprep.subr.bf16.mxu1 %v1072_v2  ;;  %v1077_v7 = vld [vmem:[%s1360_s1 + $0x18] sm:$0xff]   ;;  %v1079_v9 = vld [vmem:[%s1360_s1 + $0x20] sm:$0xff]   ;;  %v1081_v13 = vld [vmem:[%s1360_s1 + $0x28] sm:$0xff]  }
   0x5   :  { %v1088_v11 = vld [vmem:[%s1361_s0 + $0x4] ss:$12 sps:$4 sm:$0xff]   ;;  %v1091_v12 = vld [vmem:[%s1361_s0 + $0x94] ss:$12 sps:$4 sm:$0xff]   ;;  %v1084_v16 = vld [vmem:[%s1360_s1 + $0x78] sm:$0xff]  }
   0x6   :  { %v1082_v14 = vld [vmem:[%s1360_s1 + $0x70] sm:$0xff]   ;;  %407 = vmatprep.mubr.bf16.mxu0 %v1088_v11  ;;  %455 = vmatprep.mubr.bf16.mxu1 %v1091_v12  ;;  %v1085_v17 = vld [vmem:[%s1360_s1 + $0x38] sm:$0xff]   ;;  %v1086_v18 = vld [vmem:[%s1361_s0] ss:$12 sps:$4 sm:$0xff]  }
   0x7   :  { %963 = vmatpush3.bf16.msra.mxu0 %v1073_v3  ;;  %1063 = vmatpush3.bf16.msra.mxu1 %v1073_v3  ;;  %v1083_v15 = vld [vmem:[%s1360_s1 + $0x30] sm:$0xff]   ;;  %v1092_v19 = vld [vmem:[%s1360_s1 + $0x80] sm:$0xff]   ;;  %v1093_v21 = vld [vmem:[%s1361_s0 + $0x1c] ss:$12 sps:$4 sm:$0xff]  }
   0x8   :  { %964 = vmatprep.subr.bf16.mxu0 %v1074_v4  ;;  %1056 = vmatprep.subr.bf16.mxu1 %v1074_v4  ;;  %v1089_v20 = vld [vmem:[%s1361_s0 + $0x90] ss:$12 sps:$4 sm:$0xff]   ;;  %v1095_v22 = vld [vmem:[%s1361_s0 + $0xac] ss:$12 sps:$4 sm:$0xff]   ;;  %v1098_v25 = vld [vmem:[%s1361_s0 + $0xa8] ss:$12 sps:$4 sm:$0xff]  }
   0x9   :  { %v1099_v23 = vld [vmem:[%s1360_s1 + $0x88] sm:$0xff]   ;;  %v1097_v24 = vld [vmem:[%s1361_s0 + $0x18] ss:$12 sps:$4 sm:$0xff]   ;;  %v1100_v26 = vld [vmem:[%s1361_s0 + $0x34] ss:$12 sps:$4 sm:$0xff]  }
   0xa   :  { %v1102_v27 = vld [vmem:[%s1361_s0 + $0x8] ss:$12 sps:$4 sm:$0xff]   ;;  %v1103_v28 = vld [vmem:[%s1361_s0 + $0x30] ss:$12 sps:$4 sm:$0xff]   ;;  %v1104_v29 = vld [vmem:[%s1361_s0 + $0x20] ss:$12 sps:$4 sm:$0xff]  }
   0xb   :  { %965 = vmatpush3.bf16.msra.mxu0 %v1075_v5  ;;  %1064 = vmatpush3.bf16.msra.mxu1 %v1075_v5  ;;  %v1105_v30 = vld [vmem:[%s1361_s0 + $0x4c] ss:$12 sps:$4 sm:$0xff]   ;;  %v1108_v32 = vld [vmem:[%s1361_s0 + $0x48] ss:$12 sps:$4 sm:$0xff]   ;;  %v1109_v33 = vld [vmem:[%s1361_s0 + $0x50] ss:$12 sps:$4 sm:$0xff]  }
   0xc   :  { %966 = vmatprep.subr.bf16.mxu0 %v1076_v6  ;;  %1057 = vmatprep.subr.bf16.mxu1 %v1076_v6  ;;  %v1107_v31 = vld [vmem:[%s1361_s0 + $0x38] ss:$12 sps:$4 sm:$0xff]   ;;  %v1112_v35 = vld [vmem:[%s1361_s0 + $0x68] ss:$12 sps:$4 sm:$0xff]   ;;  %v1113_v36 = vld [vmem:[%s1361_s0 + $0x60] ss:$12 sps:$4 sm:$0xff]  }
   0xd   :  { %v1110_v34 = vld [vmem:[%s1361_s0 + $0x64] ss:$12 sps:$4 sm:$0xff]   ;;  %v1114_v37 = vld [vmem:[%s1361_s0 + $0x80] ss:$12 sps:$4 sm:$0xff]   ;;  %v1115_v38 = vld [vmem:[%s1361_s0 + $0x7c] ss:$12 sps:$4 sm:$0xff]  }
   0xe   :  { %v1117_v39 = vld [vmem:[%s1361_s0 + $0x98] ss:$12 sps:$4 sm:$0xff]   ;;  %v1119_v41 = vld [vmem:[%s1361_s0 + $0xb0] ss:$12 sps:$4 sm:$0xff]   ;;  %v946_v2 = vld [vmem:[%s1362_s3 + $0x8] sm:$0xff]  }
   0xf   :  { %967 = vmatpush3.bf16.msra.mxu0 %v1077_v7  ;;  %1065 = vmatpush3.bf16.msra.mxu1 %v1077_v7  ;;  %v1118_v40 = vld [vmem:[%s1361_s0 + $0x78] ss:$12 sps:$4 sm:$0xff]   ;;  %v1296_v6 = vld [vmem:[%s1363_s2] ss:$0 sm:$0xff] }
  0x10   :  { %968 = vmatprep.subr.bf16.mxu0 %v1078_v8  ;;  %1058 = vmatprep.subr.bf16.mxu1 %v1078_v8  ;;  %v875_v3 = vld [vmem:[%s1362_s3] sm:$0xff]   ;;  %v880_v8 = vunpack.c.l.bf16 %v946_v2 }
  0x13   :  { %969 = vmatpush3.bf16.msra.mxu0 %v1079_v9  ;;  %1066 = vmatpush3.bf16.msra.mxu1 %v1079_v9 }
  0x14   :  { %970 = vmatprep.subr.bf16.mxu0 %v1080_v10  ;;  %1059 = vmatprep.subr.bf16.mxu1 %v1080_v10 }
  0x17   :  { %971 = vmatpush3.bf16.msra.mxu0 %v1081_v13  ;;  %1067 = vmatpush3.bf16.msra.mxu1 %v1081_v13  ;;  %v876_v13 = vunpack.c.l.bf16 %v875_v3 }
  0x18   :  { %972 = vmatprep.subr.bf16.mxu0 %v1082_v14  ;;  %1060 = vmatprep.subr.bf16.mxu1 %v1082_v14 }
  0x1b   :  { %973 = vmatpush3.bf16.msra.mxu0 %v1083_v15  ;;  %1068 = vmatpush3.bf16.msra.mxu1 %v1083_v15 }
  0x1c   :  { %974 = vmatprep.subr.bf16.mxu0 %v1084_v16  ;;  %1061 = vmatprep.subr.bf16.mxu1 %v1084_v16 }
  0x1f   :  { %975 = vmatpush3.bf16.msra.mxu0 %v1085_v17  ;;  %1069 = vmatpush3.bf16.msra.mxu1 %v1085_v17 }
  0x20   :  { %1034 = vmatprep.subr.bf16.mxu1 %v1092_v19 }
  0x22   :  { %408 = vmatmul.mubr.bf16.vlgmr.msra.gmra.mrb[0].mxu0 %v1086_v18  ;;  %456 = vmatmul.mubr.bf16.vlgmr.msra.gmra.mrb[0].mxu1 %v1089_v20  ;;  %v881_v18 = vunpack.c.h.bf16 %v946_v2 }
  0x23   :  { %1035 = vmatpush3.bf16.msra.mxu1 %v1092_v19  ;;  %415 = vmatprep.mubr.bf16.mxu0 %v1093_v21 }
  0x24   :  { %463 = vmatprep.mubr.bf16.mxu1 %v1095_v22  ;;  %1036 = vmatprep.subr.bf16.mxu1 %v1099_v23 }
  0x27   :  { %1037 = vmatpush3.bf16.msra.mxu1 %v1099_v23 }
  0x2a   :  { %416 = vmatmul.mubr.bf16.gmra.mrb[4].mxu0 %v1097_v24  ;;  %464 = vmatmul.mubr.bf16.gmra.mrb[4].mxu1 %v1098_v25  ;;  %v877_v24 = vunpack.c.h.bf16 %v875_v3 }
  0x2b   :  { %423 = vmatprep.mubr.bf16.mxu0 %v1100_v26  ;;  %1038 = vmatprep.mubr.msk.bf16.mxu1 %vm350_vm0, %v1102_v27 }
  0x32   :  { %424 = vmatmul.mubr.bf16.gmra.mrb[8].mxu0 %v1103_v28  ;;  %1039 = vmatmul.mubr.msk.bf16.vlgmr.msra.gmra.mrb[8].mxu1 %vm350_vm0, %v1104_v29 }
  0x33   :  { %431 = vmatprep.mubr.bf16.mxu0 %v1105_v30  ;;  %1042 = vmatprep.mubr.msk.bf16.mxu1 %vm350_vm0, %v1107_v31 }
  0x3a   :  { %432 = vmatmul.mubr.bf16.gmra.mrb[12].mxu0 %v1108_v32  ;;  %1043 = vmatmul.mubr.msk.bf16.gmra.mrb[12].mxu1 %vm350_vm0, %v1109_v33  ;;  %v948_v33 = vld [vmem:[%s1362_s3 + $0x18] sm:$0xff]  }
  0x3b   :  { %439 = vmatprep.mubr.bf16.mxu0 %v1110_v34  ;;  %1046 = vmatprep.mubr.msk.bf16.mxu1 %vm350_vm0, %v1112_v35  ;;  %v947_v34 = vld [vmem:[%s1362_s3 + $0x10] sm:$0xff]  }
  0x42   :  { %440 = vmatmul.mubr.bf16.gmra.mrb[16].mxu0 %v1113_v36  ;;  %1047 = vmatmul.mubr.msk.bf16.gmra.mrb[16].mxu1 %vm350_vm0, %v1114_v37 }
  0x43   :  { %447 = vmatprep.mubr.bf16.mxu0 %v1115_v38  ;;  %1050 = vmatprep.mubr.msk.bf16.mxu1 %vm350_vm0, %v1117_v39 }
  0x4a   :  { %448 = vmatmul.mubr.bf16.gmra.mrb[20].mxu0 %v1118_v40  ;;  %1051 = vmatmul.mubr.msk.bf16.gmra.mrb[20].mxu1 %vm350_vm0, %v1119_v41 }
  0xf5   :  { %v976_v42 = vpop.f32.mrb[0].mxu0  ;;  %v1012_v43 = vpop.f32.mrb[0].mxu1 }
  0xf6   :  { %v977_v44 = vpop.f32.mrb[1].mxu0  ;;  %v1013_v45 = vpop.f32.mrb[1].mxu1 }
  0xf7   :  { %v978_v46 = vadd.f32 %v977_v44, %v976_v42  ;;  %v1279_v47 = vadd.f32 %v1013_v45, %v1012_v43  ;;  %v979_v48 = vpop.f32.mrb[2].mxu0  ;;  %v1015_v49 = vpop.f32.mrb[2].mxu1 }
  0xf8   :  { %v980_v50 = vpop.f32.mrb[3].mxu0  ;;  %v1016_v51 = vpop.f32.mrb[3].mxu1 }
  0xf9   :  { %v981_v52 = vadd.f32 %v980_v50, %v979_v48  ;;  %v1281_v53 = vadd.f32 %v1016_v51, %v1015_v49  ;;  %v884_v48 = vunpack.c.l.bf16 %v947_v34 }
  0xfd   :  { %v982_v54 = vpop.f32.mrb[4].mxu0  ;;  %v1018_v55 = vpop.f32.mrb[4].mxu1 }
  0xfe   :  { %v983_v56 = vpop.f32.mrb[5].mxu0  ;;  %v1019_v57 = vpop.f32.mrb[5].mxu1 }
  0xff   :  { %v984_v58 = vadd.f32 %v983_v56, %v982_v54  ;;  %v1283_v59 = vadd.f32 %v1019_v57, %v1018_v55  ;;  %v985_v60 = vpop.f32.mrb[6].mxu0  ;;  %v1021_v61 = vpop.f32.mrb[6].mxu1  ;;  %v885_v57 = vunpack.c.h.bf16 %v947_v34  ;;  %v950_v34 = vld [vmem:[%s1362_s3 + $0x28] sm:$0xff]  }
 0x100   :  { %v986_v62 = vpop.f32.mrb[7].mxu0  ;;  %v1022_v63 = vpop.f32.mrb[7].mxu1 }
 0x101   :  { %v987_v0 = vadd.f32 %v986_v62, %v985_v60  ;;  %v1285_v1 = vadd.f32 %v1022_v63, %v1021_v61  ;;  %v889_v61 = vunpack.c.h.bf16 %v948_v33 }
 0x105   :  { %v988_v4 = vpop.f32.mrb[8].mxu0  ;;  %v1040_v5 = vpop.f32.mrb[8].mxu1 }
 0x106   :  { %v515_v7 = vadd.f32 %v1040_v5, %v984_v58  ;;  %v989_v9 = vpop.f32.mrb[9].mxu0  ;;  %v506_v10 = vpop.f32.mrb[9].mxu1  ;;  %v949_v5 = vld [vmem:[%s1362_s3 + $0x20] sm:$0xff]  }
 0x107   :  { %v990_v11 = vadd.f32 %v989_v9, %v988_v4  ;;  %v507_v12 = vadd.f32 %v978_v46, %v506_v10  ;;  %v991_v14 = vpop.f32.mrb[10].mxu0  ;;  %v1041_v15 = vpop.f32.mrb[10].mxu1  ;;  %v888_v46 = vunpack.c.l.bf16 %v948_v33 }
 0x108   :  { %v629_v16 = vadd.f32 %v1296_v6, %v515_v7  ;;  %v518_v17 = vadd.f32 %v1041_v15, %v987_v0  ;;  %v992_v19 = vpop.f32.mrb[11].mxu0  ;;  %v509_v20 = vpop.f32.mrb[11].mxu1 }
 0x109   :  { %v627_v21 = vadd.f32 %v1296_v6, %v507_v12  ;;  %v993_v22 = vadd.f32 %v992_v19, %v991_v14  ;;  %v510_v23 = vadd.f32 %v981_v52, %v509_v20 }
 0x10a   :  { %v677_v25 = vadd.f32 %v880_v8, %v629_v16  ;;  %v630_v26 = vadd.f32 %v1296_v6, %v518_v17  ;;  %v892_v16 = vunpack.c.l.bf16 %v949_v5 }
 0x10b   :  { %v675_v27 = vadd.f32 %v876_v13, %v627_v21  ;;  %v628_v28 = vadd.f32 %v1296_v6, %v510_v23 }
 0x10c   :  { %v678_v29 = vadd.f32 %v881_v18, %v630_v26  ;;  %v693_v35 = vmax.f32 %v677_v25, 0.0 }
 0x10d   :  { %v676_v30 = vadd.f32 %v877_v24, %v628_v28  ;;  %v994_v31 = vpop.f32.mrb[12].mxu0  ;;  %v1044_v32 = vpop.f32.mrb[12].mxu1  ;;  %v691_v39 = vmax.f32 %v675_v27, 0.0  ;;  %v893_v27 = vunpack.c.h.bf16 %v949_v5  ;;  %v952_v28 = vld [vmem:[%s1362_s3 + $0x38] sm:$0xff]  }
 0x10e   :  { %v694_v36 = vmax.f32 %v678_v29, 0.0  ;;  %v995_v37 = vpop.f32.mrb[13].mxu0  ;;  %v522_v38 = vpop.f32.mrb[13].mxu1  ;;  %v951_v29 = vld [vmem:[%s1362_s3 + $0x30] sm:$0xff]  }
 0x10f   :  { %v692_v40 = vmax.f32 %v676_v30, 0.0  ;;  %v996_v41 = vadd.f32 %v995_v37, %v994_v31  ;;  %v523_v42 = vadd.f32 %v990_v11, %v522_v38  ;;  %v997_v43 = vpop.f32.mrb[14].mxu0  ;;  %v1045_v44 = vpop.f32.mrb[14].mxu1 }
 0x110   :  { %v914_v45 = vpack.c.bf16 %v694_v36, %v693_v35  ;;  %v998_v49 = vpop.f32.mrb[15].mxu0  ;;  %v525_v50 = vpop.f32.mrb[15].mxu1  ;;  %v904_v36 = vunpack.c.l.bf16 %v952_v28 }
 0x111   :  { %v909_v51 = vpack.c.bf16 %v692_v40, %v691_v39  ;;  %v531_v52 = vadd.f32 %v1044_v32, %v996_v41  ;;  %v631_v54 = vadd.f32 %v1296_v6, %v523_v42  ;;  %v999_v55 = vadd.f32 %v998_v49, %v997_v43 }
 0x112   :  { %953 = vst [vmem:[%s1364_s4 + $0x8] sm:$0xff] %v914_v45   ;;  %v526_v56 = vadd.f32 %v993_v22, %v525_v50  ;;  %v900_v39 = vunpack.c.l.bf16 %v951_v29  ;;  %v905_v45 = vunpack.c.h.bf16 %v952_v28  ;;  %v896_v49 = vunpack.c.l.bf16 %v950_v34 }
 0x113   :  { %910 = vst [vmem:[%s1364_s4] sm:$0xff] %v909_v51   ;;  %v633_v58 = vadd.f32 %v1296_v6, %v531_v52  ;;  %v534_v60 = vadd.f32 %v1045_v44, %v999_v55  ;;  %v679_v62 = vadd.f32 %v884_v48, %v631_v54 }
 0x114   :  { %v632_v63 = vadd.f32 %v1296_v6, %v526_v56 }
 0x115   :  { %v681_v0 = vadd.f32 %v888_v46, %v633_v58  ;;  %v634_v2 = vadd.f32 %v1296_v6, %v534_v60  ;;  %v1000_v3 = vpop.f32.mrb[16].mxu0  ;;  %v1048_v4 = vpop.f32.mrb[16].mxu1  ;;  %v695_v14 = vmax.f32 %v679_v62, 0.0  ;;  %v901_v60 = vunpack.c.h.bf16 %v951_v29 }
 0x116   :  { %v680_v7 = vadd.f32 %v885_v57, %v632_v63  ;;  %v1001_v8 = vpop.f32.mrb[17].mxu0  ;;  %v538_v9 = vpop.f32.mrb[17].mxu1 }
 0x117   :  { %v682_v10 = vadd.f32 %v889_v61, %v634_v2  ;;  %v1002_v11 = vadd.f32 %v1001_v8, %v1000_v3  ;;  %v1003_v12 = vpop.f32.mrb[18].mxu0  ;;  %v1049_v13 = vpop.f32.mrb[18].mxu1  ;;  %v697_v19 = vmax.f32 %v681_v0, 0.0  ;;  %v897_v0 = vunpack.c.h.bf16 %v950_v34 }
 0x118   :  { %v696_v15 = vmax.f32 %v680_v7, 0.0  ;;  %v1004_v17 = vpop.f32.mrb[19].mxu0  ;;  %v541_v18 = vpop.f32.mrb[19].mxu1 }
 0x119   :  { %v698_v20 = vmax.f32 %v682_v10, 0.0  ;;  %v539_v21 = vadd.f32 %v1002_v11, %v538_v9  ;;  %v1005_v22 = vadd.f32 %v1004_v17, %v1003_v12 }
 0x11a   :  { %v919_v23 = vpack.c.bf16 %v696_v15, %v695_v14 }
 0x11b   :  { %v924_v24 = vpack.c.bf16 %v698_v20, %v697_v19  ;;  %v635_v25 = vadd.f32 %v1296_v6, %v539_v21  ;;  %v542_v26 = vadd.f32 %v1005_v22, %v541_v18 }
 0x11c   :  { %954 = vst [vmem:[%s1364_s4 + $0x10] sm:$0xff] %v919_v23  }
 0x11d   :  { %955 = vst [vmem:[%s1364_s4 + $0x18] sm:$0xff] %v924_v24   ;;  %v683_v30 = vadd.f32 %v892_v16, %v635_v25  ;;  %v636_v31 = vadd.f32 %v1296_v6, %v542_v26  ;;  %v1006_v32 = vpop.f32.mrb[20].mxu0  ;;  %v1052_v33 = vpop.f32.mrb[20].mxu1 }
 0x11e   :  { %v563_v35 = vadd.f32 %v1052_v33, %v1283_v59  ;;  %v1007_v37 = vpop.f32.mrb[21].mxu0  ;;  %v554_v38 = vpop.f32.mrb[21].mxu1 }
 0x11f   :  { %v684_v40 = vadd.f32 %v893_v27, %v636_v31  ;;  %v1008_v41 = vadd.f32 %v1007_v37, %v1006_v32  ;;  %v555_v42 = vadd.f32 %v1279_v47, %v554_v38  ;;  %v1009_v43 = vpop.f32.mrb[22].mxu0  ;;  %v1053_v44 = vpop.f32.mrb[22].mxu1  ;;  %v699_v46 = vmax.f32 %v683_v30, 0.0 }
 0x120   :  { %v641_v48 = vadd.f32 %v1296_v6, %v563_v35  ;;  %v566_v50 = vadd.f32 %v1053_v44, %v1285_v1  ;;  %v1010_v51 = vpop.f32.mrb[23].mxu0  ;;  %v557_v52 = vpop.f32.mrb[23].mxu1 }
 0x121   :  { %v700_v59 = vmax.f32 %v684_v40, 0.0  ;;  %v547_v54 = vadd.f32 %v1048_v4, %v1008_v41  ;;  %v639_v55 = vadd.f32 %v1296_v6, %v555_v42  ;;  %v1011_v56 = vadd.f32 %v1010_v51, %v1009_v43 }
 0x122   :  { %v689_v57 = vadd.f32 %v904_v36, %v641_v48  ;;  %v642_v58 = vadd.f32 %v1296_v6, %v566_v50  ;;  %v558_v47 = vadd.f32 %v1281_v53, %v557_v52 }
 0x123   :  { %v929_v61 = vpack.c.bf16 %v700_v59, %v699_v46  ;;  %v637_v62 = vadd.f32 %v1296_v6, %v547_v54  ;;  %v550_v63 = vadd.f32 %v1049_v13, %v1011_v56  ;;  %v687_v2 = vadd.f32 %v900_v39, %v639_v55 }
 0x124   :  { %v690_v1 = vadd.f32 %v905_v45, %v642_v58  ;;  %v640_v3 = vadd.f32 %v1296_v6, %v558_v47  ;;  %v705_v7 = vmax.f32 %v689_v57, 0.0 }
 0x125   :  { %956 = vst [vmem:[%s1364_s4 + $0x20] sm:$0xff] %v929_v61   ;;  %v685_v4 = vadd.f32 %v896_v49, %v637_v62  ;;  %v638_v5 = vadd.f32 %v1296_v6, %v550_v63  ;;  %v703_v10 = vmax.f32 %v687_v2, 0.0 }
 0x126   :  { %v706_v8 = vmax.f32 %v690_v1, 0.0  ;;  %v688_v53 = vadd.f32 %v901_v60, %v640_v3 }
 0x127   :  { %v686_v9 = vadd.f32 %v897_v0, %v638_v5  ;;  %v701_v13 = vmax.f32 %v685_v4, 0.0 }
 0x128   :  { %v944_v11 = vpack.c.bf16 %v706_v8, %v705_v7  ;;  %v704_v12 = vmax.f32 %v688_v53, 0.0 }
 0x129   :  { %v702_v14 = vmax.f32 %v686_v9, 0.0 }
 0x12a   :  { %959 = vst [vmem:[%s1364_s4 + $0x38] sm:$0xff] %v944_v11   ;;  %v939_v15 = vpack.c.bf16 %v704_v12, %v703_v10 }
 0x12b   :  { %v934_v16 = vpack.c.bf16 %v702_v14, %v701_v13 }
 0x12c   :  { %958 = vst [vmem:[%s1364_s4 + $0x30] sm:$0xff] %v939_v15  }
 0x12d   :  { %957 = vst [vmem:[%s1364_s4 + $0x28] sm:$0xff] %v934_v16  }

// kernel: resnet_forward.25
= control target key start
LH: loop header
LB: loop body
LE: loop exit
PB: predicated region body
PF: predicated region fallthrough
CT: control target
= control target key end

     0   :  { %vm209_vm0 = vcmask 261120   ;;  %s581_s1 = inlined_call_operand.vmem [shape: bf16[288,128], index: 1, kind: input, shape index: {}]   ;;  %s582_s0 = inlined_call_operand.vmem [shape: bf16[32,288], index: 0, kind: input, shape index: {}]   ;;  %s583_s2 = inlined_call_operand.vmem [shape: f32[1,128], index: 2, kind: input, shape index: {}]   ;;  %s584_s3 = inlined_call_operand.vmem [shape: bf16[32,128], index: 3, kind: output, shape index: {}]  }
   0x1   :  { %v454_v0 = vld [vmem:[%s581_s1 + $0x40] sm:$0xff]   ;;  %v456_v2 = vld [vmem:[%s581_s1 + $0x48] sm:$0xff]   ;;  %v458_v4 = vld [vmem:[%s581_s1 + $0x50] sm:$0xff]  }
   0x2   :  { %v455_v1 = vld [vmem:[%s581_s1] sm:$0xff]   ;;  %414 = vmatprep.subr.bf16.mxu0 %v454_v0  ;;  %v457_v3 = vld [vmem:[%s581_s1 + $0x8] sm:$0xff]   ;;  %v459_v5 = vld [vmem:[%s581_s1 + $0x10] sm:$0xff]  }
   0x3   :  { %415 = vmatpush3.bf16.msra.mxu0 %v455_v1  ;;  %v460_v6 = vld [vmem:[%s581_s1 + $0x58] sm:$0xff]   ;;  %v462_v8 = vld [vmem:[%s581_s1 + $0x60] sm:$0xff]   ;;  %v464_v11 = vld [vmem:[%s581_s1 + $0x68] sm:$0xff]  }
   0x4   :  { %416 = vmatprep.subr.bf16.mxu0 %v456_v2  ;;  %v461_v7 = vld [vmem:[%s581_s1 + $0x18] sm:$0xff]   ;;  %v468_v9 = vld [vmem:[%s581_s1 + $0x80] sm:$0xff]   ;;  %v465_v12 = vld [vmem:[%s581_s1 + $0x28] sm:$0xff]  }
   0x5   :  { %v463_v10 = vld [vmem:[%s581_s1 + $0x20] sm:$0xff]   ;;  %446 = vmatprep.subr.bf16.mxu1 %v468_v9  ;;  %v471_v13 = vld [vmem:[%s581_s1 + $0x88] sm:$0xff]   ;;  %v466_v14 = vld [vmem:[%s581_s1 + $0x70] sm:$0xff]  }
   0x6   :  { %447 = vmatpush3.bf16.msra.mxu1 %v468_v9  ;;  %v474_v15 = vld [vmem:[%s582_s0 + $0x4] ss:$12 sps:$4 sm:$0xff]   ;;  %v475_v16 = vld [vmem:[%s582_s0 + $0x8] ss:$12 sps:$4 sm:$0xff]   ;;  %v476_v17 = vld [vmem:[%s582_s0 + $0x20] ss:$12 sps:$4 sm:$0xff]  }
   0x7   :  { %417 = vmatpush3.bf16.msra.mxu0 %v457_v3  ;;  %448 = vmatprep.subr.bf16.mxu1 %v471_v13  ;;  %v467_v18 = vld [vmem:[%s581_s1 + $0x30] sm:$0xff]   ;;  %v469_v19 = vld [vmem:[%s581_s1 + $0x78] sm:$0xff]   ;;  %v472_v21 = vld [vmem:[%s582_s0] ss:$12 sps:$4 sm:$0xff]  }
   0x8   :  { %418 = vmatprep.subr.bf16.mxu0 %v458_v4  ;;  %248 = vmatprep.mubr.bf16.mxu0 %v474_v15  ;;  %v470_v20 = vld [vmem:[%s581_s1 + $0x38] sm:$0xff]   ;;  %v394_v33 = vld [vmem:[%s583_s2] ss:$0 sm:$0xff] }
   0x9   :  { %450 = vmatprep.mubr.msk.bf16.mxu1 %vm209_vm0, %v475_v16  ;;  %v477_v22 = vld [vmem:[%s582_s0 + $0x1c] ss:$12 sps:$4 sm:$0xff]   ;;  %v479_v23 = vld [vmem:[%s582_s0 + $0x18] ss:$12 sps:$4 sm:$0xff]  }
   0xa   :  { %449 = vmatpush3.bf16.msra.mxu1 %v471_v13 }
   0xb   :  { %419 = vmatpush3.bf16.msra.mxu0 %v459_v5 }
   0xc   :  { %420 = vmatprep.subr.bf16.mxu0 %v460_v6 }
   0xd   :  { %451 = vmatmul.mubr.msk.bf16.vlgmr.msra.gmra.mrb[0].mxu1 %vm209_vm0, %v476_v17 }
   0xf   :  { %421 = vmatpush3.bf16.msra.mxu0 %v461_v7 }
  0x10   :  { %422 = vmatprep.subr.bf16.mxu0 %v462_v8 }
  0x13   :  { %423 = vmatpush3.bf16.msra.mxu0 %v463_v10 }
  0x14   :  { %424 = vmatprep.subr.bf16.mxu0 %v464_v11 }
  0x17   :  { %425 = vmatpush3.bf16.msra.mxu0 %v465_v12 }
  0x18   :  { %426 = vmatprep.subr.bf16.mxu0 %v466_v14 }
  0x1b   :  { %427 = vmatpush3.bf16.msra.mxu0 %v467_v18 }
  0x1c   :  { %428 = vmatprep.subr.bf16.mxu0 %v469_v19 }
  0x1f   :  { %429 = vmatpush3.bf16.msra.mxu0 %v470_v20 }
  0x22   :  { %249 = vmatmul.mubr.bf16.vlgmr.msra.gmra.mrb[0].mxu0 %v472_v21 }
  0x23   :  { %256 = vmatprep.mubr.bf16.mxu0 %v477_v22 }
  0x2a   :  { %257 = vmatmul.mubr.bf16.gmra.mrb[4].mxu0 %v479_v23 }
  0xe0   :  { %v452_v24 = vpop.f32.mrb[0].mxu1 }
  0xe1   :  { %v299_v25 = vpop.f32.mrb[1].mxu1 }
  0xe2   :  { %v453_v26 = vpop.f32.mrb[2].mxu1 }
  0xe3   :  { %v302_v27 = vpop.f32.mrb[3].mxu1 }
  0xf5   :  { %v430_v28 = vpop.f32.mrb[0].mxu0 }
  0xf6   :  { %v431_v29 = vpop.f32.mrb[1].mxu0 }
  0xf7   :  { %v432_v30 = vadd.f32 %v431_v29, %v430_v28  ;;  %v433_v31 = vpop.f32.mrb[2].mxu0 }
  0xf8   :  { %v434_v32 = vpop.f32.mrb[3].mxu0 }
  0xf9   :  { %v435_v34 = vadd.f32 %v434_v32, %v433_v31  ;;  %v300_v35 = vadd.f32 %v432_v30, %v299_v25 }
  0xfb   :  { %v336_v36 = vadd.f32 %v394_v33, %v300_v35  ;;  %v303_v37 = vadd.f32 %v435_v34, %v302_v27 }
  0xfd   :  { %v337_v38 = vadd.f32 %v394_v33, %v303_v37  ;;  %v436_v39 = vpop.f32.mrb[4].mxu0  ;;  %v340_v41 = vmax.f32 %v336_v36, 0.0 }
  0xfe   :  { %v437_v40 = vpop.f32.mrb[5].mxu0 }
  0xff   :  { %v341_v42 = vmax.f32 %v337_v38, 0.0  ;;  %v438_v43 = vadd.f32 %v437_v40, %v436_v39  ;;  %v439_v44 = vpop.f32.mrb[6].mxu0 }
 0x100   :  { %v440_v45 = vpop.f32.mrb[7].mxu0 }
 0x101   :  { %v406_v46 = vpack.c.bf16 %v341_v42, %v340_v41  ;;  %v308_v47 = vadd.f32 %v452_v24, %v438_v43  ;;  %v441_v48 = vadd.f32 %v440_v45, %v439_v44 }
 0x103   :  { %407 = vst [vmem:[%s584_s3] sm:$0xff] %v406_v46   ;;  %v338_v49 = vadd.f32 %v394_v33, %v308_v47  ;;  %v311_v50 = vadd.f32 %v453_v26, %v441_v48 }
 0x105   :  { %v339_v51 = vadd.f32 %v394_v33, %v311_v50  ;;  %v342_v52 = vmax.f32 %v338_v49, 0.0 }
 0x107   :  { %v343_v53 = vmax.f32 %v339_v51, 0.0 }
 0x109   :  { %v411_v54 = vpack.c.bf16 %v343_v53, %v342_v52 }
 0x10b   :  { %413 = vst [vmem:[%s584_s3 + $0x8] sm:$0xff] %v411_v54  }

// kernel: resnet_forward.26
= control target key start
LH: loop header
LB: loop body
LE: loop exit
PB: predicated region body
PF: predicated region fallthrough
CT: control target
= control target key end

     0   :  { %vm393_vm0 = vcmask 785408   ;;  %s976_s1 = inlined_call_operand.vmem [shape: bf16[608,128], index: 1, kind: input, shape index: {}]   ;;  %s977_s0 = inlined_call_operand.vmem [shape: bf16[32,608], index: 0, kind: input, shape index: {}]   ;;  %s978_s2 = inlined_call_operand.vmem [shape: f32[1,128], index: 2, kind: input, shape index: {}]   ;;  %s979_s3 = inlined_call_operand.vmem [shape: bf16[32,128], index: 3, kind: output, shape index: {}]  }
   0x1   :  { %v751_v0 = vld [vmem:[%s976_s1 + $0x40] sm:$0xff]   ;;  %v755_v4 = vld [vmem:[%s976_s1 + $0x48] sm:$0xff]   ;;  %v759_v8 = vld [vmem:[%s976_s1 + $0x50] sm:$0xff]  }
   0x2   :  { %v752_v1 = vld [vmem:[%s976_s1 + $0xc0] sm:$0xff]   ;;  %671 = vmatprep.subr.bf16.mxu0 %v751_v0  ;;  %v756_v5 = vld [vmem:[%s976_s1 + $0xc8] sm:$0xff]   ;;  %v760_v9 = vld [vmem:[%s976_s1 + $0xd0] sm:$0xff]  }
   0x3   :  { %v753_v2 = vld [vmem:[%s976_s1] sm:$0xff]   ;;  %699 = vmatprep.subr.bf16.mxu1 %v752_v1  ;;  %v757_v6 = vld [vmem:[%s976_s1 + $0x8] sm:$0xff]   ;;  %v761_v10 = vld [vmem:[%s976_s1 + $0x10] sm:$0xff]  }
   0x4   :  { %v754_v3 = vld [vmem:[%s976_s1 + $0x80] sm:$0xff]   ;;  %672 = vmatpush3.bf16.msra.mxu0 %v753_v2  ;;  %v758_v7 = vld [vmem:[%s976_s1 + $0x88] sm:$0xff]   ;;  %v762_v11 = vld [vmem:[%s976_s1 + $0x90] sm:$0xff]  }
   0x5   :  { %700 = vmatpush3.bf16.msra.mxu1 %v754_v3  ;;  %673 = vmatprep.subr.bf16.mxu0 %v755_v4  ;;  %v763_v12 = vld [vmem:[%s976_s1 + $0x58] sm:$0xff]   ;;  %v767_v16 = vld [vmem:[%s976_s1 + $0x60] sm:$0xff]   ;;  %v771_v20 = vld [vmem:[%s976_s1 + $0x68] sm:$0xff]  }
   0x6   :  { %701 = vmatprep.subr.bf16.mxu1 %v756_v5  ;;  %v764_v13 = vld [vmem:[%s976_s1 + $0xd8] sm:$0xff]   ;;  %v768_v17 = vld [vmem:[%s976_s1 + $0xe0] sm:$0xff]   ;;  %v772_v21 = vld [vmem:[%s976_s1 + $0xe8] sm:$0xff]  }
   0x7   :  { %v765_v14 = vld [vmem:[%s976_s1 + $0x18] sm:$0xff]   ;;  %v769_v18 = vld [vmem:[%s976_s1 + $0x20] sm:$0xff]   ;;  %v773_v22 = vld [vmem:[%s976_s1 + $0x28] sm:$0xff]  }
   0x8   :  { %674 = vmatpush3.bf16.msra.mxu0 %v757_v6  ;;  %v766_v15 = vld [vmem:[%s976_s1 + $0x98] sm:$0xff]   ;;  %v770_v19 = vld [vmem:[%s976_s1 + $0xa0] sm:$0xff]   ;;  %v774_v23 = vld [vmem:[%s976_s1 + $0xa8] sm:$0xff]  }
   0x9   :  { %702 = vmatpush3.bf16.msra.mxu1 %v758_v7  ;;  %675 = vmatprep.subr.bf16.mxu0 %v759_v8  ;;  %v775_v24 = vld [vmem:[%s976_s1 + $0x70] sm:$0xff]   ;;  %v779_v28 = vld [vmem:[%s976_s1 + $0x78] sm:$0xff]   ;;  %v788_v35 = vld [vmem:[%s977_s0 + $0xc] ss:$20 sps:$4 sm:$0xff]  }
   0xa   :  { %703 = vmatprep.subr.bf16.mxu1 %v760_v9  ;;  %v776_v25 = vld [vmem:[%s976_s1 + $0xf0] sm:$0xff]   ;;  %v780_v29 = vld [vmem:[%s976_s1 + $0xf8] sm:$0xff]   ;;  %v789_v36 = vld [vmem:[%s976_s1 + $0x100] sm:$0xff]   ;;  %481 = vmatprep.mubr.bf16.mxu1 %v788_v35 }
   0xb   :  { %v777_v26 = vld [vmem:[%s976_s1 + $0x30] sm:$0xff]   ;;  %v781_v30 = vld [vmem:[%s976_s1 + $0x38] sm:$0xff]   ;;  %v790_v37 = vld [vmem:[%s976_s1 + $0x108] sm:$0xff]  }
   0xc   :  { %676 = vmatpush3.bf16.msra.mxu0 %v761_v10  ;;  %v778_v27 = vld [vmem:[%s976_s1 + $0xb0] sm:$0xff]   ;;  %v782_v31 = vld [vmem:[%s976_s1 + $0xb8] sm:$0xff]   ;;  %v792_v39 = vld [vmem:[%s977_s0 + $0x2c] ss:$20 sps:$4 sm:$0xff]  }
   0xd   :  { %704 = vmatpush3.bf16.msra.mxu1 %v762_v11  ;;  %677 = vmatprep.subr.bf16.mxu0 %v763_v12  ;;  %v783_v32 = vld [vmem:[%s977_s0] ss:$20 sps:$4 sm:$0xff]   ;;  %v785_v33 = vld [vmem:[%s977_s0 + $0x4] ss:$20 sps:$4 sm:$0xff]   ;;  %v786_v34 = vld [vmem:[%s977_s0 + $0x8] ss:$20 sps:$4 sm:$0xff]  }
   0xe   :  { %705 = vmatprep.subr.bf16.mxu1 %v764_v13  ;;  %432 = vmatprep.mubr.bf16.mxu0 %v785_v33  ;;  %v791_v38 = vld [vmem:[%s976_s1 + $0x110] sm:$0xff]   ;;  %v797_v41 = vld [vmem:[%s977_s0 + $0x28] ss:$20 sps:$4 sm:$0xff]   ;;  %v799_v45 = vld [vmem:[%s976_s1 + $0x120] sm:$0xff]  }
   0xf   :  { %v794_v40 = vld [vmem:[%s977_s0 + $0x34] ss:$20 sps:$4 sm:$0xff]   ;;  %v798_v42 = vld [vmem:[%s977_s0 + $0x30] ss:$20 sps:$4 sm:$0xff]   ;;  %v796_v43 = vld [vmem:[%s976_s1 + $0x118] sm:$0xff]  }
  0x10   :  { %678 = vmatpush3.bf16.msra.mxu0 %v765_v14  ;;  %v801_v44 = vld [vmem:[%s977_s0 + $0x10] ss:$20 sps:$4 sm:$0xff]   ;;  %v800_v46 = vld [vmem:[%s976_s1 + $0x128] sm:$0xff]   ;;  %v651_v13 = vld [vmem:[%s978_s2] ss:$0 sm:$0xff] }
  0x11   :  { %706 = vmatpush3.bf16.msra.mxu1 %v766_v15  ;;  %679 = vmatprep.subr.bf16.mxu0 %v767_v16  ;;  %v802_v47 = vld [vmem:[%s977_s0 + $0x38] ss:$20 sps:$4 sm:$0xff]  }
  0x12   :  { %707 = vmatprep.subr.bf16.mxu1 %v768_v17 }
  0x14   :  { %680 = vmatpush3.bf16.msra.mxu0 %v769_v18 }
  0x15   :  { %708 = vmatpush3.bf16.msra.mxu1 %v770_v19  ;;  %681 = vmatprep.subr.bf16.mxu0 %v771_v20 }
  0x16   :  { %709 = vmatprep.subr.bf16.mxu1 %v772_v21 }
  0x18   :  { %682 = vmatpush3.bf16.msra.mxu0 %v773_v22 }
  0x19   :  { %710 = vmatpush3.bf16.msra.mxu1 %v774_v23  ;;  %683 = vmatprep.subr.bf16.mxu0 %v775_v24 }
  0x1a   :  { %711 = vmatprep.subr.bf16.mxu1 %v776_v25 }
  0x1c   :  { %684 = vmatpush3.bf16.msra.mxu0 %v777_v26 }
  0x1d   :  { %712 = vmatpush3.bf16.msra.mxu1 %v778_v27  ;;  %685 = vmatprep.subr.bf16.mxu0 %v779_v28 }
  0x1e   :  { %713 = vmatprep.subr.bf16.mxu1 %v780_v29 }
  0x20   :  { %686 = vmatpush3.bf16.msra.mxu0 %v781_v30 }
  0x21   :  { %714 = vmatpush3.bf16.msra.mxu1 %v782_v31  ;;  %735 = vmatprep.subr.bf16.mxu0 %v789_v36 }
  0x23   :  { %433 = vmatmul.mubr.bf16.vlgmr.msra.gmra.mrb[0].mxu0 %v783_v32 }
  0x24   :  { %482 = vmatmul.mubr.bf16.vlgmr.msra.gmra.mrb[0].mxu1 %v786_v34  ;;  %736 = vmatpush3.bf16.msra.mxu0 %v789_v36 }
  0x25   :  { %737 = vmatprep.subr.bf16.mxu0 %v790_v37  ;;  %440 = vmatprep.mubr.bf16.mxu0 %v792_v39 }
  0x26   :  { %489 = vmatprep.mubr.bf16.mxu1 %v794_v40 }
  0x28   :  { %738 = vmatpush3.bf16.msra.mxu0 %v790_v37 }
  0x29   :  { %739 = vmatprep.subr.bf16.mxu0 %v791_v38 }
  0x2b   :  { %441 = vmatmul.mubr.bf16.gmra.mrb[4].mxu0 %v797_v41 }
  0x2c   :  { %490 = vmatmul.mubr.bf16.gmra.mrb[4].mxu1 %v798_v42  ;;  %740 = vmatpush3.bf16.msra.mxu0 %v791_v38 }
  0x2d   :  { %747 = vmatprep.mubr.msk.bf16.mxu0 %vm393_vm0, %v801_v44  ;;  %741 = vmatprep.subr.bf16.mxu0 %v796_v43 }
  0x30   :  { %742 = vmatpush3.bf16.msra.mxu0 %v796_v43 }
  0x31   :  { %743 = vmatprep.subr.bf16.mxu0 %v799_v45 }
  0x34   :  { %744 = vmatpush3.bf16.msra.mxu0 %v799_v45 }
  0x35   :  { %745 = vmatprep.subr.bf16.mxu0 %v800_v46 }
  0x38   :  { %746 = vmatpush3.bf16.msra.mxu0 %v800_v46 }
  0x3b   :  { %748 = vmatmul.mubr.msk.bf16.vlgmr.msra.gmra.mrb[8].mxu0 %vm393_vm0, %v802_v47 }
  0xf6   :  { %v687_v48 = vpop.f32.mrb[0].mxu0 }
  0xf7   :  { %v715_v49 = vpop.f32.mrb[0].mxu1  ;;  %v688_v50 = vpop.f32.mrb[1].mxu0 }
  0xf8   :  { %v689_v51 = vadd.f32 %v688_v50, %v687_v48  ;;  %v716_v52 = vpop.f32.mrb[1].mxu1  ;;  %v690_v53 = vpop.f32.mrb[2].mxu0 }
  0xf9   :  { %v717_v54 = vadd.f32 %v716_v52, %v715_v49  ;;  %v718_v55 = vpop.f32.mrb[2].mxu1  ;;  %v691_v56 = vpop.f32.mrb[3].mxu0 }
  0xfa   :  { %v692_v57 = vadd.f32 %v691_v56, %v690_v53  ;;  %v719_v58 = vpop.f32.mrb[3].mxu1 }
  0xfb   :  { %v720_v59 = vadd.f32 %v719_v58, %v718_v55  ;;  %v484_v60 = vadd.f32 %v717_v54, %v689_v51 }
  0xfd   :  { %v487_v61 = vadd.f32 %v720_v59, %v692_v57 }
  0xfe   :  { %v693_v62 = vpop.f32.mrb[4].mxu0 }
  0xff   :  { %v721_v63 = vpop.f32.mrb[4].mxu1  ;;  %v694_v0 = vpop.f32.mrb[5].mxu0 }
 0x100   :  { %v695_v1 = vadd.f32 %v694_v0, %v693_v62  ;;  %v722_v2 = vpop.f32.mrb[5].mxu1  ;;  %v696_v3 = vpop.f32.mrb[6].mxu0 }
 0x101   :  { %v723_v4 = vadd.f32 %v722_v2, %v721_v63  ;;  %v724_v5 = vpop.f32.mrb[6].mxu1  ;;  %v697_v6 = vpop.f32.mrb[7].mxu0 }
 0x102   :  { %v698_v7 = vadd.f32 %v697_v6, %v696_v3  ;;  %v725_v8 = vpop.f32.mrb[7].mxu1 }
 0x103   :  { %v726_v9 = vadd.f32 %v725_v8, %v724_v5  ;;  %v492_v10 = vadd.f32 %v723_v4, %v695_v1 }
 0x105   :  { %v495_v11 = vadd.f32 %v726_v9, %v698_v7 }
 0x10e   :  { %v749_v12 = vpop.f32.mrb[8].mxu0 }
 0x10f   :  { %v541_v14 = vadd.f32 %v749_v12, %v492_v10  ;;  %v532_v15 = vpop.f32.mrb[9].mxu0 }
 0x110   :  { %v533_v16 = vadd.f32 %v532_v15, %v484_v60  ;;  %v750_v17 = vpop.f32.mrb[10].mxu0 }
 0x111   :  { %v571_v18 = vadd.f32 %v651_v13, %v541_v14  ;;  %v544_v19 = vadd.f32 %v750_v17, %v495_v11  ;;  %v535_v20 = vpop.f32.mrb[11].mxu0 }
 0x112   :  { %v569_v21 = vadd.f32 %v651_v13, %v533_v16  ;;  %v536_v22 = vadd.f32 %v535_v20, %v487_v61 }
 0x113   :  { %v572_v23 = vadd.f32 %v651_v13, %v544_v19  ;;  %v575_v25 = vmax.f32 %v571_v18, 0.0 }
 0x114   :  { %v570_v24 = vadd.f32 %v651_v13, %v536_v22  ;;  %v573_v27 = vmax.f32 %v569_v21, 0.0 }
 0x115   :  { %v576_v26 = vmax.f32 %v572_v23, 0.0 }
 0x116   :  { %v574_v28 = vmax.f32 %v570_v24, 0.0 }
 0x117   :  { %v668_v29 = vpack.c.bf16 %v576_v26, %v575_v25 }
 0x118   :  { %v663_v30 = vpack.c.bf16 %v574_v28, %v573_v27 }
 0x119   :  { %670 = vst [vmem:[%s979_s3 + $0x8] sm:$0xff] %v668_v29  }
 0x11a   :  { %664 = vst [vmem:[%s979_s3] sm:$0xff] %v663_v30  }

// kernel: resnet_forward.27
= control target key start
LH: loop header
LB: loop body
LE: loop exit
PB: predicated region body
PF: predicated region fallthrough
CT: control target
= control target key end

     0   :  { %vm377_vm0 = vcmask 523264   ;;  %s944_s1 = inlined_call_operand.vmem [shape: bf16[576,128], index: 1, kind: input, shape index: {}]   ;;  %s945_s0 = inlined_call_operand.vmem [shape: bf16[32,576], index: 0, kind: input, shape index: {}]   ;;  %s946_s2 = inlined_call_operand.vmem [shape: f32[1,128], index: 2, kind: input, shape index: {}]   ;;  %s947_s3 = inlined_call_operand.vmem [shape: bf16[32,128], index: 3, kind: output, shape index: {}]  }
   0x1   :  { %v727_v0 = vld [vmem:[%s944_s1 + $0x40] sm:$0xff]   ;;  %v731_v4 = vld [vmem:[%s944_s1 + $0x48] sm:$0xff]   ;;  %v735_v8 = vld [vmem:[%s944_s1 + $0x50] sm:$0xff]  }
   0x2   :  { %v728_v1 = vld [vmem:[%s944_s1 + $0xc0] sm:$0xff]   ;;  %653 = vmatprep.subr.bf16.mxu0 %v727_v0  ;;  %v732_v5 = vld [vmem:[%s944_s1 + $0xc8] sm:$0xff]   ;;  %v736_v9 = vld [vmem:[%s944_s1 + $0xd0] sm:$0xff]  }
   0x3   :  { %v729_v2 = vld [vmem:[%s944_s1] sm:$0xff]   ;;  %681 = vmatprep.subr.bf16.mxu1 %v728_v1  ;;  %v733_v6 = vld [vmem:[%s944_s1 + $0x8] sm:$0xff]   ;;  %v737_v10 = vld [vmem:[%s944_s1 + $0x10] sm:$0xff]  }
   0x4   :  { %v730_v3 = vld [vmem:[%s944_s1 + $0x80] sm:$0xff]   ;;  %654 = vmatpush3.bf16.msra.mxu0 %v729_v2  ;;  %v734_v7 = vld [vmem:[%s944_s1 + $0x88] sm:$0xff]   ;;  %v738_v11 = vld [vmem:[%s944_s1 + $0x90] sm:$0xff]  }
   0x5   :  { %682 = vmatpush3.bf16.msra.mxu1 %v730_v3  ;;  %655 = vmatprep.subr.bf16.mxu0 %v731_v4  ;;  %v739_v12 = vld [vmem:[%s944_s1 + $0x58] sm:$0xff]   ;;  %v743_v16 = vld [vmem:[%s944_s1 + $0x60] sm:$0xff]   ;;  %v747_v20 = vld [vmem:[%s944_s1 + $0x68] sm:$0xff]  }
   0x6   :  { %683 = vmatprep.subr.bf16.mxu1 %v732_v5  ;;  %v740_v13 = vld [vmem:[%s944_s1 + $0xd8] sm:$0xff]   ;;  %v744_v17 = vld [vmem:[%s944_s1 + $0xe0] sm:$0xff]   ;;  %v748_v21 = vld [vmem:[%s944_s1 + $0xe8] sm:$0xff]  }
   0x7   :  { %v741_v14 = vld [vmem:[%s944_s1 + $0x18] sm:$0xff]   ;;  %v745_v18 = vld [vmem:[%s944_s1 + $0x20] sm:$0xff]   ;;  %v749_v22 = vld [vmem:[%s944_s1 + $0x28] sm:$0xff]  }
   0x8   :  { %656 = vmatpush3.bf16.msra.mxu0 %v733_v6  ;;  %v742_v15 = vld [vmem:[%s944_s1 + $0x98] sm:$0xff]   ;;  %v746_v19 = vld [vmem:[%s944_s1 + $0xa0] sm:$0xff]   ;;  %v750_v23 = vld [vmem:[%s944_s1 + $0xa8] sm:$0xff]  }
   0x9   :  { %684 = vmatpush3.bf16.msra.mxu1 %v734_v7  ;;  %657 = vmatprep.subr.bf16.mxu0 %v735_v8  ;;  %v751_v24 = vld [vmem:[%s944_s1 + $0x70] sm:$0xff]   ;;  %v755_v28 = vld [vmem:[%s944_s1 + $0x78] sm:$0xff]   ;;  %v764_v35 = vld [vmem:[%s945_s0 + $0xc] ss:$20 sps:$4 sm:$0xff]  }
   0xa   :  { %685 = vmatprep.subr.bf16.mxu1 %v736_v9  ;;  %v752_v25 = vld [vmem:[%s944_s1 + $0xf0] sm:$0xff]   ;;  %v756_v29 = vld [vmem:[%s944_s1 + $0xf8] sm:$0xff]   ;;  %v765_v36 = vld [vmem:[%s944_s1 + $0x100] sm:$0xff]   ;;  %465 = vmatprep.mubr.bf16.mxu1 %v764_v35 }
   0xb   :  { %v753_v26 = vld [vmem:[%s944_s1 + $0x30] sm:$0xff]   ;;  %v757_v30 = vld [vmem:[%s944_s1 + $0x38] sm:$0xff]   ;;  %v766_v37 = vld [vmem:[%s944_s1 + $0x108] sm:$0xff]  }
   0xc   :  { %658 = vmatpush3.bf16.msra.mxu0 %v737_v10  ;;  %v754_v27 = vld [vmem:[%s944_s1 + $0xb0] sm:$0xff]   ;;  %v758_v31 = vld [vmem:[%s944_s1 + $0xb8] sm:$0xff]   ;;  %v767_v38 = vld [vmem:[%s945_s0 + $0x2c] ss:$20 sps:$4 sm:$0xff]  }
   0xd   :  { %686 = vmatpush3.bf16.msra.mxu1 %v738_v11  ;;  %659 = vmatprep.subr.bf16.mxu0 %v739_v12  ;;  %v759_v32 = vld [vmem:[%s945_s0] ss:$20 sps:$4 sm:$0xff]   ;;  %v761_v33 = vld [vmem:[%s945_s0 + $0x4] ss:$20 sps:$4 sm:$0xff]   ;;  %v762_v34 = vld [vmem:[%s945_s0 + $0x8] ss:$20 sps:$4 sm:$0xff]  }
   0xe   :  { %687 = vmatprep.subr.bf16.mxu1 %v740_v13  ;;  %416 = vmatprep.mubr.bf16.mxu0 %v761_v33  ;;  %v769_v39 = vld [vmem:[%s945_s0 + $0x34] ss:$20 sps:$4 sm:$0xff]   ;;  %v772_v42 = vld [vmem:[%s945_s0 + $0x30] ss:$20 sps:$4 sm:$0xff]   ;;  %v774_v44 = vld [vmem:[%s944_s1 + $0x118] sm:$0xff]  }
   0xf   :  { %v771_v40 = vld [vmem:[%s945_s0 + $0x28] ss:$20 sps:$4 sm:$0xff]   ;;  %v773_v41 = vld [vmem:[%s944_s1 + $0x110] sm:$0xff]   ;;  %v776_v45 = vld [vmem:[%s945_s0 + $0x38] ss:$20 sps:$4 sm:$0xff]  }
  0x10   :  { %660 = vmatpush3.bf16.msra.mxu0 %v741_v14  ;;  %v775_v43 = vld [vmem:[%s945_s0 + $0x10] ss:$20 sps:$4 sm:$0xff]   ;;  %v633_v11 = vld [vmem:[%s946_s2] ss:$0 sm:$0xff] }
  0x11   :  { %688 = vmatpush3.bf16.msra.mxu1 %v742_v15  ;;  %661 = vmatprep.subr.bf16.mxu0 %v743_v16 }
  0x12   :  { %689 = vmatprep.subr.bf16.mxu1 %v744_v17 }
  0x14   :  { %662 = vmatpush3.bf16.msra.mxu0 %v745_v18 }
  0x15   :  { %690 = vmatpush3.bf16.msra.mxu1 %v746_v19  ;;  %663 = vmatprep.subr.bf16.mxu0 %v747_v20 }
  0x16   :  { %691 = vmatprep.subr.bf16.mxu1 %v748_v21 }
  0x18   :  { %664 = vmatpush3.bf16.msra.mxu0 %v749_v22 }
  0x19   :  { %692 = vmatpush3.bf16.msra.mxu1 %v750_v23  ;;  %665 = vmatprep.subr.bf16.mxu0 %v751_v24 }
  0x1a   :  { %693 = vmatprep.subr.bf16.mxu1 %v752_v25 }
  0x1c   :  { %666 = vmatpush3.bf16.msra.mxu0 %v753_v26 }
  0x1d   :  { %694 = vmatpush3.bf16.msra.mxu1 %v754_v27  ;;  %667 = vmatprep.subr.bf16.mxu0 %v755_v28 }
  0x1e   :  { %695 = vmatprep.subr.bf16.mxu1 %v756_v29 }
  0x20   :  { %668 = vmatpush3.bf16.msra.mxu0 %v757_v30 }
  0x21   :  { %696 = vmatpush3.bf16.msra.mxu1 %v758_v31  ;;  %715 = vmatprep.subr.bf16.mxu0 %v765_v36 }
  0x23   :  { %417 = vmatmul.mubr.bf16.vlgmr.msra.gmra.mrb[0].mxu0 %v759_v32 }
  0x24   :  { %466 = vmatmul.mubr.bf16.vlgmr.msra.gmra.mrb[0].mxu1 %v762_v34  ;;  %716 = vmatpush3.bf16.msra.mxu0 %v765_v36 }
  0x25   :  { %717 = vmatprep.subr.bf16.mxu0 %v766_v37  ;;  %424 = vmatprep.mubr.bf16.mxu0 %v767_v38 }
  0x26   :  { %473 = vmatprep.mubr.bf16.mxu1 %v769_v39 }
  0x28   :  { %718 = vmatpush3.bf16.msra.mxu0 %v766_v37 }
  0x29   :  { %719 = vmatprep.subr.bf16.mxu0 %v773_v41 }
  0x2b   :  { %425 = vmatmul.mubr.bf16.gmra.mrb[4].mxu0 %v771_v40 }
  0x2c   :  { %474 = vmatmul.mubr.bf16.gmra.mrb[4].mxu1 %v772_v42  ;;  %723 = vmatprep.mubr.msk.bf16.mxu0 %vm377_vm0, %v775_v43 }
  0x2d   :  { %720 = vmatpush3.bf16.msra.mxu0 %v773_v41 }
  0x2e   :  { %721 = vmatprep.subr.bf16.mxu0 %v774_v44 }
  0x31   :  { %722 = vmatpush3.bf16.msra.mxu0 %v774_v44 }
  0x34   :  { %724 = vmatmul.mubr.msk.bf16.vlgmr.msra.gmra.mrb[8].mxu0 %vm377_vm0, %v776_v45 }
  0xf6   :  { %v669_v46 = vpop.f32.mrb[0].mxu0 }
  0xf7   :  { %v697_v47 = vpop.f32.mrb[0].mxu1  ;;  %v670_v48 = vpop.f32.mrb[1].mxu0 }
  0xf8   :  { %v671_v49 = vadd.f32 %v670_v48, %v669_v46  ;;  %v698_v50 = vpop.f32.mrb[1].mxu1  ;;  %v672_v51 = vpop.f32.mrb[2].mxu0 }
  0xf9   :  { %v699_v52 = vadd.f32 %v698_v50, %v697_v47  ;;  %v700_v53 = vpop.f32.mrb[2].mxu1  ;;  %v673_v54 = vpop.f32.mrb[3].mxu0 }
  0xfa   :  { %v674_v55 = vadd.f32 %v673_v54, %v672_v51  ;;  %v701_v56 = vpop.f32.mrb[3].mxu1 }
  0xfb   :  { %v702_v57 = vadd.f32 %v701_v56, %v700_v53  ;;  %v468_v58 = vadd.f32 %v699_v52, %v671_v49 }
  0xfd   :  { %v471_v59 = vadd.f32 %v702_v57, %v674_v55 }
  0xfe   :  { %v675_v60 = vpop.f32.mrb[4].mxu0 }
  0xff   :  { %v703_v61 = vpop.f32.mrb[4].mxu1  ;;  %v676_v62 = vpop.f32.mrb[5].mxu0 }
 0x100   :  { %v677_v63 = vadd.f32 %v676_v62, %v675_v60  ;;  %v704_v0 = vpop.f32.mrb[5].mxu1  ;;  %v678_v1 = vpop.f32.mrb[6].mxu0 }
 0x101   :  { %v705_v2 = vadd.f32 %v704_v0, %v703_v61  ;;  %v706_v3 = vpop.f32.mrb[6].mxu1  ;;  %v679_v4 = vpop.f32.mrb[7].mxu0 }
 0x102   :  { %v680_v5 = vadd.f32 %v679_v4, %v678_v1  ;;  %v707_v6 = vpop.f32.mrb[7].mxu1 }
 0x103   :  { %v708_v7 = vadd.f32 %v707_v6, %v706_v3  ;;  %v476_v8 = vadd.f32 %v705_v2, %v677_v63 }
 0x105   :  { %v479_v9 = vadd.f32 %v708_v7, %v680_v5 }
 0x107   :  { %v725_v10 = vpop.f32.mrb[8].mxu0 }
 0x108   :  { %v525_v12 = vadd.f32 %v725_v10, %v476_v8  ;;  %v516_v13 = vpop.f32.mrb[9].mxu0 }
 0x109   :  { %v517_v14 = vadd.f32 %v516_v13, %v468_v58  ;;  %v726_v15 = vpop.f32.mrb[10].mxu0 }
 0x10a   :  { %v555_v16 = vadd.f32 %v633_v11, %v525_v12  ;;  %v528_v17 = vadd.f32 %v726_v15, %v479_v9  ;;  %v519_v18 = vpop.f32.mrb[11].mxu0 }
 0x10b   :  { %v553_v19 = vadd.f32 %v633_v11, %v517_v14  ;;  %v520_v20 = vadd.f32 %v519_v18, %v471_v59 }
 0x10c   :  { %v556_v21 = vadd.f32 %v633_v11, %v528_v17  ;;  %v559_v23 = vmax.f32 %v555_v16, 0.0 }
 0x10d   :  { %v554_v22 = vadd.f32 %v633_v11, %v520_v20  ;;  %v557_v25 = vmax.f32 %v553_v19, 0.0 }
 0x10e   :  { %v560_v24 = vmax.f32 %v556_v21, 0.0 }
 0x10f   :  { %v558_v26 = vmax.f32 %v554_v22, 0.0 }
 0x110   :  { %v650_v27 = vpack.c.bf16 %v560_v24, %v559_v23 }
 0x111   :  { %v645_v28 = vpack.c.bf16 %v558_v26, %v557_v25 }
 0x112   :  { %652 = vst [vmem:[%s947_s3 + $0x8] sm:$0xff] %v650_v27  }
 0x113   :  { %646 = vst [vmem:[%s947_s3] sm:$0xff] %v645_v28  }

// kernel: resnet_forward.28
= control target key start
LH: loop header
LB: loop body
LE: loop exit
PB: predicated region body
PF: predicated region fallthrough
CT: control target
= control target key end

     0   :  { %vm380_vm0 = vcmask 523264   ;;  %s979_s1 = inlined_call_operand.vmem [shape: bf16[576,128], index: 1, kind: input, shape index: {}]   ;;  %s980_s0 = inlined_call_operand.vmem [shape: bf16[32,576], index: 0, kind: input, shape index: {}]   ;;  %s981_s3 = inlined_call_operand.vmem [shape: bf16[32,128], index: 3, kind: input, shape index: {}]   ;;  %s982_s2 = inlined_call_operand.vmem [shape: f32[1,128], index: 2, kind: input, shape index: {}]   ;;  %s983_s4 = inlined_call_operand.vmem [shape: bf16[32,128], index: 4, kind: output, shape index: {}]  }
   0x1   :  { %v751_v0 = vld [vmem:[%s979_s1 + $0x40] sm:$0xff]   ;;  %v755_v4 = vld [vmem:[%s979_s1 + $0x48] sm:$0xff]   ;;  %v759_v8 = vld [vmem:[%s979_s1 + $0x50] sm:$0xff]  }
   0x2   :  { %v752_v1 = vld [vmem:[%s979_s1 + $0xc0] sm:$0xff]   ;;  %677 = vmatprep.subr.bf16.mxu0 %v751_v0  ;;  %v756_v5 = vld [vmem:[%s979_s1 + $0xc8] sm:$0xff]   ;;  %v760_v9 = vld [vmem:[%s979_s1 + $0xd0] sm:$0xff]  }
   0x3   :  { %v753_v2 = vld [vmem:[%s979_s1] sm:$0xff]   ;;  %705 = vmatprep.subr.bf16.mxu1 %v752_v1  ;;  %v757_v6 = vld [vmem:[%s979_s1 + $0x8] sm:$0xff]   ;;  %v761_v10 = vld [vmem:[%s979_s1 + $0x10] sm:$0xff]  }
   0x4   :  { %v754_v3 = vld [vmem:[%s979_s1 + $0x80] sm:$0xff]   ;;  %678 = vmatpush3.bf16.msra.mxu0 %v753_v2  ;;  %v758_v7 = vld [vmem:[%s979_s1 + $0x88] sm:$0xff]   ;;  %v762_v11 = vld [vmem:[%s979_s1 + $0x90] sm:$0xff]  }
   0x5   :  { %706 = vmatpush3.bf16.msra.mxu1 %v754_v3  ;;  %679 = vmatprep.subr.bf16.mxu0 %v755_v4  ;;  %v763_v12 = vld [vmem:[%s979_s1 + $0x58] sm:$0xff]   ;;  %v767_v16 = vld [vmem:[%s979_s1 + $0x60] sm:$0xff]   ;;  %v771_v20 = vld [vmem:[%s979_s1 + $0x68] sm:$0xff]  }
   0x6   :  { %707 = vmatprep.subr.bf16.mxu1 %v756_v5  ;;  %v764_v13 = vld [vmem:[%s979_s1 + $0xd8] sm:$0xff]   ;;  %v768_v17 = vld [vmem:[%s979_s1 + $0xe0] sm:$0xff]   ;;  %v772_v21 = vld [vmem:[%s979_s1 + $0xe8] sm:$0xff]  }
   0x7   :  { %v765_v14 = vld [vmem:[%s979_s1 + $0x18] sm:$0xff]   ;;  %v769_v18 = vld [vmem:[%s979_s1 + $0x20] sm:$0xff]   ;;  %v773_v22 = vld [vmem:[%s979_s1 + $0x28] sm:$0xff]  }
   0x8   :  { %680 = vmatpush3.bf16.msra.mxu0 %v757_v6  ;;  %v766_v15 = vld [vmem:[%s979_s1 + $0x98] sm:$0xff]   ;;  %v770_v19 = vld [vmem:[%s979_s1 + $0xa0] sm:$0xff]   ;;  %v774_v23 = vld [vmem:[%s979_s1 + $0xa8] sm:$0xff]  }
   0x9   :  { %708 = vmatpush3.bf16.msra.mxu1 %v758_v7  ;;  %681 = vmatprep.subr.bf16.mxu0 %v759_v8  ;;  %v775_v24 = vld [vmem:[%s979_s1 + $0x70] sm:$0xff]   ;;  %v779_v28 = vld [vmem:[%s979_s1 + $0x78] sm:$0xff]   ;;  %v788_v35 = vld [vmem:[%s980_s0 + $0xc] ss:$20 sps:$4 sm:$0xff]  }
   0xa   :  { %709 = vmatprep.subr.bf16.mxu1 %v760_v9  ;;  %v776_v25 = vld [vmem:[%s979_s1 + $0xf0] sm:$0xff]   ;;  %v780_v29 = vld [vmem:[%s979_s1 + $0xf8] sm:$0xff]   ;;  %v789_v36 = vld [vmem:[%s979_s1 + $0x100] sm:$0xff]   ;;  %468 = vmatprep.mubr.bf16.mxu1 %v788_v35 }
   0xb   :  { %v777_v26 = vld [vmem:[%s979_s1 + $0x30] sm:$0xff]   ;;  %v781_v30 = vld [vmem:[%s979_s1 + $0x38] sm:$0xff]   ;;  %v790_v37 = vld [vmem:[%s979_s1 + $0x108] sm:$0xff]  }
   0xc   :  { %682 = vmatpush3.bf16.msra.mxu0 %v761_v10  ;;  %v778_v27 = vld [vmem:[%s979_s1 + $0xb0] sm:$0xff]   ;;  %v782_v31 = vld [vmem:[%s979_s1 + $0xb8] sm:$0xff]   ;;  %v791_v38 = vld [vmem:[%s980_s0 + $0x2c] ss:$20 sps:$4 sm:$0xff]  }
   0xd   :  { %710 = vmatpush3.bf16.msra.mxu1 %v762_v11  ;;  %683 = vmatprep.subr.bf16.mxu0 %v763_v12  ;;  %v783_v32 = vld [vmem:[%s980_s0] ss:$20 sps:$4 sm:$0xff]   ;;  %v785_v33 = vld [vmem:[%s980_s0 + $0x4] ss:$20 sps:$4 sm:$0xff]   ;;  %v786_v34 = vld [vmem:[%s980_s0 + $0x8] ss:$20 sps:$4 sm:$0xff]  }
   0xe   :  { %711 = vmatprep.subr.bf16.mxu1 %v764_v13  ;;  %419 = vmatprep.mubr.bf16.mxu0 %v785_v33  ;;  %v793_v39 = vld [vmem:[%s980_s0 + $0x34] ss:$20 sps:$4 sm:$0xff]   ;;  %v796_v42 = vld [vmem:[%s980_s0 + $0x30] ss:$20 sps:$4 sm:$0xff]   ;;  %v798_v44 = vld [vmem:[%s979_s1 + $0x118] sm:$0xff]  }
   0xf   :  { %v795_v40 = vld [vmem:[%s980_s0 + $0x28] ss:$20 sps:$4 sm:$0xff]   ;;  %v797_v41 = vld [vmem:[%s979_s1 + $0x110] sm:$0xff]   ;;  %v800_v45 = vld [vmem:[%s980_s0 + $0x38] ss:$20 sps:$4 sm:$0xff]  }
  0x10   :  { %684 = vmatpush3.bf16.msra.mxu0 %v765_v14  ;;  %v799_v43 = vld [vmem:[%s980_s0 + $0x10] ss:$20 sps:$4 sm:$0xff]   ;;  %v675_v9 = vld [vmem:[%s981_s3 + $0x8] sm:$0xff]   ;;  %v648_v13 = vld [vmem:[%s982_s2] ss:$0 sm:$0xff] }
  0x11   :  { %712 = vmatpush3.bf16.msra.mxu1 %v766_v15  ;;  %685 = vmatprep.subr.bf16.mxu0 %v767_v16  ;;  %v658_v11 = vld [vmem:[%s981_s3] sm:$0xff]   ;;  %v663_v15 = vunpack.c.l.bf16 %v675_v9 }
  0x12   :  { %713 = vmatprep.subr.bf16.mxu1 %v768_v17 }
  0x14   :  { %686 = vmatpush3.bf16.msra.mxu0 %v769_v18  ;;  %v659_v18 = vunpack.c.l.bf16 %v658_v11 }
  0x15   :  { %714 = vmatpush3.bf16.msra.mxu1 %v770_v19  ;;  %687 = vmatprep.subr.bf16.mxu0 %v771_v20 }
  0x16   :  { %715 = vmatprep.subr.bf16.mxu1 %v772_v21 }
  0x18   :  { %688 = vmatpush3.bf16.msra.mxu0 %v773_v22  ;;  %v664_v22 = vunpack.c.h.bf16 %v675_v9 }
  0x19   :  { %716 = vmatpush3.bf16.msra.mxu1 %v774_v23  ;;  %689 = vmatprep.subr.bf16.mxu0 %v775_v24 }
  0x1a   :  { %717 = vmatprep.subr.bf16.mxu1 %v776_v25 }
  0x1c   :  { %690 = vmatpush3.bf16.msra.mxu0 %v777_v26  ;;  %v660_v26 = vunpack.c.h.bf16 %v658_v11 }
  0x1d   :  { %718 = vmatpush3.bf16.msra.mxu1 %v778_v27  ;;  %691 = vmatprep.subr.bf16.mxu0 %v779_v28 }
  0x1e   :  { %719 = vmatprep.subr.bf16.mxu1 %v780_v29 }
  0x20   :  { %692 = vmatpush3.bf16.msra.mxu0 %v781_v30 }
  0x21   :  { %720 = vmatpush3.bf16.msra.mxu1 %v782_v31  ;;  %739 = vmatprep.subr.bf16.mxu0 %v789_v36 }
  0x23   :  { %420 = vmatmul.mubr.bf16.vlgmr.msra.gmra.mrb[0].mxu0 %v783_v32 }
  0x24   :  { %469 = vmatmul.mubr.bf16.vlgmr.msra.gmra.mrb[0].mxu1 %v786_v34  ;;  %740 = vmatpush3.bf16.msra.mxu0 %v789_v36 }
  0x25   :  { %741 = vmatprep.subr.bf16.mxu0 %v790_v37  ;;  %427 = vmatprep.mubr.bf16.mxu0 %v791_v38 }
  0x26   :  { %476 = vmatprep.mubr.bf16.mxu1 %v793_v39 }
  0x28   :  { %742 = vmatpush3.bf16.msra.mxu0 %v790_v37 }
  0x29   :  { %743 = vmatprep.subr.bf16.mxu0 %v797_v41 }
  0x2b   :  { %428 = vmatmul.mubr.bf16.gmra.mrb[4].mxu0 %v795_v40 }
  0x2c   :  { %477 = vmatmul.mubr.bf16.gmra.mrb[4].mxu1 %v796_v42  ;;  %747 = vmatprep.mubr.msk.bf16.mxu0 %vm380_vm0, %v799_v43 }
  0x2d   :  { %744 = vmatpush3.bf16.msra.mxu0 %v797_v41 }
  0x2e   :  { %745 = vmatprep.subr.bf16.mxu0 %v798_v44 }
  0x31   :  { %746 = vmatpush3.bf16.msra.mxu0 %v798_v44 }
  0x34   :  { %748 = vmatmul.mubr.msk.bf16.vlgmr.msra.gmra.mrb[8].mxu0 %vm380_vm0, %v800_v45 }
  0xf6   :  { %v693_v46 = vpop.f32.mrb[0].mxu0 }
  0xf7   :  { %v721_v47 = vpop.f32.mrb[0].mxu1  ;;  %v694_v48 = vpop.f32.mrb[1].mxu0 }
  0xf8   :  { %v695_v49 = vadd.f32 %v694_v48, %v693_v46  ;;  %v722_v50 = vpop.f32.mrb[1].mxu1  ;;  %v696_v51 = vpop.f32.mrb[2].mxu0 }
  0xf9   :  { %v723_v52 = vadd.f32 %v722_v50, %v721_v47  ;;  %v724_v53 = vpop.f32.mrb[2].mxu1  ;;  %v697_v54 = vpop.f32.mrb[3].mxu0 }
  0xfa   :  { %v698_v55 = vadd.f32 %v697_v54, %v696_v51  ;;  %v725_v56 = vpop.f32.mrb[3].mxu1 }
  0xfb   :  { %v726_v57 = vadd.f32 %v725_v56, %v724_v53  ;;  %v471_v58 = vadd.f32 %v723_v52, %v695_v49 }
  0xfd   :  { %v474_v59 = vadd.f32 %v726_v57, %v698_v55 }
  0xfe   :  { %v699_v60 = vpop.f32.mrb[4].mxu0 }
  0xff   :  { %v727_v61 = vpop.f32.mrb[4].mxu1  ;;  %v700_v62 = vpop.f32.mrb[5].mxu0 }
 0x100   :  { %v701_v63 = vadd.f32 %v700_v62, %v699_v60  ;;  %v728_v0 = vpop.f32.mrb[5].mxu1  ;;  %v702_v1 = vpop.f32.mrb[6].mxu0 }
 0x101   :  { %v729_v2 = vadd.f32 %v728_v0, %v727_v61  ;;  %v730_v3 = vpop.f32.mrb[6].mxu1  ;;  %v703_v4 = vpop.f32.mrb[7].mxu0 }
 0x102   :  { %v704_v5 = vadd.f32 %v703_v4, %v702_v1  ;;  %v731_v6 = vpop.f32.mrb[7].mxu1 }
 0x103   :  { %v732_v7 = vadd.f32 %v731_v6, %v730_v3  ;;  %v479_v8 = vadd.f32 %v729_v2, %v701_v63 }
 0x105   :  { %v482_v10 = vadd.f32 %v732_v7, %v704_v5 }
 0x107   :  { %v749_v12 = vpop.f32.mrb[8].mxu0 }
 0x108   :  { %v528_v14 = vadd.f32 %v749_v12, %v479_v8  ;;  %v519_v16 = vpop.f32.mrb[9].mxu0 }
 0x109   :  { %v520_v17 = vadd.f32 %v519_v16, %v471_v58  ;;  %v750_v19 = vpop.f32.mrb[10].mxu0 }
 0x10a   :  { %v558_v20 = vadd.f32 %v648_v13, %v528_v14  ;;  %v531_v21 = vadd.f32 %v750_v19, %v482_v10  ;;  %v522_v23 = vpop.f32.mrb[11].mxu0 }
 0x10b   :  { %v556_v24 = vadd.f32 %v648_v13, %v520_v17  ;;  %v523_v25 = vadd.f32 %v522_v23, %v474_v59 }
 0x10c   :  { %v570_v27 = vadd.f32 %v663_v15, %v558_v20  ;;  %v559_v28 = vadd.f32 %v648_v13, %v531_v21 }
 0x10d   :  { %v568_v29 = vadd.f32 %v659_v18, %v556_v24  ;;  %v557_v30 = vadd.f32 %v648_v13, %v523_v25 }
 0x10e   :  { %v571_v31 = vadd.f32 %v664_v22, %v559_v28  ;;  %v574_v33 = vmax.f32 %v570_v27, 0.0 }
 0x10f   :  { %v569_v32 = vadd.f32 %v660_v26, %v557_v30  ;;  %v572_v35 = vmax.f32 %v568_v29, 0.0 }
 0x110   :  { %v575_v34 = vmax.f32 %v571_v31, 0.0 }
 0x111   :  { %v573_v36 = vmax.f32 %v569_v32, 0.0 }
 0x112   :  { %v673_v37 = vpack.c.bf16 %v575_v34, %v574_v33 }
 0x113   :  { %v668_v38 = vpack.c.bf16 %v573_v36, %v572_v35 }
 0x114   :  { %676 = vst [vmem:[%s983_s4 + $0x8] sm:$0xff] %v673_v37  }
 0x115   :  { %669 = vst [vmem:[%s983_s4] sm:$0xff] %v668_v38  }

// kernel: resnet_forward.29
= control target key start
LH: loop header
LB: loop body
LE: loop exit
PB: predicated region body
PF: predicated region fallthrough
CT: control target
= control target key end

     0   :  { %v621_v36 = vmov 0.0   ;;  %vm622_vm0 = vmmov 0   ;;  %vm329_vm1 = vcmask 523264   ;;  %s766_s1 = inlined_call_operand.vmem [shape: bf16[576,128], index: 1, kind: input, shape index: {}]   ;;  %s767_s0 = inlined_call_operand.vmem [shape: bf16[8,576], index: 0, kind: input, shape index: {}]   ;;  %s768_s2 = inlined_call_operand.vmem [shape: f32[1,128], index: 2, kind: input, shape index: {}]   ;;  %s769_s3 = inlined_call_operand.vmem [shape: bf16[8,128], index: 3, kind: output, shape index: {}]  }
   0x1   :  { %v580_v0 = vld [vmem:[%s766_s1 + $0x40] sm:$0xff]   ;;  %v584_v4 = vld [vmem:[%s766_s1 + $0x48] sm:$0xff]   ;;  %v588_v8 = vld [vmem:[%s766_s1 + $0x50] sm:$0xff]  }
   0x2   :  { %v581_v1 = vld [vmem:[%s766_s1 + $0xc0] sm:$0xff]   ;;  %517 = vmatprep.subr.bf16.mxu0 %v580_v0  ;;  %v585_v5 = vld [vmem:[%s766_s1 + $0xc8] sm:$0xff]   ;;  %v589_v9 = vld [vmem:[%s766_s1 + $0xd0] sm:$0xff]  }
   0x3   :  { %v582_v2 = vld [vmem:[%s766_s1] sm:$0xff]   ;;  %539 = vmatprep.subr.bf16.mxu1 %v581_v1  ;;  %v586_v6 = vld [vmem:[%s766_s1 + $0x8] sm:$0xff]   ;;  %v590_v10 = vld [vmem:[%s766_s1 + $0x10] sm:$0xff]  }
   0x4   :  { %v583_v3 = vld [vmem:[%s766_s1 + $0x80] sm:$0xff]   ;;  %518 = vmatpush3.bf16.msra.mxu0 %v582_v2  ;;  %v587_v7 = vld [vmem:[%s766_s1 + $0x88] sm:$0xff]   ;;  %v591_v11 = vld [vmem:[%s766_s1 + $0x90] sm:$0xff]  }
   0x5   :  { %540 = vmatpush3.bf16.msra.mxu1 %v583_v3  ;;  %519 = vmatprep.subr.bf16.mxu0 %v584_v4  ;;  %v592_v12 = vld [vmem:[%s766_s1 + $0x58] sm:$0xff]   ;;  %v596_v16 = vld [vmem:[%s766_s1 + $0x60] sm:$0xff]   ;;  %v600_v20 = vld [vmem:[%s766_s1 + $0x68] sm:$0xff]  }
   0x6   :  { %541 = vmatprep.subr.bf16.mxu1 %v585_v5  ;;  %v593_v13 = vld [vmem:[%s766_s1 + $0xd8] sm:$0xff]   ;;  %v597_v17 = vld [vmem:[%s766_s1 + $0xe0] sm:$0xff]   ;;  %v601_v21 = vld [vmem:[%s766_s1 + $0xe8] sm:$0xff]  }
   0x7   :  { %v594_v14 = vld [vmem:[%s766_s1 + $0x18] sm:$0xff]   ;;  %v598_v18 = vld [vmem:[%s766_s1 + $0x20] sm:$0xff]   ;;  %v602_v22 = vld [vmem:[%s766_s1 + $0x28] sm:$0xff]  }
   0x8   :  { %520 = vmatpush3.bf16.msra.mxu0 %v586_v6  ;;  %v595_v15 = vld [vmem:[%s766_s1 + $0x98] sm:$0xff]   ;;  %v599_v19 = vld [vmem:[%s766_s1 + $0xa0] sm:$0xff]   ;;  %v603_v23 = vld [vmem:[%s766_s1 + $0xa8] sm:$0xff]  }
   0x9   :  { %542 = vmatpush3.bf16.msra.mxu1 %v587_v7  ;;  %521 = vmatprep.subr.bf16.mxu0 %v588_v8  ;;  %v604_v24 = vld [vmem:[%s766_s1 + $0x70] sm:$0xff]   ;;  %v608_v28 = vld [vmem:[%s766_s1 + $0x78] sm:$0xff]   ;;  %v21_v32 = vld [vmem:[%s767_s0] sm:$0xff] }
   0xa   :  { %543 = vmatprep.subr.bf16.mxu1 %v589_v9  ;;  %v605_v25 = vld [vmem:[%s766_s1 + $0xf0] sm:$0xff]   ;;  %v609_v29 = vld [vmem:[%s766_s1 + $0xf8] sm:$0xff]   ;;  %v474_v33 = vcombine.low %v21_v32, %v21_v32  ;;  %v475_v34 = vcombine.high %v21_v32, %v21_v32  ;;  %v22_v35 = vld [vmem:[%s767_s0 + $0x8] sm:$0xff] }
   0xb   :  { %v606_v26 = vld [vmem:[%s766_s1 + $0x30] sm:$0xff]   ;;  %v610_v30 = vld [vmem:[%s766_s1 + $0x38] sm:$0xff]   ;;  %v476_v37 = vcombine.low %v22_v35, %v22_v35  ;;  %v477_v38 = vcombine.high %v22_v35, %v22_v35  ;;  %v617_v39 = vld [vmem:[%s766_s1 + $0x100] sm:$0xff]  }
   0xc   :  { %522 = vmatpush3.bf16.msra.mxu0 %v590_v10  ;;  %v607_v27 = vld [vmem:[%s766_s1 + $0xb0] sm:$0xff]   ;;  %v611_v31 = vld [vmem:[%s766_s1 + $0xb8] sm:$0xff]   ;;  %365 = vmatprep.mubr.bf16.mxu0 %v475_v34  ;;  %v618_v40 = vld [vmem:[%s766_s1 + $0x108] sm:$0xff]  }
   0xd   :  { %544 = vmatpush3.bf16.msra.mxu1 %v591_v11  ;;  %523 = vmatprep.subr.bf16.mxu0 %v592_v12  ;;  %v619_v41 = vld [vmem:[%s766_s1 + $0x110] sm:$0xff]   ;;  %v620_v42 = vld [vmem:[%s766_s1 + $0x118] sm:$0xff]   ;;  %v516_v56 = vld [vmem:[%s768_s2] ss:$0 sm:$0xff] }
   0xe   :  { %545 = vmatprep.subr.bf16.mxu1 %v593_v13  ;;  %405 = vmatprep.mubr.bf16.mxu1 %v477_v38  ;;  %v614_v43 = vld [vmem:[%s767_s0 + $0x10] ss:$0 sps:$4 sm:$0xff]  }
  0x10   :  { %524 = vmatpush3.bf16.msra.mxu0 %v594_v14 }
  0x11   :  { %546 = vmatpush3.bf16.msra.mxu1 %v595_v15  ;;  %525 = vmatprep.subr.bf16.mxu0 %v596_v16 }
  0x12   :  { %547 = vmatprep.subr.bf16.mxu1 %v597_v17 }
  0x14   :  { %526 = vmatpush3.bf16.msra.mxu0 %v598_v18 }
  0x15   :  { %548 = vmatpush3.bf16.msra.mxu1 %v599_v19  ;;  %527 = vmatprep.subr.bf16.mxu0 %v600_v20 }
  0x16   :  { %549 = vmatprep.subr.bf16.mxu1 %v601_v21 }
  0x18   :  { %528 = vmatpush3.bf16.msra.mxu0 %v602_v22 }
  0x19   :  { %550 = vmatpush3.bf16.msra.mxu1 %v603_v23  ;;  %529 = vmatprep.subr.bf16.mxu0 %v604_v24 }
  0x1a   :  { %551 = vmatprep.subr.bf16.mxu1 %v605_v25 }
  0x1c   :  { %530 = vmatpush3.bf16.msra.mxu0 %v606_v26 }
  0x1d   :  { %552 = vmatpush3.bf16.msra.mxu1 %v607_v27  ;;  %531 = vmatprep.subr.bf16.mxu0 %v608_v28 }
  0x1e   :  { %553 = vmatprep.subr.bf16.mxu1 %v609_v29 }
  0x20   :  { %532 = vmatpush3.bf16.msra.mxu0 %v610_v30 }
  0x21   :  { %554 = vmatpush3.bf16.msra.mxu1 %v611_v31  ;;  %566 = vmatprep.subr.bf16.mxu0 %v621_v36 }
  0x23   :  { %366 = vmatmul.mubr.bf16.vlgmr.msra.gmra.mrb[0].mxu0 %v474_v33 }
  0x24   :  { %406 = vmatmul.mubr.bf16.vlgmr.msra.gmra.mrb[0].mxu1 %v476_v37  ;;  %567 = vmatpush3.bf16.msra.mxu0 %v617_v39 }
  0x25   :  { %568 = vmatprep.subr.bf16.mxu0 %v621_v36  ;;  %574 = vmatprep.mubr.msk.bf16.mxu0 %vm622_vm0, %v621_v36 }
  0x28   :  { %569 = vmatpush3.bf16.msra.mxu0 %v618_v40 }
  0x29   :  { %570 = vmatprep.subr.bf16.mxu0 %v621_v36 }
  0x2c   :  { %571 = vmatpush3.bf16.msra.mxu0 %v619_v41 }
  0x2d   :  { %572 = vmatprep.subr.bf16.mxu0 %v621_v36 }
  0x30   :  { %573 = vmatpush3.bf16.msra.mxu0 %v620_v42 }
  0x33   :  { %575 = vmatmul.mubr.msk.bf16.vlgmr.msra.gmra.mrb[4].mxu0 %vm329_vm1, %v614_v43 }
  0xf6   :  { %v533_v44 = vpop.f32.mrb[0].mxu0 }
  0xf7   :  { %v555_v45 = vpop.f32.mrb[0].mxu1  ;;  %v534_v46 = vpop.f32.mrb[1].mxu0 }
  0xf8   :  { %v535_v47 = vadd.f32 %v534_v46, %v533_v44  ;;  %v556_v48 = vpop.f32.mrb[1].mxu1  ;;  %v536_v49 = vpop.f32.mrb[2].mxu0 }
  0xf9   :  { %v557_v50 = vadd.f32 %v556_v48, %v555_v45  ;;  %v537_v51 = vpop.f32.mrb[3].mxu0  ;;  %v558_v52 = vpop.f32.mrb[2].mxu1 }
  0xfa   :  { %v559_v53 = vpop.f32.mrb[3].mxu1 }
  0xfb   :  { %v408_v54 = vadd.f32 %v557_v50, %v535_v47 }
 0x106   :  { %v447_v55 = vpop.f32.mrb[4].mxu0 }
 0x107   :  { %v448_v57 = vadd.f32 %v447_v55, %v408_v54  ;;  %v576_v58 = vpop.f32.mrb[5].mxu0 }
 0x108   :  { %v450_v59 = vpop.f32.mrb[6].mxu0 }
 0x109   :  { %v466_v60 = vadd.f32 %v516_v56, %v448_v57  ;;  %v577_v61 = vpop.f32.mrb[7].mxu0 }
 0x10b   :  { %v467_v62 = vmax.f32 %v466_v60, 0.0 }
 0x10d   :  { %v468_v63 = vpack.c.bf16 %v467_v62, %v467_v62 }
 0x10f   :  { %469 = vst [vmem:[%s769_s3] sm:$0xf] %v468_v63 }

// kernel: resnet_forward.30
= control target key start
LH: loop header
LB: loop body
LE: loop exit
PB: predicated region body
PF: predicated region fallthrough
CT: control target
= control target key end

     0   :  { %s1100_s12 = smov 0   ;;  %s1102_s13 = smov 0   ;;  %s1192_s0 = inlined_call_operand.vmem [shape: bf16[8,1280], index: 0, kind: input, shape index: {}]   ;;  %s1193_s1 = inlined_call_operand.vmem [shape: bf16[1280,128], index: 1, kind: input, shape index: {}]   ;;  %s1194_s2 = inlined_call_operand.vmem [shape: f32[1,128], index: 2, kind: input, shape index: {}]   ;;  %s1195_s3 = inlined_call_operand.vmem [shape: bf16[8,128], index: 3, kind: output, shape index: {}]  }
   0x1   :  { %s1104_s14 = smov 0  }
   0x2 LB: > { %s25_s15 = sadd.s32 1, %s1071_s13  ;;  %p854_p0 = scmp.ge.s32.totalorder %s1075_s14, 1  ;;  %s1075_s14 = sphi %s1104_s14, %s13_s14   ;;  %s1071_s13 = sphi %s1102_s13, %s1197_s13   ;;  %s1067_s12 = sphi %s1100_s12, %s1196_s12  }
   0x3   : > { %p26_p1 = scmp.ge.s32.totalorder %s25_s15, 2  ;;  %p189_p2 = scmp.lt.s32.totalorder %s1075_s14, 3 }
   0x5   : > { %s1199_s15 = smov (%p26_p1, %s25_s15), 0  ;;  %p190_p3 = pnand %p854_p0, %p189_p2 }
   0x6   : > { %s230_s16 = smul.u32 (!%p190_p3), 5, %s1067_s12  ;;  %p857_p6 = scmp.ne.s32.totalorder (!%p190_p3), %s1067_s12, 0 }
   0x7   : > { %193 = sbr.rel (%p190_p3) target bundleno = 321 (0x141), region = 32 }
   0x8   : > { %s240_s17 = smul.u32 (!%p190_p3), 80, %s1067_s12  ;;  %p233_p4 = scmp.lt.s32.totalorder (!%p190_p3), %s230_s16, 9 }
   0xa   : > { %p241_p5 = scmp.lt.s32.totalorder (!%p190_p3), %s240_s17, 159 }
   0xe   : > { %s1201_s16 = smov (!%p233_p4, %s230_s16), 9  ;;  %s1203_s17 = smov (!%p241_p5, %s240_s17), 159 }
   0xf   : > { %s855_s18 = sshll.u32 %s1201_s16, 2  ;;  %s856_s22 = sshll.u32 %s1203_s17, 2  ;;  %v1077_v0 = vmov (!%p857_p6), 0.0  }
  0x10   : > { %s1125_s21 = scalar_lea.vmem %s1192_s0, %s855_s18  ;;  %s1130_s25 = scalar_lea.vmem %s1193_s1, %s856_s22  ;;  %264 = vst [vmem:[#allocation2] sm:$0xff] (!%p857_p6), %v1077_v0 }
  0x11   : > { %263 = sbr.rel (%p857_p6) target bundleno = 24 (0x18), region = 36 }
  0x18 PF: > { %v1008_v1 = vld [vmem:[%s1130_s25 + $0x40] sm:$0xff]   ;;  %v1012_v5 = vld [vmem:[%s1130_s25 + $0x48] sm:$0xff]   ;;  %v1016_v9 = vld [vmem:[%s1130_s25 + $0x50] sm:$0xff]   ;;  %v1078_v40 = vmov 0.0   ;;  %vm1079_vm0 = vmmov 0   ;;  %p903_p7 = scmp.ne.s32.totalorder %s1067_s12, 1 }
  0x19   : > { %v1009_v2 = vld [vmem:[%s1130_s25 + $0xc0] sm:$0xff]   ;;  %908 = vmatprep.subr.bf16.mxu0 %v1008_v1  ;;  %v1013_v6 = vld [vmem:[%s1130_s25 + $0xc8] sm:$0xff]   ;;  %v1017_v10 = vld [vmem:[%s1130_s25 + $0xd0] sm:$0xff]  }
  0x1a   : > { %v1010_v3 = vld [vmem:[%s1130_s25] sm:$0xff]   ;;  %930 = vmatprep.subr.bf16.mxu1 %v1009_v2  ;;  %v1014_v7 = vld [vmem:[%s1130_s25 + $0x8] sm:$0xff]   ;;  %v1018_v11 = vld [vmem:[%s1130_s25 + $0x10] sm:$0xff]  }
  0x1b   : > { %v1011_v4 = vld [vmem:[%s1130_s25 + $0x80] sm:$0xff]   ;;  %909 = vmatpush3.bf16.msra.mxu0 %v1010_v3  ;;  %v1015_v8 = vld [vmem:[%s1130_s25 + $0x88] sm:$0xff]   ;;  %v1019_v12 = vld [vmem:[%s1130_s25 + $0x90] sm:$0xff]  }
  0x1c   : > { %931 = vmatpush3.bf16.msra.mxu1 %v1011_v4  ;;  %910 = vmatprep.subr.bf16.mxu0 %v1012_v5  ;;  %v1020_v13 = vld [vmem:[%s1130_s25 + $0x58] sm:$0xff]   ;;  %v1024_v17 = vld [vmem:[%s1130_s25 + $0x60] sm:$0xff]   ;;  %v1028_v21 = vld [vmem:[%s1130_s25 + $0x68] sm:$0xff]  }
  0x1d   : > { %932 = vmatprep.subr.bf16.mxu1 %v1013_v6  ;;  %v1021_v14 = vld [vmem:[%s1130_s25 + $0xd8] sm:$0xff]   ;;  %v1025_v18 = vld [vmem:[%s1130_s25 + $0xe0] sm:$0xff]   ;;  %v1029_v22 = vld [vmem:[%s1130_s25 + $0xe8] sm:$0xff]  }
  0x1e   : > { %v1022_v15 = vld [vmem:[%s1130_s25 + $0x18] sm:$0xff]   ;;  %v1026_v19 = vld [vmem:[%s1130_s25 + $0x20] sm:$0xff]   ;;  %v1030_v23 = vld [vmem:[%s1130_s25 + $0x28] sm:$0xff]  }
  0x1f   : > { %911 = vmatpush3.bf16.msra.mxu0 %v1014_v7  ;;  %v1023_v16 = vld [vmem:[%s1130_s25 + $0x98] sm:$0xff]   ;;  %v1027_v20 = vld [vmem:[%s1130_s25 + $0xa0] sm:$0xff]   ;;  %v1031_v24 = vld [vmem:[%s1130_s25 + $0xa8] sm:$0xff]  }
  0x20   : > { %933 = vmatpush3.bf16.msra.mxu1 %v1015_v8  ;;  %912 = vmatprep.subr.bf16.mxu0 %v1016_v9  ;;  %v1032_v25 = vld [vmem:[%s1130_s25 + $0x70] sm:$0xff]   ;;  %v1036_v29 = vld [vmem:[%s1130_s25 + $0x78] sm:$0xff]   ;;  %v266_v33 = vld [vmem:[%s1125_s21] sm:$0xff] }
  0x21   : > { %934 = vmatprep.subr.bf16.mxu1 %v1017_v10  ;;  %v1033_v26 = vld [vmem:[%s1130_s25 + $0xf0] sm:$0xff]   ;;  %v1037_v30 = vld [vmem:[%s1130_s25 + $0xf8] sm:$0xff]   ;;  %v267_v34 = vld [vmem:[%s1125_s21 + $0x8] sm:$0xff]  ;;  %v858_v35 = vcombine.low %v266_v33, %v266_v33  ;;  %v859_v36 = vcombine.high %v266_v33, %v266_v33 }
  0x22   : > { %v1034_v27 = vld [vmem:[%s1130_s25 + $0x30] sm:$0xff]   ;;  %v1038_v31 = vld [vmem:[%s1130_s25 + $0x38] sm:$0xff]   ;;  %v860_v37 = vcombine.low %v267_v34, %v267_v34  ;;  %v861_v38 = vcombine.high %v267_v34, %v267_v34  ;;  %v1044_v39 = vld [vmem:[%s1130_s25 + $0x100] sm:$0xff]  }
  0x23   : > { %913 = vmatpush3.bf16.msra.mxu0 %v1018_v11  ;;  %v1035_v28 = vld [vmem:[%s1130_s25 + $0xb0] sm:$0xff]   ;;  %v1039_v32 = vld [vmem:[%s1130_s25 + $0xb8] sm:$0xff]   ;;  %639 = vmatprep.mubr.bf16.mxu0 %v859_v36  ;;  %v1045_v41 = vld [vmem:[%s1130_s25 + $0x108] sm:$0xff]  }
  0x24   : > { %935 = vmatpush3.bf16.msra.mxu1 %v1019_v12  ;;  %914 = vmatprep.subr.bf16.mxu0 %v1020_v13  ;;  %v1046_v42 = vld [vmem:[%s1130_s25 + $0x110] sm:$0xff]   ;;  %v1047_v43 = vld [vmem:[%s1130_s25 + $0x118] sm:$0xff]   ;;  %v1048_v44 = vld [vmem:[%s1130_s25 + $0x120] sm:$0xff]  }
  0x25   : > { %936 = vmatprep.subr.bf16.mxu1 %v1021_v14  ;;  %679 = vmatprep.mubr.bf16.mxu1 %v861_v38  ;;  %v1049_v45 = vld [vmem:[%s1130_s25 + $0x128] sm:$0xff]   ;;  %v1050_v46 = vld [vmem:[%s1130_s25 + $0x130] sm:$0xff]   ;;  %v1051_v47 = vld [vmem:[%s1130_s25 + $0x138] sm:$0xff]  }
  0x26   : > { %v1052_v48 = vld [vmem:[%s1125_s21 + $0x10] ss:$0 sps:$4 sm:$0xff]   ;;  %v265_v60 = vld [vmem:[#allocation2] sm:$0xff] }
  0x27   : > { %915 = vmatpush3.bf16.msra.mxu0 %v1022_v15  ;;  %v904_v4 = vld [vmem:[%s1194_s2] ss:$0 sm:$0xff] (!%p903_p7) }
  0x28   : > { %937 = vmatpush3.bf16.msra.mxu1 %v1023_v16  ;;  %916 = vmatprep.subr.bf16.mxu0 %v1024_v17 }
  0x29   : > { %938 = vmatprep.subr.bf16.mxu1 %v1025_v18 }
  0x2b   : > { %917 = vmatpush3.bf16.msra.mxu0 %v1026_v19 }
  0x2c   : > { %939 = vmatpush3.bf16.msra.mxu1 %v1027_v20  ;;  %918 = vmatprep.subr.bf16.mxu0 %v1028_v21 }
  0x2d   : > { %940 = vmatprep.subr.bf16.mxu1 %v1029_v22 }
  0x2f   : > { %919 = vmatpush3.bf16.msra.mxu0 %v1030_v23 }
  0x30   : > { %941 = vmatpush3.bf16.msra.mxu1 %v1031_v24  ;;  %920 = vmatprep.subr.bf16.mxu0 %v1032_v25 }
  0x31   : > { %942 = vmatprep.subr.bf16.mxu1 %v1033_v26 }
  0x33   : > { %921 = vmatpush3.bf16.msra.mxu0 %v1034_v27 }
  0x34   : > { %943 = vmatpush3.bf16.msra.mxu1 %v1035_v28  ;;  %922 = vmatprep.subr.bf16.mxu0 %v1036_v29 }
  0x35   : > { %944 = vmatprep.subr.bf16.mxu1 %v1037_v30 }
  0x37   : > { %923 = vmatpush3.bf16.msra.mxu0 %v1038_v31 }
  0x38   : > { %945 = vmatpush3.bf16.msra.mxu1 %v1039_v32  ;;  %961 = vmatprep.subr.bf16.mxu0 %v1078_v40 }
  0x3a   : > { %640 = vmatmul.mubr.bf16.vlgmr.msra.gmra.mrb[0].mxu0 %v858_v35 }
  0x3b   : > { %680 = vmatmul.mubr.bf16.vlgmr.msra.gmra.mrb[0].mxu1 %v860_v37  ;;  %962 = vmatpush3.bf16.msra.mxu0 %v1044_v39 }
  0x3c   : > { %977 = vmatprep.mubr.msk.bf16.mxu0 %vm1079_vm0, %v1078_v40  ;;  %963 = vmatprep.subr.bf16.mxu0 %v1078_v40 }
  0x3f   : > { %964 = vmatpush3.bf16.msra.mxu0 %v1045_v41 }
  0x40   : > { %965 = vmatprep.subr.bf16.mxu0 %v1078_v40 }
  0x43   : > { %966 = vmatpush3.bf16.msra.mxu0 %v1046_v42 }
  0x44   : > { %967 = vmatprep.subr.bf16.mxu0 %v1078_v40 }
  0x47   : > { %968 = vmatpush3.bf16.msra.mxu0 %v1047_v43 }
  0x48   : > { %969 = vmatprep.subr.bf16.mxu0 %v1078_v40 }
  0x4b   : > { %970 = vmatpush3.bf16.msra.mxu0 %v1048_v44 }
  0x4c   : > { %971 = vmatprep.subr.bf16.mxu0 %v1078_v40 }
  0x4f   : > { %972 = vmatpush3.bf16.msra.mxu0 %v1049_v45 }
  0x50   : > { %973 = vmatprep.subr.bf16.mxu0 %v1078_v40 }
  0x53   : > { %974 = vmatpush3.bf16.msra.mxu0 %v1050_v46 }
  0x54   : > { %975 = vmatprep.subr.bf16.mxu0 %v1078_v40 }
  0x57   : > { %976 = vmatpush3.bf16.msra.mxu0 %v1051_v47 }
  0x5a   : > { %978 = vmatmul.mubr.bf16.vlgmr.msra.gmra.mrb[4].mxu0 %v1052_v48 }
 0x10d   : > { %v924_v49 = vpop.f32.mrb[0].mxu0 }
 0x10e   : > { %v946_v50 = vpop.f32.mrb[0].mxu1  ;;  %v925_v51 = vpop.f32.mrb[1].mxu0 }
 0x10f   : > { %v947_v52 = vpop.f32.mrb[1].mxu1  ;;  %v926_v53 = vadd.f32 %v925_v51, %v924_v49  ;;  %v927_v55 = vpop.f32.mrb[2].mxu0 }
 0x110   : > { %v948_v54 = vadd.f32 %v947_v52, %v946_v50  ;;  %v949_v56 = vpop.f32.mrb[2].mxu1  ;;  %v928_v57 = vpop.f32.mrb[3].mxu0 }
 0x111   : > { %v950_v58 = vpop.f32.mrb[3].mxu1 }
 0x112   : > { %v682_v59 = vadd.f32 %v948_v54, %v926_v53 }
 0x12c   : > { %732 = sbr.rel (%p903_p7) target bundleno = 321 (0x141), region = 40 }
 0x12d   : > { %v721_v61 = vpop.f32.mrb[4].mxu0 }
 0x12e   : > { %v722_v62 = vadd.f32 %v721_v61, %v682_v59  ;;  %v979_v63 = vpop.f32.mrb[5].mxu0 }
 0x12f   : > { %v724_v0 = vpop.f32.mrb[6].mxu0 }
 0x130   : > { %v727_v1 = vadd.f32 %v722_v62, %v265_v60  ;;  %v980_v2 = vpop.f32.mrb[7].mxu0 }
 0x132   : > { %728 = vst [vmem:[#allocation2] sm:$0xff] %v727_v1 }
 0x139   : > { %v733_v3 = vld [vmem:[#allocation2] sm:$0xff] }
 0x13a   : > { %v741_v5 = vadd.f32 %v904_v4, %v733_v3 }
 0x13c   : > { %v742_v6 = vmax.f32 %v741_v5, 0.0 }
 0x13e   : > { %v743_v7 = vpack.c.bf16 %v742_v6, %v742_v6 }
 0x140   : > { %744 = vst [vmem:[%s1195_s3] sm:$0xf] %v743_v7 }
 0x141 PF: > { %s13_s14 = sadd.s32 1, %s1075_s14   ;;  %s1196_s12 = smov %s1071_s13 }
 0x142   : > { %p10_p8 = scmp.ge.s32.totalorder %s13_s14, 4   ;;  %s1197_s13 = smov %s1199_s15 }
 0x144   :  { %12 = sbr.rel (!%p10_p8) target bundleno = 2 (0x2), region = 76 }

// kernel: resnet_forward.32
= control target key start
LH: loop header
LB: loop body
LE: loop exit
PB: predicated region body
PF: predicated region fallthrough
CT: control target
= control target key end

     0   :  { %s1182_s15 = smov 0   ;;  %s1184_s16 = smov 0   ;;  %s1277_s0 = inlined_call_operand.vmem [shape: bf16[8,1280], index: 0, kind: input, shape index: {}]   ;;  %s1278_s1 = inlined_call_operand.vmem [shape: bf16[1280,128], index: 1, kind: input, shape index: {}]   ;;  %s1279_s2 = inlined_call_operand.vmem [shape: f32[1,128], index: 2, kind: input, shape index: {}]   ;;  %s1280_s3 = inlined_call_operand.vmem [shape: bf16[8,128], index: 3, kind: input, shape index: {}]   ;;  %s1281_s4 = inlined_call_operand.vmem [shape: bf16[8,128], index: 4, kind: output, shape index: {}]  }
   0x1   :  { %s1186_s17 = smov 0  }
   0x2 LB: > { %s26_s18 = sadd.s32 1, %s1148_s16  ;;  %p931_p0 = scmp.ge.s32.totalorder %s1152_s17, 1  ;;  %s1152_s17 = sphi %s1186_s17, %s14_s17   ;;  %s1148_s16 = sphi %s1184_s16, %s1283_s16   ;;  %s1144_s15 = sphi %s1182_s15, %s1282_s15  }
   0x3   : > { %p27_p1 = scmp.ge.s32.totalorder %s26_s18, 2  ;;  %p228_p2 = scmp.lt.s32.totalorder %s1152_s17, 3 }
   0x5   : > { %s1285_s18 = smov (%p27_p1, %s26_s18), 0  ;;  %p229_p3 = pnand %p931_p0, %p228_p2 }
   0x6   : > { %s278_s19 = smul.u32 (!%p229_p3), 5, %s1144_s15  ;;  %p934_p6 = scmp.ne.s32.totalorder (!%p229_p3), %s1144_s15, 0 }
   0x7   : > { %232 = sbr.rel (%p229_p3) target bundleno = 323 (0x143), region = 36 }
   0x8   : > { %s288_s20 = smul.u32 (!%p229_p3), 80, %s1144_s15  ;;  %p281_p4 = scmp.lt.s32.totalorder (!%p229_p3), %s278_s19, 9 }
   0xa   : > { %p289_p5 = scmp.lt.s32.totalorder (!%p229_p3), %s288_s20, 159 }
   0xe   : > { %s1287_s19 = smov (!%p281_p4, %s278_s19), 9  ;;  %s1289_s20 = smov (!%p289_p5, %s288_s20), 159 }
   0xf   : > { %s932_s21 = sshll.u32 %s1287_s19, 2  ;;  %s933_s25 = sshll.u32 %s1289_s20, 2  ;;  %v1154_v0 = vmov (!%p934_p6), 0.0  }
  0x10   : > { %s1207_s24 = scalar_lea.vmem %s1277_s0, %s932_s21  ;;  %s1212_s28 = scalar_lea.vmem %s1278_s1, %s933_s25  ;;  %319 = vst [vmem:[#allocation2] sm:$0xff] (!%p934_p6), %v1154_v0 }
  0x11   : > { %318 = sbr.rel (%p934_p6) target bundleno = 24 (0x18), region = 40 }
  0x18 PF: > { %v1085_v1 = vld [vmem:[%s1212_s28 + $0x40] sm:$0xff]   ;;  %v1089_v5 = vld [vmem:[%s1212_s28 + $0x48] sm:$0xff]   ;;  %v1093_v9 = vld [vmem:[%s1212_s28 + $0x50] sm:$0xff]   ;;  %v1155_v40 = vmov 0.0   ;;  %vm1156_vm0 = vmmov 0   ;;  %p980_p7 = scmp.ne.s32.totalorder %s1144_s15, 1 }
  0x19   : > { %v1086_v2 = vld [vmem:[%s1212_s28 + $0xc0] sm:$0xff]   ;;  %985 = vmatprep.subr.bf16.mxu0 %v1085_v1  ;;  %v1090_v6 = vld [vmem:[%s1212_s28 + $0xc8] sm:$0xff]   ;;  %v1094_v10 = vld [vmem:[%s1212_s28 + $0xd0] sm:$0xff]  }
  0x1a   : > { %v1087_v3 = vld [vmem:[%s1212_s28] sm:$0xff]   ;;  %1007 = vmatprep.subr.bf16.mxu1 %v1086_v2  ;;  %v1091_v7 = vld [vmem:[%s1212_s28 + $0x8] sm:$0xff]   ;;  %v1095_v11 = vld [vmem:[%s1212_s28 + $0x10] sm:$0xff]  }
  0x1b   : > { %v1088_v4 = vld [vmem:[%s1212_s28 + $0x80] sm:$0xff]   ;;  %986 = vmatpush3.bf16.msra.mxu0 %v1087_v3  ;;  %v1092_v8 = vld [vmem:[%s1212_s28 + $0x88] sm:$0xff]   ;;  %v1096_v12 = vld [vmem:[%s1212_s28 + $0x90] sm:$0xff]  }
  0x1c   : > { %1008 = vmatpush3.bf16.msra.mxu1 %v1088_v4  ;;  %987 = vmatprep.subr.bf16.mxu0 %v1089_v5  ;;  %v1097_v13 = vld [vmem:[%s1212_s28 + $0x58] sm:$0xff]   ;;  %v1101_v17 = vld [vmem:[%s1212_s28 + $0x60] sm:$0xff]   ;;  %v1105_v21 = vld [vmem:[%s1212_s28 + $0x68] sm:$0xff]  }
  0x1d   : > { %1009 = vmatprep.subr.bf16.mxu1 %v1090_v6  ;;  %v1098_v14 = vld [vmem:[%s1212_s28 + $0xd8] sm:$0xff]   ;;  %v1102_v18 = vld [vmem:[%s1212_s28 + $0xe0] sm:$0xff]   ;;  %v1106_v22 = vld [vmem:[%s1212_s28 + $0xe8] sm:$0xff]  }
  0x1e   : > { %v1099_v15 = vld [vmem:[%s1212_s28 + $0x18] sm:$0xff]   ;;  %v1103_v19 = vld [vmem:[%s1212_s28 + $0x20] sm:$0xff]   ;;  %v1107_v23 = vld [vmem:[%s1212_s28 + $0x28] sm:$0xff]  }
  0x1f   : > { %988 = vmatpush3.bf16.msra.mxu0 %v1091_v7  ;;  %v1100_v16 = vld [vmem:[%s1212_s28 + $0x98] sm:$0xff]   ;;  %v1104_v20 = vld [vmem:[%s1212_s28 + $0xa0] sm:$0xff]   ;;  %v1108_v24 = vld [vmem:[%s1212_s28 + $0xa8] sm:$0xff]  }
  0x20   : > { %1010 = vmatpush3.bf16.msra.mxu1 %v1092_v8  ;;  %989 = vmatprep.subr.bf16.mxu0 %v1093_v9  ;;  %v1109_v25 = vld [vmem:[%s1212_s28 + $0x70] sm:$0xff]   ;;  %v1113_v29 = vld [vmem:[%s1212_s28 + $0x78] sm:$0xff]   ;;  %v321_v33 = vld [vmem:[%s1207_s24] sm:$0xff] }
  0x21   : > { %1011 = vmatprep.subr.bf16.mxu1 %v1094_v10  ;;  %v1110_v26 = vld [vmem:[%s1212_s28 + $0xf0] sm:$0xff]   ;;  %v1114_v30 = vld [vmem:[%s1212_s28 + $0xf8] sm:$0xff]   ;;  %v322_v34 = vld [vmem:[%s1207_s24 + $0x8] sm:$0xff]  ;;  %v935_v35 = vcombine.low %v321_v33, %v321_v33  ;;  %v936_v36 = vcombine.high %v321_v33, %v321_v33 }
  0x22   : > { %v1111_v27 = vld [vmem:[%s1212_s28 + $0x30] sm:$0xff]   ;;  %v1115_v31 = vld [vmem:[%s1212_s28 + $0x38] sm:$0xff]   ;;  %v937_v37 = vcombine.low %v322_v34, %v322_v34  ;;  %v938_v38 = vcombine.high %v322_v34, %v322_v34  ;;  %v1121_v39 = vld [vmem:[%s1212_s28 + $0x100] sm:$0xff]  }
  0x23   : > { %990 = vmatpush3.bf16.msra.mxu0 %v1095_v11  ;;  %v1112_v28 = vld [vmem:[%s1212_s28 + $0xb0] sm:$0xff]   ;;  %v1116_v32 = vld [vmem:[%s1212_s28 + $0xb8] sm:$0xff]   ;;  %694 = vmatprep.mubr.bf16.mxu0 %v936_v36  ;;  %v1122_v41 = vld [vmem:[%s1212_s28 + $0x108] sm:$0xff]  }
  0x24   : > { %1012 = vmatpush3.bf16.msra.mxu1 %v1096_v12  ;;  %991 = vmatprep.subr.bf16.mxu0 %v1097_v13  ;;  %v1123_v42 = vld [vmem:[%s1212_s28 + $0x110] sm:$0xff]   ;;  %v1124_v43 = vld [vmem:[%s1212_s28 + $0x118] sm:$0xff]   ;;  %v1125_v44 = vld [vmem:[%s1212_s28 + $0x120] sm:$0xff]  }
  0x25   : > { %1013 = vmatprep.subr.bf16.mxu1 %v1098_v14  ;;  %734 = vmatprep.mubr.bf16.mxu1 %v938_v38  ;;  %v1126_v45 = vld [vmem:[%s1212_s28 + $0x128] sm:$0xff]   ;;  %v1127_v46 = vld [vmem:[%s1212_s28 + $0x130] sm:$0xff]   ;;  %v1128_v47 = vld [vmem:[%s1212_s28 + $0x138] sm:$0xff]  }
  0x26   : > { %v1129_v48 = vld [vmem:[%s1207_s24 + $0x10] ss:$0 sps:$4 sm:$0xff]   ;;  %v320_v60 = vld [vmem:[#allocation2] sm:$0xff] }
  0x27   : > { %992 = vmatpush3.bf16.msra.mxu0 %v1099_v15  ;;  %v981_v4 = vld [vmem:[%s1279_s2] ss:$0 sm:$0xff] (!%p980_p7) }
  0x28   : > { %1014 = vmatpush3.bf16.msra.mxu1 %v1100_v16  ;;  %993 = vmatprep.subr.bf16.mxu0 %v1101_v17  ;;  %v797_v5 = vld [vmem:[%s1280_s3] sm:$0xf] (!%p980_p7) }
  0x29   : > { %1015 = vmatprep.subr.bf16.mxu1 %v1102_v18  ;;  %v798_v7 = vunpack.c.l.bf16 (!%p980_p7), %v797_v5 }
  0x2b   : > { %994 = vmatpush3.bf16.msra.mxu0 %v1103_v19 }
  0x2c   : > { %1016 = vmatpush3.bf16.msra.mxu1 %v1104_v20  ;;  %995 = vmatprep.subr.bf16.mxu0 %v1105_v21 }
  0x2d   : > { %1017 = vmatprep.subr.bf16.mxu1 %v1106_v22 }
  0x2f   : > { %996 = vmatpush3.bf16.msra.mxu0 %v1107_v23 }
  0x30   : > { %1018 = vmatpush3.bf16.msra.mxu1 %v1108_v24  ;;  %997 = vmatprep.subr.bf16.mxu0 %v1109_v25 }
  0x31   : > { %1019 = vmatprep.subr.bf16.mxu1 %v1110_v26 }
  0x33   : > { %998 = vmatpush3.bf16.msra.mxu0 %v1111_v27 }
  0x34   : > { %1020 = vmatpush3.bf16.msra.mxu1 %v1112_v28  ;;  %999 = vmatprep.subr.bf16.mxu0 %v1113_v29 }
  0x35   : > { %1021 = vmatprep.subr.bf16.mxu1 %v1114_v30 }
  0x37   : > { %1000 = vmatpush3.bf16.msra.mxu0 %v1115_v31 }
  0x38   : > { %1022 = vmatpush3.bf16.msra.mxu1 %v1116_v32  ;;  %1038 = vmatprep.subr.bf16.mxu0 %v1155_v40 }
  0x3a   : > { %695 = vmatmul.mubr.bf16.vlgmr.msra.gmra.mrb[0].mxu0 %v935_v35 }
  0x3b   : > { %735 = vmatmul.mubr.bf16.vlgmr.msra.gmra.mrb[0].mxu1 %v937_v37  ;;  %1039 = vmatpush3.bf16.msra.mxu0 %v1121_v39 }
  0x3c   : > { %1054 = vmatprep.mubr.msk.bf16.mxu0 %vm1156_vm0, %v1155_v40  ;;  %1040 = vmatprep.subr.bf16.mxu0 %v1155_v40 }
  0x3f   : > { %1041 = vmatpush3.bf16.msra.mxu0 %v1122_v41 }
  0x40   : > { %1042 = vmatprep.subr.bf16.mxu0 %v1155_v40 }
  0x43   : > { %1043 = vmatpush3.bf16.msra.mxu0 %v1123_v42 }
  0x44   : > { %1044 = vmatprep.subr.bf16.mxu0 %v1155_v40 }
  0x47   : > { %1045 = vmatpush3.bf16.msra.mxu0 %v1124_v43 }
  0x48   : > { %1046 = vmatprep.subr.bf16.mxu0 %v1155_v40 }
  0x4b   : > { %1047 = vmatpush3.bf16.msra.mxu0 %v1125_v44 }
  0x4c   : > { %1048 = vmatprep.subr.bf16.mxu0 %v1155_v40 }
  0x4f   : > { %1049 = vmatpush3.bf16.msra.mxu0 %v1126_v45 }
  0x50   : > { %1050 = vmatprep.subr.bf16.mxu0 %v1155_v40 }
  0x53   : > { %1051 = vmatpush3.bf16.msra.mxu0 %v1127_v46 }
  0x54   : > { %1052 = vmatprep.subr.bf16.mxu0 %v1155_v40 }
  0x57   : > { %1053 = vmatpush3.bf16.msra.mxu0 %v1128_v47 }
  0x5a   : > { %1055 = vmatmul.mubr.bf16.vlgmr.msra.gmra.mrb[4].mxu0 %v1129_v48 }
 0x10d   : > { %v1001_v49 = vpop.f32.mrb[0].mxu0 }
 0x10e   : > { %v1023_v50 = vpop.f32.mrb[0].mxu1  ;;  %v1002_v51 = vpop.f32.mrb[1].mxu0 }
 0x10f   : > { %v1024_v52 = vpop.f32.mrb[1].mxu1  ;;  %v1003_v53 = vadd.f32 %v1002_v51, %v1001_v49  ;;  %v1004_v55 = vpop.f32.mrb[2].mxu0 }
 0x110   : > { %v1025_v54 = vadd.f32 %v1024_v52, %v1023_v50  ;;  %v1026_v56 = vpop.f32.mrb[2].mxu1  ;;  %v1005_v57 = vpop.f32.mrb[3].mxu0 }
 0x111   : > { %v1027_v58 = vpop.f32.mrb[3].mxu1 }
 0x112   : > { %v737_v59 = vadd.f32 %v1025_v54, %v1003_v53 }
 0x12c   : > { %787 = sbr.rel (%p980_p7) target bundleno = 323 (0x143), region = 44 }
 0x12d   : > { %v776_v61 = vpop.f32.mrb[4].mxu0 }
 0x12e   : > { %v777_v62 = vadd.f32 %v776_v61, %v737_v59  ;;  %v1056_v63 = vpop.f32.mrb[5].mxu0 }
 0x12f   : > { %v779_v0 = vpop.f32.mrb[6].mxu0 }
 0x130   : > { %v782_v1 = vadd.f32 %v777_v62, %v320_v60  ;;  %v1057_v2 = vpop.f32.mrb[7].mxu0 }
 0x132   : > { %783 = vst [vmem:[#allocation2] sm:$0xff] %v782_v1 }
 0x139   : > { %v788_v3 = vld [vmem:[#allocation2] sm:$0xff] }
 0x13a   : > { %v796_v6 = vadd.f32 %v981_v4, %v788_v3 }
 0x13c   : > { %v799_v8 = vadd.f32 %v798_v7, %v796_v6 }
 0x13e   : > { %v800_v9 = vmax.f32 %v799_v8, 0.0 }
 0x140   : > { %v801_v10 = vpack.c.bf16 %v800_v9, %v800_v9 }
 0x142   : > { %802 = vst [vmem:[%s1281_s4] sm:$0xf] %v801_v10 }
 0x143 PF: > { %s14_s17 = sadd.s32 1, %s1152_s17   ;;  %s1282_s15 = smov %s1148_s16 }
 0x144   : > { %p11_p8 = scmp.ge.s32.totalorder %s14_s17, 4   ;;  %s1283_s16 = smov %s1285_s18 }
 0x146   :  { %13 = sbr.rel (!%p11_p8) target bundleno = 2 (0x2), region = 83 }

// kernel: resnet_forward.33
= control target key start
LH: loop header
LB: loop body
LE: loop exit
PB: predicated region body
PF: predicated region fallthrough
CT: control target
= control target key end

     0   :  { %s1361_s12 = smov 0   ;;  %s1363_s13 = smov 0   ;;  %s1493_s0 = inlined_call_operand.vmem [shape: bf16[8,1280], index: 0, kind: input, shape index: {}]   ;;  %s1494_s1 = inlined_call_operand.vmem [shape: bf16[1280,256], index: 1, kind: input, shape index: {}]   ;;  %s1495_s2 = inlined_call_operand.vmem [shape: f32[1,256], index: 2, kind: input, shape index: {}]   ;;  %s1496_s3 = inlined_call_operand.vmem [shape: bf16[8,256], index: 3, kind: output, shape index: {}]  }
   0x1   :  { %s1365_s14 = smov 0  }
   0x2 LB: > { %s25_s15 = sadd.s32 1, %s1333_s13  ;;  %p1066_p0 = scmp.ge.s32.totalorder %s1337_s14, 1  ;;  %s1337_s14 = sphi %s1365_s14, %s13_s14   ;;  %s1333_s13 = sphi %s1363_s13, %s1498_s13   ;;  %s1329_s12 = sphi %s1361_s12, %s1497_s12  }
   0x3   : > { %p26_p1 = scmp.ge.s32.totalorder %s25_s15, 2  ;;  %p194_p2 = scmp.lt.s32.totalorder %s1337_s14, 3 }
   0x5   : > { %s1500_s15 = smov (%p26_p1, %s25_s15), 0  ;;  %p195_p3 = pnand %p1066_p0, %p194_p2 }
   0x6   : > { %s240_s16 = smul.u32 (!%p195_p3), 5, %s1329_s12  ;;  %p1070_p6 = scmp.ne.s32.totalorder (!%p195_p3), %s1329_s12, 0 }
   0x7   : > { %198 = sbr.rel (%p195_p3) target bundleno = 353 (0x161), region = 32 }
   0x8   : > { %s250_s17 = smul.u32 (!%p195_p3), 80, %s1329_s12  ;;  %p243_p4 = scmp.lt.s32.totalorder (!%p195_p3), %s240_s16, 9 }
   0xa   : > { %p252_p5 = scmp.lt.s32.totalorder (!%p195_p3), %s250_s17, 159 }
   0xe   : > { %s1502_s16 = smov (!%p243_p4, %s240_s16), 9  ;;  %s1504_s17 = smov (!%p252_p5, %s250_s17), 159 }
   0xf   : > { %s1067_s18 = sshll.u32 %s1502_s16, 2  ;;  %s1162_s22 = sshll.u32 %s1504_s17, 3  ;;  %v1339_v0 = vmov (!%p1070_p6), 0.0  }
  0x10   : > { %s1386_s21 = scalar_lea.vmem %s1493_s0, %s1067_s18  ;;  %s1391_s25 = scalar_lea.vmem %s1494_s1, %s1162_s22  ;;  %282 = vst [vmem:[#allocation2] sm:$0xff] (!%p1070_p6), %v1339_v0  ;;  %283 = vst [vmem:[#allocation2 + $0x8] sm:$0xff] (!%p1070_p6), %v1339_v0 }
  0x11   : > { %281 = sbr.rel (%p1070_p6) target bundleno = 24 (0x18), region = 36 }
  0x18 PF: > { %v1190_v1 = vld [vmem:[%s1391_s25 + $0x4] ss:$8 sps:$4 sm:$0xff]   ;;  %v1194_v3 = vld [vmem:[%s1391_s25] ss:$8 sps:$4 sm:$0xff]   ;;  %v1196_v5 = vld [vmem:[%s1391_s25 + $0x14] ss:$8 sps:$4 sm:$0xff]  }
  0x19   : > { %v1192_v2 = vld [vmem:[%s1391_s25 + $0x104] ss:$8 sps:$4 sm:$0xff]   ;;  %787 = vmatprep.subr.bf16.mxu0 %v1190_v1  ;;  %v1195_v4 = vld [vmem:[%s1391_s25 + $0x100] ss:$8 sps:$4 sm:$0xff]   ;;  %v1198_v6 = vld [vmem:[%s1391_s25 + $0x114] ss:$8 sps:$4 sm:$0xff]  }
  0x1a   : > { %828 = vmatprep.subr.bf16.mxu1 %v1192_v2  ;;  %788 = vmatpush1.bf16.msra.mxu0 %v1194_v3  ;;  %v1200_v7 = vld [vmem:[%s1391_s25 + $0x10] ss:$8 sps:$4 sm:$0xff]   ;;  %v1202_v9 = vld [vmem:[%s1391_s25 + $0x24] ss:$8 sps:$4 sm:$0xff]   ;;  %v1206_v11 = vld [vmem:[%s1391_s25 + $0x20] ss:$8 sps:$4 sm:$0xff]  }
  0x1b   : > { %829 = vmatpush1.bf16.msra.mxu1 %v1195_v4  ;;  %789 = vmatprep.subr.bf16.mxu0 %v1196_v5  ;;  %v1201_v8 = vld [vmem:[%s1391_s25 + $0x110] ss:$8 sps:$4 sm:$0xff]   ;;  %v1204_v10 = vld [vmem:[%s1391_s25 + $0x124] ss:$8 sps:$4 sm:$0xff]   ;;  %v1207_v12 = vld [vmem:[%s1391_s25 + $0x120] ss:$8 sps:$4 sm:$0xff]  }
  0x1c   : > { %830 = vmatprep.subr.bf16.mxu1 %v1198_v6  ;;  %v1208_v13 = vld [vmem:[%s1391_s25 + $0x34] ss:$8 sps:$4 sm:$0xff]   ;;  %v1212_v15 = vld [vmem:[%s1391_s25 + $0x30] ss:$8 sps:$4 sm:$0xff]   ;;  %v1214_v17 = vld [vmem:[%s1391_s25 + $0x44] ss:$8 sps:$4 sm:$0xff]  }
  0x1d   : > { %v1210_v14 = vld [vmem:[%s1391_s25 + $0x134] ss:$8 sps:$4 sm:$0xff]   ;;  %v1213_v16 = vld [vmem:[%s1391_s25 + $0x130] ss:$8 sps:$4 sm:$0xff]   ;;  %v1216_v18 = vld [vmem:[%s1391_s25 + $0x144] ss:$8 sps:$4 sm:$0xff]  }
  0x1e   : > { %790 = vmatpush1.bf16.msra.mxu0 %v1200_v7  ;;  %v1218_v19 = vld [vmem:[%s1391_s25 + $0x40] ss:$8 sps:$4 sm:$0xff]   ;;  %v1220_v21 = vld [vmem:[%s1391_s25 + $0x54] ss:$8 sps:$4 sm:$0xff]   ;;  %v1224_v23 = vld [vmem:[%s1391_s25 + $0x50] ss:$8 sps:$4 sm:$0xff]  }
  0x1f   : > { %831 = vmatpush1.bf16.msra.mxu1 %v1201_v8  ;;  %791 = vmatprep.subr.bf16.mxu0 %v1202_v9  ;;  %v1219_v20 = vld [vmem:[%s1391_s25 + $0x140] ss:$8 sps:$4 sm:$0xff]   ;;  %v1222_v22 = vld [vmem:[%s1391_s25 + $0x154] ss:$8 sps:$4 sm:$0xff]   ;;  %v1225_v24 = vld [vmem:[%s1391_s25 + $0x150] ss:$8 sps:$4 sm:$0xff]  }
  0x20   : > { %832 = vmatprep.subr.bf16.mxu1 %v1204_v10  ;;  %v1226_v25 = vld [vmem:[%s1391_s25 + $0x64] ss:$8 sps:$4 sm:$0xff]   ;;  %v1230_v27 = vld [vmem:[%s1391_s25 + $0x60] ss:$8 sps:$4 sm:$0xff]   ;;  %v1232_v29 = vld [vmem:[%s1391_s25 + $0x74] ss:$8 sps:$4 sm:$0xff]  }
  0x21   : > { %v1228_v26 = vld [vmem:[%s1391_s25 + $0x164] ss:$8 sps:$4 sm:$0xff]   ;;  %v1231_v28 = vld [vmem:[%s1391_s25 + $0x160] ss:$8 sps:$4 sm:$0xff]   ;;  %v1234_v30 = vld [vmem:[%s1391_s25 + $0x174] ss:$8 sps:$4 sm:$0xff]  }
  0x22   : > { %792 = vmatpush1.bf16.msra.mxu0 %v1206_v11  ;;  %v1236_v31 = vld [vmem:[%s1391_s25 + $0x70] ss:$8 sps:$4 sm:$0xff]   ;;  %v1238_v33 = vld [vmem:[%s1391_s25 + $0x84] ss:$8 sps:$4 sm:$0xff]   ;;  %v1242_v35 = vld [vmem:[%s1391_s25 + $0x80] ss:$8 sps:$4 sm:$0xff]  }
  0x23   : > { %833 = vmatpush1.bf16.msra.mxu1 %v1207_v12  ;;  %793 = vmatprep.subr.bf16.mxu0 %v1208_v13  ;;  %v1237_v32 = vld [vmem:[%s1391_s25 + $0x170] ss:$8 sps:$4 sm:$0xff]   ;;  %v1240_v34 = vld [vmem:[%s1391_s25 + $0x184] ss:$8 sps:$4 sm:$0xff]   ;;  %v1243_v36 = vld [vmem:[%s1391_s25 + $0x180] ss:$8 sps:$4 sm:$0xff]  }
  0x24   : > { %834 = vmatprep.subr.bf16.mxu1 %v1210_v14  ;;  %v1244_v37 = vld [vmem:[%s1391_s25 + $0x94] ss:$8 sps:$4 sm:$0xff]   ;;  %v1248_v39 = vld [vmem:[%s1391_s25 + $0x90] ss:$8 sps:$4 sm:$0xff]   ;;  %v1250_v41 = vld [vmem:[%s1391_s25 + $0xa4] ss:$8 sps:$4 sm:$0xff]  }
  0x25   : > { %v1246_v38 = vld [vmem:[%s1391_s25 + $0x194] ss:$8 sps:$4 sm:$0xff]   ;;  %v1249_v40 = vld [vmem:[%s1391_s25 + $0x190] ss:$8 sps:$4 sm:$0xff]   ;;  %v1252_v42 = vld [vmem:[%s1391_s25 + $0x1a4] ss:$8 sps:$4 sm:$0xff]  }
  0x26   : > { %794 = vmatpush1.bf16.msra.mxu0 %v1212_v15  ;;  %v1254_v43 = vld [vmem:[%s1391_s25 + $0xa0] ss:$8 sps:$4 sm:$0xff]   ;;  %v1256_v45 = vld [vmem:[%s1391_s25 + $0xb4] ss:$8 sps:$4 sm:$0xff]   ;;  %v1260_v50 = vld [vmem:[%s1391_s25 + $0xb0] ss:$8 sps:$4 sm:$0xff]  }
  0x27   : > { %835 = vmatpush1.bf16.msra.mxu1 %v1213_v16  ;;  %795 = vmatprep.subr.bf16.mxu0 %v1214_v17  ;;  %v1255_v44 = vld [vmem:[%s1391_s25 + $0x1a0] ss:$8 sps:$4 sm:$0xff]   ;;  %v1258_v46 = vld [vmem:[%s1391_s25 + $0x1b4] ss:$8 sps:$4 sm:$0xff]   ;;  %v1261_v51 = vld [vmem:[%s1391_s25 + $0x1b0] ss:$8 sps:$4 sm:$0xff]  }
  0x28   : > { %836 = vmatprep.subr.bf16.mxu1 %v1216_v18  ;;  %v286_v47 = vld [vmem:[%s1386_s21] sm:$0xff]  ;;  %v287_v49 = vld [vmem:[%s1386_s21 + $0x8] sm:$0xff]  ;;  %v1268_v57 = vld [vmem:[%s1391_s25 + $0xd4] ss:$8 sps:$4 sm:$0xff]   ;;  %v1340_v11 = vmov 0   ;;  %p1156_p7 = scmp.ne.s32.totalorder %s1329_s12, 1 }
  0x29   : > { %v1072_v48 = vcombine.high %v286_v47, %v286_v47  ;;  %v1074_v52 = vcombine.high %v287_v49, %v287_v49  ;;  %v1262_v53 = vld [vmem:[%s1391_s25 + $0xc4] ss:$8 sps:$4 sm:$0xff]   ;;  %v1266_v55 = vld [vmem:[%s1391_s25 + $0xc0] ss:$8 sps:$4 sm:$0xff]   ;;  %v1270_v58 = vld [vmem:[%s1391_s25 + $0x1d4] ss:$8 sps:$4 sm:$0xff]   ;;  %v1071_v6 = vcombine.low %v286_v47, %v286_v47  ;;  %v1073_v7 = vcombine.low %v287_v49, %v287_v49 }
  0x2a   : > { %796 = vmatpush1.bf16.msra.mxu0 %v1218_v19  ;;  %v1264_v54 = vld [vmem:[%s1391_s25 + $0x1c4] ss:$8 sps:$4 sm:$0xff]   ;;  %v1267_v56 = vld [vmem:[%s1391_s25 + $0x1c0] ss:$8 sps:$4 sm:$0xff]   ;;  %v1272_v59 = vld [vmem:[%s1391_s25 + $0xd0] ss:$8 sps:$4 sm:$0xff]  }
  0x2b   : > { %837 = vmatpush1.bf16.msra.mxu1 %v1219_v20  ;;  %797 = vmatprep.subr.bf16.mxu0 %v1220_v21  ;;  %v1273_v60 = vld [vmem:[%s1391_s25 + $0x1d0] ss:$8 sps:$4 sm:$0xff]   ;;  %v1274_v61 = vld [vmem:[%s1391_s25 + $0xe4] ss:$8 sps:$4 sm:$0xff]   ;;  %v1278_v63 = vld [vmem:[%s1391_s25 + $0xe0] ss:$8 sps:$4 sm:$0xff]  }
  0x2c   : > { %838 = vmatprep.subr.bf16.mxu1 %v1222_v22  ;;  %819 = vmatprep.mubr.bf16.mxu0 %v1072_v48  ;;  %v1276_v62 = vld [vmem:[%s1391_s25 + $0x1e4] ss:$8 sps:$4 sm:$0xff]   ;;  %v1279_v0 = vld [vmem:[%s1391_s25 + $0x1e0] ss:$8 sps:$4 sm:$0xff]   ;;  %v1280_v1 = vld [vmem:[%s1391_s25 + $0xf4] ss:$8 sps:$4 sm:$0xff]  }
  0x2d   : > { %860 = vmatprep.mubr.bf16.mxu1 %v1074_v52  ;;  %v1282_v2 = vld [vmem:[%s1391_s25 + $0x1f4] ss:$8 sps:$4 sm:$0xff]   ;;  %v1284_v3 = vld [vmem:[%s1391_s25 + $0xf0] ss:$8 sps:$4 sm:$0xff]   ;;  %v1292_v5 = vld [vmem:[%s1391_s25 + $0x204] ss:$8 sps:$4 sm:$0xff]  }
  0x2e   : > { %798 = vmatpush1.bf16.msra.mxu0 %v1224_v23  ;;  %v1285_v4 = vld [vmem:[%s1391_s25 + $0x1f0] ss:$8 sps:$4 sm:$0xff]   ;;  %v1290_v8 = vld [vmem:[%s1391_s25 + $0x200] ss:$8 sps:$4 sm:$0xff]   ;;  %v1295_v9 = vld [vmem:[%s1391_s25 + $0x214] ss:$8 sps:$4 sm:$0xff]  }
  0x2f   : > { %839 = vmatpush1.bf16.msra.mxu1 %v1225_v24  ;;  %799 = vmatprep.subr.bf16.mxu0 %v1226_v25  ;;  %v1293_v10 = vld [vmem:[%s1391_s25 + $0x210] ss:$8 sps:$4 sm:$0xff]   ;;  %v1298_v12 = vld [vmem:[%s1391_s25 + $0x224] ss:$8 sps:$4 sm:$0xff]   ;;  %v1296_v13 = vld [vmem:[%s1391_s25 + $0x220] ss:$8 sps:$4 sm:$0xff]  }
  0x30   : > { %840 = vmatprep.subr.bf16.mxu1 %v1228_v26  ;;  %v1301_v14 = vld [vmem:[%s1391_s25 + $0x234] ss:$8 sps:$4 sm:$0xff]   ;;  %v1299_v15 = vld [vmem:[%s1391_s25 + $0x230] ss:$8 sps:$4 sm:$0xff]   ;;  %v1304_v16 = vld [vmem:[%s1391_s25 + $0x244] ss:$8 sps:$4 sm:$0xff]  }
  0x31   : > { %v1302_v17 = vld [vmem:[%s1391_s25 + $0x240] ss:$8 sps:$4 sm:$0xff]   ;;  %v1307_v18 = vld [vmem:[%s1391_s25 + $0x254] ss:$8 sps:$4 sm:$0xff]   ;;  %v1305_v19 = vld [vmem:[%s1391_s25 + $0x250] ss:$8 sps:$4 sm:$0xff]  }
  0x32   : > { %800 = vmatpush1.bf16.msra.mxu0 %v1230_v27  ;;  %v1310_v20 = vld [vmem:[%s1391_s25 + $0x264] ss:$8 sps:$4 sm:$0xff]   ;;  %v1308_v21 = vld [vmem:[%s1391_s25 + $0x260] ss:$8 sps:$4 sm:$0xff]   ;;  %v1313_v22 = vld [vmem:[%s1391_s25 + $0x274] ss:$8 sps:$4 sm:$0xff]  }
  0x33   : > { %841 = vmatpush1.bf16.msra.mxu1 %v1231_v28  ;;  %801 = vmatprep.subr.bf16.mxu0 %v1232_v29  ;;  %v1311_v23 = vld [vmem:[%s1391_s25 + $0x270] ss:$8 sps:$4 sm:$0xff]   ;;  %v920_v47 = vld [vmem:[%s1495_s2] sm:$0x3] (!%p1156_p7) }
  0x34   : > { %842 = vmatprep.subr.bf16.mxu1 %v1234_v30  ;;  %v1314_v24 = vld [vmem:[%s1386_s21 + $0x10] ss:$0 sps:$4 sm:$0xff]  }
  0x36   : > { %802 = vmatpush1.bf16.msra.mxu0 %v1236_v31 }
  0x37   : > { %843 = vmatpush1.bf16.msra.mxu1 %v1237_v32  ;;  %803 = vmatprep.subr.bf16.mxu0 %v1238_v33 }
  0x38   : > { %844 = vmatprep.subr.bf16.mxu1 %v1240_v34 }
  0x3a   : > { %804 = vmatpush1.bf16.msra.mxu0 %v1242_v35  ;;  %v284_v35 = vld [vmem:[#allocation2] sm:$0xff] }
  0x3b   : > { %845 = vmatpush1.bf16.msra.mxu1 %v1243_v36  ;;  %805 = vmatprep.subr.bf16.mxu0 %v1244_v37 }
  0x3c   : > { %846 = vmatprep.subr.bf16.mxu1 %v1246_v38  ;;  %v285_v38 = vld [vmem:[#allocation2 + $0x8] sm:$0xff] }
  0x3e   : > { %806 = vmatpush1.bf16.msra.mxu0 %v1248_v39 }
  0x3f   : > { %847 = vmatpush1.bf16.msra.mxu1 %v1249_v40  ;;  %807 = vmatprep.subr.bf16.mxu0 %v1250_v41 }
  0x40   : > { %848 = vmatprep.subr.bf16.mxu1 %v1252_v42 }
  0x42   : > { %808 = vmatpush1.bf16.msra.mxu0 %v1254_v43 }
  0x43   : > { %849 = vmatpush1.bf16.msra.mxu1 %v1255_v44  ;;  %809 = vmatprep.subr.bf16.mxu0 %v1256_v45  ;;  %v922_v45 = vlaneseq (!%p1156_p7) }
  0x44   : > { %850 = vmatprep.subr.bf16.mxu1 %v1258_v46 }
  0x45   : > { %v923_v46 = vshrl.u32 (!%p1156_p7), %v922_v45, 7 }
  0x46   : > { %810 = vmatpush1.bf16.msra.mxu0 %v1260_v50 }
  0x47   : > { %851 = vmatpush1.bf16.msra.mxu1 %v1261_v51  ;;  %811 = vmatprep.subr.bf16.mxu0 %v1262_v53  ;;  %v924_v48 = vsub.s32 (!%p1156_p7), 0, %v923_v46  ;;  %v928_v49 = vsub.s32 (!%p1156_p7), 1, %v923_v46 }
  0x48   : > { %852 = vmatprep.subr.bf16.mxu1 %v1264_v54 }
  0x49   : > { %v925_v52 = vrot.slane (!%p1156_p7), %v920_v47, %v924_v48  ;;  %v929_v53 = vrot.slane (!%p1156_p7), %v920_v47, %v928_v49 }
  0x4a   : > { %812 = vmatpush1.bf16.msra.mxu0 %v1266_v55 }
  0x4b   : > { %853 = vmatpush1.bf16.msra.mxu1 %v1267_v56  ;;  %813 = vmatprep.subr.bf16.mxu0 %v1268_v57 }
  0x4c   : > { %854 = vmatprep.subr.bf16.mxu1 %v1270_v58 }
  0x4e   : > { %814 = vmatpush1.bf16.msra.mxu0 %v1272_v59 }
  0x4f   : > { %855 = vmatpush1.bf16.msra.mxu1 %v1273_v60  ;;  %815 = vmatprep.subr.bf16.mxu0 %v1274_v61 }
  0x50   : > { %856 = vmatprep.subr.bf16.mxu1 %v1276_v62 }
  0x52   : > { %816 = vmatpush1.bf16.msra.mxu0 %v1278_v63 }
  0x53   : > { %857 = vmatpush1.bf16.msra.mxu1 %v1279_v0  ;;  %817 = vmatprep.subr.bf16.mxu0 %v1280_v1 }
  0x54   : > { %858 = vmatprep.subr.bf16.mxu1 %v1282_v2 }
  0x56   : > { %818 = vmatpush1.bf16.msra.mxu0 %v1284_v3 }
  0x57   : > { %859 = vmatpush1.bf16.msra.mxu1 %v1285_v4  ;;  %869 = vmatprep.subr.bf16.mxu0 %v1292_v5 }
  0x59   : > { %820 = vmatmul.mubr.bf16.vlgmr.msra.gmra.mrb[0].mxu0 %v1071_v6 }
  0x5a   : > { %861 = vmatmul.mubr.bf16.vlgmr.msra.gmra.mrb[0].mxu1 %v1073_v7  ;;  %870 = vmatpush1.bf16.msra.mxu0 %v1290_v8 }
  0x5b   : > { %901 = vmatprep.mubr.bf16.mxu0 %v1340_v11  ;;  %871 = vmatprep.subr.bf16.mxu0 %v1295_v9 }
  0x5e   : > { %872 = vmatpush1.bf16.msra.mxu0 %v1293_v10 }
  0x5f   : > { %873 = vmatprep.subr.bf16.mxu0 %v1298_v12 }
  0x62   : > { %874 = vmatpush1.bf16.msra.mxu0 %v1296_v13 }
  0x63   : > { %875 = vmatprep.subr.bf16.mxu0 %v1301_v14 }
  0x66   : > { %876 = vmatpush1.bf16.msra.mxu0 %v1299_v15 }
  0x67   : > { %877 = vmatprep.subr.bf16.mxu0 %v1304_v16 }
  0x6a   : > { %878 = vmatpush1.bf16.msra.mxu0 %v1302_v17 }
  0x6b   : > { %879 = vmatprep.subr.bf16.mxu0 %v1307_v18 }
  0x6e   : > { %880 = vmatpush1.bf16.msra.mxu0 %v1305_v19 }
  0x6f   : > { %881 = vmatprep.subr.bf16.mxu0 %v1310_v20 }
  0x72   : > { %882 = vmatpush1.bf16.msra.mxu0 %v1308_v21 }
  0x73   : > { %883 = vmatprep.subr.bf16.mxu0 %v1313_v22 }
  0x76   : > { %884 = vmatpush1.bf16.msra.mxu0 %v1311_v23 }
  0x79   : > { %902 = vmatmul.mubr.bf16.vlgmr.msra.gmra.mrb[4].mxu0 %v1314_v24 }
 0x12c   : > { %v821_v25 = vpop.f32.mrb[0].mxu0 }
 0x12d   : > { %v862_v26 = vpop.f32.mrb[0].mxu1  ;;  %v823_v28 = vpop.f32.mrb[1].mxu0 }
 0x12e   : > { %v863_v27 = vadd.f32 %v862_v26, %v821_v25  ;;  %v864_v29 = vpop.f32.mrb[1].mxu1  ;;  %v825_v31 = vpop.f32.mrb[2].mxu0 }
 0x12f   : > { %v865_v30 = vadd.f32 %v864_v29, %v823_v28  ;;  %v866_v32 = vpop.f32.mrb[2].mxu1  ;;  %v826_v33 = vpop.f32.mrb[3].mxu0 }
 0x130   : > { %v867_v34 = vpop.f32.mrb[3].mxu1 }
 0x14c   : > { %v903_v36 = vpop.f32.mrb[4].mxu0  ;;  %917 = sbr.rel (%p1156_p7) target bundleno = 353 (0x161), region = 40 }
 0x14d   : > { %v904_v37 = vadd.f32 %v903_v36, %v863_v27  ;;  %v905_v39 = vpop.f32.mrb[5].mxu0 }
 0x14e   : > { %v906_v40 = vadd.f32 %v905_v39, %v865_v30  ;;  %v907_v41 = vpop.f32.mrb[6].mxu0 }
 0x14f   : > { %v910_v42 = vadd.f32 %v904_v37, %v284_v35  ;;  %v908_v43 = vpop.f32.mrb[7].mxu0 }
 0x150   : > { %v911_v44 = vadd.f32 %v906_v40, %v285_v38 }
 0x151   : > { %912 = vst [vmem:[#allocation2] sm:$0xff] %v910_v42 }
 0x152   : > { %913 = vst [vmem:[#allocation2 + $0x8] sm:$0xff] %v911_v44 }
 0x158   : > { %v918_v50 = vld [vmem:[#allocation2] sm:$0xff] }
 0x159   : > { %v919_v51 = vld [vmem:[#allocation2 + $0x8] sm:$0xff]  ;;  %v932_v54 = vadd.f32 %v925_v52, %v918_v50 }
 0x15a   : > { %v933_v55 = vadd.f32 %v929_v53, %v919_v51 }
 0x15b   : > { %v934_v56 = vmax.f32 %v932_v54, 0.0 }
 0x15c   : > { %v935_v57 = vmax.f32 %v933_v55, 0.0 }
 0x15e   : > { %v1163_v58 = vpack.c.bf16 %v935_v57, %v934_v56 }
 0x160   : > { %944 = vst [vmem:[%s1496_s3] sm:$0xff] %v1163_v58 }
 0x161 PF: > { %s13_s14 = sadd.s32 1, %s1337_s14   ;;  %s1497_s12 = smov %s1333_s13 }
 0x162   : > { %p10_p8 = scmp.ge.s32.totalorder %s13_s14, 4   ;;  %s1498_s13 = smov %s1500_s15 }
 0x164   :  { %12 = sbr.rel (!%p10_p8) target bundleno = 2 (0x2), region = 76 }

// kernel: resnet_forward.34
= control target key start
LH: loop header
LB: loop body
LE: loop exit
PB: predicated region body
PF: predicated region fallthrough
CT: control target
= control target key end

     0   :  { %s1361_s12 = smov 0   ;;  %s1363_s13 = smov 0   ;;  %s1493_s0 = inlined_call_operand.vmem [shape: bf16[8,2560], index: 0, kind: input, shape index: {}]   ;;  %s1494_s1 = inlined_call_operand.vmem [shape: bf16[2560,256], index: 1, kind: input, shape index: {}]   ;;  %s1495_s2 = inlined_call_operand.vmem [shape: f32[1,256], index: 2, kind: input, shape index: {}]   ;;  %s1496_s3 = inlined_call_operand.vmem [shape: bf16[8,256], index: 3, kind: output, shape index: {}]  }
   0x1   :  { %s1365_s14 = smov 0  }
   0x2 LB: > { %s25_s15 = sadd.s32 1, %s1333_s13  ;;  %p1066_p0 = scmp.ge.s32.totalorder %s1337_s14, 1  ;;  %s1337_s14 = sphi %s1365_s14, %s13_s14   ;;  %s1333_s13 = sphi %s1363_s13, %s1498_s13   ;;  %s1329_s12 = sphi %s1361_s12, %s1497_s12  }
   0x3   : > { %p26_p1 = scmp.ge.s32.totalorder %s25_s15, 4  ;;  %p194_p2 = scmp.lt.s32.totalorder %s1337_s14, 5 }
   0x5   : > { %s1500_s15 = smov (%p26_p1, %s25_s15), 0  ;;  %p195_p3 = pnand %p1066_p0, %p194_p2 }
   0x6   : > { %s240_s16 = smul.u32 (!%p195_p3), 5, %s1329_s12  ;;  %p1070_p6 = scmp.ne.s32.totalorder (!%p195_p3), %s1329_s12, 0 }
   0x7   : > { %198 = sbr.rel (%p195_p3) target bundleno = 353 (0x161), region = 32 }
   0x8   : > { %s250_s17 = smul.u32 (!%p195_p3), 80, %s1329_s12  ;;  %p243_p4 = scmp.lt.s32.totalorder (!%p195_p3), %s240_s16, 19 }
   0xa   : > { %p252_p5 = scmp.lt.s32.totalorder (!%p195_p3), %s250_s17, 319 }
   0xe   : > { %s1502_s16 = smov (!%p243_p4, %s240_s16), 19  ;;  %s1504_s17 = smov (!%p252_p5, %s250_s17), 319 }
   0xf   : > { %s1067_s18 = sshll.u32 %s1502_s16, 2  ;;  %s1162_s22 = sshll.u32 %s1504_s17, 3  ;;  %v1339_v0 = vmov (!%p1070_p6), 0.0  }
  0x10   : > { %s1386_s21 = scalar_lea.vmem %s1493_s0, %s1067_s18  ;;  %s1391_s25 = scalar_lea.vmem %s1494_s1, %s1162_s22  ;;  %282 = vst [vmem:[#allocation2] sm:$0xff] (!%p1070_p6), %v1339_v0  ;;  %283 = vst [vmem:[#allocation2 + $0x8] sm:$0xff] (!%p1070_p6), %v1339_v0 }
  0x11   : > { %281 = sbr.rel (%p1070_p6) target bundleno = 24 (0x18), region = 36 }
  0x18 PF: > { %v1190_v1 = vld [vmem:[%s1391_s25 + $0x4] ss:$8 sps:$4 sm:$0xff]   ;;  %v1194_v3 = vld [vmem:[%s1391_s25] ss:$8 sps:$4 sm:$0xff]   ;;  %v1196_v5 = vld [vmem:[%s1391_s25 + $0x14] ss:$8 sps:$4 sm:$0xff]  }
  0x19   : > { %v1192_v2 = vld [vmem:[%s1391_s25 + $0x104] ss:$8 sps:$4 sm:$0xff]   ;;  %787 = vmatprep.subr.bf16.mxu0 %v1190_v1  ;;  %v1195_v4 = vld [vmem:[%s1391_s25 + $0x100] ss:$8 sps:$4 sm:$0xff]   ;;  %v1198_v6 = vld [vmem:[%s1391_s25 + $0x114] ss:$8 sps:$4 sm:$0xff]  }
  0x1a   : > { %828 = vmatprep.subr.bf16.mxu1 %v1192_v2  ;;  %788 = vmatpush1.bf16.msra.mxu0 %v1194_v3  ;;  %v1200_v7 = vld [vmem:[%s1391_s25 + $0x10] ss:$8 sps:$4 sm:$0xff]   ;;  %v1202_v9 = vld [vmem:[%s1391_s25 + $0x24] ss:$8 sps:$4 sm:$0xff]   ;;  %v1206_v11 = vld [vmem:[%s1391_s25 + $0x20] ss:$8 sps:$4 sm:$0xff]  }
  0x1b   : > { %829 = vmatpush1.bf16.msra.mxu1 %v1195_v4  ;;  %789 = vmatprep.subr.bf16.mxu0 %v1196_v5  ;;  %v1201_v8 = vld [vmem:[%s1391_s25 + $0x110] ss:$8 sps:$4 sm:$0xff]   ;;  %v1204_v10 = vld [vmem:[%s1391_s25 + $0x124] ss:$8 sps:$4 sm:$0xff]   ;;  %v1207_v12 = vld [vmem:[%s1391_s25 + $0x120] ss:$8 sps:$4 sm:$0xff]  }
  0x1c   : > { %830 = vmatprep.subr.bf16.mxu1 %v1198_v6  ;;  %v1208_v13 = vld [vmem:[%s1391_s25 + $0x34] ss:$8 sps:$4 sm:$0xff]   ;;  %v1212_v15 = vld [vmem:[%s1391_s25 + $0x30] ss:$8 sps:$4 sm:$0xff]   ;;  %v1214_v17 = vld [vmem:[%s1391_s25 + $0x44] ss:$8 sps:$4 sm:$0xff]  }
  0x1d   : > { %v1210_v14 = vld [vmem:[%s1391_s25 + $0x134] ss:$8 sps:$4 sm:$0xff]   ;;  %v1213_v16 = vld [vmem:[%s1391_s25 + $0x130] ss:$8 sps:$4 sm:$0xff]   ;;  %v1216_v18 = vld [vmem:[%s1391_s25 + $0x144] ss:$8 sps:$4 sm:$0xff]  }
  0x1e   : > { %790 = vmatpush1.bf16.msra.mxu0 %v1200_v7  ;;  %v1218_v19 = vld [vmem:[%s1391_s25 + $0x40] ss:$8 sps:$4 sm:$0xff]   ;;  %v1220_v21 = vld [vmem:[%s1391_s25 + $0x54] ss:$8 sps:$4 sm:$0xff]   ;;  %v1224_v23 = vld [vmem:[%s1391_s25 + $0x50] ss:$8 sps:$4 sm:$0xff]  }
  0x1f   : > { %831 = vmatpush1.bf16.msra.mxu1 %v1201_v8  ;;  %791 = vmatprep.subr.bf16.mxu0 %v1202_v9  ;;  %v1219_v20 = vld [vmem:[%s1391_s25 + $0x140] ss:$8 sps:$4 sm:$0xff]   ;;  %v1222_v22 = vld [vmem:[%s1391_s25 + $0x154] ss:$8 sps:$4 sm:$0xff]   ;;  %v1225_v24 = vld [vmem:[%s1391_s25 + $0x150] ss:$8 sps:$4 sm:$0xff]  }
  0x20   : > { %832 = vmatprep.subr.bf16.mxu1 %v1204_v10  ;;  %v1226_v25 = vld [vmem:[%s1391_s25 + $0x64] ss:$8 sps:$4 sm:$0xff]   ;;  %v1230_v27 = vld [vmem:[%s1391_s25 + $0x60] ss:$8 sps:$4 sm:$0xff]   ;;  %v1232_v29 = vld [vmem:[%s1391_s25 + $0x74] ss:$8 sps:$4 sm:$0xff]  }
  0x21   : > { %v1228_v26 = vld [vmem:[%s1391_s25 + $0x164] ss:$8 sps:$4 sm:$0xff]   ;;  %v1231_v28 = vld [vmem:[%s1391_s25 + $0x160] ss:$8 sps:$4 sm:$0xff]   ;;  %v1234_v30 = vld [vmem:[%s1391_s25 + $0x174] ss:$8 sps:$4 sm:$0xff]  }
  0x22   : > { %792 = vmatpush1.bf16.msra.mxu0 %v1206_v11  ;;  %v1236_v31 = vld [vmem:[%s1391_s25 + $0x70] ss:$8 sps:$4 sm:$0xff]   ;;  %v1238_v33 = vld [vmem:[%s1391_s25 + $0x84] ss:$8 sps:$4 sm:$0xff]   ;;  %v1242_v35 = vld [vmem:[%s1391_s25 + $0x80] ss:$8 sps:$4 sm:$0xff]  }
  0x23   : > { %833 = vmatpush1.bf16.msra.mxu1 %v1207_v12  ;;  %793 = vmatprep.subr.bf16.mxu0 %v1208_v13  ;;  %v1237_v32 = vld [vmem:[%s1391_s25 + $0x170] ss:$8 sps:$4 sm:$0xff]   ;;  %v1240_v34 = vld [vmem:[%s1391_s25 + $0x184] ss:$8 sps:$4 sm:$0xff]   ;;  %v1243_v36 = vld [vmem:[%s1391_s25 + $0x180] ss:$8 sps:$4 sm:$0xff]  }
  0x24   : > { %834 = vmatprep.subr.bf16.mxu1 %v1210_v14  ;;  %v1244_v37 = vld [vmem:[%s1391_s25 + $0x94] ss:$8 sps:$4 sm:$0xff]   ;;  %v1248_v39 = vld [vmem:[%s1391_s25 + $0x90] ss:$8 sps:$4 sm:$0xff]   ;;  %v1250_v41 = vld [vmem:[%s1391_s25 + $0xa4] ss:$8 sps:$4 sm:$0xff]  }
  0x25   : > { %v1246_v38 = vld [vmem:[%s1391_s25 + $0x194] ss:$8 sps:$4 sm:$0xff]   ;;  %v1249_v40 = vld [vmem:[%s1391_s25 + $0x190] ss:$8 sps:$4 sm:$0xff]   ;;  %v1252_v42 = vld [vmem:[%s1391_s25 + $0x1a4] ss:$8 sps:$4 sm:$0xff]  }
  0x26   : > { %794 = vmatpush1.bf16.msra.mxu0 %v1212_v15  ;;  %v1254_v43 = vld [vmem:[%s1391_s25 + $0xa0] ss:$8 sps:$4 sm:$0xff]   ;;  %v1256_v45 = vld [vmem:[%s1391_s25 + $0xb4] ss:$8 sps:$4 sm:$0xff]   ;;  %v1260_v50 = vld [vmem:[%s1391_s25 + $0xb0] ss:$8 sps:$4 sm:$0xff]  }
  0x27   : > { %835 = vmatpush1.bf16.msra.mxu1 %v1213_v16  ;;  %795 = vmatprep.subr.bf16.mxu0 %v1214_v17  ;;  %v1255_v44 = vld [vmem:[%s1391_s25 + $0x1a0] ss:$8 sps:$4 sm:$0xff]   ;;  %v1258_v46 = vld [vmem:[%s1391_s25 + $0x1b4] ss:$8 sps:$4 sm:$0xff]   ;;  %v1261_v51 = vld [vmem:[%s1391_s25 + $0x1b0] ss:$8 sps:$4 sm:$0xff]  }
  0x28   : > { %836 = vmatprep.subr.bf16.mxu1 %v1216_v18  ;;  %v286_v47 = vld [vmem:[%s1386_s21] sm:$0xff]  ;;  %v287_v49 = vld [vmem:[%s1386_s21 + $0x8] sm:$0xff]  ;;  %v1268_v57 = vld [vmem:[%s1391_s25 + $0xd4] ss:$8 sps:$4 sm:$0xff]   ;;  %v1340_v11 = vmov 0   ;;  %p1156_p7 = scmp.ne.s32.totalorder %s1329_s12, 3 }
  0x29   : > { %v1072_v48 = vcombine.high %v286_v47, %v286_v47  ;;  %v1074_v52 = vcombine.high %v287_v49, %v287_v49  ;;  %v1262_v53 = vld [vmem:[%s1391_s25 + $0xc4] ss:$8 sps:$4 sm:$0xff]   ;;  %v1266_v55 = vld [vmem:[%s1391_s25 + $0xc0] ss:$8 sps:$4 sm:$0xff]   ;;  %v1270_v58 = vld [vmem:[%s1391_s25 + $0x1d4] ss:$8 sps:$4 sm:$0xff]   ;;  %v1071_v6 = vcombine.low %v286_v47, %v286_v47  ;;  %v1073_v7 = vcombine.low %v287_v49, %v287_v49 }
  0x2a   : > { %796 = vmatpush1.bf16.msra.mxu0 %v1218_v19  ;;  %v1264_v54 = vld [vmem:[%s1391_s25 + $0x1c4] ss:$8 sps:$4 sm:$0xff]   ;;  %v1267_v56 = vld [vmem:[%s1391_s25 + $0x1c0] ss:$8 sps:$4 sm:$0xff]   ;;  %v1272_v59 = vld [vmem:[%s1391_s25 + $0xd0] ss:$8 sps:$4 sm:$0xff]  }
  0x2b   : > { %837 = vmatpush1.bf16.msra.mxu1 %v1219_v20  ;;  %797 = vmatprep.subr.bf16.mxu0 %v1220_v21  ;;  %v1273_v60 = vld [vmem:[%s1391_s25 + $0x1d0] ss:$8 sps:$4 sm:$0xff]   ;;  %v1274_v61 = vld [vmem:[%s1391_s25 + $0xe4] ss:$8 sps:$4 sm:$0xff]   ;;  %v1278_v63 = vld [vmem:[%s1391_s25 + $0xe0] ss:$8 sps:$4 sm:$0xff]  }
  0x2c   : > { %838 = vmatprep.subr.bf16.mxu1 %v1222_v22  ;;  %819 = vmatprep.mubr.bf16.mxu0 %v1072_v48  ;;  %v1276_v62 = vld [vmem:[%s1391_s25 + $0x1e4] ss:$8 sps:$4 sm:$0xff]   ;;  %v1279_v0 = vld [vmem:[%s1391_s25 + $0x1e0] ss:$8 sps:$4 sm:$0xff]   ;;  %v1280_v1 = vld [vmem:[%s1391_s25 + $0xf4] ss:$8 sps:$4 sm:$0xff]  }
  0x2d   : > { %860 = vmatprep.mubr.bf16.mxu1 %v1074_v52  ;;  %v1282_v2 = vld [vmem:[%s1391_s25 + $0x1f4] ss:$8 sps:$4 sm:$0xff]   ;;  %v1284_v3 = vld [vmem:[%s1391_s25 + $0xf0] ss:$8 sps:$4 sm:$0xff]   ;;  %v1292_v5 = vld [vmem:[%s1391_s25 + $0x204] ss:$8 sps:$4 sm:$0xff]  }
  0x2e   : > { %798 = vmatpush1.bf16.msra.mxu0 %v1224_v23  ;;  %v1285_v4 = vld [vmem:[%s1391_s25 + $0x1f0] ss:$8 sps:$4 sm:$0xff]   ;;  %v1290_v8 = vld [vmem:[%s1391_s25 + $0x200] ss:$8 sps:$4 sm:$0xff]   ;;  %v1295_v9 = vld [vmem:[%s1391_s25 + $0x214] ss:$8 sps:$4 sm:$0xff]  }
  0x2f   : > { %839 = vmatpush1.bf16.msra.mxu1 %v1225_v24  ;;  %799 = vmatprep.subr.bf16.mxu0 %v1226_v25  ;;  %v1293_v10 = vld [vmem:[%s1391_s25 + $0x210] ss:$8 sps:$4 sm:$0xff]   ;;  %v1298_v12 = vld [vmem:[%s1391_s25 + $0x224] ss:$8 sps:$4 sm:$0xff]   ;;  %v1296_v13 = vld [vmem:[%s1391_s25 + $0x220] ss:$8 sps:$4 sm:$0xff]  }
  0x30   : > { %840 = vmatprep.subr.bf16.mxu1 %v1228_v26  ;;  %v1301_v14 = vld [vmem:[%s1391_s25 + $0x234] ss:$8 sps:$4 sm:$0xff]   ;;  %v1299_v15 = vld [vmem:[%s1391_s25 + $0x230] ss:$8 sps:$4 sm:$0xff]   ;;  %v1304_v16 = vld [vmem:[%s1391_s25 + $0x244] ss:$8 sps:$4 sm:$0xff]  }
  0x31   : > { %v1302_v17 = vld [vmem:[%s1391_s25 + $0x240] ss:$8 sps:$4 sm:$0xff]   ;;  %v1307_v18 = vld [vmem:[%s1391_s25 + $0x254] ss:$8 sps:$4 sm:$0xff]   ;;  %v1305_v19 = vld [vmem:[%s1391_s25 + $0x250] ss:$8 sps:$4 sm:$0xff]  }
  0x32   : > { %800 = vmatpush1.bf16.msra.mxu0 %v1230_v27  ;;  %v1310_v20 = vld [vmem:[%s1391_s25 + $0x264] ss:$8 sps:$4 sm:$0xff]   ;;  %v1308_v21 = vld [vmem:[%s1391_s25 + $0x260] ss:$8 sps:$4 sm:$0xff]   ;;  %v1313_v22 = vld [vmem:[%s1391_s25 + $0x274] ss:$8 sps:$4 sm:$0xff]  }
  0x33   : > { %841 = vmatpush1.bf16.msra.mxu1 %v1231_v28  ;;  %801 = vmatprep.subr.bf16.mxu0 %v1232_v29  ;;  %v1311_v23 = vld [vmem:[%s1391_s25 + $0x270] ss:$8 sps:$4 sm:$0xff]   ;;  %v920_v47 = vld [vmem:[%s1495_s2] sm:$0x3] (!%p1156_p7) }
  0x34   : > { %842 = vmatprep.subr.bf16.mxu1 %v1234_v30  ;;  %v1314_v24 = vld [vmem:[%s1386_s21 + $0x10] ss:$0 sps:$4 sm:$0xff]  }
  0x36   : > { %802 = vmatpush1.bf16.msra.mxu0 %v1236_v31 }
  0x37   : > { %843 = vmatpush1.bf16.msra.mxu1 %v1237_v32  ;;  %803 = vmatprep.subr.bf16.mxu0 %v1238_v33 }
  0x38   : > { %844 = vmatprep.subr.bf16.mxu1 %v1240_v34 }
  0x3a   : > { %804 = vmatpush1.bf16.msra.mxu0 %v1242_v35  ;;  %v284_v35 = vld [vmem:[#allocation2] sm:$0xff] }
  0x3b   : > { %845 = vmatpush1.bf16.msra.mxu1 %v1243_v36  ;;  %805 = vmatprep.subr.bf16.mxu0 %v1244_v37 }
  0x3c   : > { %846 = vmatprep.subr.bf16.mxu1 %v1246_v38  ;;  %v285_v38 = vld [vmem:[#allocation2 + $0x8] sm:$0xff] }
  0x3e   : > { %806 = vmatpush1.bf16.msra.mxu0 %v1248_v39 }
  0x3f   : > { %847 = vmatpush1.bf16.msra.mxu1 %v1249_v40  ;;  %807 = vmatprep.subr.bf16.mxu0 %v1250_v41 }
  0x40   : > { %848 = vmatprep.subr.bf16.mxu1 %v1252_v42 }
  0x42   : > { %808 = vmatpush1.bf16.msra.mxu0 %v1254_v43 }
  0x43   : > { %849 = vmatpush1.bf16.msra.mxu1 %v1255_v44  ;;  %809 = vmatprep.subr.bf16.mxu0 %v1256_v45  ;;  %v922_v45 = vlaneseq (!%p1156_p7) }
  0x44   : > { %850 = vmatprep.subr.bf16.mxu1 %v1258_v46 }
  0x45   : > { %v923_v46 = vshrl.u32 (!%p1156_p7), %v922_v45, 7 }
  0x46   : > { %810 = vmatpush1.bf16.msra.mxu0 %v1260_v50 }
  0x47   : > { %851 = vmatpush1.bf16.msra.mxu1 %v1261_v51  ;;  %811 = vmatprep.subr.bf16.mxu0 %v1262_v53  ;;  %v924_v48 = vsub.s32 (!%p1156_p7), 0, %v923_v46  ;;  %v928_v49 = vsub.s32 (!%p1156_p7), 1, %v923_v46 }
  0x48   : > { %852 = vmatprep.subr.bf16.mxu1 %v1264_v54 }
  0x49   : > { %v925_v52 = vrot.slane (!%p1156_p7), %v920_v47, %v924_v48  ;;  %v929_v53 = vrot.slane (!%p1156_p7), %v920_v47, %v928_v49 }
  0x4a   : > { %812 = vmatpush1.bf16.msra.mxu0 %v1266_v55 }
  0x4b   : > { %853 = vmatpush1.bf16.msra.mxu1 %v1267_v56  ;;  %813 = vmatprep.subr.bf16.mxu0 %v1268_v57 }
  0x4c   : > { %854 = vmatprep.subr.bf16.mxu1 %v1270_v58 }
  0x4e   : > { %814 = vmatpush1.bf16.msra.mxu0 %v1272_v59 }
  0x4f   : > { %855 = vmatpush1.bf16.msra.mxu1 %v1273_v60  ;;  %815 = vmatprep.subr.bf16.mxu0 %v1274_v61 }
  0x50   : > { %856 = vmatprep.subr.bf16.mxu1 %v1276_v62 }
  0x52   : > { %816 = vmatpush1.bf16.msra.mxu0 %v1278_v63 }
  0x53   : > { %857 = vmatpush1.bf16.msra.mxu1 %v1279_v0  ;;  %817 = vmatprep.subr.bf16.mxu0 %v1280_v1 }
  0x54   : > { %858 = vmatprep.subr.bf16.mxu1 %v1282_v2 }
  0x56   : > { %818 = vmatpush1.bf16.msra.mxu0 %v1284_v3 }
  0x57   : > { %859 = vmatpush1.bf16.msra.mxu1 %v1285_v4  ;;  %869 = vmatprep.subr.bf16.mxu0 %v1292_v5 }
  0x59   : > { %820 = vmatmul.mubr.bf16.vlgmr.msra.gmra.mrb[0].mxu0 %v1071_v6 }
  0x5a   : > { %861 = vmatmul.mubr.bf16.vlgmr.msra.gmra.mrb[0].mxu1 %v1073_v7  ;;  %870 = vmatpush1.bf16.msra.mxu0 %v1290_v8 }
  0x5b   : > { %901 = vmatprep.mubr.bf16.mxu0 %v1340_v11  ;;  %871 = vmatprep.subr.bf16.mxu0 %v1295_v9 }
  0x5e   : > { %872 = vmatpush1.bf16.msra.mxu0 %v1293_v10 }
  0x5f   : > { %873 = vmatprep.subr.bf16.mxu0 %v1298_v12 }
  0x62   : > { %874 = vmatpush1.bf16.msra.mxu0 %v1296_v13 }
  0x63   : > { %875 = vmatprep.subr.bf16.mxu0 %v1301_v14 }
  0x66   : > { %876 = vmatpush1.bf16.msra.mxu0 %v1299_v15 }
  0x67   : > { %877 = vmatprep.subr.bf16.mxu0 %v1304_v16 }
  0x6a   : > { %878 = vmatpush1.bf16.msra.mxu0 %v1302_v17 }
  0x6b   : > { %879 = vmatprep.subr.bf16.mxu0 %v1307_v18 }
  0x6e   : > { %880 = vmatpush1.bf16.msra.mxu0 %v1305_v19 }
  0x6f   : > { %881 = vmatprep.subr.bf16.mxu0 %v1310_v20 }
  0x72   : > { %882 = vmatpush1.bf16.msra.mxu0 %v1308_v21 }
  0x73   : > { %883 = vmatprep.subr.bf16.mxu0 %v1313_v22 }
  0x76   : > { %884 = vmatpush1.bf16.msra.mxu0 %v1311_v23 }
  0x79   : > { %902 = vmatmul.mubr.bf16.vlgmr.msra.gmra.mrb[4].mxu0 %v1314_v24 }
 0x12c   : > { %v821_v25 = vpop.f32.mrb[0].mxu0 }
 0x12d   : > { %v862_v26 = vpop.f32.mrb[0].mxu1  ;;  %v823_v28 = vpop.f32.mrb[1].mxu0 }
 0x12e   : > { %v863_v27 = vadd.f32 %v862_v26, %v821_v25  ;;  %v864_v29 = vpop.f32.mrb[1].mxu1  ;;  %v825_v31 = vpop.f32.mrb[2].mxu0 }
 0x12f   : > { %v865_v30 = vadd.f32 %v864_v29, %v823_v28  ;;  %v866_v32 = vpop.f32.mrb[2].mxu1  ;;  %v826_v33 = vpop.f32.mrb[3].mxu0 }
 0x130   : > { %v867_v34 = vpop.f32.mrb[3].mxu1 }
 0x14c   : > { %v903_v36 = vpop.f32.mrb[4].mxu0  ;;  %917 = sbr.rel (%p1156_p7) target bundleno = 353 (0x161), region = 40 }
 0x14d   : > { %v904_v37 = vadd.f32 %v903_v36, %v863_v27  ;;  %v905_v39 = vpop.f32.mrb[5].mxu0 }
 0x14e   : > { %v906_v40 = vadd.f32 %v905_v39, %v865_v30  ;;  %v907_v41 = vpop.f32.mrb[6].mxu0 }
 0x14f   : > { %v910_v42 = vadd.f32 %v904_v37, %v284_v35  ;;  %v908_v43 = vpop.f32.mrb[7].mxu0 }
 0x150   : > { %v911_v44 = vadd.f32 %v906_v40, %v285_v38 }
 0x151   : > { %912 = vst [vmem:[#allocation2] sm:$0xff] %v910_v42 }
 0x152   : > { %913 = vst [vmem:[#allocation2 + $0x8] sm:$0xff] %v911_v44 }
 0x158   : > { %v918_v50 = vld [vmem:[#allocation2] sm:$0xff] }
 0x159   : > { %v919_v51 = vld [vmem:[#allocation2 + $0x8] sm:$0xff]  ;;  %v932_v54 = vadd.f32 %v925_v52, %v918_v50 }
 0x15a   : > { %v933_v55 = vadd.f32 %v929_v53, %v919_v51 }
 0x15b   : > { %v934_v56 = vmax.f32 %v932_v54, 0.0 }
 0x15c   : > { %v935_v57 = vmax.f32 %v933_v55, 0.0 }
 0x15e   : > { %v1163_v58 = vpack.c.bf16 %v935_v57, %v934_v56 }
 0x160   : > { %944 = vst [vmem:[%s1496_s3] sm:$0xff] %v1163_v58 }
 0x161 PF: > { %s13_s14 = sadd.s32 1, %s1337_s14   ;;  %s1497_s12 = smov %s1333_s13 }
 0x162   : > { %p10_p8 = scmp.ge.s32.totalorder %s13_s14, 6   ;;  %s1498_s13 = smov %s1500_s15 }
 0x164   :  { %12 = sbr.rel (!%p10_p8) target bundleno = 2 (0x2), region = 76 }

// kernel: resnet_forward.35
= control target key start
LH: loop header
LB: loop body
LE: loop exit
PB: predicated region body
PF: predicated region fallthrough
CT: control target
= control target key end

     0   :  { %s1499_s12 = smov 0   ;;  %s1501_s13 = smov 0   ;;  %s1653_s0 = inlined_call_operand.vmem [shape: bf16[8,2304], index: 0, kind: input, shape index: {}]   ;;  %s1654_s1 = inlined_call_operand.vmem [shape: bf16[2304,256], index: 1, kind: input, shape index: {}]   ;;  %s1655_s2 = inlined_call_operand.vmem [shape: f32[1,256], index: 2, kind: input, shape index: {}]   ;;  %s1656_s3 = inlined_call_operand.vmem [shape: bf16[8,256], index: 3, kind: output, shape index: {}]  }
   0x1   :  { %s1503_s14 = smov 0  }
   0x2 LB: > { %s25_s15 = sadd.s32 1, %s1472_s13  ;;  %p1164_p0 = scmp.ge.s32.totalorder %s1476_s14, 1  ;;  %s1476_s14 = sphi %s1503_s14, %s13_s14   ;;  %s1472_s13 = sphi %s1501_s13, %s1658_s13   ;;  %s1468_s12 = sphi %s1499_s12, %s1657_s12  }
   0x3   : > { %p26_p1 = scmp.ge.s32.totalorder %s25_s15, 3  ;;  %p194_p2 = scmp.lt.s32.totalorder %s1476_s14, 4 }
   0x5   : > { %s1660_s15 = smov (%p26_p1, %s25_s15), 0  ;;  %p195_p3 = pnand %p1164_p0, %p194_p2 }
   0x6   : > { %s240_s16 = smul.u32 (!%p195_p3), 6, %s1468_s12  ;;  %p1168_p6 = scmp.ne.s32.totalorder (!%p195_p3), %s1468_s12, 0 }
   0x7   : > { %198 = sbr.rel (%p195_p3) target bundleno = 385 (0x181), region = 32 }
   0x8   : > { %s250_s17 = smul.u32 (!%p195_p3), 96, %s1468_s12  ;;  %p243_p4 = scmp.lt.s32.totalorder (!%p195_p3), %s240_s16, 17 }
   0xa   : > { %p252_p5 = scmp.lt.s32.totalorder (!%p195_p3), %s250_s17, 287 }
   0xe   : > { %s1662_s16 = smov (!%p243_p4, %s240_s16), 17  ;;  %s1664_s17 = smov (!%p252_p5, %s250_s17), 287 }
   0xf   : > { %s1165_s18 = sshll.u32 %s1662_s16, 2  ;;  %s1277_s22 = sshll.u32 %s1664_s17, 3  ;;  %v1478_v0 = vmov (!%p1168_p6), 0.0  }
  0x10   : > { %s1524_s21 = scalar_lea.vmem %s1653_s0, %s1165_s18  ;;  %s1529_s25 = scalar_lea.vmem %s1654_s1, %s1277_s22  ;;  %281 = vst [vmem:[#allocation2] sm:$0xff] (!%p1168_p6), %v1478_v0  ;;  %282 = vst [vmem:[#allocation2 + $0x8] sm:$0xff] (!%p1168_p6), %v1478_v0 }
  0x11   : > { %280 = sbr.rel (%p1168_p6) target bundleno = 24 (0x18), region = 36 }
  0x18 PF: > { %v1304_v1 = vld [vmem:[%s1529_s25 + $0x4] ss:$8 sps:$4 sm:$0xff]   ;;  %v1308_v3 = vld [vmem:[%s1529_s25] ss:$8 sps:$4 sm:$0xff]   ;;  %v1310_v5 = vld [vmem:[%s1529_s25 + $0x14] ss:$8 sps:$4 sm:$0xff]  }
  0x19   : > { %v1306_v2 = vld [vmem:[%s1529_s25 + $0x104] ss:$8 sps:$4 sm:$0xff]   ;;  %885 = vmatprep.subr.bf16.mxu0 %v1304_v1  ;;  %v1309_v4 = vld [vmem:[%s1529_s25 + $0x100] ss:$8 sps:$4 sm:$0xff]   ;;  %v1312_v6 = vld [vmem:[%s1529_s25 + $0x114] ss:$8 sps:$4 sm:$0xff]  }
  0x1a   : > { %926 = vmatprep.subr.bf16.mxu1 %v1306_v2  ;;  %886 = vmatpush1.bf16.msra.mxu0 %v1308_v3  ;;  %v1314_v7 = vld [vmem:[%s1529_s25 + $0x10] ss:$8 sps:$4 sm:$0xff]   ;;  %v1316_v9 = vld [vmem:[%s1529_s25 + $0x24] ss:$8 sps:$4 sm:$0xff]   ;;  %v1320_v11 = vld [vmem:[%s1529_s25 + $0x20] ss:$8 sps:$4 sm:$0xff]  }
  0x1b   : > { %927 = vmatpush1.bf16.msra.mxu1 %v1309_v4  ;;  %887 = vmatprep.subr.bf16.mxu0 %v1310_v5  ;;  %v1315_v8 = vld [vmem:[%s1529_s25 + $0x110] ss:$8 sps:$4 sm:$0xff]   ;;  %v1318_v10 = vld [vmem:[%s1529_s25 + $0x124] ss:$8 sps:$4 sm:$0xff]   ;;  %v1321_v12 = vld [vmem:[%s1529_s25 + $0x120] ss:$8 sps:$4 sm:$0xff]  }
  0x1c   : > { %928 = vmatprep.subr.bf16.mxu1 %v1312_v6  ;;  %v1322_v13 = vld [vmem:[%s1529_s25 + $0x34] ss:$8 sps:$4 sm:$0xff]   ;;  %v1326_v15 = vld [vmem:[%s1529_s25 + $0x30] ss:$8 sps:$4 sm:$0xff]   ;;  %v1328_v17 = vld [vmem:[%s1529_s25 + $0x44] ss:$8 sps:$4 sm:$0xff]  }
  0x1d   : > { %v1324_v14 = vld [vmem:[%s1529_s25 + $0x134] ss:$8 sps:$4 sm:$0xff]   ;;  %v1327_v16 = vld [vmem:[%s1529_s25 + $0x130] ss:$8 sps:$4 sm:$0xff]   ;;  %v1330_v18 = vld [vmem:[%s1529_s25 + $0x144] ss:$8 sps:$4 sm:$0xff]  }
  0x1e   : > { %888 = vmatpush1.bf16.msra.mxu0 %v1314_v7  ;;  %v1332_v19 = vld [vmem:[%s1529_s25 + $0x40] ss:$8 sps:$4 sm:$0xff]   ;;  %v1334_v21 = vld [vmem:[%s1529_s25 + $0x54] ss:$8 sps:$4 sm:$0xff]   ;;  %v1338_v23 = vld [vmem:[%s1529_s25 + $0x50] ss:$8 sps:$4 sm:$0xff]  }
  0x1f   : > { %929 = vmatpush1.bf16.msra.mxu1 %v1315_v8  ;;  %889 = vmatprep.subr.bf16.mxu0 %v1316_v9  ;;  %v1333_v20 = vld [vmem:[%s1529_s25 + $0x140] ss:$8 sps:$4 sm:$0xff]   ;;  %v1336_v22 = vld [vmem:[%s1529_s25 + $0x154] ss:$8 sps:$4 sm:$0xff]   ;;  %v1339_v24 = vld [vmem:[%s1529_s25 + $0x150] ss:$8 sps:$4 sm:$0xff]  }
  0x20   : > { %930 = vmatprep.subr.bf16.mxu1 %v1318_v10  ;;  %v1340_v25 = vld [vmem:[%s1529_s25 + $0x64] ss:$8 sps:$4 sm:$0xff]   ;;  %v1344_v27 = vld [vmem:[%s1529_s25 + $0x60] ss:$8 sps:$4 sm:$0xff]   ;;  %v1346_v29 = vld [vmem:[%s1529_s25 + $0x74] ss:$8 sps:$4 sm:$0xff]  }
  0x21   : > { %v1342_v26 = vld [vmem:[%s1529_s25 + $0x164] ss:$8 sps:$4 sm:$0xff]   ;;  %v1345_v28 = vld [vmem:[%s1529_s25 + $0x160] ss:$8 sps:$4 sm:$0xff]   ;;  %v1348_v30 = vld [vmem:[%s1529_s25 + $0x174] ss:$8 sps:$4 sm:$0xff]  }
  0x22   : > { %890 = vmatpush1.bf16.msra.mxu0 %v1320_v11  ;;  %v1350_v31 = vld [vmem:[%s1529_s25 + $0x70] ss:$8 sps:$4 sm:$0xff]   ;;  %v1352_v33 = vld [vmem:[%s1529_s25 + $0x84] ss:$8 sps:$4 sm:$0xff]   ;;  %v1356_v35 = vld [vmem:[%s1529_s25 + $0x80] ss:$8 sps:$4 sm:$0xff]  }
  0x23   : > { %931 = vmatpush1.bf16.msra.mxu1 %v1321_v12  ;;  %891 = vmatprep.subr.bf16.mxu0 %v1322_v13  ;;  %v1351_v32 = vld [vmem:[%s1529_s25 + $0x170] ss:$8 sps:$4 sm:$0xff]   ;;  %v1354_v34 = vld [vmem:[%s1529_s25 + $0x184] ss:$8 sps:$4 sm:$0xff]   ;;  %v1357_v36 = vld [vmem:[%s1529_s25 + $0x180] ss:$8 sps:$4 sm:$0xff]  }
  0x24   : > { %932 = vmatprep.subr.bf16.mxu1 %v1324_v14  ;;  %v1358_v37 = vld [vmem:[%s1529_s25 + $0x94] ss:$8 sps:$4 sm:$0xff]   ;;  %v1362_v39 = vld [vmem:[%s1529_s25 + $0x90] ss:$8 sps:$4 sm:$0xff]   ;;  %v1364_v41 = vld [vmem:[%s1529_s25 + $0xa4] ss:$8 sps:$4 sm:$0xff]  }
  0x25   : > { %v1360_v38 = vld [vmem:[%s1529_s25 + $0x194] ss:$8 sps:$4 sm:$0xff]   ;;  %v1363_v40 = vld [vmem:[%s1529_s25 + $0x190] ss:$8 sps:$4 sm:$0xff]   ;;  %v1366_v42 = vld [vmem:[%s1529_s25 + $0x1a4] ss:$8 sps:$4 sm:$0xff]  }
  0x26   : > { %892 = vmatpush1.bf16.msra.mxu0 %v1326_v15  ;;  %v1368_v43 = vld [vmem:[%s1529_s25 + $0xa0] ss:$8 sps:$4 sm:$0xff]   ;;  %v1370_v45 = vld [vmem:[%s1529_s25 + $0xb4] ss:$8 sps:$4 sm:$0xff]   ;;  %v1374_v50 = vld [vmem:[%s1529_s25 + $0xb0] ss:$8 sps:$4 sm:$0xff]  }
  0x27   : > { %933 = vmatpush1.bf16.msra.mxu1 %v1327_v16  ;;  %893 = vmatprep.subr.bf16.mxu0 %v1328_v17  ;;  %v1369_v44 = vld [vmem:[%s1529_s25 + $0x1a0] ss:$8 sps:$4 sm:$0xff]   ;;  %v1372_v46 = vld [vmem:[%s1529_s25 + $0x1b4] ss:$8 sps:$4 sm:$0xff]   ;;  %v1375_v51 = vld [vmem:[%s1529_s25 + $0x1b0] ss:$8 sps:$4 sm:$0xff]  }
  0x28   : > { %934 = vmatprep.subr.bf16.mxu1 %v1330_v18  ;;  %v285_v47 = vld [vmem:[%s1524_s21] sm:$0xff]  ;;  %v286_v49 = vld [vmem:[%s1524_s21 + $0x8] sm:$0xff]  ;;  %v1382_v57 = vld [vmem:[%s1529_s25 + $0xd4] ss:$8 sps:$4 sm:$0xff]   ;;  %p1271_p7 = scmp.ne.s32.totalorder %s1468_s12, 2 }
  0x29   : > { %v1170_v48 = vcombine.high %v285_v47, %v285_v47  ;;  %v1172_v52 = vcombine.high %v286_v49, %v286_v49  ;;  %v1376_v53 = vld [vmem:[%s1529_s25 + $0xc4] ss:$8 sps:$4 sm:$0xff]   ;;  %v1380_v55 = vld [vmem:[%s1529_s25 + $0xc0] ss:$8 sps:$4 sm:$0xff]   ;;  %v1384_v58 = vld [vmem:[%s1529_s25 + $0x1d4] ss:$8 sps:$4 sm:$0xff]   ;;  %v1169_v6 = vcombine.low %v285_v47, %v285_v47  ;;  %v1171_v7 = vcombine.low %v286_v49, %v286_v49 }
  0x2a   : > { %894 = vmatpush1.bf16.msra.mxu0 %v1332_v19  ;;  %v1378_v54 = vld [vmem:[%s1529_s25 + $0x1c4] ss:$8 sps:$4 sm:$0xff]   ;;  %v1381_v56 = vld [vmem:[%s1529_s25 + $0x1c0] ss:$8 sps:$4 sm:$0xff]   ;;  %v1386_v59 = vld [vmem:[%s1529_s25 + $0xd0] ss:$8 sps:$4 sm:$0xff]  }
  0x2b   : > { %935 = vmatpush1.bf16.msra.mxu1 %v1333_v20  ;;  %895 = vmatprep.subr.bf16.mxu0 %v1334_v21  ;;  %v1387_v60 = vld [vmem:[%s1529_s25 + $0x1d0] ss:$8 sps:$4 sm:$0xff]   ;;  %v1388_v61 = vld [vmem:[%s1529_s25 + $0xe4] ss:$8 sps:$4 sm:$0xff]   ;;  %v1392_v63 = vld [vmem:[%s1529_s25 + $0xe0] ss:$8 sps:$4 sm:$0xff]  }
  0x2c   : > { %936 = vmatprep.subr.bf16.mxu1 %v1336_v22  ;;  %917 = vmatprep.mubr.bf16.mxu0 %v1170_v48  ;;  %v1390_v62 = vld [vmem:[%s1529_s25 + $0x1e4] ss:$8 sps:$4 sm:$0xff]   ;;  %v1393_v0 = vld [vmem:[%s1529_s25 + $0x1e0] ss:$8 sps:$4 sm:$0xff]   ;;  %v1394_v1 = vld [vmem:[%s1529_s25 + $0xf4] ss:$8 sps:$4 sm:$0xff]  }
  0x2d   : > { %958 = vmatprep.mubr.bf16.mxu1 %v1172_v52  ;;  %v1396_v2 = vld [vmem:[%s1529_s25 + $0x1f4] ss:$8 sps:$4 sm:$0xff]   ;;  %v1398_v3 = vld [vmem:[%s1529_s25 + $0xf0] ss:$8 sps:$4 sm:$0xff]   ;;  %v1406_v5 = vld [vmem:[%s1529_s25 + $0x204] ss:$8 sps:$4 sm:$0xff]  }
  0x2e   : > { %896 = vmatpush1.bf16.msra.mxu0 %v1338_v23  ;;  %v1399_v4 = vld [vmem:[%s1529_s25 + $0x1f0] ss:$8 sps:$4 sm:$0xff]   ;;  %v1404_v8 = vld [vmem:[%s1529_s25 + $0x200] ss:$8 sps:$4 sm:$0xff]   ;;  %v1409_v10 = vld [vmem:[%s1529_s25 + $0x214] ss:$8 sps:$4 sm:$0xff]  }
  0x2f   : > { %937 = vmatpush1.bf16.msra.mxu1 %v1339_v24  ;;  %897 = vmatprep.subr.bf16.mxu0 %v1340_v25  ;;  %v1601_v9 = vld [vmem:[%s1524_s21 + $0x10] sm:$0xff]  ;;  %v1412_v13 = vld [vmem:[%s1529_s25 + $0x224] ss:$8 sps:$4 sm:$0xff]   ;;  %v1410_v14 = vld [vmem:[%s1529_s25 + $0x220] ss:$8 sps:$4 sm:$0xff]  }
  0x30   : > { %938 = vmatprep.subr.bf16.mxu1 %v1342_v26  ;;  %v1174_v11 = vcombine.high %v1601_v9, %v1601_v9  ;;  %v1407_v12 = vld [vmem:[%s1529_s25 + $0x210] ss:$8 sps:$4 sm:$0xff]   ;;  %v1415_v15 = vld [vmem:[%s1529_s25 + $0x234] ss:$8 sps:$4 sm:$0xff]   ;;  %v1418_v17 = vld [vmem:[%s1529_s25 + $0x244] ss:$8 sps:$4 sm:$0xff]  }
  0x31   : > { %v1413_v16 = vld [vmem:[%s1529_s25 + $0x230] ss:$8 sps:$4 sm:$0xff]   ;;  %v1416_v18 = vld [vmem:[%s1529_s25 + $0x240] ss:$8 sps:$4 sm:$0xff]   ;;  %v1421_v19 = vld [vmem:[%s1529_s25 + $0x254] ss:$8 sps:$4 sm:$0xff]  }
  0x32   : > { %898 = vmatpush1.bf16.msra.mxu0 %v1344_v27  ;;  %v1419_v20 = vld [vmem:[%s1529_s25 + $0x250] ss:$8 sps:$4 sm:$0xff]   ;;  %v1424_v21 = vld [vmem:[%s1529_s25 + $0x264] ss:$8 sps:$4 sm:$0xff]   ;;  %v1422_v22 = vld [vmem:[%s1529_s25 + $0x260] ss:$8 sps:$4 sm:$0xff]  }
  0x33   : > { %939 = vmatpush1.bf16.msra.mxu1 %v1345_v28  ;;  %899 = vmatprep.subr.bf16.mxu0 %v1346_v29  ;;  %v1427_v23 = vld [vmem:[%s1529_s25 + $0x274] ss:$8 sps:$4 sm:$0xff]   ;;  %v1425_v24 = vld [vmem:[%s1529_s25 + $0x270] ss:$8 sps:$4 sm:$0xff]   ;;  %v1430_v25 = vld [vmem:[%s1529_s25 + $0x284] ss:$8 sps:$4 sm:$0xff]  }
  0x34   : > { %940 = vmatprep.subr.bf16.mxu1 %v1348_v30  ;;  %v1428_v26 = vld [vmem:[%s1529_s25 + $0x280] ss:$8 sps:$4 sm:$0xff]   ;;  %v1433_v27 = vld [vmem:[%s1529_s25 + $0x294] ss:$8 sps:$4 sm:$0xff]   ;;  %v1431_v28 = vld [vmem:[%s1529_s25 + $0x290] ss:$8 sps:$4 sm:$0xff]  }
  0x35   : > { %v1436_v29 = vld [vmem:[%s1529_s25 + $0x2a4] ss:$8 sps:$4 sm:$0xff]   ;;  %v1434_v30 = vld [vmem:[%s1529_s25 + $0x2a0] ss:$8 sps:$4 sm:$0xff]  }
  0x36   : > { %900 = vmatpush1.bf16.msra.mxu0 %v1350_v31  ;;  %v1439_v31 = vld [vmem:[%s1529_s25 + $0x2b4] ss:$8 sps:$4 sm:$0xff]   ;;  %v283_v52 = vld [vmem:[#allocation2] sm:$0xff] }
  0x37   : > { %941 = vmatpush1.bf16.msra.mxu1 %v1351_v32  ;;  %901 = vmatprep.subr.bf16.mxu0 %v1352_v33  ;;  %v1437_v32 = vld [vmem:[%s1529_s25 + $0x2b0] ss:$8 sps:$4 sm:$0xff]   ;;  %v1442_v33 = vld [vmem:[%s1529_s25 + $0x2c4] ss:$8 sps:$4 sm:$0xff]  }
  0x38   : > { %942 = vmatprep.subr.bf16.mxu1 %v1354_v34  ;;  %v1440_v34 = vld [vmem:[%s1529_s25 + $0x2c0] ss:$8 sps:$4 sm:$0xff]  }
  0x3a   : > { %902 = vmatpush1.bf16.msra.mxu0 %v1356_v35  ;;  %v1445_v35 = vld [vmem:[%s1529_s25 + $0x2d4] ss:$8 sps:$4 sm:$0xff]  }
  0x3b   : > { %943 = vmatpush1.bf16.msra.mxu1 %v1357_v36  ;;  %903 = vmatprep.subr.bf16.mxu0 %v1358_v37  ;;  %v1443_v36 = vld [vmem:[%s1529_s25 + $0x2d0] ss:$8 sps:$4 sm:$0xff]   ;;  %v1448_v37 = vld [vmem:[%s1529_s25 + $0x2e4] ss:$8 sps:$4 sm:$0xff]  }
  0x3c   : > { %944 = vmatprep.subr.bf16.mxu1 %v1360_v38  ;;  %v1446_v38 = vld [vmem:[%s1529_s25 + $0x2e0] ss:$8 sps:$4 sm:$0xff]  }
  0x3e   : > { %904 = vmatpush1.bf16.msra.mxu0 %v1362_v39  ;;  %v1451_v39 = vld [vmem:[%s1529_s25 + $0x2f4] ss:$8 sps:$4 sm:$0xff]  }
  0x3f   : > { %945 = vmatpush1.bf16.msra.mxu1 %v1363_v40  ;;  %905 = vmatprep.subr.bf16.mxu0 %v1364_v41  ;;  %v1449_v40 = vld [vmem:[%s1529_s25 + $0x2f0] ss:$8 sps:$4 sm:$0xff]   ;;  %v1173_v41 = vcombine.low %v1601_v9, %v1601_v9 }
  0x40   : > { %946 = vmatprep.subr.bf16.mxu1 %v1366_v42 }
  0x42   : > { %906 = vmatpush1.bf16.msra.mxu0 %v1368_v43 }
  0x43   : > { %947 = vmatpush1.bf16.msra.mxu1 %v1369_v44  ;;  %907 = vmatprep.subr.bf16.mxu0 %v1370_v45 }
  0x44   : > { %948 = vmatprep.subr.bf16.mxu1 %v1372_v46 }
  0x46   : > { %908 = vmatpush1.bf16.msra.mxu0 %v1374_v50 }
  0x47   : > { %949 = vmatpush1.bf16.msra.mxu1 %v1375_v51  ;;  %909 = vmatprep.subr.bf16.mxu0 %v1376_v53 }
  0x48   : > { %950 = vmatprep.subr.bf16.mxu1 %v1378_v54 }
  0x4a   : > { %910 = vmatpush1.bf16.msra.mxu0 %v1380_v55  ;;  %v284_v55 = vld [vmem:[#allocation2 + $0x8] sm:$0xff] }
  0x4b   : > { %951 = vmatpush1.bf16.msra.mxu1 %v1381_v56  ;;  %911 = vmatprep.subr.bf16.mxu0 %v1382_v57 }
  0x4c   : > { %952 = vmatprep.subr.bf16.mxu1 %v1384_v58 }
  0x4e   : > { %912 = vmatpush1.bf16.msra.mxu0 %v1386_v59 }
  0x4f   : > { %953 = vmatpush1.bf16.msra.mxu1 %v1387_v60  ;;  %913 = vmatprep.subr.bf16.mxu0 %v1388_v61 }
  0x50   : > { %954 = vmatprep.subr.bf16.mxu1 %v1390_v62  ;;  %v1020_v62 = vlaneseq (!%p1271_p7) }
  0x52   : > { %914 = vmatpush1.bf16.msra.mxu0 %v1392_v63  ;;  %v1021_v63 = vshrl.u32 (!%p1271_p7), %v1020_v62, 7 }
  0x53   : > { %955 = vmatpush1.bf16.msra.mxu1 %v1393_v0  ;;  %915 = vmatprep.subr.bf16.mxu0 %v1394_v1  ;;  %v1018_v0 = vld [vmem:[%s1655_s2] sm:$0x3] (!%p1271_p7) }
  0x54   : > { %956 = vmatprep.subr.bf16.mxu1 %v1396_v2  ;;  %v1022_v1 = vsub.s32 (!%p1271_p7), 0, %v1021_v63  ;;  %v1026_v2 = vsub.s32 (!%p1271_p7), 1, %v1021_v63 }
  0x56   : > { %916 = vmatpush1.bf16.msra.mxu0 %v1398_v3 }
  0x57   : > { %957 = vmatpush1.bf16.msra.mxu1 %v1399_v4  ;;  %967 = vmatprep.subr.bf16.mxu0 %v1406_v5  ;;  %v1023_v5 = vrot.slane (!%p1271_p7), %v1018_v0, %v1022_v1 }
  0x59   : > { %918 = vmatmul.mubr.bf16.vlgmr.msra.gmra.mrb[0].mxu0 %v1169_v6  ;;  %v1027_v6 = vrot.slane (!%p1271_p7), %v1018_v0, %v1026_v2 }
  0x5a   : > { %959 = vmatmul.mubr.bf16.vlgmr.msra.gmra.mrb[0].mxu1 %v1171_v7  ;;  %968 = vmatpush1.bf16.msra.mxu0 %v1404_v8 }
  0x5b   : > { %999 = vmatprep.mubr.bf16.mxu0 %v1174_v11  ;;  %969 = vmatprep.subr.bf16.mxu0 %v1409_v10 }
  0x5e   : > { %970 = vmatpush1.bf16.msra.mxu0 %v1407_v12 }
  0x5f   : > { %971 = vmatprep.subr.bf16.mxu0 %v1412_v13 }
  0x62   : > { %972 = vmatpush1.bf16.msra.mxu0 %v1410_v14 }
  0x63   : > { %973 = vmatprep.subr.bf16.mxu0 %v1415_v15 }
  0x66   : > { %974 = vmatpush1.bf16.msra.mxu0 %v1413_v16 }
  0x67   : > { %975 = vmatprep.subr.bf16.mxu0 %v1418_v17 }
  0x6a   : > { %976 = vmatpush1.bf16.msra.mxu0 %v1416_v18 }
  0x6b   : > { %977 = vmatprep.subr.bf16.mxu0 %v1421_v19 }
  0x6e   : > { %978 = vmatpush1.bf16.msra.mxu0 %v1419_v20 }
  0x6f   : > { %979 = vmatprep.subr.bf16.mxu0 %v1424_v21 }
  0x72   : > { %980 = vmatpush1.bf16.msra.mxu0 %v1422_v22 }
  0x73   : > { %981 = vmatprep.subr.bf16.mxu0 %v1427_v23 }
  0x76   : > { %982 = vmatpush1.bf16.msra.mxu0 %v1425_v24 }
  0x77   : > { %983 = vmatprep.subr.bf16.mxu0 %v1430_v25 }
  0x7a   : > { %984 = vmatpush1.bf16.msra.mxu0 %v1428_v26 }
  0x7b   : > { %985 = vmatprep.subr.bf16.mxu0 %v1433_v27 }
  0x7e   : > { %986 = vmatpush1.bf16.msra.mxu0 %v1431_v28 }
  0x7f   : > { %987 = vmatprep.subr.bf16.mxu0 %v1436_v29 }
  0x82   : > { %988 = vmatpush1.bf16.msra.mxu0 %v1434_v30 }
  0x83   : > { %989 = vmatprep.subr.bf16.mxu0 %v1439_v31 }
  0x86   : > { %990 = vmatpush1.bf16.msra.mxu0 %v1437_v32 }
  0x87   : > { %991 = vmatprep.subr.bf16.mxu0 %v1442_v33 }
  0x8a   : > { %992 = vmatpush1.bf16.msra.mxu0 %v1440_v34 }
  0x8b   : > { %993 = vmatprep.subr.bf16.mxu0 %v1445_v35 }
  0x8e   : > { %994 = vmatpush1.bf16.msra.mxu0 %v1443_v36 }
  0x8f   : > { %995 = vmatprep.subr.bf16.mxu0 %v1448_v37 }
  0x92   : > { %996 = vmatpush1.bf16.msra.mxu0 %v1446_v38 }
  0x93   : > { %997 = vmatprep.subr.bf16.mxu0 %v1451_v39 }
  0x96   : > { %998 = vmatpush1.bf16.msra.mxu0 %v1449_v40 }
  0x99   : > { %1000 = vmatmul.mubr.bf16.vlgmr.msra.gmra.mrb[4].mxu0 %v1173_v41 }
 0x12c   : > { %v919_v42 = vpop.f32.mrb[0].mxu0 }
 0x12d   : > { %v960_v43 = vpop.f32.mrb[0].mxu1  ;;  %v921_v45 = vpop.f32.mrb[1].mxu0 }
 0x12e   : > { %v961_v44 = vadd.f32 %v960_v43, %v919_v42  ;;  %v962_v46 = vpop.f32.mrb[1].mxu1  ;;  %v923_v48 = vpop.f32.mrb[2].mxu0 }
 0x12f   : > { %v963_v47 = vadd.f32 %v962_v46, %v921_v45  ;;  %v964_v49 = vpop.f32.mrb[2].mxu1  ;;  %v924_v50 = vpop.f32.mrb[3].mxu0 }
 0x130   : > { %v965_v51 = vpop.f32.mrb[3].mxu1 }
 0x16c   : > { %v1001_v53 = vpop.f32.mrb[4].mxu0  ;;  %1015 = sbr.rel (%p1271_p7) target bundleno = 385 (0x181), region = 40 }
 0x16d   : > { %v1002_v54 = vadd.f32 %v1001_v53, %v961_v44  ;;  %v1003_v56 = vpop.f32.mrb[5].mxu0 }
 0x16e   : > { %v1004_v57 = vadd.f32 %v1003_v56, %v963_v47  ;;  %v1005_v58 = vpop.f32.mrb[6].mxu0 }
 0x16f   : > { %v1008_v59 = vadd.f32 %v1002_v54, %v283_v52  ;;  %v1006_v60 = vpop.f32.mrb[7].mxu0 }
 0x170   : > { %v1009_v61 = vadd.f32 %v1004_v57, %v284_v55 }
 0x171   : > { %1010 = vst [vmem:[#allocation2] sm:$0xff] %v1008_v59 }
 0x172   : > { %1011 = vst [vmem:[#allocation2 + $0x8] sm:$0xff] %v1009_v61 }
 0x178   : > { %v1016_v3 = vld [vmem:[#allocation2] sm:$0xff] }
 0x179   : > { %v1017_v4 = vld [vmem:[#allocation2 + $0x8] sm:$0xff]  ;;  %v1030_v7 = vadd.f32 %v1023_v5, %v1016_v3 }
 0x17a   : > { %v1031_v8 = vadd.f32 %v1027_v6, %v1017_v4 }
 0x17b   : > { %v1032_v9 = vmax.f32 %v1030_v7, 0.0 }
 0x17c   : > { %v1033_v10 = vmax.f32 %v1031_v8, 0.0 }
 0x17e   : > { %v1278_v11 = vpack.c.bf16 %v1033_v10, %v1032_v9 }
 0x180   : > { %1042 = vst [vmem:[%s1656_s3] sm:$0xff] %v1278_v11 }
 0x181 PF: > { %s13_s14 = sadd.s32 1, %s1476_s14   ;;  %s1657_s12 = smov %s1472_s13 }
 0x182   : > { %p10_p8 = scmp.ge.s32.totalorder %s13_s14, 5   ;;  %s1658_s13 = smov %s1660_s15 }
 0x184   :  { %12 = sbr.rel (!%p10_p8) target bundleno = 2 (0x2), region = 76 }

// kernel: resnet_forward.36
= control target key start
LH: loop header
LB: loop body
LE: loop exit
PB: predicated region body
PF: predicated region fallthrough
CT: control target
= control target key end

     0   :  { %s1594_s15 = smov 0   ;;  %s1596_s16 = smov 0   ;;  %s1751_s0 = inlined_call_operand.vmem [shape: bf16[8,2304], index: 0, kind: input, shape index: {}]   ;;  %s1752_s1 = inlined_call_operand.vmem [shape: bf16[2304,256], index: 1, kind: input, shape index: {}]   ;;  %s1753_s2 = inlined_call_operand.vmem [shape: f32[1,256], index: 2, kind: input, shape index: {}]   ;;  %s1754_s3 = inlined_call_operand.vmem [shape: bf16[8,256], index: 3, kind: input, shape index: {}]   ;;  %s1755_s4 = inlined_call_operand.vmem [shape: bf16[8,256], index: 4, kind: output, shape index: {}]  }
   0x1   :  { %s1598_s17 = smov 0  }
   0x2 LB: > { %s26_s18 = sadd.s32 1, %s1562_s16  ;;  %p1254_p0 = scmp.ge.s32.totalorder %s1566_s17, 1  ;;  %s1566_s17 = sphi %s1598_s17, %s14_s17   ;;  %s1562_s16 = sphi %s1596_s16, %s1757_s16   ;;  %s1558_s15 = sphi %s1594_s15, %s1756_s15  }
   0x3   : > { %p27_p1 = scmp.ge.s32.totalorder %s26_s18, 3  ;;  %p236_p2 = scmp.lt.s32.totalorder %s1566_s17, 4 }
   0x5   : > { %s1759_s18 = smov (%p27_p1, %s26_s18), 0  ;;  %p237_p3 = pnand %p1254_p0, %p236_p2 }
   0x6   : > { %s293_s19 = smul.u32 (!%p237_p3), 6, %s1558_s15  ;;  %p1258_p6 = scmp.ne.s32.totalorder (!%p237_p3), %s1558_s15, 0 }
   0x7   : > { %240 = sbr.rel (%p237_p3) target bundleno = 387 (0x183), region = 36 }
   0x8   : > { %s303_s20 = smul.u32 (!%p237_p3), 96, %s1558_s15  ;;  %p296_p4 = scmp.lt.s32.totalorder (!%p237_p3), %s293_s19, 17 }
   0xa   : > { %p305_p5 = scmp.lt.s32.totalorder (!%p237_p3), %s303_s20, 287 }
   0xe   : > { %s1761_s19 = smov (!%p296_p4, %s293_s19), 17  ;;  %s1763_s20 = smov (!%p305_p5, %s303_s20), 287 }
   0xf   : > { %s1255_s21 = sshll.u32 %s1761_s19, 2  ;;  %s1367_s25 = sshll.u32 %s1763_s20, 3  ;;  %v1568_v0 = vmov (!%p1258_p6), 0.0  }
  0x10   : > { %s1619_s24 = scalar_lea.vmem %s1751_s0, %s1255_s21  ;;  %s1624_s28 = scalar_lea.vmem %s1752_s1, %s1367_s25  ;;  %344 = vst [vmem:[#allocation2] sm:$0xff] (!%p1258_p6), %v1568_v0  ;;  %345 = vst [vmem:[#allocation2 + $0x8] sm:$0xff] (!%p1258_p6), %v1568_v0 }
  0x11   : > { %343 = sbr.rel (%p1258_p6) target bundleno = 24 (0x18), region = 40 }
  0x18 PF: > { %v1394_v1 = vld [vmem:[%s1624_s28 + $0x4] ss:$8 sps:$4 sm:$0xff]   ;;  %v1398_v3 = vld [vmem:[%s1624_s28] ss:$8 sps:$4 sm:$0xff]   ;;  %v1400_v5 = vld [vmem:[%s1624_s28 + $0x14] ss:$8 sps:$4 sm:$0xff]  }
  0x19   : > { %v1396_v2 = vld [vmem:[%s1624_s28 + $0x104] ss:$8 sps:$4 sm:$0xff]   ;;  %948 = vmatprep.subr.bf16.mxu0 %v1394_v1  ;;  %v1399_v4 = vld [vmem:[%s1624_s28 + $0x100] ss:$8 sps:$4 sm:$0xff]   ;;  %v1402_v6 = vld [vmem:[%s1624_s28 + $0x114] ss:$8 sps:$4 sm:$0xff]  }
  0x1a   : > { %989 = vmatprep.subr.bf16.mxu1 %v1396_v2  ;;  %949 = vmatpush1.bf16.msra.mxu0 %v1398_v3  ;;  %v1404_v7 = vld [vmem:[%s1624_s28 + $0x10] ss:$8 sps:$4 sm:$0xff]   ;;  %v1406_v9 = vld [vmem:[%s1624_s28 + $0x24] ss:$8 sps:$4 sm:$0xff]   ;;  %v1410_v11 = vld [vmem:[%s1624_s28 + $0x20] ss:$8 sps:$4 sm:$0xff]  }
  0x1b   : > { %990 = vmatpush1.bf16.msra.mxu1 %v1399_v4  ;;  %950 = vmatprep.subr.bf16.mxu0 %v1400_v5  ;;  %v1405_v8 = vld [vmem:[%s1624_s28 + $0x110] ss:$8 sps:$4 sm:$0xff]   ;;  %v1408_v10 = vld [vmem:[%s1624_s28 + $0x124] ss:$8 sps:$4 sm:$0xff]   ;;  %v1411_v12 = vld [vmem:[%s1624_s28 + $0x120] ss:$8 sps:$4 sm:$0xff]  }
  0x1c   : > { %991 = vmatprep.subr.bf16.mxu1 %v1402_v6  ;;  %v1412_v13 = vld [vmem:[%s1624_s28 + $0x34] ss:$8 sps:$4 sm:$0xff]   ;;  %v1416_v15 = vld [vmem:[%s1624_s28 + $0x30] ss:$8 sps:$4 sm:$0xff]   ;;  %v1418_v17 = vld [vmem:[%s1624_s28 + $0x44] ss:$8 sps:$4 sm:$0xff]  }
  0x1d   : > { %v1414_v14 = vld [vmem:[%s1624_s28 + $0x134] ss:$8 sps:$4 sm:$0xff]   ;;  %v1417_v16 = vld [vmem:[%s1624_s28 + $0x130] ss:$8 sps:$4 sm:$0xff]   ;;  %v1420_v18 = vld [vmem:[%s1624_s28 + $0x144] ss:$8 sps:$4 sm:$0xff]  }
  0x1e   : > { %951 = vmatpush1.bf16.msra.mxu0 %v1404_v7  ;;  %v1422_v19 = vld [vmem:[%s1624_s28 + $0x40] ss:$8 sps:$4 sm:$0xff]   ;;  %v1424_v21 = vld [vmem:[%s1624_s28 + $0x54] ss:$8 sps:$4 sm:$0xff]   ;;  %v1428_v23 = vld [vmem:[%s1624_s28 + $0x50] ss:$8 sps:$4 sm:$0xff]  }
  0x1f   : > { %992 = vmatpush1.bf16.msra.mxu1 %v1405_v8  ;;  %952 = vmatprep.subr.bf16.mxu0 %v1406_v9  ;;  %v1423_v20 = vld [vmem:[%s1624_s28 + $0x140] ss:$8 sps:$4 sm:$0xff]   ;;  %v1426_v22 = vld [vmem:[%s1624_s28 + $0x154] ss:$8 sps:$4 sm:$0xff]   ;;  %v1429_v24 = vld [vmem:[%s1624_s28 + $0x150] ss:$8 sps:$4 sm:$0xff]  }
  0x20   : > { %993 = vmatprep.subr.bf16.mxu1 %v1408_v10  ;;  %v1430_v25 = vld [vmem:[%s1624_s28 + $0x64] ss:$8 sps:$4 sm:$0xff]   ;;  %v1434_v27 = vld [vmem:[%s1624_s28 + $0x60] ss:$8 sps:$4 sm:$0xff]   ;;  %v1436_v29 = vld [vmem:[%s1624_s28 + $0x74] ss:$8 sps:$4 sm:$0xff]  }
  0x21   : > { %v1432_v26 = vld [vmem:[%s1624_s28 + $0x164] ss:$8 sps:$4 sm:$0xff]   ;;  %v1435_v28 = vld [vmem:[%s1624_s28 + $0x160] ss:$8 sps:$4 sm:$0xff]   ;;  %v1438_v30 = vld [vmem:[%s1624_s28 + $0x174] ss:$8 sps:$4 sm:$0xff]  }
  0x22   : > { %953 = vmatpush1.bf16.msra.mxu0 %v1410_v11  ;;  %v1440_v31 = vld [vmem:[%s1624_s28 + $0x70] ss:$8 sps:$4 sm:$0xff]   ;;  %v1442_v33 = vld [vmem:[%s1624_s28 + $0x84] ss:$8 sps:$4 sm:$0xff]   ;;  %v1446_v35 = vld [vmem:[%s1624_s28 + $0x80] ss:$8 sps:$4 sm:$0xff]  }
  0x23   : > { %994 = vmatpush1.bf16.msra.mxu1 %v1411_v12  ;;  %954 = vmatprep.subr.bf16.mxu0 %v1412_v13  ;;  %v1441_v32 = vld [vmem:[%s1624_s28 + $0x170] ss:$8 sps:$4 sm:$0xff]   ;;  %v1444_v34 = vld [vmem:[%s1624_s28 + $0x184] ss:$8 sps:$4 sm:$0xff]   ;;  %v1447_v36 = vld [vmem:[%s1624_s28 + $0x180] ss:$8 sps:$4 sm:$0xff]  }
  0x24   : > { %995 = vmatprep.subr.bf16.mxu1 %v1414_v14  ;;  %v1448_v37 = vld [vmem:[%s1624_s28 + $0x94] ss:$8 sps:$4 sm:$0xff]   ;;  %v1452_v39 = vld [vmem:[%s1624_s28 + $0x90] ss:$8 sps:$4 sm:$0xff]   ;;  %v1454_v41 = vld [vmem:[%s1624_s28 + $0xa4] ss:$8 sps:$4 sm:$0xff]  }
  0x25   : > { %v1450_v38 = vld [vmem:[%s1624_s28 + $0x194] ss:$8 sps:$4 sm:$0xff]   ;;  %v1453_v40 = vld [vmem:[%s1624_s28 + $0x190] ss:$8 sps:$4 sm:$0xff]   ;;  %v1456_v42 = vld [vmem:[%s1624_s28 + $0x1a4] ss:$8 sps:$4 sm:$0xff]  }
  0x26   : > { %955 = vmatpush1.bf16.msra.mxu0 %v1416_v15  ;;  %v1458_v43 = vld [vmem:[%s1624_s28 + $0xa0] ss:$8 sps:$4 sm:$0xff]   ;;  %v1460_v45 = vld [vmem:[%s1624_s28 + $0xb4] ss:$8 sps:$4 sm:$0xff]   ;;  %v1464_v50 = vld [vmem:[%s1624_s28 + $0xb0] ss:$8 sps:$4 sm:$0xff]  }
  0x27   : > { %996 = vmatpush1.bf16.msra.mxu1 %v1417_v16  ;;  %956 = vmatprep.subr.bf16.mxu0 %v1418_v17  ;;  %v1459_v44 = vld [vmem:[%s1624_s28 + $0x1a0] ss:$8 sps:$4 sm:$0xff]   ;;  %v1462_v46 = vld [vmem:[%s1624_s28 + $0x1b4] ss:$8 sps:$4 sm:$0xff]   ;;  %v1465_v51 = vld [vmem:[%s1624_s28 + $0x1b0] ss:$8 sps:$4 sm:$0xff]  }
  0x28   : > { %997 = vmatprep.subr.bf16.mxu1 %v1420_v18  ;;  %v348_v47 = vld [vmem:[%s1619_s24] sm:$0xff]  ;;  %v349_v49 = vld [vmem:[%s1619_s24 + $0x8] sm:$0xff]  ;;  %v1472_v57 = vld [vmem:[%s1624_s28 + $0xd4] ss:$8 sps:$4 sm:$0xff]   ;;  %p1361_p7 = scmp.ne.s32.totalorder %s1558_s15, 2 }
  0x29   : > { %v1260_v48 = vcombine.high %v348_v47, %v348_v47  ;;  %v1262_v52 = vcombine.high %v349_v49, %v349_v49  ;;  %v1466_v53 = vld [vmem:[%s1624_s28 + $0xc4] ss:$8 sps:$4 sm:$0xff]   ;;  %v1470_v55 = vld [vmem:[%s1624_s28 + $0xc0] ss:$8 sps:$4 sm:$0xff]   ;;  %v1474_v58 = vld [vmem:[%s1624_s28 + $0x1d4] ss:$8 sps:$4 sm:$0xff]   ;;  %v1259_v6 = vcombine.low %v348_v47, %v348_v47  ;;  %v1261_v7 = vcombine.low %v349_v49, %v349_v49 }
  0x2a   : > { %957 = vmatpush1.bf16.msra.mxu0 %v1422_v19  ;;  %v1468_v54 = vld [vmem:[%s1624_s28 + $0x1c4] ss:$8 sps:$4 sm:$0xff]   ;;  %v1471_v56 = vld [vmem:[%s1624_s28 + $0x1c0] ss:$8 sps:$4 sm:$0xff]   ;;  %v1476_v59 = vld [vmem:[%s1624_s28 + $0xd0] ss:$8 sps:$4 sm:$0xff]  }
  0x2b   : > { %998 = vmatpush1.bf16.msra.mxu1 %v1423_v20  ;;  %958 = vmatprep.subr.bf16.mxu0 %v1424_v21  ;;  %v1477_v60 = vld [vmem:[%s1624_s28 + $0x1d0] ss:$8 sps:$4 sm:$0xff]   ;;  %v1478_v61 = vld [vmem:[%s1624_s28 + $0xe4] ss:$8 sps:$4 sm:$0xff]   ;;  %v1482_v63 = vld [vmem:[%s1624_s28 + $0xe0] ss:$8 sps:$4 sm:$0xff]  }
  0x2c   : > { %999 = vmatprep.subr.bf16.mxu1 %v1426_v22  ;;  %980 = vmatprep.mubr.bf16.mxu0 %v1260_v48  ;;  %v1480_v62 = vld [vmem:[%s1624_s28 + $0x1e4] ss:$8 sps:$4 sm:$0xff]   ;;  %v1483_v0 = vld [vmem:[%s1624_s28 + $0x1e0] ss:$8 sps:$4 sm:$0xff]   ;;  %v1484_v1 = vld [vmem:[%s1624_s28 + $0xf4] ss:$8 sps:$4 sm:$0xff]  }
  0x2d   : > { %1021 = vmatprep.mubr.bf16.mxu1 %v1262_v52  ;;  %v1486_v2 = vld [vmem:[%s1624_s28 + $0x1f4] ss:$8 sps:$4 sm:$0xff]   ;;  %v1488_v3 = vld [vmem:[%s1624_s28 + $0xf0] ss:$8 sps:$4 sm:$0xff]   ;;  %v1496_v5 = vld [vmem:[%s1624_s28 + $0x204] ss:$8 sps:$4 sm:$0xff]  }
  0x2e   : > { %959 = vmatpush1.bf16.msra.mxu0 %v1428_v23  ;;  %v1489_v4 = vld [vmem:[%s1624_s28 + $0x1f0] ss:$8 sps:$4 sm:$0xff]   ;;  %v1494_v8 = vld [vmem:[%s1624_s28 + $0x200] ss:$8 sps:$4 sm:$0xff]   ;;  %v1499_v10 = vld [vmem:[%s1624_s28 + $0x214] ss:$8 sps:$4 sm:$0xff]  }
  0x2f   : > { %1000 = vmatpush1.bf16.msra.mxu1 %v1429_v24  ;;  %960 = vmatprep.subr.bf16.mxu0 %v1430_v25  ;;  %v1696_v9 = vld [vmem:[%s1619_s24 + $0x10] sm:$0xff]  ;;  %v1502_v13 = vld [vmem:[%s1624_s28 + $0x224] ss:$8 sps:$4 sm:$0xff]   ;;  %v1500_v14 = vld [vmem:[%s1624_s28 + $0x220] ss:$8 sps:$4 sm:$0xff]  }
  0x30   : > { %1001 = vmatprep.subr.bf16.mxu1 %v1432_v26  ;;  %v1264_v11 = vcombine.high %v1696_v9, %v1696_v9  ;;  %v1497_v12 = vld [vmem:[%s1624_s28 + $0x210] ss:$8 sps:$4 sm:$0xff]   ;;  %v1505_v15 = vld [vmem:[%s1624_s28 + $0x234] ss:$8 sps:$4 sm:$0xff]   ;;  %v1508_v17 = vld [vmem:[%s1624_s28 + $0x244] ss:$8 sps:$4 sm:$0xff]  }
  0x31   : > { %v1503_v16 = vld [vmem:[%s1624_s28 + $0x230] ss:$8 sps:$4 sm:$0xff]   ;;  %v1506_v18 = vld [vmem:[%s1624_s28 + $0x240] ss:$8 sps:$4 sm:$0xff]   ;;  %v1511_v19 = vld [vmem:[%s1624_s28 + $0x254] ss:$8 sps:$4 sm:$0xff]  }
  0x32   : > { %961 = vmatpush1.bf16.msra.mxu0 %v1434_v27  ;;  %v1509_v20 = vld [vmem:[%s1624_s28 + $0x250] ss:$8 sps:$4 sm:$0xff]   ;;  %v1514_v21 = vld [vmem:[%s1624_s28 + $0x264] ss:$8 sps:$4 sm:$0xff]   ;;  %v1512_v22 = vld [vmem:[%s1624_s28 + $0x260] ss:$8 sps:$4 sm:$0xff]  }
  0x33   : > { %1002 = vmatpush1.bf16.msra.mxu1 %v1435_v28  ;;  %962 = vmatprep.subr.bf16.mxu0 %v1436_v29  ;;  %v1517_v23 = vld [vmem:[%s1624_s28 + $0x274] ss:$8 sps:$4 sm:$0xff]   ;;  %v1515_v24 = vld [vmem:[%s1624_s28 + $0x270] ss:$8 sps:$4 sm:$0xff]   ;;  %v1520_v25 = vld [vmem:[%s1624_s28 + $0x284] ss:$8 sps:$4 sm:$0xff]  }
  0x34   : > { %1003 = vmatprep.subr.bf16.mxu1 %v1438_v30  ;;  %v1518_v26 = vld [vmem:[%s1624_s28 + $0x280] ss:$8 sps:$4 sm:$0xff]   ;;  %v1523_v27 = vld [vmem:[%s1624_s28 + $0x294] ss:$8 sps:$4 sm:$0xff]   ;;  %v1521_v28 = vld [vmem:[%s1624_s28 + $0x290] ss:$8 sps:$4 sm:$0xff]  }
  0x35   : > { %v1526_v29 = vld [vmem:[%s1624_s28 + $0x2a4] ss:$8 sps:$4 sm:$0xff]   ;;  %v1524_v30 = vld [vmem:[%s1624_s28 + $0x2a0] ss:$8 sps:$4 sm:$0xff]  }
  0x36   : > { %963 = vmatpush1.bf16.msra.mxu0 %v1440_v31  ;;  %v1529_v31 = vld [vmem:[%s1624_s28 + $0x2b4] ss:$8 sps:$4 sm:$0xff]   ;;  %v346_v52 = vld [vmem:[#allocation2] sm:$0xff] }
  0x37   : > { %1004 = vmatpush1.bf16.msra.mxu1 %v1441_v32  ;;  %964 = vmatprep.subr.bf16.mxu0 %v1442_v33  ;;  %v1527_v32 = vld [vmem:[%s1624_s28 + $0x2b0] ss:$8 sps:$4 sm:$0xff]   ;;  %v1532_v33 = vld [vmem:[%s1624_s28 + $0x2c4] ss:$8 sps:$4 sm:$0xff]  }
  0x38   : > { %1005 = vmatprep.subr.bf16.mxu1 %v1444_v34  ;;  %v1530_v34 = vld [vmem:[%s1624_s28 + $0x2c0] ss:$8 sps:$4 sm:$0xff]  }
  0x3a   : > { %965 = vmatpush1.bf16.msra.mxu0 %v1446_v35  ;;  %v1535_v35 = vld [vmem:[%s1624_s28 + $0x2d4] ss:$8 sps:$4 sm:$0xff]  }
  0x3b   : > { %1006 = vmatpush1.bf16.msra.mxu1 %v1447_v36  ;;  %966 = vmatprep.subr.bf16.mxu0 %v1448_v37  ;;  %v1533_v36 = vld [vmem:[%s1624_s28 + $0x2d0] ss:$8 sps:$4 sm:$0xff]   ;;  %v1538_v37 = vld [vmem:[%s1624_s28 + $0x2e4] ss:$8 sps:$4 sm:$0xff]  }
  0x3c   : > { %1007 = vmatprep.subr.bf16.mxu1 %v1450_v38  ;;  %v1536_v38 = vld [vmem:[%s1624_s28 + $0x2e0] ss:$8 sps:$4 sm:$0xff]  }
  0x3e   : > { %967 = vmatpush1.bf16.msra.mxu0 %v1452_v39  ;;  %v1541_v39 = vld [vmem:[%s1624_s28 + $0x2f4] ss:$8 sps:$4 sm:$0xff]  }
  0x3f   : > { %1008 = vmatpush1.bf16.msra.mxu1 %v1453_v40  ;;  %968 = vmatprep.subr.bf16.mxu0 %v1454_v41  ;;  %v1539_v40 = vld [vmem:[%s1624_s28 + $0x2f0] ss:$8 sps:$4 sm:$0xff]   ;;  %v1263_v41 = vcombine.low %v1696_v9, %v1696_v9 }
  0x40   : > { %1009 = vmatprep.subr.bf16.mxu1 %v1456_v42 }
  0x42   : > { %969 = vmatpush1.bf16.msra.mxu0 %v1458_v43 }
  0x43   : > { %1010 = vmatpush1.bf16.msra.mxu1 %v1459_v44  ;;  %970 = vmatprep.subr.bf16.mxu0 %v1460_v45 }
  0x44   : > { %1011 = vmatprep.subr.bf16.mxu1 %v1462_v46 }
  0x46   : > { %971 = vmatpush1.bf16.msra.mxu0 %v1464_v50 }
  0x47   : > { %1012 = vmatpush1.bf16.msra.mxu1 %v1465_v51  ;;  %972 = vmatprep.subr.bf16.mxu0 %v1466_v53 }
  0x48   : > { %1013 = vmatprep.subr.bf16.mxu1 %v1468_v54 }
  0x4a   : > { %973 = vmatpush1.bf16.msra.mxu0 %v1470_v55  ;;  %v347_v55 = vld [vmem:[#allocation2 + $0x8] sm:$0xff] }
  0x4b   : > { %1014 = vmatpush1.bf16.msra.mxu1 %v1471_v56  ;;  %974 = vmatprep.subr.bf16.mxu0 %v1472_v57 }
  0x4c   : > { %1015 = vmatprep.subr.bf16.mxu1 %v1474_v58 }
  0x4e   : > { %975 = vmatpush1.bf16.msra.mxu0 %v1476_v59 }
  0x4f   : > { %1016 = vmatpush1.bf16.msra.mxu1 %v1477_v60  ;;  %976 = vmatprep.subr.bf16.mxu0 %v1478_v61 }
  0x50   : > { %1017 = vmatprep.subr.bf16.mxu1 %v1480_v62  ;;  %v1083_v62 = vlaneseq (!%p1361_p7) }
  0x52   : > { %977 = vmatpush1.bf16.msra.mxu0 %v1482_v63  ;;  %v1084_v63 = vshrl.u32 (!%p1361_p7), %v1083_v62, 7 }
  0x53   : > { %1018 = vmatpush1.bf16.msra.mxu1 %v1483_v0  ;;  %978 = vmatprep.subr.bf16.mxu0 %v1484_v1  ;;  %v1081_v0 = vld [vmem:[%s1753_s2] sm:$0x3] (!%p1361_p7) }
  0x54   : > { %1019 = vmatprep.subr.bf16.mxu1 %v1486_v2  ;;  %v1095_v1 = vld [vmem:[%s1754_s3] sm:$0xff] (!%p1361_p7)  ;;  %v1085_v2 = vsub.s32 (!%p1361_p7), 0, %v1084_v63 }
  0x55   : > { %v1097_v9 = vunpack.c.h.bf16 (!%p1361_p7), %v1095_v1 }
  0x56   : > { %979 = vmatpush1.bf16.msra.mxu0 %v1488_v3  ;;  %v1089_v3 = vsub.s32 (!%p1361_p7), 1, %v1084_v63 }
  0x57   : > { %1020 = vmatpush1.bf16.msra.mxu1 %v1489_v4  ;;  %1030 = vmatprep.subr.bf16.mxu0 %v1496_v5 }
  0x59   : > { %981 = vmatmul.mubr.bf16.vlgmr.msra.gmra.mrb[0].mxu0 %v1259_v6  ;;  %v1086_v6 = vrot.slane (!%p1361_p7), %v1081_v0, %v1085_v2 }
  0x5a   : > { %1022 = vmatmul.mubr.bf16.vlgmr.msra.gmra.mrb[0].mxu1 %v1261_v7  ;;  %1031 = vmatpush1.bf16.msra.mxu0 %v1494_v8  ;;  %v1090_v7 = vrot.slane (!%p1361_p7), %v1081_v0, %v1089_v3  ;;  %v1096_v8 = vunpack.c.l.bf16 (!%p1361_p7), %v1095_v1 }
  0x5b   : > { %1062 = vmatprep.mubr.bf16.mxu0 %v1264_v11  ;;  %1032 = vmatprep.subr.bf16.mxu0 %v1499_v10 }
  0x5e   : > { %1033 = vmatpush1.bf16.msra.mxu0 %v1497_v12 }
  0x5f   : > { %1034 = vmatprep.subr.bf16.mxu0 %v1502_v13 }
  0x62   : > { %1035 = vmatpush1.bf16.msra.mxu0 %v1500_v14 }
  0x63   : > { %1036 = vmatprep.subr.bf16.mxu0 %v1505_v15 }
  0x66   : > { %1037 = vmatpush1.bf16.msra.mxu0 %v1503_v16 }
  0x67   : > { %1038 = vmatprep.subr.bf16.mxu0 %v1508_v17 }
  0x6a   : > { %1039 = vmatpush1.bf16.msra.mxu0 %v1506_v18 }
  0x6b   : > { %1040 = vmatprep.subr.bf16.mxu0 %v1511_v19 }
  0x6e   : > { %1041 = vmatpush1.bf16.msra.mxu0 %v1509_v20 }
  0x6f   : > { %1042 = vmatprep.subr.bf16.mxu0 %v1514_v21 }
  0x72   : > { %1043 = vmatpush1.bf16.msra.mxu0 %v1512_v22 }
  0x73   : > { %1044 = vmatprep.subr.bf16.mxu0 %v1517_v23 }
  0x76   : > { %1045 = vmatpush1.bf16.msra.mxu0 %v1515_v24 }
  0x77   : > { %1046 = vmatprep.subr.bf16.mxu0 %v1520_v25 }
  0x7a   : > { %1047 = vmatpush1.bf16.msra.mxu0 %v1518_v26 }
  0x7b   : > { %1048 = vmatprep.subr.bf16.mxu0 %v1523_v27 }
  0x7e   : > { %1049 = vmatpush1.bf16.msra.mxu0 %v1521_v28 }
  0x7f   : > { %1050 = vmatprep.subr.bf16.mxu0 %v1526_v29 }
  0x82   : > { %1051 = vmatpush1.bf16.msra.mxu0 %v1524_v30 }
  0x83   : > { %1052 = vmatprep.subr.bf16.mxu0 %v1529_v31 }
  0x86   : > { %1053 = vmatpush1.bf16.msra.mxu0 %v1527_v32 }
  0x87   : > { %1054 = vmatprep.subr.bf16.mxu0 %v1532_v33 }
  0x8a   : > { %1055 = vmatpush1.bf16.msra.mxu0 %v1530_v34 }
  0x8b   : > { %1056 = vmatprep.subr.bf16.mxu0 %v1535_v35 }
  0x8e   : > { %1057 = vmatpush1.bf16.msra.mxu0 %v1533_v36 }
  0x8f   : > { %1058 = vmatprep.subr.bf16.mxu0 %v1538_v37 }
  0x92   : > { %1059 = vmatpush1.bf16.msra.mxu0 %v1536_v38 }
  0x93   : > { %1060 = vmatprep.subr.bf16.mxu0 %v1541_v39 }
  0x96   : > { %1061 = vmatpush1.bf16.msra.mxu0 %v1539_v40 }
  0x99   : > { %1063 = vmatmul.mubr.bf16.vlgmr.msra.gmra.mrb[4].mxu0 %v1263_v41 }
 0x12c   : > { %v982_v42 = vpop.f32.mrb[0].mxu0 }
 0x12d   : > { %v1023_v43 = vpop.f32.mrb[0].mxu1  ;;  %v984_v45 = vpop.f32.mrb[1].mxu0 }
 0x12e   : > { %v1024_v44 = vadd.f32 %v1023_v43, %v982_v42  ;;  %v1025_v46 = vpop.f32.mrb[1].mxu1  ;;  %v986_v48 = vpop.f32.mrb[2].mxu0 }
 0x12f   : > { %v1026_v47 = vadd.f32 %v1025_v46, %v984_v45  ;;  %v1027_v49 = vpop.f32.mrb[2].mxu1  ;;  %v987_v50 = vpop.f32.mrb[3].mxu0 }
 0x130   : > { %v1028_v51 = vpop.f32.mrb[3].mxu1 }
 0x16c   : > { %v1064_v53 = vpop.f32.mrb[4].mxu0  ;;  %1078 = sbr.rel (%p1361_p7) target bundleno = 387 (0x183), region = 44 }
 0x16d   : > { %v1065_v54 = vadd.f32 %v1064_v53, %v1024_v44  ;;  %v1066_v56 = vpop.f32.mrb[5].mxu0 }
 0x16e   : > { %v1067_v57 = vadd.f32 %v1066_v56, %v1026_v47  ;;  %v1068_v58 = vpop.f32.mrb[6].mxu0 }
 0x16f   : > { %v1071_v59 = vadd.f32 %v1065_v54, %v346_v52  ;;  %v1069_v60 = vpop.f32.mrb[7].mxu0 }
 0x170   : > { %v1072_v61 = vadd.f32 %v1067_v57, %v347_v55 }
 0x171   : > { %1073 = vst [vmem:[#allocation2] sm:$0xff] %v1071_v59 }
 0x172   : > { %1074 = vst [vmem:[#allocation2 + $0x8] sm:$0xff] %v1072_v61 }
 0x178   : > { %v1079_v4 = vld [vmem:[#allocation2] sm:$0xff] }
 0x179   : > { %v1080_v5 = vld [vmem:[#allocation2 + $0x8] sm:$0xff]  ;;  %v1093_v10 = vadd.f32 %v1086_v6, %v1079_v4 }
 0x17a   : > { %v1094_v11 = vadd.f32 %v1090_v7, %v1080_v5 }
 0x17b   : > { %v1098_v12 = vadd.f32 %v1096_v8, %v1093_v10 }
 0x17c   : > { %v1099_v13 = vadd.f32 %v1097_v9, %v1094_v11 }
 0x17d   : > { %v1100_v14 = vmax.f32 %v1098_v12, 0.0 }
 0x17e   : > { %v1101_v15 = vmax.f32 %v1099_v13, 0.0 }
 0x180   : > { %v1368_v16 = vpack.c.bf16 %v1101_v15, %v1100_v14 }
 0x182   : > { %1110 = vst [vmem:[%s1755_s4] sm:$0xff] %v1368_v16 }
 0x183 PF: > { %s14_s17 = sadd.s32 1, %s1566_s17   ;;  %s1756_s15 = smov %s1562_s16 }
 0x184   : > { %p11_p8 = scmp.ge.s32.totalorder %s14_s17, 5   ;;  %s1757_s16 = smov %s1759_s18 }
 0x186   :  { %13 = sbr.rel (!%p11_p8) target bundleno = 2 (0x2), region = 83 }

// kernel: resnet_forward.37
= control target key start
LH: loop header
LB: loop body
LE: loop exit
PB: predicated region body
PF: predicated region fallthrough
CT: control target
= control target key end

     0   :  { %v47_v6 = vlaneseq  ;;  %vm215_vm0 = vcmask 1041409   ;;  %vm218_vm1 = vcmask 1042434   ;;  %vm221_vm2 = vcmask 1043459   ;;  %s582_s1 = inlined_call_operand.vmem [shape: bf16[256,128], index: 1, kind: input, shape index: {}]   ;;  %s583_s0 = inlined_call_operand.vmem [shape: bf16[8,1,256], index: 0, kind: input, shape index: {}]   ;;  %s584_s2 = inlined_call_operand.vmem [shape: f32[1,128], index: 2, kind: input, shape index: {}]   ;;  %s585_s3 = inlined_call_operand.vmem [shape: f32[8,128], index: 3, kind: output, shape index: {}]  }
   0x1   :  { %v433_v0 = vld [vmem:[%s582_s1 + $0x40] sm:$0xff]   ;;  %v435_v2 = vld [vmem:[%s582_s1 + $0x48] sm:$0xff]   ;;  %v437_v4 = vld [vmem:[%s582_s1 + $0x50] sm:$0xff]   ;;  %vm224_vm3 = vcmask 1044484   ;;  %vm227_vm4 = vcmask 1045509   ;;  %vm230_vm5 = vcmask 1046534  }
   0x2   :  { %v434_v1 = vld [vmem:[%s582_s1] sm:$0xff]   ;;  %411 = vmatprep.subr.bf16.mxu0 %v433_v0  ;;  %v436_v3 = vld [vmem:[%s582_s1 + $0x8] sm:$0xff]   ;;  %v438_v5 = vld [vmem:[%s582_s1 + $0x10] sm:$0xff]   ;;  %v48_v9 = vshrl.u32 %v47_v6, 7  ;;  %vm233_vm6 = vcmask 1047559  }
   0x3   :  { %412 = vmatpush3.bf16.msra.mxu0 %v434_v1  ;;  %v439_v7 = vld [vmem:[%s582_s1 + $0x58] sm:$0xff]   ;;  %v441_v10 = vld [vmem:[%s582_s1 + $0x60] sm:$0xff]   ;;  %v443_v12 = vld [vmem:[%s582_s1 + $0x68] sm:$0xff]  }
   0x4   :  { %413 = vmatprep.subr.bf16.mxu0 %v435_v2  ;;  %v440_v8 = vld [vmem:[%s582_s1 + $0x18] sm:$0xff]   ;;  %v442_v11 = vld [vmem:[%s582_s1 + $0x20] sm:$0xff]   ;;  %v53_v13 = vsub.s32 2, %v48_v9  ;;  %v523_v18 = vld [vmem:[%s583_s0 + $0x8] sm:$0x3]  ;;  %v49_v28 = vsub.s32 0, %v48_v9 }
   0x5   :  { %v15_v14 = vld [vmem:[%s583_s0] sm:$0x3]  ;;  %v508_v15 = vld [vmem:[%s583_s0 + $0x2] sm:$0x3]  ;;  %v513_v16 = vld [vmem:[%s583_s0 + $0x4] sm:$0x3]  ;;  %v27_v26 = vunpack.c.l.bf16 %v523_v18 }
   0x6   :  { %v518_v17 = vld [vmem:[%s583_s0 + $0x6] sm:$0x3]  ;;  %v528_v19 = vld [vmem:[%s583_s0 + $0xa] sm:$0x3]  ;;  %v23_v20 = vunpack.c.l.bf16 %v15_v14  ;;  %v24_v21 = vunpack.c.l.bf16 %v508_v15  ;;  %v25_v22 = vunpack.c.l.bf16 %v513_v16  ;;  %v535_v23 = vld [vmem:[%s583_s0 + $0xc] sm:$0x3] }
   0x7   :  { %414 = vmatpush3.bf16.msra.mxu0 %v436_v3  ;;  %v540_v24 = vld [vmem:[%s583_s0 + $0xe] sm:$0x3]  ;;  %v26_v25 = vunpack.c.l.bf16 %v518_v17  ;;  %v28_v27 = vunpack.c.l.bf16 %v528_v19  ;;  %v29_v30 = vunpack.c.l.bf16 %v535_v23  ;;  %v445_v34 = vld [vmem:[%s582_s1 + $0x70] sm:$0xff]   ;;  %v86_v37 = vrot.slane %v27_v26, %v53_v13  ;;  %v447_v52 = vld [vmem:[%s582_s1 + $0x78] sm:$0xff]  }
   0x8   :  { %415 = vmatprep.subr.bf16.mxu0 %v437_v4  ;;  %v444_v29 = vld [vmem:[%s582_s1 + $0x28] sm:$0xff]   ;;  %v30_v31 = vunpack.c.l.bf16 %v540_v24  ;;  %v54_v32 = vrot.slane %v23_v20, %v53_v13  ;;  %v62_v33 = vrot.slane %v24_v21, %v53_v13  ;;  %v70_v35 = vrot.slane %v25_v22, %v53_v13  ;;  %v446_v47 = vld [vmem:[%s582_s1 + $0x30] sm:$0xff]   ;;  %v448_v1 = vld [vmem:[%s582_s1 + $0x38] sm:$0xff]  }
   0x9   :  { %v78_v36 = vrot.slane %v26_v25, %v53_v13  ;;  %v94_v38 = vrot.slane %v28_v27, %v53_v13  ;;  %v102_v39 = vrot.slane %v29_v30, %v53_v13  ;;  %v136_v45 = vpack.c.bf16 %v86_v37, %v86_v37 }
   0xa   :  { %v110_v40 = vrot.slane %v30_v31, %v53_v13  ;;  %v128_v41 = vpack.c.bf16 %v54_v32, %v54_v32  ;;  %v130_v42 = vpack.c.bf16 %v62_v33, %v62_v33  ;;  %v132_v43 = vpack.c.bf16 %v70_v35, %v70_v35 }
   0xb   :  { %416 = vmatpush3.bf16.msra.mxu0 %v438_v5  ;;  %v134_v44 = vpack.c.bf16 %v78_v36, %v78_v36  ;;  %v138_v46 = vpack.c.bf16 %v94_v38, %v94_v38  ;;  %v140_v48 = vpack.c.bf16 %v102_v39, %v102_v39  ;;  %v207_v55 = vunpack.c.l.b16 %v136_v45 }
   0xc   :  { %417 = vmatprep.subr.bf16.mxu0 %v439_v7  ;;  %v142_v49 = vpack.c.bf16 %v110_v40, %v110_v40  ;;  %v199_v50 = vunpack.c.l.b16 %v128_v41  ;;  %v201_v51 = vunpack.c.l.b16 %v130_v42  ;;  %v203_v53 = vunpack.c.l.b16 %v132_v43 }
   0xd   :  { %v205_v54 = vunpack.c.l.b16 %v134_v44  ;;  %v209_v56 = vunpack.c.l.b16 %v138_v46  ;;  %v211_v57 = vunpack.c.l.b16 %v140_v48  ;;  %v50_v60 = vrot.slane %v23_v20, %v49_v28 }
   0xe   :  { %v213_v58 = vunpack.c.l.b16 %v142_v49  ;;  %v235_v59 = vrot.slane %v201_v51, 7  ;;  %v237_v61 = vrot.slane %v203_v53, 6  ;;  %v241_v63 = vrot.slane %v207_v55, 4  ;;  %v394_v51 = vld [vmem:[%s584_s2] ss:$0 sm:$0xff] }
   0xf   :  { %418 = vmatpush3.bf16.msra.mxu0 %v440_v8  ;;  %v239_v62 = vrot.slane %v205_v54, 5  ;;  %v243_v0 = vrot.slane %v209_v56, 3  ;;  %v245_v3 = vrot.slane %v211_v57, 2  ;;  %v58_v5 = vrot.slane %v24_v21, %v49_v28 }
  0x10   :  { %419 = vmatprep.subr.bf16.mxu0 %v441_v10  ;;  %v236_v2 = vsel %vm215_vm0, %v235_v59, %v199_v50  ;;  %v247_v4 = vrot.slane %v213_v58, 1  ;;  %v66_v7 = vrot.slane %v25_v22, %v49_v28  ;;  %v74_v8 = vrot.slane %v26_v25, %v49_v28 }
  0x11   :  { %v238_v6 = vsel %vm218_vm1, %v237_v61, %v236_v2  ;;  %v82_v9 = vrot.slane %v27_v26, %v49_v28  ;;  %v106_v13 = vrot.slane %v30_v31, %v49_v28  ;;  %v127_v15 = vpack.c.bf16 %v50_v60, %v50_v60 }
  0x12   :  { %v240_v10 = vsel %vm221_vm2, %v239_v62, %v238_v6  ;;  %v129_v16 = vpack.c.bf16 %v58_v5, %v58_v5  ;;  %v131_v17 = vpack.c.bf16 %v66_v7, %v66_v7  ;;  %v133_v19 = vpack.c.bf16 %v74_v8, %v74_v8 }
  0x13   :  { %420 = vmatpush3.bf16.msra.mxu0 %v442_v11  ;;  %v90_v11 = vrot.slane %v28_v27, %v49_v28  ;;  %v242_v14 = vsel %vm224_vm3, %v241_v63, %v240_v10  ;;  %v135_v20 = vpack.c.bf16 %v82_v9, %v82_v9  ;;  %v141_v24 = vpack.c.bf16 %v106_v13, %v106_v13 }
  0x14   :  { %421 = vmatprep.subr.bf16.mxu0 %v443_v12  ;;  %v98_v12 = vrot.slane %v29_v30, %v49_v28  ;;  %v244_v18 = vsel %vm227_vm4, %v243_v0, %v242_v14  ;;  %v198_v25 = vunpack.c.l.b16 %v127_v15  ;;  %v200_v27 = vunpack.c.l.b16 %v129_v16 }
  0x15   :  { %v137_v21 = vpack.c.bf16 %v90_v11, %v90_v11  ;;  %v246_v22 = vsel %vm230_vm5, %v245_v3, %v244_v18  ;;  %v202_v28 = vunpack.c.l.b16 %v131_v17  ;;  %v206_v31 = vunpack.c.l.b16 %v135_v20 }
  0x16   :  { %v139_v23 = vpack.c.bf16 %v98_v12, %v98_v12  ;;  %v248_v26 = vsel %vm233_vm6, %v247_v4, %v246_v22  ;;  %v214_v35 = vrot.slane %v200_v27, 7 }
  0x17   :  { %422 = vmatpush3.bf16.msra.mxu0 %v444_v29  ;;  %v204_v29 = vunpack.c.l.b16 %v133_v19  ;;  %v250_v30 = vpack.c.b16 %v248_v26, %v248_v26  ;;  %v208_v32 = vunpack.c.l.b16 %v137_v21  ;;  %v217_v36 = vrot.slane %v202_v28, 6 }
  0x18   :  { %423 = vmatprep.subr.bf16.mxu0 %v445_v34  ;;  %v210_v33 = vunpack.c.l.b16 %v139_v23  ;;  %v212_v34 = vunpack.c.l.b16 %v141_v24  ;;  %v223_v38 = vrot.slane %v206_v31, 4  ;;  %v216_v39 = vsel %vm215_vm0, %v214_v35, %v198_v25 }
  0x19   :  { %v220_v37 = vrot.slane %v204_v29, 5  ;;  %381 = vmatprep.mubr.bf16.mxu0 %v250_v30  ;;  %v226_v40 = vrot.slane %v208_v32, 3  ;;  %v219_v41 = vsel %vm218_vm1, %v217_v36, %v216_v39 }
  0x1a   :  { %v229_v42 = vrot.slane %v210_v33, 2  ;;  %v232_v44 = vrot.slane %v212_v34, 1 }
  0x1b   :  { %424 = vmatpush3.bf16.msra.mxu0 %v446_v47  ;;  %v222_v43 = vsel %vm221_vm2, %v220_v37, %v219_v41 }
  0x1c   :  { %425 = vmatprep.subr.bf16.mxu0 %v447_v52  ;;  %v225_v45 = vsel %vm224_vm3, %v223_v38, %v222_v43 }
  0x1d   :  { %v228_v46 = vsel %vm227_vm4, %v226_v40, %v225_v45 }
  0x1e   :  { %v231_v47 = vsel %vm230_vm5, %v229_v42, %v228_v46 }
  0x1f   :  { %426 = vmatpush3.bf16.msra.mxu0 %v448_v1  ;;  %v234_v48 = vsel %vm233_vm6, %v232_v44, %v231_v47 }
  0x20   :  { %v249_v49 = vpack.c.b16 %v234_v48, %v234_v48 }
  0x22   :  { %382 = vmatmul.mubr.bf16.vlgmr.msra.gmra.mrb[0].mxu0 %v249_v49 }
  0xf5   :  { %v427_v50 = vpop.f32.mrb[0].mxu0 }
  0xf6   :  { %v428_v52 = vpop.f32.mrb[1].mxu0 }
  0xf7   :  { %v429_v53 = vadd.f32 %v428_v52, %v427_v50  ;;  %v430_v54 = vpop.f32.mrb[2].mxu0 }
  0xf8   :  { %v431_v55 = vpop.f32.mrb[3].mxu0 }
  0xf9   :  { %v384_v56 = vadd.f32 %v429_v53, %v394_v51 }
  0xfb   :  { %389 = vst [vmem:[%s585_s3] sm:$0xff] %v384_v56 }

</bundles_post_ra>
